<compile_context>
chip_gen: v6e
topology: v6e:2x2x1
jax: 0.10.0
libtpu: 0.0.40
codegen_flags: <defaults>
</compile_context>

<pallas_src>
import functools

import jax
import jax.numpy as jnp
from jax.experimental import pallas as pl
from jax.experimental.pallas import tpu as pltpu

EPS = 1e-5
P_LAYER = 12  # refs per encoder layer


def _layernorm(x, g, b):
    mu = jnp.mean(x, axis=-1, keepdims=True)
    xc = x - mu
    var = jnp.mean(xc * xc, axis=-1, keepdims=True)
    return xc * jax.lax.rsqrt(var + EPS) * g + b


# --------------------------------------------------------------------------
# Fused Pallas kernel: L encoder layers + final projection in one body
# --------------------------------------------------------------------------
def fused_decoder_kernel(num_heads, num_layers, seq, batch, *refs):
    """x is batch-major flat (N*S, E); weights pre-transposed to (in, out)."""
    x_ref = refs[0]
    n_layer_refs = num_layers * P_LAYER
    layer_refs = refs[1:1 + n_layer_refs]
    wf_ref = refs[1 + n_layer_refs]
    bf_ref = refs[2 + n_layer_refs]
    o_ref = refs[3 + n_layer_refs]

    S, N, H = seq, batch, num_heads
    E = x_ref.shape[-1]
    hd = E // H

    x = x_ref[...]                                             # (N*S, E)

    for l in range(num_layers):
        (wqkv_r, bqkv_r, wo_r, bo_r, w1_r, b1_r, w2_r, b2_r,
         g1_r, be1_r, g2_r, be2_r) = layer_refs[l * P_LAYER:(l + 1) * P_LAYER]

        # ---- fused QKV projection for all (batch, seq) rows (single MXU op)
        qkv = jnp.dot(x, wqkv_r[...],
                      preferred_element_type=jnp.float32) + bqkv_r[...]

        # ---- multi-head self-attention (q already carries 1/sqrt(hd))
        ctx_rows = []
        for n in range(N):
            r0 = n * S
            head_ctx = []
            for h in range(H):
                c0 = h * hd
                qh = qkv[r0:r0 + S, c0:c0 + hd]
                kh = qkv[r0:r0 + S, E + c0:E + c0 + hd]
                vh = qkv[r0:r0 + S, 2 * E + c0:2 * E + c0 + hd]
                s = jnp.dot(qh, kh.T, preferred_element_type=jnp.float32)
                s = s - jnp.max(s, axis=-1, keepdims=True)
                p = jnp.exp(s)
                p = p * pl.reciprocal(
                    jnp.sum(p, axis=-1, keepdims=True), approx=True)
                head_ctx.append(
                    jnp.dot(p, vh, preferred_element_type=jnp.float32))
            ctx_rows.append(jnp.concatenate(head_ctx, axis=-1))   # (S, E)
        ctx = jnp.concatenate(ctx_rows, axis=0)                   # (N*S, E)

        # ---- output projection + residual + norm1 (post-norm)
        attn = jnp.dot(ctx, wo_r[...],
                       preferred_element_type=jnp.float32) + bo_r[...]
        y = _layernorm(x + attn, g1_r[...], be1_r[...])

        # ---- feed-forward (ReLU) + residual + norm2, batched over all rows
        hmid = jnp.maximum(
            jnp.dot(y, w1_r[...], preferred_element_type=jnp.float32)
            + b1_r[...], 0.0)
        ff = jnp.dot(hmid, w2_r[...],
                     preferred_element_type=jnp.float32) + b2_r[...]
        x = _layernorm(y + ff, g2_r[...], be2_r[...])

    # ---- final linear; single full-tile, lane-dense store
    o_ref[...] = jnp.dot(x, wf_ref[...],
                         preferred_element_type=jnp.float32) + bf_ref[...]


# --------------------------------------------------------------------------
# Wrapper
# --------------------------------------------------------------------------
def _full_spec(shape):
    nd = len(shape)
    return pl.BlockSpec(shape, lambda i, _nd=nd: (0,) * _nd)


def mae_decoder_forward(x, layer_params, final_params, num_heads):
    S, N, E = x.shape
    H = num_heads
    hd = E // H
    scale = 1.0 / (hd ** 0.5)
    num_layers = len(layer_params)
    P = final_params["w"].shape[0]

    # batch-major flatten: (S, N, E) -> (N*S, E)  (layout plumbing outside kernel)
    x_flat = jnp.transpose(x, (1, 0, 2)).reshape(N * S, E)

    # fold 1/sqrt(hd) into the Q third of the packed QKV weights/bias
    qscale = jnp.concatenate(
        [jnp.full((1, E), scale, jnp.float32),
         jnp.ones((1, 2 * E), jnp.float32)], axis=-1)

    args = [x_flat]
    for p in layer_params:
        args += [
            p["in_w"].T * qscale,        # (E, 3E), Q columns pre-scaled
            p["in_b"] * qscale,          # (1, 3E)
            p["out_w"].T, p["out_b"],    # (E, E), (1, E)
            p["lin1_w"].T, p["lin1_b"],  # (E, F), (1, F)
            p["lin2_w"].T, p["lin2_b"],  # (F, E), (1, E)
            p["n1_w"], p["n1_b"], p["n2_w"], p["n2_b"],
        ]
    args += [final_params["w"].T, final_params["b"]]   # (E, P), (1, P)

    out_flat = pl.pallas_call(
        functools.partial(fused_decoder_kernel, num_heads, num_layers, S, N),
        grid=(1,),
        in_specs=[_full_spec(a.shape) for a in args],
        out_specs=_full_spec((N * S, P)),
        out_shape=jax.ShapeDtypeStruct((N * S, P), jnp.float32),
        compiler_params=pltpu.CompilerParams(
            dimension_semantics=("arbitrary",),
            vmem_limit_bytes=32 * 1024 * 1024),
    )(*args)

    # (N*S, P) -> (S, N, P)
    return jnp.transpose(out_flat.reshape(N, S, P), (1, 0, 2))


# --------------------------------------------------------------------------
# Pure-JAX reference (same math), for sanity check
# --------------------------------------------------------------------------
def ref_forward(x, layer_params, final_params, num_heads):
    S, N, E = x.shape
    H = num_heads
    hd = E // H
    scale = 1.0 / (hd ** 0.5)
    for p in layer_params:
        Wq, Wk, Wv = p["in_w"][0:E], p["in_w"][E:2 * E], p["in_w"][2 * E:3 * E]
        bq = p["in_b"][:, 0:E]
        bk = p["in_b"][:, E:2 * E]
        bv = p["in_b"][:, 2 * E:3 * E]
        q = (x @ Wq.T + bq).reshape(S, N, H, hd)
        k = (x @ Wk.T + bk).reshape(S, N, H, hd)
        v = (x @ Wv.T + bv).reshape(S, N, H, hd)
        s = jnp.einsum("snhd,tnhd->nhst", q * scale, k)
        a = jax.nn.softmax(s, axis=-1)
        ctx = jnp.einsum("nhst,tnhd->snhd", a, v).reshape(S, N, E)
        attn_out = ctx @ p["out_w"].T + p["out_b"]
        y = _layernorm(x + attn_out, p["n1_w"], p["n1_b"])
        ff = jnp.maximum(y @ p["lin1_w"].T + p["lin1_b"], 0.0) @ p["lin2_w"].T \
            + p["lin2_b"]
        x = _layernorm(y + ff, p["n2_w"], p["n2_b"])
    return x @ final_params["w"].T + final_params["b"]


# --------------------------------------------------------------------------
# Deterministic parameter init (PyTorch Linear-style uniform)
# --------------------------------------------------------------------------
def init_params(key, embed_dim, output_patch, num_layers):
    E = embed_dim
    F = 4 * embed_dim
    P = output_patch

    def uni(k, shape, fan_in):
        bound = 1.0 / (fan_in ** 0.5)
        return jax.random.uniform(k, shape, jnp.float32, -bound, bound)

    layers = []
    for _ in range(num_layers):
        key, *ks = jax.random.split(key, 9)
        layers.append(dict(
            in_w=uni(ks[0], (3 * E, E), E),
            in_b=uni(ks[1], (1, 3 * E), E),
            out_w=uni(ks[2], (E, E), E),
            out_b=uni(ks[3], (1, E), E),
            lin1_w=uni(ks[4], (F, E), E),
            lin1_b=uni(ks[5], (1, F), E),
            lin2_w=uni(ks[6], (E, F), F),
            lin2_b=uni(ks[7], (1, E), F),
            n1_w=jnp.ones((1, E), jnp.float32),
            n1_b=jnp.zeros((1, E), jnp.float32),
            n2_w=jnp.ones((1, E), jnp.float32),
            n2_b=jnp.zeros((1, E), jnp.float32),
        ))
    key, k1, k2 = jax.random.split(key, 3)
    final = dict(w=uni(k1, (P, E), E), b=uni(k2, (1, P), E))
    return layers, final


if __name__ == "__main__":
    # Module-default dims at small seq/batch:
    # x: (seq=8, batch=2, embed_dim=192); num_heads=6; output_patch=256; 2 layers.
    SEQ, BATCH, EMBED = 8, 2, 192
    NUM_HEADS, OUTPUT_PATCH, NUM_LAYERS = 6, 256, 2

    root = jax.random.PRNGKey(0)
    kx, kp = jax.random.split(root)
    x = jax.random.normal(kx, (SEQ, BATCH, EMBED), dtype=jnp.float32)
    layer_params, final_params = init_params(kp, EMBED, OUTPUT_PATCH, NUM_LAYERS)

    out = mae_decoder_forward(x, layer_params, final_params, NUM_HEADS)
    out = jax.block_until_ready(out)

    ref = jax.block_until_ready(
        ref_forward(x, layer_params, final_params, NUM_HEADS))

    assert out.shape == (SEQ, BATCH, OUTPUT_PATCH), out.shape
    assert out.dtype == jnp.float32
    assert bool(jnp.allclose(out, ref, atol=2e-2, rtol=2e-2)), \
        float(jnp.max(jnp.abs(out - ref)))

    print("KERNEL_OK")
</pallas_src>

<mosaic_0001>
module attributes {stable_mosaic.version = 11 : i64} {
  func.func @fused_decoder_kernel(%arg0: i32, %arg1: memref<16x192xf32, #tpu.memory_space<vmem>>, %arg2: memref<192x576xf32, #tpu.memory_space<vmem>>, %arg3: memref<1x576xf32, #tpu.memory_space<vmem>>, %arg4: memref<192x192xf32, #tpu.memory_space<vmem>>, %arg5: memref<1x192xf32, #tpu.memory_space<vmem>>, %arg6: memref<192x768xf32, #tpu.memory_space<vmem>>, %arg7: memref<1x768xf32, #tpu.memory_space<vmem>>, %arg8: memref<768x192xf32, #tpu.memory_space<vmem>>, %arg9: memref<1x192xf32, #tpu.memory_space<vmem>>, %arg10: memref<1x192xf32, #tpu.memory_space<vmem>>, %arg11: memref<1x192xf32, #tpu.memory_space<vmem>>, %arg12: memref<1x192xf32, #tpu.memory_space<vmem>>, %arg13: memref<1x192xf32, #tpu.memory_space<vmem>>, %arg14: memref<192x576xf32, #tpu.memory_space<vmem>>, %arg15: memref<1x576xf32, #tpu.memory_space<vmem>>, %arg16: memref<192x192xf32, #tpu.memory_space<vmem>>, %arg17: memref<1x192xf32, #tpu.memory_space<vmem>>, %arg18: memref<192x768xf32, #tpu.memory_space<vmem>>, %arg19: memref<1x768xf32, #tpu.memory_space<vmem>>, %arg20: memref<768x192xf32, #tpu.memory_space<vmem>>, %arg21: memref<1x192xf32, #tpu.memory_space<vmem>>, %arg22: memref<1x192xf32, #tpu.memory_space<vmem>>, %arg23: memref<1x192xf32, #tpu.memory_space<vmem>>, %arg24: memref<1x192xf32, #tpu.memory_space<vmem>>, %arg25: memref<1x192xf32, #tpu.memory_space<vmem>>, %arg26: memref<192x256xf32, #tpu.memory_space<vmem>>, %arg27: memref<1x256xf32, #tpu.memory_space<vmem>>, %arg28: memref<16x256xf32, #tpu.memory_space<vmem>>) attributes {dimension_semantics = [#tpu.dimension_semantics<arbitrary>], iteration_bounds = array<i64: 1>, scalar_prefetch = 0 : i64, scratch_operands = 0 : i64, tpu.core_type = #tpu.core_type<tc>, window_params = [{pipeline_mode = #tpu.pipeline_mode<synchronous>, transform_indices = @transform_0, window_bounds = array<i64: 16, 192>}, {pipeline_mode = #tpu.pipeline_mode<synchronous>, transform_indices = @transform_1, window_bounds = array<i64: 192, 576>}, {pipeline_mode = #tpu.pipeline_mode<synchronous>, transform_indices = @transform_2, window_bounds = array<i64: 1, 576>}, {pipeline_mode = #tpu.pipeline_mode<synchronous>, transform_indices = @transform_3, window_bounds = array<i64: 192, 192>}, {pipeline_mode = #tpu.pipeline_mode<synchronous>, transform_indices = @transform_4, window_bounds = array<i64: 1, 192>}, {pipeline_mode = #tpu.pipeline_mode<synchronous>, transform_indices = @transform_5, window_bounds = array<i64: 192, 768>}, {pipeline_mode = #tpu.pipeline_mode<synchronous>, transform_indices = @transform_6, window_bounds = array<i64: 1, 768>}, {pipeline_mode = #tpu.pipeline_mode<synchronous>, transform_indices = @transform_7, window_bounds = array<i64: 768, 192>}, {pipeline_mode = #tpu.pipeline_mode<synchronous>, transform_indices = @transform_8, window_bounds = array<i64: 1, 192>}, {pipeline_mode = #tpu.pipeline_mode<synchronous>, transform_indices = @transform_9, window_bounds = array<i64: 1, 192>}, {pipeline_mode = #tpu.pipeline_mode<synchronous>, transform_indices = @transform_10, window_bounds = array<i64: 1, 192>}, {pipeline_mode = #tpu.pipeline_mode<synchronous>, transform_indices = @transform_11, window_bounds = array<i64: 1, 192>}, {pipeline_mode = #tpu.pipeline_mode<synchronous>, transform_indices = @transform_12, window_bounds = array<i64: 1, 192>}, {pipeline_mode = #tpu.pipeline_mode<synchronous>, transform_indices = @transform_13, window_bounds = array<i64: 192, 576>}, {pipeline_mode = #tpu.pipeline_mode<synchronous>, transform_indices = @transform_14, window_bounds = array<i64: 1, 576>}, {pipeline_mode = #tpu.pipeline_mode<synchronous>, transform_indices = @transform_15, window_bounds = array<i64: 192, 192>}, {pipeline_mode = #tpu.pipeline_mode<synchronous>, transform_indices = @transform_16, window_bounds = array<i64: 1, 192>}, {pipeline_mode = #tpu.pipeline_mode<synchronous>, transform_indices = @transform_17, window_bounds = array<i64: 192, 768>}, {pipeline_mode = #tpu.pipeline_mode<synchronous>, transform_indices = @transform_18, window_bounds = array<i64: 1, 768>}, {pipeline_mode = #tpu.pipeline_mode<synchronous>, transform_indices = @transform_19, window_bounds = array<i64: 768, 192>}, {pipeline_mode = #tpu.pipeline_mode<synchronous>, transform_indices = @transform_20, window_bounds = array<i64: 1, 192>}, {pipeline_mode = #tpu.pipeline_mode<synchronous>, transform_indices = @transform_21, window_bounds = array<i64: 1, 192>}, {pipeline_mode = #tpu.pipeline_mode<synchronous>, transform_indices = @transform_22, window_bounds = array<i64: 1, 192>}, {pipeline_mode = #tpu.pipeline_mode<synchronous>, transform_indices = @transform_23, window_bounds = array<i64: 1, 192>}, {pipeline_mode = #tpu.pipeline_mode<synchronous>, transform_indices = @transform_24, window_bounds = array<i64: 1, 192>}, {pipeline_mode = #tpu.pipeline_mode<synchronous>, transform_indices = @transform_25, window_bounds = array<i64: 192, 256>}, {pipeline_mode = #tpu.pipeline_mode<synchronous>, transform_indices = @transform_26, window_bounds = array<i64: 1, 256>}, {pipeline_mode = #tpu.pipeline_mode<synchronous>, transform_indices = @transform_27, window_bounds = array<i64: 16, 256>}]} {
    %c0 = arith.constant 0 : index
    %c0_0 = arith.constant 0 : index
    %0 = vector.load %arg1[%c0, %c0_0] : memref<16x192xf32, #tpu.memory_space<vmem>>, vector<16x192xf32>
    %c0_1 = arith.constant 0 : index
    %c0_2 = arith.constant 0 : index
    %1 = vector.load %arg2[%c0_1, %c0_2] : memref<192x576xf32, #tpu.memory_space<vmem>>, vector<192x576xf32>
    %cst = arith.constant dense<0.000000e+00> : vector<16x576xf32>
    %2 = tpu.matmul %0, %1, %cst {dimension_numbers = #tpu.dot_dimension_numbers<[1], [0], [0], [1], [0, 0, 1, 1], [], []>} : vector<16x192xf32>, vector<192x576xf32>, vector<16x576xf32> -> vector<16x576xf32>
    %c0_3 = arith.constant 0 : index
    %c0_4 = arith.constant 0 : index
    %3 = vector.load %arg3[%c0_3, %c0_4] : memref<1x576xf32, #tpu.memory_space<vmem>>, vector<1x576xf32>
    %4 = vector.broadcast %3 : vector<1x576xf32> to vector<16x576xf32>
    %5 = arith.addf %2, %4 : vector<16x576xf32>
    %6 = vector.extract_strided_slice %5 {offsets = [0, 0], sizes = [8, 32], strides = [1, 1]} : vector<16x576xf32> to vector<8x32xf32>
    %7 = vector.extract_strided_slice %5 {offsets = [0, 192], sizes = [8, 32], strides = [1, 1]} : vector<16x576xf32> to vector<8x32xf32>
    %8 = vector.extract_strided_slice %5 {offsets = [0, 384], sizes = [8, 32], strides = [1, 1]} : vector<16x576xf32> to vector<8x32xf32>
    %9 = tpu.transpose %7, [1, 0] : vector<8x32xf32> -> vector<32x8xf32>
    %cst_5 = arith.constant dense<0.000000e+00> : vector<8x8xf32>
    %10 = tpu.matmul %6, %9, %cst_5 {dimension_numbers = #tpu.dot_dimension_numbers<[1], [0], [0], [1], [0, 0, 1, 1], [], []>} : vector<8x32xf32>, vector<32x8xf32>, vector<8x8xf32> -> vector<8x8xf32>
    %cst_6 = arith.constant dense<0xFF800000> : vector<8xf32>
    %11 = vector.multi_reduction <maximumf>, %10, %cst_6 [1] : vector<8x8xf32> to vector<8xf32>
    %12 = vector.shape_cast %11 : vector<8xf32> to vector<8x1xf32>
    %13 = vector.broadcast %12 : vector<8x1xf32> to vector<8x8xf32>
    %14 = arith.subf %10, %13 : vector<8x8xf32>
    %15 = math.exp %14 : vector<8x8xf32>
    %cst_7 = arith.constant dense<0.000000e+00> : vector<8xf32>
    %16 = vector.multi_reduction <add>, %15, %cst_7 [1] : vector<8x8xf32> to vector<8xf32>
    %17 = vector.shape_cast %16 : vector<8xf32> to vector<8x1xf32>
    %18 = tpu.reciprocal %17 {approx = true} : vector<8x1xf32> -> vector<8x1xf32>
    %19 = vector.broadcast %18 : vector<8x1xf32> to vector<8x8xf32>
    %20 = arith.mulf %15, %19 : vector<8x8xf32>
    %cst_8 = arith.constant dense<0.000000e+00> : vector<8x32xf32>
    %21 = tpu.matmul %20, %8, %cst_8 {dimension_numbers = #tpu.dot_dimension_numbers<[1], [0], [0], [1], [0, 0, 1, 1], [], []>} : vector<8x8xf32>, vector<8x32xf32>, vector<8x32xf32> -> vector<8x32xf32>
    %22 = vector.extract_strided_slice %5 {offsets = [0, 32], sizes = [8, 32], strides = [1, 1]} : vector<16x576xf32> to vector<8x32xf32>
    %23 = vector.extract_strided_slice %5 {offsets = [0, 224], sizes = [8, 32], strides = [1, 1]} : vector<16x576xf32> to vector<8x32xf32>
    %24 = vector.extract_strided_slice %5 {offsets = [0, 416], sizes = [8, 32], strides = [1, 1]} : vector<16x576xf32> to vector<8x32xf32>
    %25 = tpu.transpose %23, [1, 0] : vector<8x32xf32> -> vector<32x8xf32>
    %cst_9 = arith.constant dense<0.000000e+00> : vector<8x8xf32>
    %26 = tpu.matmul %22, %25, %cst_9 {dimension_numbers = #tpu.dot_dimension_numbers<[1], [0], [0], [1], [0, 0, 1, 1], [], []>} : vector<8x32xf32>, vector<32x8xf32>, vector<8x8xf32> -> vector<8x8xf32>
    %cst_10 = arith.constant dense<0xFF800000> : vector<8xf32>
    %27 = vector.multi_reduction <maximumf>, %26, %cst_10 [1] : vector<8x8xf32> to vector<8xf32>
    %28 = vector.shape_cast %27 : vector<8xf32> to vector<8x1xf32>
    %29 = vector.broadcast %28 : vector<8x1xf32> to vector<8x8xf32>
    %30 = arith.subf %26, %29 : vector<8x8xf32>
    %31 = math.exp %30 : vector<8x8xf32>
    %cst_11 = arith.constant dense<0.000000e+00> : vector<8xf32>
    %32 = vector.multi_reduction <add>, %31, %cst_11 [1] : vector<8x8xf32> to vector<8xf32>
    %33 = vector.shape_cast %32 : vector<8xf32> to vector<8x1xf32>
    %34 = tpu.reciprocal %33 {approx = true} : vector<8x1xf32> -> vector<8x1xf32>
    %35 = vector.broadcast %34 : vector<8x1xf32> to vector<8x8xf32>
    %36 = arith.mulf %31, %35 : vector<8x8xf32>
    %cst_12 = arith.constant dense<0.000000e+00> : vector<8x32xf32>
    %37 = tpu.matmul %36, %24, %cst_12 {dimension_numbers = #tpu.dot_dimension_numbers<[1], [0], [0], [1], [0, 0, 1, 1], [], []>} : vector<8x8xf32>, vector<8x32xf32>, vector<8x32xf32> -> vector<8x32xf32>
    %38 = vector.extract_strided_slice %5 {offsets = [0, 64], sizes = [8, 32], strides = [1, 1]} : vector<16x576xf32> to vector<8x32xf32>
    %39 = vector.extract_strided_slice %5 {offsets = [0, 256], sizes = [8, 32], strides = [1, 1]} : vector<16x576xf32> to vector<8x32xf32>
    %40 = vector.extract_strided_slice %5 {offsets = [0, 448], sizes = [8, 32], strides = [1, 1]} : vector<16x576xf32> to vector<8x32xf32>
    %41 = tpu.transpose %39, [1, 0] : vector<8x32xf32> -> vector<32x8xf32>
    %cst_13 = arith.constant dense<0.000000e+00> : vector<8x8xf32>
    %42 = tpu.matmul %38, %41, %cst_13 {dimension_numbers = #tpu.dot_dimension_numbers<[1], [0], [0], [1], [0, 0, 1, 1], [], []>} : vector<8x32xf32>, vector<32x8xf32>, vector<8x8xf32> -> vector<8x8xf32>
    %cst_14 = arith.constant dense<0xFF800000> : vector<8xf32>
    %43 = vector.multi_reduction <maximumf>, %42, %cst_14 [1] : vector<8x8xf32> to vector<8xf32>
    %44 = vector.shape_cast %43 : vector<8xf32> to vector<8x1xf32>
    %45 = vector.broadcast %44 : vector<8x1xf32> to vector<8x8xf32>
    %46 = arith.subf %42, %45 : vector<8x8xf32>
    %47 = math.exp %46 : vector<8x8xf32>
    %cst_15 = arith.constant dense<0.000000e+00> : vector<8xf32>
    %48 = vector.multi_reduction <add>, %47, %cst_15 [1] : vector<8x8xf32> to vector<8xf32>
    %49 = vector.shape_cast %48 : vector<8xf32> to vector<8x1xf32>
    %50 = tpu.reciprocal %49 {approx = true} : vector<8x1xf32> -> vector<8x1xf32>
    %51 = vector.broadcast %50 : vector<8x1xf32> to vector<8x8xf32>
    %52 = arith.mulf %47, %51 : vector<8x8xf32>
    %cst_16 = arith.constant dense<0.000000e+00> : vector<8x32xf32>
    %53 = tpu.matmul %52, %40, %cst_16 {dimension_numbers = #tpu.dot_dimension_numbers<[1], [0], [0], [1], [0, 0, 1, 1], [], []>} : vector<8x8xf32>, vector<8x32xf32>, vector<8x32xf32> -> vector<8x32xf32>
    %54 = vector.extract_strided_slice %5 {offsets = [0, 96], sizes = [8, 32], strides = [1, 1]} : vector<16x576xf32> to vector<8x32xf32>
    %55 = vector.extract_strided_slice %5 {offsets = [0, 288], sizes = [8, 32], strides = [1, 1]} : vector<16x576xf32> to vector<8x32xf32>
    %56 = vector.extract_strided_slice %5 {offsets = [0, 480], sizes = [8, 32], strides = [1, 1]} : vector<16x576xf32> to vector<8x32xf32>
    %57 = tpu.transpose %55, [1, 0] : vector<8x32xf32> -> vector<32x8xf32>
    %cst_17 = arith.constant dense<0.000000e+00> : vector<8x8xf32>
    %58 = tpu.matmul %54, %57, %cst_17 {dimension_numbers = #tpu.dot_dimension_numbers<[1], [0], [0], [1], [0, 0, 1, 1], [], []>} : vector<8x32xf32>, vector<32x8xf32>, vector<8x8xf32> -> vector<8x8xf32>
    %cst_18 = arith.constant dense<0xFF800000> : vector<8xf32>
    %59 = vector.multi_reduction <maximumf>, %58, %cst_18 [1] : vector<8x8xf32> to vector<8xf32>
    %60 = vector.shape_cast %59 : vector<8xf32> to vector<8x1xf32>
    %61 = vector.broadcast %60 : vector<8x1xf32> to vector<8x8xf32>
    %62 = arith.subf %58, %61 : vector<8x8xf32>
    %63 = math.exp %62 : vector<8x8xf32>
    %cst_19 = arith.constant dense<0.000000e+00> : vector<8xf32>
    %64 = vector.multi_reduction <add>, %63, %cst_19 [1] : vector<8x8xf32> to vector<8xf32>
    %65 = vector.shape_cast %64 : vector<8xf32> to vector<8x1xf32>
    %66 = tpu.reciprocal %65 {approx = true} : vector<8x1xf32> -> vector<8x1xf32>
    %67 = vector.broadcast %66 : vector<8x1xf32> to vector<8x8xf32>
    %68 = arith.mulf %63, %67 : vector<8x8xf32>
    %cst_20 = arith.constant dense<0.000000e+00> : vector<8x32xf32>
    %69 = tpu.matmul %68, %56, %cst_20 {dimension_numbers = #tpu.dot_dimension_numbers<[1], [0], [0], [1], [0, 0, 1, 1], [], []>} : vector<8x8xf32>, vector<8x32xf32>, vector<8x32xf32> -> vector<8x32xf32>
    %70 = vector.extract_strided_slice %5 {offsets = [0, 128], sizes = [8, 32], strides = [1, 1]} : vector<16x576xf32> to vector<8x32xf32>
    %71 = vector.extract_strided_slice %5 {offsets = [0, 320], sizes = [8, 32], strides = [1, 1]} : vector<16x576xf32> to vector<8x32xf32>
    %72 = vector.extract_strided_slice %5 {offsets = [0, 512], sizes = [8, 32], strides = [1, 1]} : vector<16x576xf32> to vector<8x32xf32>
    %73 = tpu.transpose %71, [1, 0] : vector<8x32xf32> -> vector<32x8xf32>
    %cst_21 = arith.constant dense<0.000000e+00> : vector<8x8xf32>
    %74 = tpu.matmul %70, %73, %cst_21 {dimension_numbers = #tpu.dot_dimension_numbers<[1], [0], [0], [1], [0, 0, 1, 1], [], []>} : vector<8x32xf32>, vector<32x8xf32>, vector<8x8xf32> -> vector<8x8xf32>
    %cst_22 = arith.constant dense<0xFF800000> : vector<8xf32>
    %75 = vector.multi_reduction <maximumf>, %74, %cst_22 [1] : vector<8x8xf32> to vector<8xf32>
    %76 = vector.shape_cast %75 : vector<8xf32> to vector<8x1xf32>
    %77 = vector.broadcast %76 : vector<8x1xf32> to vector<8x8xf32>
    %78 = arith.subf %74, %77 : vector<8x8xf32>
    %79 = math.exp %78 : vector<8x8xf32>
    %cst_23 = arith.constant dense<0.000000e+00> : vector<8xf32>
    %80 = vector.multi_reduction <add>, %79, %cst_23 [1] : vector<8x8xf32> to vector<8xf32>
    %81 = vector.shape_cast %80 : vector<8xf32> to vector<8x1xf32>
    %82 = tpu.reciprocal %81 {approx = true} : vector<8x1xf32> -> vector<8x1xf32>
    %83 = vector.broadcast %82 : vector<8x1xf32> to vector<8x8xf32>
    %84 = arith.mulf %79, %83 : vector<8x8xf32>
    %cst_24 = arith.constant dense<0.000000e+00> : vector<8x32xf32>
    %85 = tpu.matmul %84, %72, %cst_24 {dimension_numbers = #tpu.dot_dimension_numbers<[1], [0], [0], [1], [0, 0, 1, 1], [], []>} : vector<8x8xf32>, vector<8x32xf32>, vector<8x32xf32> -> vector<8x32xf32>
    %86 = vector.extract_strided_slice %5 {offsets = [0, 160], sizes = [8, 32], strides = [1, 1]} : vector<16x576xf32> to vector<8x32xf32>
    %87 = vector.extract_strided_slice %5 {offsets = [0, 352], sizes = [8, 32], strides = [1, 1]} : vector<16x576xf32> to vector<8x32xf32>
    %88 = vector.extract_strided_slice %5 {offsets = [0, 544], sizes = [8, 32], strides = [1, 1]} : vector<16x576xf32> to vector<8x32xf32>
    %89 = tpu.transpose %87, [1, 0] : vector<8x32xf32> -> vector<32x8xf32>
    %cst_25 = arith.constant dense<0.000000e+00> : vector<8x8xf32>
    %90 = tpu.matmul %86, %89, %cst_25 {dimension_numbers = #tpu.dot_dimension_numbers<[1], [0], [0], [1], [0, 0, 1, 1], [], []>} : vector<8x32xf32>, vector<32x8xf32>, vector<8x8xf32> -> vector<8x8xf32>
    %cst_26 = arith.constant dense<0xFF800000> : vector<8xf32>
    %91 = vector.multi_reduction <maximumf>, %90, %cst_26 [1] : vector<8x8xf32> to vector<8xf32>
    %92 = vector.shape_cast %91 : vector<8xf32> to vector<8x1xf32>
    %93 = vector.broadcast %92 : vector<8x1xf32> to vector<8x8xf32>
    %94 = arith.subf %90, %93 : vector<8x8xf32>
    %95 = math.exp %94 : vector<8x8xf32>
    %cst_27 = arith.constant dense<0.000000e+00> : vector<8xf32>
    %96 = vector.multi_reduction <add>, %95, %cst_27 [1] : vector<8x8xf32> to vector<8xf32>
    %97 = vector.shape_cast %96 : vector<8xf32> to vector<8x1xf32>
    %98 = tpu.reciprocal %97 {approx = true} : vector<8x1xf32> -> vector<8x1xf32>
    %99 = vector.broadcast %98 : vector<8x1xf32> to vector<8x8xf32>
    %100 = arith.mulf %95, %99 : vector<8x8xf32>
    %cst_28 = arith.constant dense<0.000000e+00> : vector<8x32xf32>
    %101 = tpu.matmul %100, %88, %cst_28 {dimension_numbers = #tpu.dot_dimension_numbers<[1], [0], [0], [1], [0, 0, 1, 1], [], []>} : vector<8x8xf32>, vector<8x32xf32>, vector<8x32xf32> -> vector<8x32xf32>
    %102 = tpu.concatenate %21, %37, %53, %69, %85, %101 in 1 : vector<8x32xf32>, vector<8x32xf32>, vector<8x32xf32>, vector<8x32xf32>, vector<8x32xf32>, vector<8x32xf32> -> vector<8x192xf32>
    %103 = vector.extract_strided_slice %5 {offsets = [8, 0], sizes = [8, 32], strides = [1, 1]} : vector<16x576xf32> to vector<8x32xf32>
    %104 = vector.extract_strided_slice %5 {offsets = [8, 192], sizes = [8, 32], strides = [1, 1]} : vector<16x576xf32> to vector<8x32xf32>
    %105 = vector.extract_strided_slice %5 {offsets = [8, 384], sizes = [8, 32], strides = [1, 1]} : vector<16x576xf32> to vector<8x32xf32>
    %106 = tpu.transpose %104, [1, 0] : vector<8x32xf32> -> vector<32x8xf32>
    %cst_29 = arith.constant dense<0.000000e+00> : vector<8x8xf32>
    %107 = tpu.matmul %103, %106, %cst_29 {dimension_numbers = #tpu.dot_dimension_numbers<[1], [0], [0], [1], [0, 0, 1, 1], [], []>} : vector<8x32xf32>, vector<32x8xf32>, vector<8x8xf32> -> vector<8x8xf32>
    %cst_30 = arith.constant dense<0xFF800000> : vector<8xf32>
    %108 = vector.multi_reduction <maximumf>, %107, %cst_30 [1] : vector<8x8xf32> to vector<8xf32>
    %109 = vector.shape_cast %108 : vector<8xf32> to vector<8x1xf32>
    %110 = vector.broadcast %109 : vector<8x1xf32> to vector<8x8xf32>
    %111 = arith.subf %107, %110 : vector<8x8xf32>
    %112 = math.exp %111 : vector<8x8xf32>
    %cst_31 = arith.constant dense<0.000000e+00> : vector<8xf32>
    %113 = vector.multi_reduction <add>, %112, %cst_31 [1] : vector<8x8xf32> to vector<8xf32>
    %114 = vector.shape_cast %113 : vector<8xf32> to vector<8x1xf32>
    %115 = tpu.reciprocal %114 {approx = true} : vector<8x1xf32> -> vector<8x1xf32>
    %116 = vector.broadcast %115 : vector<8x1xf32> to vector<8x8xf32>
    %117 = arith.mulf %112, %116 : vector<8x8xf32>
    %cst_32 = arith.constant dense<0.000000e+00> : vector<8x32xf32>
    %118 = tpu.matmul %117, %105, %cst_32 {dimension_numbers = #tpu.dot_dimension_numbers<[1], [0], [0], [1], [0, 0, 1, 1], [], []>} : vector<8x8xf32>, vector<8x32xf32>, vector<8x32xf32> -> vector<8x32xf32>
    %119 = vector.extract_strided_slice %5 {offsets = [8, 32], sizes = [8, 32], strides = [1, 1]} : vector<16x576xf32> to vector<8x32xf32>
    %120 = vector.extract_strided_slice %5 {offsets = [8, 224], sizes = [8, 32], strides = [1, 1]} : vector<16x576xf32> to vector<8x32xf32>
    %121 = vector.extract_strided_slice %5 {offsets = [8, 416], sizes = [8, 32], strides = [1, 1]} : vector<16x576xf32> to vector<8x32xf32>
    %122 = tpu.transpose %120, [1, 0] : vector<8x32xf32> -> vector<32x8xf32>
    %cst_33 = arith.constant dense<0.000000e+00> : vector<8x8xf32>
    %123 = tpu.matmul %119, %122, %cst_33 {dimension_numbers = #tpu.dot_dimension_numbers<[1], [0], [0], [1], [0, 0, 1, 1], [], []>} : vector<8x32xf32>, vector<32x8xf32>, vector<8x8xf32> -> vector<8x8xf32>
    %cst_34 = arith.constant dense<0xFF800000> : vector<8xf32>
    %124 = vector.multi_reduction <maximumf>, %123, %cst_34 [1] : vector<8x8xf32> to vector<8xf32>
    %125 = vector.shape_cast %124 : vector<8xf32> to vector<8x1xf32>
    %126 = vector.broadcast %125 : vector<8x1xf32> to vector<8x8xf32>
    %127 = arith.subf %123, %126 : vector<8x8xf32>
    %128 = math.exp %127 : vector<8x8xf32>
    %cst_35 = arith.constant dense<0.000000e+00> : vector<8xf32>
    %129 = vector.multi_reduction <add>, %128, %cst_35 [1] : vector<8x8xf32> to vector<8xf32>
    %130 = vector.shape_cast %129 : vector<8xf32> to vector<8x1xf32>
    %131 = tpu.reciprocal %130 {approx = true} : vector<8x1xf32> -> vector<8x1xf32>
    %132 = vector.broadcast %131 : vector<8x1xf32> to vector<8x8xf32>
    %133 = arith.mulf %128, %132 : vector<8x8xf32>
    %cst_36 = arith.constant dense<0.000000e+00> : vector<8x32xf32>
    %134 = tpu.matmul %133, %121, %cst_36 {dimension_numbers = #tpu.dot_dimension_numbers<[1], [0], [0], [1], [0, 0, 1, 1], [], []>} : vector<8x8xf32>, vector<8x32xf32>, vector<8x32xf32> -> vector<8x32xf32>
    %135 = vector.extract_strided_slice %5 {offsets = [8, 64], sizes = [8, 32], strides = [1, 1]} : vector<16x576xf32> to vector<8x32xf32>
    %136 = vector.extract_strided_slice %5 {offsets = [8, 256], sizes = [8, 32], strides = [1, 1]} : vector<16x576xf32> to vector<8x32xf32>
    %137 = vector.extract_strided_slice %5 {offsets = [8, 448], sizes = [8, 32], strides = [1, 1]} : vector<16x576xf32> to vector<8x32xf32>
    %138 = tpu.transpose %136, [1, 0] : vector<8x32xf32> -> vector<32x8xf32>
    %cst_37 = arith.constant dense<0.000000e+00> : vector<8x8xf32>
    %139 = tpu.matmul %135, %138, %cst_37 {dimension_numbers = #tpu.dot_dimension_numbers<[1], [0], [0], [1], [0, 0, 1, 1], [], []>} : vector<8x32xf32>, vector<32x8xf32>, vector<8x8xf32> -> vector<8x8xf32>
    %cst_38 = arith.constant dense<0xFF800000> : vector<8xf32>
    %140 = vector.multi_reduction <maximumf>, %139, %cst_38 [1] : vector<8x8xf32> to vector<8xf32>
    %141 = vector.shape_cast %140 : vector<8xf32> to vector<8x1xf32>
    %142 = vector.broadcast %141 : vector<8x1xf32> to vector<8x8xf32>
    %143 = arith.subf %139, %142 : vector<8x8xf32>
    %144 = math.exp %143 : vector<8x8xf32>
    %cst_39 = arith.constant dense<0.000000e+00> : vector<8xf32>
    %145 = vector.multi_reduction <add>, %144, %cst_39 [1] : vector<8x8xf32> to vector<8xf32>
    %146 = vector.shape_cast %145 : vector<8xf32> to vector<8x1xf32>
    %147 = tpu.reciprocal %146 {approx = true} : vector<8x1xf32> -> vector<8x1xf32>
    %148 = vector.broadcast %147 : vector<8x1xf32> to vector<8x8xf32>
    %149 = arith.mulf %144, %148 : vector<8x8xf32>
    %cst_40 = arith.constant dense<0.000000e+00> : vector<8x32xf32>
    %150 = tpu.matmul %149, %137, %cst_40 {dimension_numbers = #tpu.dot_dimension_numbers<[1], [0], [0], [1], [0, 0, 1, 1], [], []>} : vector<8x8xf32>, vector<8x32xf32>, vector<8x32xf32> -> vector<8x32xf32>
    %151 = vector.extract_strided_slice %5 {offsets = [8, 96], sizes = [8, 32], strides = [1, 1]} : vector<16x576xf32> to vector<8x32xf32>
    %152 = vector.extract_strided_slice %5 {offsets = [8, 288], sizes = [8, 32], strides = [1, 1]} : vector<16x576xf32> to vector<8x32xf32>
    %153 = vector.extract_strided_slice %5 {offsets = [8, 480], sizes = [8, 32], strides = [1, 1]} : vector<16x576xf32> to vector<8x32xf32>
    %154 = tpu.transpose %152, [1, 0] : vector<8x32xf32> -> vector<32x8xf32>
    %cst_41 = arith.constant dense<0.000000e+00> : vector<8x8xf32>
    %155 = tpu.matmul %151, %154, %cst_41 {dimension_numbers = #tpu.dot_dimension_numbers<[1], [0], [0], [1], [0, 0, 1, 1], [], []>} : vector<8x32xf32>, vector<32x8xf32>, vector<8x8xf32> -> vector<8x8xf32>
    %cst_42 = arith.constant dense<0xFF800000> : vector<8xf32>
    %156 = vector.multi_reduction <maximumf>, %155, %cst_42 [1] : vector<8x8xf32> to vector<8xf32>
    %157 = vector.shape_cast %156 : vector<8xf32> to vector<8x1xf32>
    %158 = vector.broadcast %157 : vector<8x1xf32> to vector<8x8xf32>
    %159 = arith.subf %155, %158 : vector<8x8xf32>
    %160 = math.exp %159 : vector<8x8xf32>
    %cst_43 = arith.constant dense<0.000000e+00> : vector<8xf32>
    %161 = vector.multi_reduction <add>, %160, %cst_43 [1] : vector<8x8xf32> to vector<8xf32>
    %162 = vector.shape_cast %161 : vector<8xf32> to vector<8x1xf32>
    %163 = tpu.reciprocal %162 {approx = true} : vector<8x1xf32> -> vector<8x1xf32>
    %164 = vector.broadcast %163 : vector<8x1xf32> to vector<8x8xf32>
    %165 = arith.mulf %160, %164 : vector<8x8xf32>
    %cst_44 = arith.constant dense<0.000000e+00> : vector<8x32xf32>
    %166 = tpu.matmul %165, %153, %cst_44 {dimension_numbers = #tpu.dot_dimension_numbers<[1], [0], [0], [1], [0, 0, 1, 1], [], []>} : vector<8x8xf32>, vector<8x32xf32>, vector<8x32xf32> -> vector<8x32xf32>
    %167 = vector.extract_strided_slice %5 {offsets = [8, 128], sizes = [8, 32], strides = [1, 1]} : vector<16x576xf32> to vector<8x32xf32>
    %168 = vector.extract_strided_slice %5 {offsets = [8, 320], sizes = [8, 32], strides = [1, 1]} : vector<16x576xf32> to vector<8x32xf32>
    %169 = vector.extract_strided_slice %5 {offsets = [8, 512], sizes = [8, 32], strides = [1, 1]} : vector<16x576xf32> to vector<8x32xf32>
    %170 = tpu.transpose %168, [1, 0] : vector<8x32xf32> -> vector<32x8xf32>
    %cst_45 = arith.constant dense<0.000000e+00> : vector<8x8xf32>
    %171 = tpu.matmul %167, %170, %cst_45 {dimension_numbers = #tpu.dot_dimension_numbers<[1], [0], [0], [1], [0, 0, 1, 1], [], []>} : vector<8x32xf32>, vector<32x8xf32>, vector<8x8xf32> -> vector<8x8xf32>
    %cst_46 = arith.constant dense<0xFF800000> : vector<8xf32>
    %172 = vector.multi_reduction <maximumf>, %171, %cst_46 [1] : vector<8x8xf32> to vector<8xf32>
    %173 = vector.shape_cast %172 : vector<8xf32> to vector<8x1xf32>
    %174 = vector.broadcast %173 : vector<8x1xf32> to vector<8x8xf32>
    %175 = arith.subf %171, %174 : vector<8x8xf32>
    %176 = math.exp %175 : vector<8x8xf32>
    %cst_47 = arith.constant dense<0.000000e+00> : vector<8xf32>
    %177 = vector.multi_reduction <add>, %176, %cst_47 [1] : vector<8x8xf32> to vector<8xf32>
    %178 = vector.shape_cast %177 : vector<8xf32> to vector<8x1xf32>
    %179 = tpu.reciprocal %178 {approx = true} : vector<8x1xf32> -> vector<8x1xf32>
    %180 = vector.broadcast %179 : vector<8x1xf32> to vector<8x8xf32>
    %181 = arith.mulf %176, %180 : vector<8x8xf32>
    %cst_48 = arith.constant dense<0.000000e+00> : vector<8x32xf32>
    %182 = tpu.matmul %181, %169, %cst_48 {dimension_numbers = #tpu.dot_dimension_numbers<[1], [0], [0], [1], [0, 0, 1, 1], [], []>} : vector<8x8xf32>, vector<8x32xf32>, vector<8x32xf32> -> vector<8x32xf32>
    %183 = vector.extract_strided_slice %5 {offsets = [8, 160], sizes = [8, 32], strides = [1, 1]} : vector<16x576xf32> to vector<8x32xf32>
    %184 = vector.extract_strided_slice %5 {offsets = [8, 352], sizes = [8, 32], strides = [1, 1]} : vector<16x576xf32> to vector<8x32xf32>
    %185 = vector.extract_strided_slice %5 {offsets = [8, 544], sizes = [8, 32], strides = [1, 1]} : vector<16x576xf32> to vector<8x32xf32>
    %186 = tpu.transpose %184, [1, 0] : vector<8x32xf32> -> vector<32x8xf32>
    %cst_49 = arith.constant dense<0.000000e+00> : vector<8x8xf32>
    %187 = tpu.matmul %183, %186, %cst_49 {dimension_numbers = #tpu.dot_dimension_numbers<[1], [0], [0], [1], [0, 0, 1, 1], [], []>} : vector<8x32xf32>, vector<32x8xf32>, vector<8x8xf32> -> vector<8x8xf32>
    %cst_50 = arith.constant dense<0xFF800000> : vector<8xf32>
    %188 = vector.multi_reduction <maximumf>, %187, %cst_50 [1] : vector<8x8xf32> to vector<8xf32>
    %189 = vector.shape_cast %188 : vector<8xf32> to vector<8x1xf32>
    %190 = vector.broadcast %189 : vector<8x1xf32> to vector<8x8xf32>
    %191 = arith.subf %187, %190 : vector<8x8xf32>
    %192 = math.exp %191 : vector<8x8xf32>
    %cst_51 = arith.constant dense<0.000000e+00> : vector<8xf32>
    %193 = vector.multi_reduction <add>, %192, %cst_51 [1] : vector<8x8xf32> to vector<8xf32>
    %194 = vector.shape_cast %193 : vector<8xf32> to vector<8x1xf32>
    %195 = tpu.reciprocal %194 {approx = true} : vector<8x1xf32> -> vector<8x1xf32>
    %196 = vector.broadcast %195 : vector<8x1xf32> to vector<8x8xf32>
    %197 = arith.mulf %192, %196 : vector<8x8xf32>
    %cst_52 = arith.constant dense<0.000000e+00> : vector<8x32xf32>
    %198 = tpu.matmul %197, %185, %cst_52 {dimension_numbers = #tpu.dot_dimension_numbers<[1], [0], [0], [1], [0, 0, 1, 1], [], []>} : vector<8x8xf32>, vector<8x32xf32>, vector<8x32xf32> -> vector<8x32xf32>
    %199 = tpu.concatenate %118, %134, %150, %166, %182, %198 in 1 : vector<8x32xf32>, vector<8x32xf32>, vector<8x32xf32>, vector<8x32xf32>, vector<8x32xf32>, vector<8x32xf32> -> vector<8x192xf32>
    %200 = tpu.concatenate %102, %199 in 0 : vector<8x192xf32>, vector<8x192xf32> -> vector<16x192xf32>
    %c0_53 = arith.constant 0 : index
    %c0_54 = arith.constant 0 : index
    %201 = vector.load %arg4[%c0_53, %c0_54] : memref<192x192xf32, #tpu.memory_space<vmem>>, vector<192x192xf32>
    %cst_55 = arith.constant dense<0.000000e+00> : vector<16x192xf32>
    %202 = tpu.matmul %200, %201, %cst_55 {dimension_numbers = #tpu.dot_dimension_numbers<[1], [0], [0], [1], [0, 0, 1, 1], [], []>} : vector<16x192xf32>, vector<192x192xf32>, vector<16x192xf32> -> vector<16x192xf32>
    %c0_56 = arith.constant 0 : index
    %c0_57 = arith.constant 0 : index
    %203 = vector.load %arg5[%c0_56, %c0_57] : memref<1x192xf32, #tpu.memory_space<vmem>>, vector<1x192xf32>
    %204 = vector.broadcast %203 : vector<1x192xf32> to vector<16x192xf32>
    %205 = arith.addf %202, %204 : vector<16x192xf32>
    %206 = arith.addf %0, %205 : vector<16x192xf32>
    %c0_58 = arith.constant 0 : index
    %c0_59 = arith.constant 0 : index
    %207 = vector.load %arg10[%c0_58, %c0_59] : memref<1x192xf32, #tpu.memory_space<vmem>>, vector<1x192xf32>
    %c0_60 = arith.constant 0 : index
    %c0_61 = arith.constant 0 : index
    %208 = vector.load %arg11[%c0_60, %c0_61] : memref<1x192xf32, #tpu.memory_space<vmem>>, vector<1x192xf32>
    %cst_62 = arith.constant dense<0.000000e+00> : vector<16xf32>
    %209 = vector.multi_reduction <add>, %206, %cst_62 [1] : vector<16x192xf32> to vector<16xf32>
    %210 = vector.shape_cast %209 : vector<16xf32> to vector<16x1xf32>
    %cst_63 = arith.constant 1.920000e+02 : f32
    %211 = vector.broadcast %cst_63 : f32 to vector<16x1xf32>
    %212 = arith.divf %210, %211 : vector<16x1xf32>
    %213 = vector.broadcast %212 : vector<16x1xf32> to vector<16x192xf32>
    %214 = arith.subf %206, %213 : vector<16x192xf32>
    %215 = arith.mulf %214, %214 : vector<16x192xf32>
    %cst_64 = arith.constant dense<0.000000e+00> : vector<16xf32>
    %216 = vector.multi_reduction <add>, %215, %cst_64 [1] : vector<16x192xf32> to vector<16xf32>
    %217 = vector.shape_cast %216 : vector<16xf32> to vector<16x1xf32>
    %cst_65 = arith.constant 1.920000e+02 : f32
    %218 = vector.broadcast %cst_65 : f32 to vector<16x1xf32>
    %219 = arith.divf %217, %218 : vector<16x1xf32>
    %cst_66 = arith.constant 9.99999974E-6 : f32
    %220 = vector.broadcast %cst_66 : f32 to vector<16x1xf32>
    %221 = arith.addf %219, %220 : vector<16x1xf32>
    %222 = math.rsqrt %221 : vector<16x1xf32>
    %223 = vector.broadcast %222 : vector<16x1xf32> to vector<16x192xf32>
    %224 = arith.mulf %214, %223 : vector<16x192xf32>
    %225 = vector.broadcast %207 : vector<1x192xf32> to vector<16x192xf32>
    %226 = arith.mulf %224, %225 : vector<16x192xf32>
    %227 = vector.broadcast %208 : vector<1x192xf32> to vector<16x192xf32>
    %228 = arith.addf %226, %227 : vector<16x192xf32>
    %c0_67 = arith.constant 0 : index
    %c0_68 = arith.constant 0 : index
    %229 = vector.load %arg6[%c0_67, %c0_68] : memref<192x768xf32, #tpu.memory_space<vmem>>, vector<192x768xf32>
    %cst_69 = arith.constant dense<0.000000e+00> : vector<16x768xf32>
    %230 = tpu.matmul %228, %229, %cst_69 {dimension_numbers = #tpu.dot_dimension_numbers<[1], [0], [0], [1], [0, 0, 1, 1], [], []>} : vector<16x192xf32>, vector<192x768xf32>, vector<16x768xf32> -> vector<16x768xf32>
    %c0_70 = arith.constant 0 : index
    %c0_71 = arith.constant 0 : index
    %231 = vector.load %arg7[%c0_70, %c0_71] : memref<1x768xf32, #tpu.memory_space<vmem>>, vector<1x768xf32>
    %232 = vector.broadcast %231 : vector<1x768xf32> to vector<16x768xf32>
    %233 = arith.addf %230, %232 : vector<16x768xf32>
    %cst_72 = arith.constant 0.000000e+00 : f32
    %234 = vector.broadcast %cst_72 : f32 to vector<16x768xf32>
    %235 = arith.maximumf %233, %234 : vector<16x768xf32>
    %c0_73 = arith.constant 0 : index
    %c0_74 = arith.constant 0 : index
    %236 = vector.load %arg8[%c0_73, %c0_74] : memref<768x192xf32, #tpu.memory_space<vmem>>, vector<768x192xf32>
    %cst_75 = arith.constant dense<0.000000e+00> : vector<16x192xf32>
    %237 = tpu.matmul %235, %236, %cst_75 {dimension_numbers = #tpu.dot_dimension_numbers<[1], [0], [0], [1], [0, 0, 1, 1], [], []>} : vector<16x768xf32>, vector<768x192xf32>, vector<16x192xf32> -> vector<16x192xf32>
    %c0_76 = arith.constant 0 : index
    %c0_77 = arith.constant 0 : index
    %238 = vector.load %arg9[%c0_76, %c0_77] : memref<1x192xf32, #tpu.memory_space<vmem>>, vector<1x192xf32>
    %239 = vector.broadcast %238 : vector<1x192xf32> to vector<16x192xf32>
    %240 = arith.addf %237, %239 : vector<16x192xf32>
    %241 = arith.addf %228, %240 : vector<16x192xf32>
    %c0_78 = arith.constant 0 : index
    %c0_79 = arith.constant 0 : index
    %242 = vector.load %arg12[%c0_78, %c0_79] : memref<1x192xf32, #tpu.memory_space<vmem>>, vector<1x192xf32>
    %c0_80 = arith.constant 0 : index
    %c0_81 = arith.constant 0 : index
    %243 = vector.load %arg13[%c0_80, %c0_81] : memref<1x192xf32, #tpu.memory_space<vmem>>, vector<1x192xf32>
    %cst_82 = arith.constant dense<0.000000e+00> : vector<16xf32>
    %244 = vector.multi_reduction <add>, %241, %cst_82 [1] : vector<16x192xf32> to vector<16xf32>
    %245 = vector.shape_cast %244 : vector<16xf32> to vector<16x1xf32>
    %cst_83 = arith.constant 1.920000e+02 : f32
    %246 = vector.broadcast %cst_83 : f32 to vector<16x1xf32>
    %247 = arith.divf %245, %246 : vector<16x1xf32>
    %248 = vector.broadcast %247 : vector<16x1xf32> to vector<16x192xf32>
    %249 = arith.subf %241, %248 : vector<16x192xf32>
    %250 = arith.mulf %249, %249 : vector<16x192xf32>
    %cst_84 = arith.constant dense<0.000000e+00> : vector<16xf32>
    %251 = vector.multi_reduction <add>, %250, %cst_84 [1] : vector<16x192xf32> to vector<16xf32>
    %252 = vector.shape_cast %251 : vector<16xf32> to vector<16x1xf32>
    %cst_85 = arith.constant 1.920000e+02 : f32
    %253 = vector.broadcast %cst_85 : f32 to vector<16x1xf32>
    %254 = arith.divf %252, %253 : vector<16x1xf32>
    %cst_86 = arith.constant 9.99999974E-6 : f32
    %255 = vector.broadcast %cst_86 : f32 to vector<16x1xf32>
    %256 = arith.addf %254, %255 : vector<16x1xf32>
    %257 = math.rsqrt %256 : vector<16x1xf32>
    %258 = vector.broadcast %257 : vector<16x1xf32> to vector<16x192xf32>
    %259 = arith.mulf %249, %258 : vector<16x192xf32>
    %260 = vector.broadcast %242 : vector<1x192xf32> to vector<16x192xf32>
    %261 = arith.mulf %259, %260 : vector<16x192xf32>
    %262 = vector.broadcast %243 : vector<1x192xf32> to vector<16x192xf32>
    %263 = arith.addf %261, %262 : vector<16x192xf32>
    %c0_87 = arith.constant 0 : index
    %c0_88 = arith.constant 0 : index
    %264 = vector.load %arg14[%c0_87, %c0_88] : memref<192x576xf32, #tpu.memory_space<vmem>>, vector<192x576xf32>
    %cst_89 = arith.constant dense<0.000000e+00> : vector<16x576xf32>
    %265 = tpu.matmul %263, %264, %cst_89 {dimension_numbers = #tpu.dot_dimension_numbers<[1], [0], [0], [1], [0, 0, 1, 1], [], []>} : vector<16x192xf32>, vector<192x576xf32>, vector<16x576xf32> -> vector<16x576xf32>
    %c0_90 = arith.constant 0 : index
    %c0_91 = arith.constant 0 : index
    %266 = vector.load %arg15[%c0_90, %c0_91] : memref<1x576xf32, #tpu.memory_space<vmem>>, vector<1x576xf32>
    %267 = vector.broadcast %266 : vector<1x576xf32> to vector<16x576xf32>
    %268 = arith.addf %265, %267 : vector<16x576xf32>
    %269 = vector.extract_strided_slice %268 {offsets = [0, 0], sizes = [8, 32], strides = [1, 1]} : vector<16x576xf32> to vector<8x32xf32>
    %270 = vector.extract_strided_slice %268 {offsets = [0, 192], sizes = [8, 32], strides = [1, 1]} : vector<16x576xf32> to vector<8x32xf32>
    %271 = vector.extract_strided_slice %268 {offsets = [0, 384], sizes = [8, 32], strides = [1, 1]} : vector<16x576xf32> to vector<8x32xf32>
    %272 = tpu.transpose %270, [1, 0] : vector<8x32xf32> -> vector<32x8xf32>
    %cst_92 = arith.constant dense<0.000000e+00> : vector<8x8xf32>
    %273 = tpu.matmul %269, %272, %cst_92 {dimension_numbers = #tpu.dot_dimension_numbers<[1], [0], [0], [1], [0, 0, 1, 1], [], []>} : vector<8x32xf32>, vector<32x8xf32>, vector<8x8xf32> -> vector<8x8xf32>
    %cst_93 = arith.constant dense<0xFF800000> : vector<8xf32>
    %274 = vector.multi_reduction <maximumf>, %273, %cst_93 [1] : vector<8x8xf32> to vector<8xf32>
    %275 = vector.shape_cast %274 : vector<8xf32> to vector<8x1xf32>
    %276 = vector.broadcast %275 : vector<8x1xf32> to vector<8x8xf32>
    %277 = arith.subf %273, %276 : vector<8x8xf32>
    %278 = math.exp %277 : vector<8x8xf32>
    %cst_94 = arith.constant dense<0.000000e+00> : vector<8xf32>
    %279 = vector.multi_reduction <add>, %278, %cst_94 [1] : vector<8x8xf32> to vector<8xf32>
    %280 = vector.shape_cast %279 : vector<8xf32> to vector<8x1xf32>
    %281 = tpu.reciprocal %280 {approx = true} : vector<8x1xf32> -> vector<8x1xf32>
    %282 = vector.broadcast %281 : vector<8x1xf32> to vector<8x8xf32>
    %283 = arith.mulf %278, %282 : vector<8x8xf32>
    %cst_95 = arith.constant dense<0.000000e+00> : vector<8x32xf32>
    %284 = tpu.matmul %283, %271, %cst_95 {dimension_numbers = #tpu.dot_dimension_numbers<[1], [0], [0], [1], [0, 0, 1, 1], [], []>} : vector<8x8xf32>, vector<8x32xf32>, vector<8x32xf32> -> vector<8x32xf32>
    %285 = vector.extract_strided_slice %268 {offsets = [0, 32], sizes = [8, 32], strides = [1, 1]} : vector<16x576xf32> to vector<8x32xf32>
    %286 = vector.extract_strided_slice %268 {offsets = [0, 224], sizes = [8, 32], strides = [1, 1]} : vector<16x576xf32> to vector<8x32xf32>
    %287 = vector.extract_strided_slice %268 {offsets = [0, 416], sizes = [8, 32], strides = [1, 1]} : vector<16x576xf32> to vector<8x32xf32>
    %288 = tpu.transpose %286, [1, 0] : vector<8x32xf32> -> vector<32x8xf32>
    %cst_96 = arith.constant dense<0.000000e+00> : vector<8x8xf32>
    %289 = tpu.matmul %285, %288, %cst_96 {dimension_numbers = #tpu.dot_dimension_numbers<[1], [0], [0], [1], [0, 0, 1, 1], [], []>} : vector<8x32xf32>, vector<32x8xf32>, vector<8x8xf32> -> vector<8x8xf32>
    %cst_97 = arith.constant dense<0xFF800000> : vector<8xf32>
    %290 = vector.multi_reduction <maximumf>, %289, %cst_97 [1] : vector<8x8xf32> to vector<8xf32>
    %291 = vector.shape_cast %290 : vector<8xf32> to vector<8x1xf32>
    %292 = vector.broadcast %291 : vector<8x1xf32> to vector<8x8xf32>
    %293 = arith.subf %289, %292 : vector<8x8xf32>
    %294 = math.exp %293 : vector<8x8xf32>
    %cst_98 = arith.constant dense<0.000000e+00> : vector<8xf32>
    %295 = vector.multi_reduction <add>, %294, %cst_98 [1] : vector<8x8xf32> to vector<8xf32>
    %296 = vector.shape_cast %295 : vector<8xf32> to vector<8x1xf32>
    %297 = tpu.reciprocal %296 {approx = true} : vector<8x1xf32> -> vector<8x1xf32>
    %298 = vector.broadcast %297 : vector<8x1xf32> to vector<8x8xf32>
    %299 = arith.mulf %294, %298 : vector<8x8xf32>
    %cst_99 = arith.constant dense<0.000000e+00> : vector<8x32xf32>
    %300 = tpu.matmul %299, %287, %cst_99 {dimension_numbers = #tpu.dot_dimension_numbers<[1], [0], [0], [1], [0, 0, 1, 1], [], []>} : vector<8x8xf32>, vector<8x32xf32>, vector<8x32xf32> -> vector<8x32xf32>
    %301 = vector.extract_strided_slice %268 {offsets = [0, 64], sizes = [8, 32], strides = [1, 1]} : vector<16x576xf32> to vector<8x32xf32>
    %302 = vector.extract_strided_slice %268 {offsets = [0, 256], sizes = [8, 32], strides = [1, 1]} : vector<16x576xf32> to vector<8x32xf32>
    %303 = vector.extract_strided_slice %268 {offsets = [0, 448], sizes = [8, 32], strides = [1, 1]} : vector<16x576xf32> to vector<8x32xf32>
    %304 = tpu.transpose %302, [1, 0] : vector<8x32xf32> -> vector<32x8xf32>
    %cst_100 = arith.constant dense<0.000000e+00> : vector<8x8xf32>
    %305 = tpu.matmul %301, %304, %cst_100 {dimension_numbers = #tpu.dot_dimension_numbers<[1], [0], [0], [1], [0, 0, 1, 1], [], []>} : vector<8x32xf32>, vector<32x8xf32>, vector<8x8xf32> -> vector<8x8xf32>
    %cst_101 = arith.constant dense<0xFF800000> : vector<8xf32>
    %306 = vector.multi_reduction <maximumf>, %305, %cst_101 [1] : vector<8x8xf32> to vector<8xf32>
    %307 = vector.shape_cast %306 : vector<8xf32> to vector<8x1xf32>
    %308 = vector.broadcast %307 : vector<8x1xf32> to vector<8x8xf32>
    %309 = arith.subf %305, %308 : vector<8x8xf32>
    %310 = math.exp %309 : vector<8x8xf32>
    %cst_102 = arith.constant dense<0.000000e+00> : vector<8xf32>
    %311 = vector.multi_reduction <add>, %310, %cst_102 [1] : vector<8x8xf32> to vector<8xf32>
    %312 = vector.shape_cast %311 : vector<8xf32> to vector<8x1xf32>
    %313 = tpu.reciprocal %312 {approx = true} : vector<8x1xf32> -> vector<8x1xf32>
    %314 = vector.broadcast %313 : vector<8x1xf32> to vector<8x8xf32>
    %315 = arith.mulf %310, %314 : vector<8x8xf32>
    %cst_103 = arith.constant dense<0.000000e+00> : vector<8x32xf32>
    %316 = tpu.matmul %315, %303, %cst_103 {dimension_numbers = #tpu.dot_dimension_numbers<[1], [0], [0], [1], [0, 0, 1, 1], [], []>} : vector<8x8xf32>, vector<8x32xf32>, vector<8x32xf32> -> vector<8x32xf32>
    %317 = vector.extract_strided_slice %268 {offsets = [0, 96], sizes = [8, 32], strides = [1, 1]} : vector<16x576xf32> to vector<8x32xf32>
    %318 = vector.extract_strided_slice %268 {offsets = [0, 288], sizes = [8, 32], strides = [1, 1]} : vector<16x576xf32> to vector<8x32xf32>
    %319 = vector.extract_strided_slice %268 {offsets = [0, 480], sizes = [8, 32], strides = [1, 1]} : vector<16x576xf32> to vector<8x32xf32>
    %320 = tpu.transpose %318, [1, 0] : vector<8x32xf32> -> vector<32x8xf32>
    %cst_104 = arith.constant dense<0.000000e+00> : vector<8x8xf32>
    %321 = tpu.matmul %317, %320, %cst_104 {dimension_numbers = #tpu.dot_dimension_numbers<[1], [0], [0], [1], [0, 0, 1, 1], [], []>} : vector<8x32xf32>, vector<32x8xf32>, vector<8x8xf32> -> vector<8x8xf32>
    %cst_105 = arith.constant dense<0xFF800000> : vector<8xf32>
    %322 = vector.multi_reduction <maximumf>, %321, %cst_105 [1] : vector<8x8xf32> to vector<8xf32>
    %323 = vector.shape_cast %322 : vector<8xf32> to vector<8x1xf32>
    %324 = vector.broadcast %323 : vector<8x1xf32> to vector<8x8xf32>
    %325 = arith.subf %321, %324 : vector<8x8xf32>
    %326 = math.exp %325 : vector<8x8xf32>
    %cst_106 = arith.constant dense<0.000000e+00> : vector<8xf32>
    %327 = vector.multi_reduction <add>, %326, %cst_106 [1] : vector<8x8xf32> to vector<8xf32>
    %328 = vector.shape_cast %327 : vector<8xf32> to vector<8x1xf32>
    %329 = tpu.reciprocal %328 {approx = true} : vector<8x1xf32> -> vector<8x1xf32>
    %330 = vector.broadcast %329 : vector<8x1xf32> to vector<8x8xf32>
    %331 = arith.mulf %326, %330 : vector<8x8xf32>
    %cst_107 = arith.constant dense<0.000000e+00> : vector<8x32xf32>
    %332 = tpu.matmul %331, %319, %cst_107 {dimension_numbers = #tpu.dot_dimension_numbers<[1], [0], [0], [1], [0, 0, 1, 1], [], []>} : vector<8x8xf32>, vector<8x32xf32>, vector<8x32xf32> -> vector<8x32xf32>
    %333 = vector.extract_strided_slice %268 {offsets = [0, 128], sizes = [8, 32], strides = [1, 1]} : vector<16x576xf32> to vector<8x32xf32>
    %334 = vector.extract_strided_slice %268 {offsets = [0, 320], sizes = [8, 32], strides = [1, 1]} : vector<16x576xf32> to vector<8x32xf32>
    %335 = vector.extract_strided_slice %268 {offsets = [0, 512], sizes = [8, 32], strides = [1, 1]} : vector<16x576xf32> to vector<8x32xf32>
    %336 = tpu.transpose %334, [1, 0] : vector<8x32xf32> -> vector<32x8xf32>
    %cst_108 = arith.constant dense<0.000000e+00> : vector<8x8xf32>
    %337 = tpu.matmul %333, %336, %cst_108 {dimension_numbers = #tpu.dot_dimension_numbers<[1], [0], [0], [1], [0, 0, 1, 1], [], []>} : vector<8x32xf32>, vector<32x8xf32>, vector<8x8xf32> -> vector<8x8xf32>
    %cst_109 = arith.constant dense<0xFF800000> : vector<8xf32>
    %338 = vector.multi_reduction <maximumf>, %337, %cst_109 [1] : vector<8x8xf32> to vector<8xf32>
    %339 = vector.shape_cast %338 : vector<8xf32> to vector<8x1xf32>
    %340 = vector.broadcast %339 : vector<8x1xf32> to vector<8x8xf32>
    %341 = arith.subf %337, %340 : vector<8x8xf32>
    %342 = math.exp %341 : vector<8x8xf32>
    %cst_110 = arith.constant dense<0.000000e+00> : vector<8xf32>
    %343 = vector.multi_reduction <add>, %342, %cst_110 [1] : vector<8x8xf32> to vector<8xf32>
    %344 = vector.shape_cast %343 : vector<8xf32> to vector<8x1xf32>
    %345 = tpu.reciprocal %344 {approx = true} : vector<8x1xf32> -> vector<8x1xf32>
    %346 = vector.broadcast %345 : vector<8x1xf32> to vector<8x8xf32>
    %347 = arith.mulf %342, %346 : vector<8x8xf32>
    %cst_111 = arith.constant dense<0.000000e+00> : vector<8x32xf32>
    %348 = tpu.matmul %347, %335, %cst_111 {dimension_numbers = #tpu.dot_dimension_numbers<[1], [0], [0], [1], [0, 0, 1, 1], [], []>} : vector<8x8xf32>, vector<8x32xf32>, vector<8x32xf32> -> vector<8x32xf32>
    %349 = vector.extract_strided_slice %268 {offsets = [0, 160], sizes = [8, 32], strides = [1, 1]} : vector<16x576xf32> to vector<8x32xf32>
    %350 = vector.extract_strided_slice %268 {offsets = [0, 352], sizes = [8, 32], strides = [1, 1]} : vector<16x576xf32> to vector<8x32xf32>
    %351 = vector.extract_strided_slice %268 {offsets = [0, 544], sizes = [8, 32], strides = [1, 1]} : vector<16x576xf32> to vector<8x32xf32>
    %352 = tpu.transpose %350, [1, 0] : vector<8x32xf32> -> vector<32x8xf32>
    %cst_112 = arith.constant dense<0.000000e+00> : vector<8x8xf32>
    %353 = tpu.matmul %349, %352, %cst_112 {dimension_numbers = #tpu.dot_dimension_numbers<[1], [0], [0], [1], [0, 0, 1, 1], [], []>} : vector<8x32xf32>, vector<32x8xf32>, vector<8x8xf32> -> vector<8x8xf32>
    %cst_113 = arith.constant dense<0xFF800000> : vector<8xf32>
    %354 = vector.multi_reduction <maximumf>, %353, %cst_113 [1] : vector<8x8xf32> to vector<8xf32>
    %355 = vector.shape_cast %354 : vector<8xf32> to vector<8x1xf32>
    %356 = vector.broadcast %355 : vector<8x1xf32> to vector<8x8xf32>
    %357 = arith.subf %353, %356 : vector<8x8xf32>
    %358 = math.exp %357 : vector<8x8xf32>
    %cst_114 = arith.constant dense<0.000000e+00> : vector<8xf32>
    %359 = vector.multi_reduction <add>, %358, %cst_114 [1] : vector<8x8xf32> to vector<8xf32>
    %360 = vector.shape_cast %359 : vector<8xf32> to vector<8x1xf32>
    %361 = tpu.reciprocal %360 {approx = true} : vector<8x1xf32> -> vector<8x1xf32>
    %362 = vector.broadcast %361 : vector<8x1xf32> to vector<8x8xf32>
    %363 = arith.mulf %358, %362 : vector<8x8xf32>
    %cst_115 = arith.constant dense<0.000000e+00> : vector<8x32xf32>
    %364 = tpu.matmul %363, %351, %cst_115 {dimension_numbers = #tpu.dot_dimension_numbers<[1], [0], [0], [1], [0, 0, 1, 1], [], []>} : vector<8x8xf32>, vector<8x32xf32>, vector<8x32xf32> -> vector<8x32xf32>
    %365 = tpu.concatenate %284, %300, %316, %332, %348, %364 in 1 : vector<8x32xf32>, vector<8x32xf32>, vector<8x32xf32>, vector<8x32xf32>, vector<8x32xf32>, vector<8x32xf32> -> vector<8x192xf32>
    %366 = vector.extract_strided_slice %268 {offsets = [8, 0], sizes = [8, 32], strides = [1, 1]} : vector<16x576xf32> to vector<8x32xf32>
    %367 = vector.extract_strided_slice %268 {offsets = [8, 192], sizes = [8, 32], strides = [1, 1]} : vector<16x576xf32> to vector<8x32xf32>
    %368 = vector.extract_strided_slice %268 {offsets = [8, 384], sizes = [8, 32], strides = [1, 1]} : vector<16x576xf32> to vector<8x32xf32>
    %369 = tpu.transpose %367, [1, 0] : vector<8x32xf32> -> vector<32x8xf32>
    %cst_116 = arith.constant dense<0.000000e+00> : vector<8x8xf32>
    %370 = tpu.matmul %366, %369, %cst_116 {dimension_numbers = #tpu.dot_dimension_numbers<[1], [0], [0], [1], [0, 0, 1, 1], [], []>} : vector<8x32xf32>, vector<32x8xf32>, vector<8x8xf32> -> vector<8x8xf32>
    %cst_117 = arith.constant dense<0xFF800000> : vector<8xf32>
    %371 = vector.multi_reduction <maximumf>, %370, %cst_117 [1] : vector<8x8xf32> to vector<8xf32>
    %372 = vector.shape_cast %371 : vector<8xf32> to vector<8x1xf32>
    %373 = vector.broadcast %372 : vector<8x1xf32> to vector<8x8xf32>
    %374 = arith.subf %370, %373 : vector<8x8xf32>
    %375 = math.exp %374 : vector<8x8xf32>
    %cst_118 = arith.constant dense<0.000000e+00> : vector<8xf32>
    %376 = vector.multi_reduction <add>, %375, %cst_118 [1] : vector<8x8xf32> to vector<8xf32>
    %377 = vector.shape_cast %376 : vector<8xf32> to vector<8x1xf32>
    %378 = tpu.reciprocal %377 {approx = true} : vector<8x1xf32> -> vector<8x1xf32>
    %379 = vector.broadcast %378 : vector<8x1xf32> to vector<8x8xf32>
    %380 = arith.mulf %375, %379 : vector<8x8xf32>
    %cst_119 = arith.constant dense<0.000000e+00> : vector<8x32xf32>
    %381 = tpu.matmul %380, %368, %cst_119 {dimension_numbers = #tpu.dot_dimension_numbers<[1], [0], [0], [1], [0, 0, 1, 1], [], []>} : vector<8x8xf32>, vector<8x32xf32>, vector<8x32xf32> -> vector<8x32xf32>
    %382 = vector.extract_strided_slice %268 {offsets = [8, 32], sizes = [8, 32], strides = [1, 1]} : vector<16x576xf32> to vector<8x32xf32>
    %383 = vector.extract_strided_slice %268 {offsets = [8, 224], sizes = [8, 32], strides = [1, 1]} : vector<16x576xf32> to vector<8x32xf32>
    %384 = vector.extract_strided_slice %268 {offsets = [8, 416], sizes = [8, 32], strides = [1, 1]} : vector<16x576xf32> to vector<8x32xf32>
    %385 = tpu.transpose %383, [1, 0] : vector<8x32xf32> -> vector<32x8xf32>
    %cst_120 = arith.constant dense<0.000000e+00> : vector<8x8xf32>
    %386 = tpu.matmul %382, %385, %cst_120 {dimension_numbers = #tpu.dot_dimension_numbers<[1], [0], [0], [1], [0, 0, 1, 1], [], []>} : vector<8x32xf32>, vector<32x8xf32>, vector<8x8xf32> -> vector<8x8xf32>
    %cst_121 = arith.constant dense<0xFF800000> : vector<8xf32>
    %387 = vector.multi_reduction <maximumf>, %386, %cst_121 [1] : vector<8x8xf32> to vector<8xf32>
    %388 = vector.shape_cast %387 : vector<8xf32> to vector<8x1xf32>
    %389 = vector.broadcast %388 : vector<8x1xf32> to vector<8x8xf32>
    %390 = arith.subf %386, %389 : vector<8x8xf32>
    %391 = math.exp %390 : vector<8x8xf32>
    %cst_122 = arith.constant dense<0.000000e+00> : vector<8xf32>
    %392 = vector.multi_reduction <add>, %391, %cst_122 [1] : vector<8x8xf32> to vector<8xf32>
    %393 = vector.shape_cast %392 : vector<8xf32> to vector<8x1xf32>
    %394 = tpu.reciprocal %393 {approx = true} : vector<8x1xf32> -> vector<8x1xf32>
    %395 = vector.broadcast %394 : vector<8x1xf32> to vector<8x8xf32>
    %396 = arith.mulf %391, %395 : vector<8x8xf32>
    %cst_123 = arith.constant dense<0.000000e+00> : vector<8x32xf32>
    %397 = tpu.matmul %396, %384, %cst_123 {dimension_numbers = #tpu.dot_dimension_numbers<[1], [0], [0], [1], [0, 0, 1, 1], [], []>} : vector<8x8xf32>, vector<8x32xf32>, vector<8x32xf32> -> vector<8x32xf32>
    %398 = vector.extract_strided_slice %268 {offsets = [8, 64], sizes = [8, 32], strides = [1, 1]} : vector<16x576xf32> to vector<8x32xf32>
    %399 = vector.extract_strided_slice %268 {offsets = [8, 256], sizes = [8, 32], strides = [1, 1]} : vector<16x576xf32> to vector<8x32xf32>
    %400 = vector.extract_strided_slice %268 {offsets = [8, 448], sizes = [8, 32], strides = [1, 1]} : vector<16x576xf32> to vector<8x32xf32>
    %401 = tpu.transpose %399, [1, 0] : vector<8x32xf32> -> vector<32x8xf32>
    %cst_124 = arith.constant dense<0.000000e+00> : vector<8x8xf32>
    %402 = tpu.matmul %398, %401, %cst_124 {dimension_numbers = #tpu.dot_dimension_numbers<[1], [0], [0], [1], [0, 0, 1, 1], [], []>} : vector<8x32xf32>, vector<32x8xf32>, vector<8x8xf32> -> vector<8x8xf32>
    %cst_125 = arith.constant dense<0xFF800000> : vector<8xf32>
    %403 = vector.multi_reduction <maximumf>, %402, %cst_125 [1] : vector<8x8xf32> to vector<8xf32>
    %404 = vector.shape_cast %403 : vector<8xf32> to vector<8x1xf32>
    %405 = vector.broadcast %404 : vector<8x1xf32> to vector<8x8xf32>
    %406 = arith.subf %402, %405 : vector<8x8xf32>
    %407 = math.exp %406 : vector<8x8xf32>
    %cst_126 = arith.constant dense<0.000000e+00> : vector<8xf32>
    %408 = vector.multi_reduction <add>, %407, %cst_126 [1] : vector<8x8xf32> to vector<8xf32>
    %409 = vector.shape_cast %408 : vector<8xf32> to vector<8x1xf32>
    %410 = tpu.reciprocal %409 {approx = true} : vector<8x1xf32> -> vector<8x1xf32>
    %411 = vector.broadcast %410 : vector<8x1xf32> to vector<8x8xf32>
    %412 = arith.mulf %407, %411 : vector<8x8xf32>
    %cst_127 = arith.constant dense<0.000000e+00> : vector<8x32xf32>
    %413 = tpu.matmul %412, %400, %cst_127 {dimension_numbers = #tpu.dot_dimension_numbers<[1], [0], [0], [1], [0, 0, 1, 1], [], []>} : vector<8x8xf32>, vector<8x32xf32>, vector<8x32xf32> -> vector<8x32xf32>
    %414 = vector.extract_strided_slice %268 {offsets = [8, 96], sizes = [8, 32], strides = [1, 1]} : vector<16x576xf32> to vector<8x32xf32>
    %415 = vector.extract_strided_slice %268 {offsets = [8, 288], sizes = [8, 32], strides = [1, 1]} : vector<16x576xf32> to vector<8x32xf32>
    %416 = vector.extract_strided_slice %268 {offsets = [8, 480], sizes = [8, 32], strides = [1, 1]} : vector<16x576xf32> to vector<8x32xf32>
    %417 = tpu.transpose %415, [1, 0] : vector<8x32xf32> -> vector<32x8xf32>
    %cst_128 = arith.constant dense<0.000000e+00> : vector<8x8xf32>
    %418 = tpu.matmul %414, %417, %cst_128 {dimension_numbers = #tpu.dot_dimension_numbers<[1], [0], [0], [1], [0, 0, 1, 1], [], []>} : vector<8x32xf32>, vector<32x8xf32>, vector<8x8xf32> -> vector<8x8xf32>
    %cst_129 = arith.constant dense<0xFF800000> : vector<8xf32>
    %419 = vector.multi_reduction <maximumf>, %418, %cst_129 [1] : vector<8x8xf32> to vector<8xf32>
    %420 = vector.shape_cast %419 : vector<8xf32> to vector<8x1xf32>
    %421 = vector.broadcast %420 : vector<8x1xf32> to vector<8x8xf32>
    %422 = arith.subf %418, %421 : vector<8x8xf32>
    %423 = math.exp %422 : vector<8x8xf32>
    %cst_130 = arith.constant dense<0.000000e+00> : vector<8xf32>
    %424 = vector.multi_reduction <add>, %423, %cst_130 [1] : vector<8x8xf32> to vector<8xf32>
    %425 = vector.shape_cast %424 : vector<8xf32> to vector<8x1xf32>
    %426 = tpu.reciprocal %425 {approx = true} : vector<8x1xf32> -> vector<8x1xf32>
    %427 = vector.broadcast %426 : vector<8x1xf32> to vector<8x8xf32>
    %428 = arith.mulf %423, %427 : vector<8x8xf32>
    %cst_131 = arith.constant dense<0.000000e+00> : vector<8x32xf32>
    %429 = tpu.matmul %428, %416, %cst_131 {dimension_numbers = #tpu.dot_dimension_numbers<[1], [0], [0], [1], [0, 0, 1, 1], [], []>} : vector<8x8xf32>, vector<8x32xf32>, vector<8x32xf32> -> vector<8x32xf32>
    %430 = vector.extract_strided_slice %268 {offsets = [8, 128], sizes = [8, 32], strides = [1, 1]} : vector<16x576xf32> to vector<8x32xf32>
    %431 = vector.extract_strided_slice %268 {offsets = [8, 320], sizes = [8, 32], strides = [1, 1]} : vector<16x576xf32> to vector<8x32xf32>
    %432 = vector.extract_strided_slice %268 {offsets = [8, 512], sizes = [8, 32], strides = [1, 1]} : vector<16x576xf32> to vector<8x32xf32>
    %433 = tpu.transpose %431, [1, 0] : vector<8x32xf32> -> vector<32x8xf32>
    %cst_132 = arith.constant dense<0.000000e+00> : vector<8x8xf32>
    %434 = tpu.matmul %430, %433, %cst_132 {dimension_numbers = #tpu.dot_dimension_numbers<[1], [0], [0], [1], [0, 0, 1, 1], [], []>} : vector<8x32xf32>, vector<32x8xf32>, vector<8x8xf32> -> vector<8x8xf32>
    %cst_133 = arith.constant dense<0xFF800000> : vector<8xf32>
    %435 = vector.multi_reduction <maximumf>, %434, %cst_133 [1] : vector<8x8xf32> to vector<8xf32>
    %436 = vector.shape_cast %435 : vector<8xf32> to vector<8x1xf32>
    %437 = vector.broadcast %436 : vector<8x1xf32> to vector<8x8xf32>
    %438 = arith.subf %434, %437 : vector<8x8xf32>
    %439 = math.exp %438 : vector<8x8xf32>
    %cst_134 = arith.constant dense<0.000000e+00> : vector<8xf32>
    %440 = vector.multi_reduction <add>, %439, %cst_134 [1] : vector<8x8xf32> to vector<8xf32>
    %441 = vector.shape_cast %440 : vector<8xf32> to vector<8x1xf32>
    %442 = tpu.reciprocal %441 {approx = true} : vector<8x1xf32> -> vector<8x1xf32>
    %443 = vector.broadcast %442 : vector<8x1xf32> to vector<8x8xf32>
    %444 = arith.mulf %439, %443 : vector<8x8xf32>
    %cst_135 = arith.constant dense<0.000000e+00> : vector<8x32xf32>
    %445 = tpu.matmul %444, %432, %cst_135 {dimension_numbers = #tpu.dot_dimension_numbers<[1], [0], [0], [1], [0, 0, 1, 1], [], []>} : vector<8x8xf32>, vector<8x32xf32>, vector<8x32xf32> -> vector<8x32xf32>
    %446 = vector.extract_strided_slice %268 {offsets = [8, 160], sizes = [8, 32], strides = [1, 1]} : vector<16x576xf32> to vector<8x32xf32>
    %447 = vector.extract_strided_slice %268 {offsets = [8, 352], sizes = [8, 32], strides = [1, 1]} : vector<16x576xf32> to vector<8x32xf32>
    %448 = vector.extract_strided_slice %268 {offsets = [8, 544], sizes = [8, 32], strides = [1, 1]} : vector<16x576xf32> to vector<8x32xf32>
    %449 = tpu.transpose %447, [1, 0] : vector<8x32xf32> -> vector<32x8xf32>
    %cst_136 = arith.constant dense<0.000000e+00> : vector<8x8xf32>
    %450 = tpu.matmul %446, %449, %cst_136 {dimension_numbers = #tpu.dot_dimension_numbers<[1], [0], [0], [1], [0, 0, 1, 1], [], []>} : vector<8x32xf32>, vector<32x8xf32>, vector<8x8xf32> -> vector<8x8xf32>
    %cst_137 = arith.constant dense<0xFF800000> : vector<8xf32>
    %451 = vector.multi_reduction <maximumf>, %450, %cst_137 [1] : vector<8x8xf32> to vector<8xf32>
    %452 = vector.shape_cast %451 : vector<8xf32> to vector<8x1xf32>
    %453 = vector.broadcast %452 : vector<8x1xf32> to vector<8x8xf32>
    %454 = arith.subf %450, %453 : vector<8x8xf32>
    %455 = math.exp %454 : vector<8x8xf32>
    %cst_138 = arith.constant dense<0.000000e+00> : vector<8xf32>
    %456 = vector.multi_reduction <add>, %455, %cst_138 [1] : vector<8x8xf32> to vector<8xf32>
    %457 = vector.shape_cast %456 : vector<8xf32> to vector<8x1xf32>
    %458 = tpu.reciprocal %457 {approx = true} : vector<8x1xf32> -> vector<8x1xf32>
    %459 = vector.broadcast %458 : vector<8x1xf32> to vector<8x8xf32>
    %460 = arith.mulf %455, %459 : vector<8x8xf32>
    %cst_139 = arith.constant dense<0.000000e+00> : vector<8x32xf32>
    %461 = tpu.matmul %460, %448, %cst_139 {dimension_numbers = #tpu.dot_dimension_numbers<[1], [0], [0], [1], [0, 0, 1, 1], [], []>} : vector<8x8xf32>, vector<8x32xf32>, vector<8x32xf32> -> vector<8x32xf32>
    %462 = tpu.concatenate %381, %397, %413, %429, %445, %461 in 1 : vector<8x32xf32>, vector<8x32xf32>, vector<8x32xf32>, vector<8x32xf32>, vector<8x32xf32>, vector<8x32xf32> -> vector<8x192xf32>
    %463 = tpu.concatenate %365, %462 in 0 : vector<8x192xf32>, vector<8x192xf32> -> vector<16x192xf32>
    %c0_140 = arith.constant 0 : index
    %c0_141 = arith.constant 0 : index
    %464 = vector.load %arg16[%c0_140, %c0_141] : memref<192x192xf32, #tpu.memory_space<vmem>>, vector<192x192xf32>
    %cst_142 = arith.constant dense<0.000000e+00> : vector<16x192xf32>
    %465 = tpu.matmul %463, %464, %cst_142 {dimension_numbers = #tpu.dot_dimension_numbers<[1], [0], [0], [1], [0, 0, 1, 1], [], []>} : vector<16x192xf32>, vector<192x192xf32>, vector<16x192xf32> -> vector<16x192xf32>
    %c0_143 = arith.constant 0 : index
    %c0_144 = arith.constant 0 : index
    %466 = vector.load %arg17[%c0_143, %c0_144] : memref<1x192xf32, #tpu.memory_space<vmem>>, vector<1x192xf32>
    %467 = vector.broadcast %466 : vector<1x192xf32> to vector<16x192xf32>
    %468 = arith.addf %465, %467 : vector<16x192xf32>
    %469 = arith.addf %263, %468 : vector<16x192xf32>
    %c0_145 = arith.constant 0 : index
    %c0_146 = arith.constant 0 : index
    %470 = vector.load %arg22[%c0_145, %c0_146] : memref<1x192xf32, #tpu.memory_space<vmem>>, vector<1x192xf32>
    %c0_147 = arith.constant 0 : index
    %c0_148 = arith.constant 0 : index
    %471 = vector.load %arg23[%c0_147, %c0_148] : memref<1x192xf32, #tpu.memory_space<vmem>>, vector<1x192xf32>
    %cst_149 = arith.constant dense<0.000000e+00> : vector<16xf32>
    %472 = vector.multi_reduction <add>, %469, %cst_149 [1] : vector<16x192xf32> to vector<16xf32>
    %473 = vector.shape_cast %472 : vector<16xf32> to vector<16x1xf32>
    %cst_150 = arith.constant 1.920000e+02 : f32
    %474 = vector.broadcast %cst_150 : f32 to vector<16x1xf32>
    %475 = arith.divf %473, %474 : vector<16x1xf32>
    %476 = vector.broadcast %475 : vector<16x1xf32> to vector<16x192xf32>
    %477 = arith.subf %469, %476 : vector<16x192xf32>
    %478 = arith.mulf %477, %477 : vector<16x192xf32>
    %cst_151 = arith.constant dense<0.000000e+00> : vector<16xf32>
    %479 = vector.multi_reduction <add>, %478, %cst_151 [1] : vector<16x192xf32> to vector<16xf32>
    %480 = vector.shape_cast %479 : vector<16xf32> to vector<16x1xf32>
    %cst_152 = arith.constant 1.920000e+02 : f32
    %481 = vector.broadcast %cst_152 : f32 to vector<16x1xf32>
    %482 = arith.divf %480, %481 : vector<16x1xf32>
    %cst_153 = arith.constant 9.99999974E-6 : f32
    %483 = vector.broadcast %cst_153 : f32 to vector<16x1xf32>
    %484 = arith.addf %482, %483 : vector<16x1xf32>
    %485 = math.rsqrt %484 : vector<16x1xf32>
    %486 = vector.broadcast %485 : vector<16x1xf32> to vector<16x192xf32>
    %487 = arith.mulf %477, %486 : vector<16x192xf32>
    %488 = vector.broadcast %470 : vector<1x192xf32> to vector<16x192xf32>
    %489 = arith.mulf %487, %488 : vector<16x192xf32>
    %490 = vector.broadcast %471 : vector<1x192xf32> to vector<16x192xf32>
    %491 = arith.addf %489, %490 : vector<16x192xf32>
    %c0_154 = arith.constant 0 : index
    %c0_155 = arith.constant 0 : index
    %492 = vector.load %arg18[%c0_154, %c0_155] : memref<192x768xf32, #tpu.memory_space<vmem>>, vector<192x768xf32>
    %cst_156 = arith.constant dense<0.000000e+00> : vector<16x768xf32>
    %493 = tpu.matmul %491, %492, %cst_156 {dimension_numbers = #tpu.dot_dimension_numbers<[1], [0], [0], [1], [0, 0, 1, 1], [], []>} : vector<16x192xf32>, vector<192x768xf32>, vector<16x768xf32> -> vector<16x768xf32>
    %c0_157 = arith.constant 0 : index
    %c0_158 = arith.constant 0 : index
    %494 = vector.load %arg19[%c0_157, %c0_158] : memref<1x768xf32, #tpu.memory_space<vmem>>, vector<1x768xf32>
    %495 = vector.broadcast %494 : vector<1x768xf32> to vector<16x768xf32>
    %496 = arith.addf %493, %495 : vector<16x768xf32>
    %cst_159 = arith.constant 0.000000e+00 : f32
    %497 = vector.broadcast %cst_159 : f32 to vector<16x768xf32>
    %498 = arith.maximumf %496, %497 : vector<16x768xf32>
    %c0_160 = arith.constant 0 : index
    %c0_161 = arith.constant 0 : index
    %499 = vector.load %arg20[%c0_160, %c0_161] : memref<768x192xf32, #tpu.memory_space<vmem>>, vector<768x192xf32>
    %cst_162 = arith.constant dense<0.000000e+00> : vector<16x192xf32>
    %500 = tpu.matmul %498, %499, %cst_162 {dimension_numbers = #tpu.dot_dimension_numbers<[1], [0], [0], [1], [0, 0, 1, 1], [], []>} : vector<16x768xf32>, vector<768x192xf32>, vector<16x192xf32> -> vector<16x192xf32>
    %c0_163 = arith.constant 0 : index
    %c0_164 = arith.constant 0 : index
    %501 = vector.load %arg21[%c0_163, %c0_164] : memref<1x192xf32, #tpu.memory_space<vmem>>, vector<1x192xf32>
    %502 = vector.broadcast %501 : vector<1x192xf32> to vector<16x192xf32>
    %503 = arith.addf %500, %502 : vector<16x192xf32>
    %504 = arith.addf %491, %503 : vector<16x192xf32>
    %c0_165 = arith.constant 0 : index
    %c0_166 = arith.constant 0 : index
    %505 = vector.load %arg24[%c0_165, %c0_166] : memref<1x192xf32, #tpu.memory_space<vmem>>, vector<1x192xf32>
    %c0_167 = arith.constant 0 : index
    %c0_168 = arith.constant 0 : index
    %506 = vector.load %arg25[%c0_167, %c0_168] : memref<1x192xf32, #tpu.memory_space<vmem>>, vector<1x192xf32>
    %cst_169 = arith.constant dense<0.000000e+00> : vector<16xf32>
    %507 = vector.multi_reduction <add>, %504, %cst_169 [1] : vector<16x192xf32> to vector<16xf32>
    %508 = vector.shape_cast %507 : vector<16xf32> to vector<16x1xf32>
    %cst_170 = arith.constant 1.920000e+02 : f32
    %509 = vector.broadcast %cst_170 : f32 to vector<16x1xf32>
    %510 = arith.divf %508, %509 : vector<16x1xf32>
    %511 = vector.broadcast %510 : vector<16x1xf32> to vector<16x192xf32>
    %512 = arith.subf %504, %511 : vector<16x192xf32>
    %513 = arith.mulf %512, %512 : vector<16x192xf32>
    %cst_171 = arith.constant dense<0.000000e+00> : vector<16xf32>
    %514 = vector.multi_reduction <add>, %513, %cst_171 [1] : vector<16x192xf32> to vector<16xf32>
    %515 = vector.shape_cast %514 : vector<16xf32> to vector<16x1xf32>
    %cst_172 = arith.constant 1.920000e+02 : f32
    %516 = vector.broadcast %cst_172 : f32 to vector<16x1xf32>
    %517 = arith.divf %515, %516 : vector<16x1xf32>
    %cst_173 = arith.constant 9.99999974E-6 : f32
    %518 = vector.broadcast %cst_173 : f32 to vector<16x1xf32>
    %519 = arith.addf %517, %518 : vector<16x1xf32>
    %520 = math.rsqrt %519 : vector<16x1xf32>
    %521 = vector.broadcast %520 : vector<16x1xf32> to vector<16x192xf32>
    %522 = arith.mulf %512, %521 : vector<16x192xf32>
    %523 = vector.broadcast %505 : vector<1x192xf32> to vector<16x192xf32>
    %524 = arith.mulf %522, %523 : vector<16x192xf32>
    %525 = vector.broadcast %506 : vector<1x192xf32> to vector<16x192xf32>
    %526 = arith.addf %524, %525 : vector<16x192xf32>
    %c0_174 = arith.constant 0 : index
    %c0_175 = arith.constant 0 : index
    %527 = vector.load %arg26[%c0_174, %c0_175] : memref<192x256xf32, #tpu.memory_space<vmem>>, vector<192x256xf32>
    %cst_176 = arith.constant dense<0.000000e+00> : vector<16x256xf32>
    %528 = tpu.matmul %526, %527, %cst_176 {dimension_numbers = #tpu.dot_dimension_numbers<[1], [0], [0], [1], [0, 0, 1, 1], [], []>} : vector<16x192xf32>, vector<192x256xf32>, vector<16x256xf32> -> vector<16x256xf32>
    %c0_177 = arith.constant 0 : index
    %c0_178 = arith.constant 0 : index
    %529 = vector.load %arg27[%c0_177, %c0_178] : memref<1x256xf32, #tpu.memory_space<vmem>>, vector<1x256xf32>
    %530 = vector.broadcast %529 : vector<1x256xf32> to vector<16x256xf32>
    %531 = arith.addf %528, %530 : vector<16x256xf32>
    %c0_179 = arith.constant 0 : index
    %c0_180 = arith.constant 0 : index
    %532 = vector.load %arg28[%c0_179, %c0_180] : memref<16x256xf32, #tpu.memory_space<vmem>>, vector<16x256xf32>
    tpu.vector_store %arg28[%c0_179, %c0_180], %531 {strides = array<i32>} : memref<16x256xf32, #tpu.memory_space<vmem>>, vector<16x256xf32>,
    return
  }
  func.func @transform_0(%arg0: i32) -> (i32, i32) {
    %c0_i32 = arith.constant 0 : i32
    %c0_i32_0 = arith.constant 0 : i32
    %c0_i32_1 = arith.constant 0 : i32
    return %c0_i32, %c0_i32_0 : i32, i32
  }
  func.func @transform_1(%arg0: i32) -> (i32, i32) {
    %c0_i32 = arith.constant 0 : i32
    %c0_i32_0 = arith.constant 0 : i32
    %c0_i32_1 = arith.constant 0 : i32
    return %c0_i32, %c0_i32_0 : i32, i32
  }
  func.func @transform_2(%arg0: i32) -> (i32, i32) {
    %c0_i32 = arith.constant 0 : i32
    %c0_i32_0 = arith.constant 0 : i32
    %c0_i32_1 = arith.constant 0 : i32
    return %c0_i32, %c0_i32_0 : i32, i32
  }
  func.func @transform_3(%arg0: i32) -> (i32, i32) {
    %c0_i32 = arith.constant 0 : i32
    %c0_i32_0 = arith.constant 0 : i32
    %c0_i32_1 = arith.constant 0 : i32
    return %c0_i32, %c0_i32_0 : i32, i32
  }
  func.func @transform_4(%arg0: i32) -> (i32, i32) {
    %c0_i32 = arith.constant 0 : i32
    %c0_i32_0 = arith.constant 0 : i32
    %c0_i32_1 = arith.constant 0 : i32
    return %c0_i32, %c0_i32_0 : i32, i32
  }
  func.func @transform_5(%arg0: i32) -> (i32, i32) {
    %c0_i32 = arith.constant 0 : i32
    %c0_i32_0 = arith.constant 0 : i32
    %c0_i32_1 = arith.constant 0 : i32
    return %c0_i32, %c0_i32_0 : i32, i32
  }
  func.func @transform_6(%arg0: i32) -> (i32, i32) {
    %c0_i32 = arith.constant 0 : i32
    %c0_i32_0 = arith.constant 0 : i32
    %c0_i32_1 = arith.constant 0 : i32
    return %c0_i32, %c0_i32_0 : i32, i32
  }
  func.func @transform_7(%arg0: i32) -> (i32, i32) {
    %c0_i32 = arith.constant 0 : i32
    %c0_i32_0 = arith.constant 0 : i32
    %c0_i32_1 = arith.constant 0 : i32
    return %c0_i32, %c0_i32_0 : i32, i32
  }
  func.func @transform_8(%arg0: i32) -> (i32, i32) {
    %c0_i32 = arith.constant 0 : i32
    %c0_i32_0 = arith.constant 0 : i32
    %c0_i32_1 = arith.constant 0 : i32
    return %c0_i32, %c0_i32_0 : i32, i32
  }
  func.func @transform_9(%arg0: i32) -> (i32, i32) {
    %c0_i32 = arith.constant 0 : i32
    %c0_i32_0 = arith.constant 0 : i32
    %c0_i32_1 = arith.constant 0 : i32
    return %c0_i32, %c0_i32_0 : i32, i32
  }
  func.func @transform_10(%arg0: i32) -> (i32, i32) {
    %c0_i32 = arith.constant 0 : i32
    %c0_i32_0 = arith.constant 0 : i32
    %c0_i32_1 = arith.constant 0 : i32
    return %c0_i32, %c0_i32_0 : i32, i32
  }
  func.func @transform_11(%arg0: i32) -> (i32, i32) {
    %c0_i32 = arith.constant 0 : i32
    %c0_i32_0 = arith.constant 0 : i32
    %c0_i32_1 = arith.constant 0 : i32
    return %c0_i32, %c0_i32_0 : i32, i32
  }
  func.func @transform_12(%arg0: i32) -> (i32, i32) {
    %c0_i32 = arith.constant 0 : i32
    %c0_i32_0 = arith.constant 0 : i32
    %c0_i32_1 = arith.constant 0 : i32
    return %c0_i32, %c0_i32_0 : i32, i32
  }
  func.func @transform_13(%arg0: i32) -> (i32, i32) {
    %c0_i32 = arith.constant 0 : i32
    %c0_i32_0 = arith.constant 0 : i32
    %c0_i32_1 = arith.constant 0 : i32
    return %c0_i32, %c0_i32_0 : i32, i32
  }
  func.func @transform_14(%arg0: i32) -> (i32, i32) {
    %c0_i32 = arith.constant 0 : i32
    %c0_i32_0 = arith.constant 0 : i32
    %c0_i32_1 = arith.constant 0 : i32
    return %c0_i32, %c0_i32_0 : i32, i32
  }
  func.func @transform_15(%arg0: i32) -> (i32, i32) {
    %c0_i32 = arith.constant 0 : i32
    %c0_i32_0 = arith.constant 0 : i32
    %c0_i32_1 = arith.constant 0 : i32
    return %c0_i32, %c0_i32_0 : i32, i32
  }
  func.func @transform_16(%arg0: i32) -> (i32, i32) {
    %c0_i32 = arith.constant 0 : i32
    %c0_i32_0 = arith.constant 0 : i32
    %c0_i32_1 = arith.constant 0 : i32
    return %c0_i32, %c0_i32_0 : i32, i32
  }
  func.func @transform_17(%arg0: i32) -> (i32, i32) {
    %c0_i32 = arith.constant 0 : i32
    %c0_i32_0 = arith.constant 0 : i32
    %c0_i32_1 = arith.constant 0 : i32
    return %c0_i32, %c0_i32_0 : i32, i32
  }
  func.func @transform_18(%arg0: i32) -> (i32, i32) {
    %c0_i32 = arith.constant 0 : i32
    %c0_i32_0 = arith.constant 0 : i32
    %c0_i32_1 = arith.constant 0 : i32
    return %c0_i32, %c0_i32_0 : i32, i32
  }
  func.func @transform_19(%arg0: i32) -> (i32, i32) {
    %c0_i32 = arith.constant 0 : i32
    %c0_i32_0 = arith.constant 0 : i32
    %c0_i32_1 = arith.constant 0 : i32
    return %c0_i32, %c0_i32_0 : i32, i32
  }
  func.func @transform_20(%arg0: i32) -> (i32, i32) {
    %c0_i32 = arith.constant 0 : i32
    %c0_i32_0 = arith.constant 0 : i32
    %c0_i32_1 = arith.constant 0 : i32
    return %c0_i32, %c0_i32_0 : i32, i32
  }
  func.func @transform_21(%arg0: i32) -> (i32, i32) {
    %c0_i32 = arith.constant 0 : i32
    %c0_i32_0 = arith.constant 0 : i32
    %c0_i32_1 = arith.constant 0 : i32
    return %c0_i32, %c0_i32_0 : i32, i32
  }
  func.func @transform_22(%arg0: i32) -> (i32, i32) {
    %c0_i32 = arith.constant 0 : i32
    %c0_i32_0 = arith.constant 0 : i32
    %c0_i32_1 = arith.constant 0 : i32
    return %c0_i32, %c0_i32_0 : i32, i32
  }
  func.func @transform_23(%arg0: i32) -> (i32, i32) {
    %c0_i32 = arith.constant 0 : i32
    %c0_i32_0 = arith.constant 0 : i32
    %c0_i32_1 = arith.constant 0 : i32
    return %c0_i32, %c0_i32_0 : i32, i32
  }
  func.func @transform_24(%arg0: i32) -> (i32, i32) {
    %c0_i32 = arith.constant 0 : i32
    %c0_i32_0 = arith.constant 0 : i32
    %c0_i32_1 = arith.constant 0 : i32
    return %c0_i32, %c0_i32_0 : i32, i32
  }
  func.func @transform_25(%arg0: i32) -> (i32, i32) {
    %c0_i32 = arith.constant 0 : i32
    %c0_i32_0 = arith.constant 0 : i32
    %c0_i32_1 = arith.constant 0 : i32
    return %c0_i32, %c0_i32_0 : i32, i32
  }
  func.func @transform_26(%arg0: i32) -> (i32, i32) {
    %c0_i32 = arith.constant 0 : i32
    %c0_i32_0 = arith.constant 0 : i32
    %c0_i32_1 = arith.constant 0 : i32
    return %c0_i32, %c0_i32_0 : i32, i32
  }
  func.func @transform_27(%arg0: i32) -> (i32, i32) {
    %c0_i32 = arith.constant 0 : i32
    %c0_i32_0 = arith.constant 0 : i32
    %c0_i32_1 = arith.constant 0 : i32
    return %c0_i32, %c0_i32_0 : i32, i32
  }
}

</mosaic_0001>

<bundles_post_ra>
// kernel: tpu_custom_call.1
= control target key start
LH: loop header
LB: loop body
LE: loop exit
PB: predicated region body
PF: predicated region fallthrough
CT: control target
= control target key end

     0   :  { %s12702_s0 = inlined_call_operand.hbm [shape: f32[16,192], index: 0, kind: input, shape index: {}]   ;;  %s12703_s1 = inlined_call_operand.vmem [shape: f32[192,576], index: 1, kind: input, shape index: {}]   ;;  %s12704_s2 = inlined_call_operand.hbm [shape: f32[1,576], index: 2, kind: input, shape index: {}]   ;;  %s12705_s3 = inlined_call_operand.hbm [shape: f32[192,192], index: 3, kind: input, shape index: {}]   ;;  %s12706_s4 = inlined_call_operand.hbm [shape: f32[1,192], index: 4, kind: input, shape index: {}]   ;;  %s12707_s5 = inlined_call_operand.vmem [shape: f32[192,768], index: 5, kind: input, shape index: {}]   ;;  %s12708_s6 = inlined_call_operand.hbm [shape: f32[1,768], index: 6, kind: input, shape index: {}]   ;;  %s12709_s7 = inlined_call_operand.vmem [shape: f32[768,192], index: 7, kind: input, shape index: {}]   ;;  %s12710_s8 = inlined_call_operand.hbm [shape: f32[1,192], index: 8, kind: input, shape index: {}]   ;;  %s12711_s9 = inlined_call_operand.hbm [shape: f32[1,192], index: 9, kind: input, shape index: {}]   ;;  %s12712_s10 = inlined_call_operand.hbm [shape: f32[1,192], index: 10, kind: input, shape index: {}]   ;;  %s12713_s11 = inlined_call_operand.hbm [shape: f32[1,192], index: 11, kind: input, shape index: {}]   ;;  %s12714_s12 = inlined_call_operand.hbm [shape: f32[1,192], index: 12, kind: input, shape index: {}]   ;;  %s12715_s13 = inlined_call_operand.vmem [shape: f32[192,576], index: 13, kind: input, shape index: {}]   ;;  %s12716_s14 = inlined_call_operand.hbm [shape: f32[1,576], index: 14, kind: input, shape index: {}]   ;;  %s12717_s15 = inlined_call_operand.hbm [shape: f32[192,192], index: 15, kind: input, shape index: {}]   ;;  %s12718_s16 = inlined_call_operand.hbm [shape: f32[1,192], index: 16, kind: input, shape index: {}]   ;;  %s12719_s17 = inlined_call_operand.vmem [shape: f32[192,768], index: 17, kind: input, shape index: {}]   ;;  %s12720_s18 = inlined_call_operand.hbm [shape: f32[1,768], index: 18, kind: input, shape index: {}]   ;;  %s12721_s19 = inlined_call_operand.vmem [shape: f32[768,192], index: 19, kind: input, shape index: {}]   ;;  %s12722_s20 = inlined_call_operand.hbm [shape: f32[1,192], index: 20, kind: input, shape index: {}]   ;;  %s12723_s21 = inlined_call_operand.hbm [shape: f32[1,192], index: 21, kind: input, shape index: {}]   ;;  %s12724_s22 = inlined_call_operand.hbm [shape: f32[1,192], index: 22, kind: input, shape index: {}]   ;;  %s12725_s23 = inlined_call_operand.hbm [shape: f32[1,192], index: 23, kind: input, shape index: {}]   ;;  %s12726_s24 = inlined_call_operand.hbm [shape: f32[1,192], index: 24, kind: input, shape index: {}]   ;;  %s12727_s25 = inlined_call_operand.hbm [shape: f32[192,256], index: 25, kind: input, shape index: {}]   ;;  %s12728_s26 = inlined_call_operand.hbm [shape: f32[1,256], index: 26, kind: input, shape index: {}]   ;;  %s12729_s27 = inlined_call_operand.hbm [shape: f32[16,256], index: 27, kind: output, shape index: {}]  }
   0x1   :  { %12733 = sst [smem:[#allocation48_spill]] %s12702_s0 }
   0x2   :  { %12734 = sst [smem:[#allocation49_spill]] %s12703_s1 }
   0x3   :  { %12735 = sst [smem:[#allocation50_spill]] %s12704_s2 }
   0x4   :  { %12736 = sst [smem:[#allocation51_spill]] %s12705_s3 }
   0x5   :  { %12737 = sst [smem:[#allocation52_spill]] %s12706_s4 }
   0x6   :  { %12738 = sst [smem:[#allocation53_spill]] %s12707_s5 }
   0x7   :  { %12739 = sst [smem:[#allocation54_spill]] %s12708_s6 }
   0x8   :  { %12740 = sst [smem:[#allocation55_spill]] %s12709_s7 }
   0x9   :  { %12741 = sst [smem:[#allocation56_spill]] %s12710_s8 }
   0xa   :  { %12742 = sst [smem:[#allocation57_spill]] %s12711_s9 }
   0xb   :  { %12743 = sst [smem:[#allocation58_spill]] %s12712_s10 }
   0xc   :  { %12744 = sst [smem:[#allocation59_spill]] %s12713_s11 }
   0xd   :  { %32 = vsyncpa [#allocation3], 0 }
   0xe   :  { %33 = vsyncpa [#allocation6], 0 }
   0xf   :  { %34 = vsyncpa [#allocation9], 0 }
  0x10   :  { %35 = vsyncpa [#allocation12], 0 }
  0x11   :  { %36 = vsyncpa [#allocation15], 0 }
  0x12   :  { %37 = vsyncpa [#allocation18], 0 }
  0x13   :  { %38 = vsyncpa [#allocation21], 0 }
  0x14   :  { %39 = vsyncpa [#allocation24], 0 }
  0x15   :  { %40 = vsyncpa [#allocation27], 0 }
  0x16   :  { %41 = vsyncpa [#allocation30], 0 }
  0x17   :  { %42 = vsyncpa [#allocation33], 0 }
  0x18   :  { %43 = vsyncpa [#allocation4], 0  ;;  %s8637_s7 = smov [#allocation5]   ;;  %s8638_s8 = smov [#allocation8]  }
  0x19   :  { %s64_s4 = sshll.u32 %s8637_s7, 4  ;;  %s86_s30 = sshll.u32 %s8638_s8, 4  ;;  %s65_s4 = int_to_ptr.vmem [resolvable:$true] %s64_s4  ;;  %s87_s30 = int_to_ptr.vmem [resolvable:$true] %s86_s30 }
  0x1a   :  { %s8181_s9 = scalar_lea.vmem %s65_s4, 80  ;;  %s8185_s5 = scalar_lea.vmem %s65_s4, 96 }
  0x1b   :  { %p8182_p0 = scmp.ne.s32.totalorder %s65_s4, %s8181_s9  ;;  %p8186_p1 = scmp.lt.s32.totalorder %s65_s4, %s65_s4 }
  0x1c   :  { %p8187_p2 = scmp.lt.s32.totalorder %s8185_s5, %s8181_s9 }
  0x1e   :  { %p8188_p3 = por %p8187_p2, %p8186_p1 }
  0x20   :  { %p8189_p4 = pnand %p8188_p3, %p8182_p0 }
  0x22   :  { %8192 = shalt.err (!%p8189_p4)
}
  0x23   :  { %s12745_s10 = sld [smem:[#allocation50_spill]]  ;;  %s8201_s29 = scalar_lea.vmem %s87_s30, 32 }
  0x24   :  { %p8202_p5 = scmp.ne.s32.totalorder %s87_s30, %s8201_s29  ;;  %p8206_p6 = scmp.lt.s32.totalorder %s87_s30, %s87_s30 }
  0x25   :  { %p8207_p7 = scmp.lt.s32.totalorder %s8201_s29, %s8201_s29 }
  0x27   :  { %p8208_p8 = por %p8207_p7, %p8206_p6 }
  0x29   :  { %67 = dma.hbm_to_vmem [thread:$0]  %s12745_s10, 80, %s65_s4, [#allocation6]  }
  0x2a   :  { %p8209_p9 = pnand %p8208_p8, %p8202_p5 }
  0x2c   :  { %8212 = shalt.err (!%p8209_p9)
}
  0x2d   :  { %s12746_s11 = sld [smem:[#allocation52_spill]]  ;;  %s8639_s2 = smov [#allocation11]  }
  0x2e   :  { %s110_s3 = sshll.u32 %s8639_s2, 4  ;;  %s8640_s7 = smov [#allocation14]   ;;  %s111_s3 = int_to_ptr.vmem [resolvable:$true] %s110_s3 }
  0x2f   :  { %s130_s8 = sshll.u32 %s8640_s7, 4  ;;  %s8221_s9 = scalar_lea.vmem %s111_s3, 32  ;;  %s131_s8 = int_to_ptr.vmem [resolvable:$true] %s130_s8 }
  0x30   :  { %p8222_p10 = scmp.ne.s32.totalorder %s111_s3, %s8221_s9  ;;  %p8226_p11 = scmp.lt.s32.totalorder %s111_s3, %s111_s3 }
  0x31   :  { %p8227_p12 = scmp.lt.s32.totalorder %s8221_s9, %s8221_s9 }
  0x33   :  { %89 = dma.hbm_to_vmem [thread:$0]  %s12746_s11, 32, %s87_s30, [#allocation9]  }
  0x34   :  { %p8228_p13 = por %p8227_p12, %p8226_p11 }
  0x36   :  { %p8229_p0 = pnand %p8228_p13, %p8222_p10 }
  0x38   :  { %8232 = shalt.err (!%p8229_p0)
}
  0x39   :  { %s12747_s28 = sld [smem:[#allocation56_spill]]  ;;  %s8241_s0 = scalar_lea.vmem %s131_s8, 32 }
  0x3a   :  { %p8242_p1 = scmp.ne.s32.totalorder %s131_s8, %s8241_s0  ;;  %p8246_p2 = scmp.lt.s32.totalorder %s131_s8, %s131_s8 }
  0x3b   :  { %p8247_p3 = scmp.lt.s32.totalorder %s8241_s0, %s8241_s0 }
  0x3d   :  { %p8248_p4 = por %p8247_p3, %p8246_p2 }
  0x3f   :  { %113 = dma.hbm_to_vmem [thread:$0]  %s12747_s28, 32, %s111_s3, [#allocation12]  }
  0x40   :  { %p8249_p5 = pnand %p8248_p4, %p8242_p1 }
  0x42   :  { %8252 = shalt.err (!%p8249_p5)
}
  0x43   :  { %s12748_s29 = sld [smem:[#allocation58_spill]]  ;;  %s8641_s1 = smov [#allocation17]  }
  0x44   :  { %s150_s6 = sshll.u32 %s8641_s1, 4  ;;  %s151_s6 = int_to_ptr.vmem [resolvable:$true] %s150_s6 }
  0x45   :  { %s8261_s11 = scalar_lea.vmem %s151_s6, 32  ;;  %p8266_p7 = scmp.lt.s32.totalorder %s151_s6, %s151_s6 }
  0x46   :  { %p8262_p6 = scmp.ne.s32.totalorder %s151_s6, %s8261_s11  ;;  %p8267_p8 = scmp.lt.s32.totalorder %s8261_s11, %s8261_s11 }
  0x48   :  { %p8268_p9 = por %p8267_p8, %p8266_p7 }
  0x49   :  { %133 = dma.hbm_to_vmem [thread:$0]  %s12748_s29, 32, %s131_s8, [#allocation15]  }
  0x4a   :  { %p8269_p10 = pnand %p8268_p9, %p8262_p6 }
  0x4c   :  { %8272 = shalt.err (!%p8269_p10)
}
  0x4d   :  { %153 = dma.hbm_to_vmem [thread:$0]  %s12714_s12, 32, %s151_s6, [#allocation18]  }
  0x4e   :  { %s8642_s7 = smov [#allocation20]   ;;  %s8643_s4 = smov [#allocation23]  }
  0x4f   :  { %s171_s9 = sshll.u32 %s8642_s7, 4  ;;  %s196_s5 = sshll.u32 %s8643_s4, 4  ;;  %s172_s9 = int_to_ptr.vmem [resolvable:$true] %s171_s9  ;;  %s197_s5 = int_to_ptr.vmem [resolvable:$true] %s196_s5 }
  0x50   :  { %s8281_s8 = scalar_lea.vmem %s172_s9, 6144  ;;  %p8286_p12 = scmp.lt.s32.totalorder %s172_s9, %s172_s9 }
  0x51   :  { %p8282_p11 = scmp.ne.s32.totalorder %s172_s9, %s8281_s8  ;;  %p8287_p13 = scmp.lt.s32.totalorder %s8281_s8, %s8281_s8 }
  0x53   :  { %p8288_p0 = por %p8287_p13, %p8286_p12 }
  0x55   :  { %p8289_p1 = pnand %p8288_p0, %p8282_p11 }
  0x57   :  { %8292 = shalt.err (!%p8289_p1)
}
  0x58   :  { %s8644_s28 = smov 256   ;;  %s8645_s0 = smov 16  }
  0x59   :  { %177 = dma.hbm_to_vmem [thread:$0]  %s12717_s15, 6144, %s172_s9, [#allocation21], %s8644_s28, %s8644_s28, %s8645_s0  }
  0x5a   :  { %s8301_s12 = scalar_lea.vmem %s197_s5, 96  ;;  %p8306_p3 = scmp.lt.s32.totalorder %s197_s5, %s197_s5 }
  0x5b   :  { %p8302_p2 = scmp.ne.s32.totalorder %s197_s5, %s8301_s12  ;;  %p8307_p4 = scmp.lt.s32.totalorder %s8301_s12, %s8301_s12 }
  0x5d   :  { %p8308_p5 = por %p8307_p4, %p8306_p3 }
  0x5f   :  { %p8309_p6 = pnand %p8308_p5, %p8302_p2 }
  0x61   :  { %8312 = shalt.err (!%p8309_p6)
}
  0x62   :  { %199 = dma.hbm_to_vmem [thread:$0]  %s12720_s18, 96, %s197_s5, [#allocation24]  }
  0x63   :  { %s8646_s6 = smov [#allocation26]   ;;  %s8647_s2 = smov [#allocation29]  }
  0x64   :  { %s218_s11 = sshll.u32 %s8646_s6, 4  ;;  %s238_s3 = sshll.u32 %s8647_s2, 4  ;;  %s219_s11 = int_to_ptr.vmem [resolvable:$true] %s218_s11  ;;  %s239_s3 = int_to_ptr.vmem [resolvable:$true] %s238_s3 }
  0x65   :  { %s8321_s7 = scalar_lea.vmem %s219_s11, 32  ;;  %p8326_p8 = scmp.lt.s32.totalorder %s219_s11, %s219_s11 }
  0x66   :  { %p8322_p7 = scmp.ne.s32.totalorder %s219_s11, %s8321_s7  ;;  %p8327_p9 = scmp.lt.s32.totalorder %s8321_s7, %s8321_s7 }
  0x68   :  { %p8328_p10 = por %p8327_p9, %p8326_p8 }
  0x6a   :  { %p8329_p11 = pnand %p8328_p10, %p8322_p7 }
  0x6c   :  { %8332 = shalt.err (!%p8329_p11)
}
  0x6d   :  { %221 = dma.hbm_to_vmem [thread:$0]  %s12723_s21, 32, %s219_s11, [#allocation27]  }
  0x6e   :  { %s8341_s4 = scalar_lea.vmem %s239_s3, 32  ;;  %p8346_p13 = scmp.lt.s32.totalorder %s239_s3, %s239_s3 }
  0x6f   :  { %p8342_p12 = scmp.ne.s32.totalorder %s239_s3, %s8341_s4  ;;  %p8347_p0 = scmp.lt.s32.totalorder %s8341_s4, %s8341_s4 }
  0x71   :  { %p8348_p1 = por %p8347_p0, %p8346_p13 }
  0x73   :  { %p8349_p2 = pnand %p8348_p1, %p8342_p12 }
  0x75   :  { %8352 = shalt.err (!%p8349_p2)
}
  0x76   :  { %241 = dma.hbm_to_vmem [thread:$0]  %s12725_s23, 32, %s239_s3, [#allocation30]  }
  0x77   :  { %s8648_s8 = smov [#allocation32]   ;;  %s8649_s10 = smov [#allocation2]  }
  0x78   :  { %s257_s30 = sshll.u32 %s8648_s8, 4  ;;  %s49_s12 = sshll.u32 %s8649_s10, 4  ;;  %s258_s30 = int_to_ptr.vmem [resolvable:$true] %s257_s30  ;;  %s50_s12 = int_to_ptr.vmem [resolvable:$true] %s49_s12 }
  0x79   :  { %s8361_s29 = scalar_lea.vmem %s258_s30, 6144  ;;  %p8366_p4 = scmp.lt.s32.totalorder %s258_s30, %s258_s30 }
  0x7a   :  { %p8362_p3 = scmp.ne.s32.totalorder %s258_s30, %s8361_s29  ;;  %p8367_p5 = scmp.lt.s32.totalorder %s8361_s29, %s8361_s29 }
  0x7c   :  { %p8368_p6 = por %p8367_p5, %p8366_p4 }
  0x7e   :  { %p8369_p7 = pnand %p8368_p6, %p8362_p3 }
  0x80   :  { %8372 = shalt.err (!%p8369_p7)
}
  0x81   :  { %263 = dma.hbm_to_vmem [thread:$0]  %s12727_s25, 6144, %s258_s30, [#allocation33], %s8644_s28, %s8644_s28, %s8645_s0  }
  0x82   :  { %s8381_s23 = scalar_lea.vmem %s50_s12, 512  ;;  %p8386_p9 = scmp.lt.s32.totalorder %s50_s12, %s50_s12 }
  0x83   :  { %p8382_p8 = scmp.ne.s32.totalorder %s50_s12, %s8381_s23  ;;  %p8387_p10 = scmp.lt.s32.totalorder %s8381_s23, %s8381_s23 }
  0x85   :  { %p8388_p11 = por %p8387_p10, %p8386_p9 }
  0x87   :  { %p8389_p12 = pnand %p8388_p11, %p8382_p8 }
  0x89   :  { %8392 = shalt.err (!%p8389_p12)
}
  0x8a   :  { %s12749_s2 = sld [smem:[#allocation48_spill]]  ;;  %s8650_s3 = smov [#allocation7]  }
  0x8b   :  { %s73_s7 = sshll.u32 %s8650_s3, 4  ;;  %s8651_s15 = smov [#allocation10]   ;;  %s74_s7 = int_to_ptr.vmem [resolvable:$true] %s73_s7 }
  0x8c   :  { %s98_s25 = sshll.u32 %s8651_s15, 4  ;;  %s8401_s9 = scalar_lea.vmem %s74_s7, 6144  ;;  %s99_s25 = int_to_ptr.vmem [resolvable:$true] %s98_s25 }
  0x8d   :  { %p8402_p13 = scmp.ne.s32.totalorder %s74_s7, %s8401_s9  ;;  %p8406_p0 = scmp.lt.s32.totalorder %s74_s7, %s74_s7 }
  0x8e   :  { %p8407_p1 = scmp.lt.s32.totalorder %s8401_s9, %s8401_s9 }
  0x90   :  { %55 = dma.hbm_to_vmem [thread:$0]  %s12749_s2, 512, %s50_s12, [#allocation3], %s8644_s28, %s8644_s28, %s8645_s0  }
  0x91   :  { %p8408_p2 = por %p8407_p1, %p8406_p0 }
  0x93   :  { %p8409_p3 = pnand %p8408_p2, %p8402_p13 }
  0x95   :  { %8412 = shalt.err (!%p8409_p3)
}
  0x96   :  { %s12750_s5 = sld [smem:[#allocation51_spill]]  ;;  %s8421_s8 = scalar_lea.vmem %s99_s25, 96 }
  0x97   :  { %p8422_p4 = scmp.ne.s32.totalorder %s99_s25, %s8421_s8  ;;  %p8426_p5 = scmp.lt.s32.totalorder %s99_s25, %s99_s25 }
  0x98   :  { %p8427_p6 = scmp.lt.s32.totalorder %s8421_s8, %s8421_s8 }
  0x9a   :  { %p8428_p7 = por %p8427_p6, %p8426_p5 }
  0x9c   :  { %79 = dma.hbm_to_vmem [thread:$0]  %s12750_s5, 6144, %s74_s7, [#allocation6], %s8644_s28, %s8644_s28, %s8645_s0  }
  0x9d   :  { %p8429_p8 = pnand %p8428_p7, %p8422_p4 }
  0x9f   :  { %8432 = shalt.err (!%p8429_p8)
}
  0xa0   :  { %s12751_s12 = sld [smem:[#allocation54_spill]]  ;;  %s8652_s29 = smov [#allocation13]  }
  0xa1   :  { %s120_s21 = sshll.u32 %s8652_s29, 4  ;;  %s8653_s1 = smov [#allocation16]   ;;  %s121_s21 = int_to_ptr.vmem [resolvable:$true] %s120_s21 }
  0xa2   :  { %s140_s23 = sshll.u32 %s8653_s1, 4  ;;  %s8441_s6 = scalar_lea.vmem %s121_s21, 32  ;;  %s141_s23 = int_to_ptr.vmem [resolvable:$true] %s140_s23 }
  0xa3   :  { %p8442_p9 = scmp.ne.s32.totalorder %s121_s21, %s8441_s6  ;;  %p8446_p10 = scmp.lt.s32.totalorder %s121_s21, %s121_s21 }
  0xa4   :  { %p8447_p11 = scmp.lt.s32.totalorder %s8441_s6, %s8441_s6 }
  0xa6   :  { %101 = dma.hbm_to_vmem [thread:$0]  %s12751_s12, 96, %s99_s25, [#allocation9]  }
  0xa7   :  { %p8448_p12 = por %p8447_p11, %p8446_p10 }
  0xa9   :  { %p8449_p13 = pnand %p8448_p12, %p8442_p9 }
  0xab   :  { %8452 = shalt.err (!%p8449_p13)
}
  0xac   :  { %s12752_s3 = sld [smem:[#allocation57_spill]]  ;;  %s8461_s7 = scalar_lea.vmem %s141_s23, 32 }
  0xad   :  { %p8462_p0 = scmp.ne.s32.totalorder %s141_s23, %s8461_s7  ;;  %p8466_p1 = scmp.lt.s32.totalorder %s141_s23, %s141_s23 }
  0xae   :  { %p8467_p2 = scmp.lt.s32.totalorder %s8461_s7, %s8461_s7 }
  0xb0   :  { %p8468_p3 = por %p8467_p2, %p8466_p1 }
  0xb2   :  { %123 = dma.hbm_to_vmem [thread:$0]  %s12752_s3, 32, %s121_s21, [#allocation12]  }
  0xb3   :  { %p8469_p4 = pnand %p8468_p3, %p8462_p0 }
  0xb5   :  { %8472 = shalt.err (!%p8469_p4)
}
  0xb6   :  { %s12753_s9 = sld [smem:[#allocation59_spill]]  ;;  %s8654_s4 = smov [#allocation19]  }
  0xb7   :  { %s162_s18 = sshll.u32 %s8654_s4, 4  ;;  %s8655_s5 = smov [#allocation22]   ;;  %s163_s18 = int_to_ptr.vmem [resolvable:$true] %s162_s18 }
  0xb8   :  { %s184_s8 = sshll.u32 %s8655_s5, 4  ;;  %s8481_s30 = scalar_lea.vmem %s163_s18, 80  ;;  %s185_s8 = int_to_ptr.vmem [resolvable:$true] %s184_s8 }
  0xb9   :  { %p8482_p5 = scmp.ne.s32.totalorder %s163_s18, %s8481_s30  ;;  %s8485_s10 = scalar_lea.vmem %s163_s18, 96 }
  0xba   :  { %p8486_p6 = scmp.lt.s32.totalorder %s163_s18, %s163_s18  ;;  %p8487_p7 = scmp.lt.s32.totalorder %s8485_s10, %s8481_s30 }
  0xbc   :  { %143 = dma.hbm_to_vmem [thread:$0]  %s12753_s9, 32, %s141_s23, [#allocation15]  }
  0xbd   :  { %p8488_p8 = por %p8487_p7, %p8486_p6 }
  0xbf   :  { %p8489_p9 = pnand %p8488_p8, %p8482_p5 }
  0xc1   :  { %8492 = shalt.err (!%p8489_p9)
}
  0xc2   :  { %165 = dma.hbm_to_vmem [thread:$0]  %s12716_s14, 80, %s163_s18, [#allocation18]  }
  0xc3   :  { %s8501_s21 = scalar_lea.vmem %s185_s8, 32  ;;  %p8506_p11 = scmp.lt.s32.totalorder %s185_s8, %s185_s8 }
  0xc4   :  { %p8502_p10 = scmp.ne.s32.totalorder %s185_s8, %s8501_s21  ;;  %p8507_p12 = scmp.lt.s32.totalorder %s8501_s21, %s8501_s21 }
  0xc6   :  { %p8508_p13 = por %p8507_p12, %p8506_p11 }
  0xc8   :  { %p8509_p0 = pnand %p8508_p13, %p8502_p10 }
  0xca   :  { %8512 = shalt.err (!%p8509_p0)
}
  0xcb   :  { %187 = dma.hbm_to_vmem [thread:$0]  %s12718_s16, 32, %s185_s8, [#allocation21]  }
  0xcc   :  { %s8656_s6 = smov [#allocation25]   ;;  %s8657_s2 = smov [#allocation28]  }
  0xcd   :  { %s208_s11 = sshll.u32 %s8656_s6, 4  ;;  %s228_s3 = sshll.u32 %s8657_s2, 4  ;;  %s209_s11 = int_to_ptr.vmem [resolvable:$true] %s208_s11  ;;  %s229_s3 = int_to_ptr.vmem [resolvable:$true] %s228_s3 }
  0xce   :  { %s8521_s7 = scalar_lea.vmem %s209_s11, 32  ;;  %p8526_p2 = scmp.lt.s32.totalorder %s209_s11, %s209_s11 }
  0xcf   :  { %p8522_p1 = scmp.ne.s32.totalorder %s209_s11, %s8521_s7  ;;  %p8527_p3 = scmp.lt.s32.totalorder %s8521_s7, %s8521_s7 }
  0xd1   :  { %p8528_p4 = por %p8527_p3, %p8526_p2 }
  0xd3   :  { %p8529_p5 = pnand %p8528_p4, %p8522_p1 }
  0xd5   :  { %8532 = shalt.err (!%p8529_p5)
}
  0xd6   :  { %211 = dma.hbm_to_vmem [thread:$0]  %s12722_s20, 32, %s209_s11, [#allocation24]  }
  0xd7   :  { %s8541_s25 = scalar_lea.vmem %s229_s3, 32  ;;  %p8546_p7 = scmp.lt.s32.totalorder %s229_s3, %s229_s3 }
  0xd8   :  { %p8542_p6 = scmp.ne.s32.totalorder %s229_s3, %s8541_s25  ;;  %p8547_p8 = scmp.lt.s32.totalorder %s8541_s25, %s8541_s25 }
  0xda   :  { %p8548_p9 = por %p8547_p8, %p8546_p7 }
  0xdc   :  { %p8549_p10 = pnand %p8548_p9, %p8542_p6 }
  0xde   :  { %8552 = shalt.err (!%p8549_p10)
}
  0xdf   :  { %231 = dma.hbm_to_vmem [thread:$0]  %s12724_s22, 32, %s229_s3, [#allocation27]  }
  0xe0   :  { %s8658_s4 = smov [#allocation31]   ;;  %s8659_s5 = smov [#allocation34]  }
  0xe1   :  { %s248_s18 = sshll.u32 %s8658_s4, 4  ;;  %s270_s8 = sshll.u32 %s8659_s5, 4  ;;  %s249_s18 = int_to_ptr.vmem [resolvable:$true] %s248_s18  ;;  %s271_s8 = int_to_ptr.vmem [resolvable:$true] %s270_s8 }
  0xe2   :  { %s8561_s30 = scalar_lea.vmem %s249_s18, 32  ;;  %p8566_p12 = scmp.lt.s32.totalorder %s249_s18, %s249_s18 }
  0xe3   :  { %p8562_p11 = scmp.ne.s32.totalorder %s249_s18, %s8561_s30  ;;  %p8567_p13 = scmp.lt.s32.totalorder %s8561_s30, %s8561_s30 }
  0xe5   :  { %p8568_p0 = por %p8567_p13, %p8566_p12 }
  0xe7   :  { %p8569_p1 = pnand %p8568_p0, %p8562_p11 }
  0xe9   :  { %8572 = shalt.err (!%p8569_p1)
}
  0xea   :  { %251 = dma.hbm_to_vmem [thread:$0]  %s12726_s24, 32, %s249_s18, [#allocation30]  }
  0xeb   :  { %s8581_s12 = scalar_lea.vmem %s271_s8, 32  ;;  %p8586_p3 = scmp.lt.s32.totalorder %s271_s8, %s271_s8 }
  0xec   :  { %p8582_p2 = scmp.ne.s32.totalorder %s271_s8, %s8581_s12  ;;  %p8587_p4 = scmp.lt.s32.totalorder %s8581_s12, %s8581_s12 }
  0xee   :  { %p8588_p5 = por %p8587_p4, %p8586_p3 }
  0xf0   :  { %p8589_p6 = pnand %p8588_p5, %p8582_p2 }
  0xf2   :  { %8592 = shalt.err (!%p8589_p6)
}
  0xf3   :  { %273 = dma.hbm_to_vmem [thread:$0]  %s12728_s26, 32, %s271_s8, [#allocation33]  }
  0xf4   :  { %8613 = dma.done.wait [#allocation3], 512  }
  0xf5   :  { %8614 = vsyncadd [#allocation3], 4294966784 }
  0xf6   :  { %8615 = dma.done.wait [#allocation6], 6224  }
  0xf7   :  { %8616 = vsyncadd [#allocation6], 4294961072 }
  0xf8   :  { %8617 = dma.done.wait [#allocation9], 128  }
  0xf9   :  { %8618 = vsyncadd [#allocation9], 4294967168 }
  0xfa   :  { %8619 = dma.done.wait [#allocation12], 64  }
  0xfb   :  { %8620 = vsyncadd [#allocation12], 4294967232 }
  0xfc   :  { %8621 = dma.done.wait [#allocation15], 64  }
  0xfd   :  { %8622 = vsyncadd [#allocation15], 4294967232 }
  0xfe   :  { %8623 = dma.done.wait [#allocation18], 112  }
  0xff   :  { %8624 = vsyncadd [#allocation18], 4294967184 }
 0x100   :  { %8625 = dma.done.wait [#allocation21], 6176  }
 0x101   :  { %8626 = vsyncadd [#allocation21], 4294961120 }
 0x102   :  { %8627 = dma.done.wait [#allocation24], 128  }
 0x103   :  { %8628 = vsyncadd [#allocation24], 4294967168 }
 0x104   :  { %8629 = dma.done.wait [#allocation27], 64  }
 0x105   :  { %8630 = vsyncadd [#allocation27], 4294967232 }
 0x106   :  { %8631 = dma.done.wait [#allocation30], 64  }
 0x107   :  { %8632 = vsyncadd [#allocation30], 4294967232 }
 0x108   :  { %8633 = dma.done.wait [#allocation33], 6176  }
 0x109   :  { %8634 = vsyncadd [#allocation33], 4294961120  ;;  %s12754_s21 = sld [smem:[#allocation49_spill]]  ;;  %vm488_vm0 = vcmask 523264   ;;  %v8938_v19 = vld [vmem:[#allocation2 + $0x8] sm:$0xff]  ;;  %v9031_v49 = vld [vmem:[#allocation2] sm:$0xff] }
 0x10a   :  { %7590 = vmatprep.mubr.msk.f32.mxu0 %vm488_vm0, %v8938_v19  ;;  %7592 = vmatprep.mubr.msk.f32.mxu1 %vm488_vm0, %v8938_v19  ;;  %v8660_v54 = vmov 0.0   ;;  %vm8661_vm1 = vmmov 0   ;;  %s8662_s16 = smov 32   ;;  %s8663_s9 = smov 64   ;;  %vm727_vm2 = vcmask 261120   ;;  %vm803_vm3 = vcmask 64512  }
 0x10b   :  { %vm1727_vm4 = vcmask 785408   ;;  %s12755_s2 = sld [smem:[#allocation53_spill]] }
 0x10c   :  { %s12756_s15 = sld [smem:[#allocation55_spill]] }
 0x10f   :  { %v417_v0 = vld [vmem:[%s12754_s21 + $0x260] sm:$0xff]  ;;  %v416_v1 = vld [vmem:[%s12754_s21 + $0x258] sm:$0xff]  ;;  %v411_v3 = vld [vmem:[%s12754_s21 + $0x230] sm:$0xff] }
 0x110   :  { %v412_v2 = vld [vmem:[%s12754_s21 + $0x238] sm:$0xff]  ;;  %495 = vmatprep.subr.mxu0 %v417_v0  ;;  %v407_v4 = vld [vmem:[%s12754_s21 + $0x210] sm:$0xff]  ;;  %v406_v5 = vld [vmem:[%s12754_s21 + $0x208] sm:$0xff] }
 0x111   :  { %496 = vmatpush1.msra.mxu0 %v416_v1  ;;  %v402_v6 = vld [vmem:[%s12754_s21 + $0x1e8] sm:$0xff]  ;;  %v401_v7 = vld [vmem:[%s12754_s21 + $0x1e0] sm:$0xff]  ;;  %v396_v9 = vld [vmem:[%s12754_s21 + $0x1b8] sm:$0xff] }
 0x112   :  { %497 = vmatprep.subr.mxu0 %v412_v2  ;;  %v397_v8 = vld [vmem:[%s12754_s21 + $0x1c0] sm:$0xff]  ;;  %v392_v10 = vld [vmem:[%s12754_s21 + $0x198] sm:$0xff]  ;;  %v391_v11 = vld [vmem:[%s12754_s21 + $0x190] sm:$0xff] }
 0x113   :  { %498 = vmatpush1.msra.mxu0 %v411_v3  ;;  %v387_v12 = vld [vmem:[%s12754_s21 + $0x170] sm:$0xff]  ;;  %v386_v13 = vld [vmem:[%s12754_s21 + $0x168] sm:$0xff]  ;;  %v381_v15 = vld [vmem:[%s12754_s21 + $0x140] sm:$0xff] }
 0x114   :  { %499 = vmatprep.subr.mxu0 %v407_v4  ;;  %v382_v14 = vld [vmem:[%s12754_s21 + $0x148] sm:$0xff]  ;;  %v377_v16 = vld [vmem:[%s12754_s21 + $0x120] sm:$0xff]  ;;  %v376_v17 = vld [vmem:[%s12754_s21 + $0x118] sm:$0xff] }
 0x115   :  { %500 = vmatpush1.msra.mxu0 %v406_v5  ;;  %v372_v18 = vld [vmem:[%s12754_s21 + $0xf8] sm:$0xff]  ;;  %v371_v20 = vld [vmem:[%s12754_s21 + $0xf0] sm:$0xff]  ;;  %v366_v22 = vld [vmem:[%s12754_s21 + $0xc8] sm:$0xff] }
 0x116   :  { %501 = vmatprep.subr.mxu0 %v402_v6  ;;  %v367_v21 = vld [vmem:[%s12754_s21 + $0xd0] sm:$0xff]  ;;  %v362_v23 = vld [vmem:[%s12754_s21 + $0xa8] sm:$0xff]  ;;  %v361_v24 = vld [vmem:[%s12754_s21 + $0xa0] sm:$0xff] }
 0x117   :  { %502 = vmatpush1.msra.mxu0 %v401_v7  ;;  %v357_v25 = vld [vmem:[%s12754_s21 + $0x80] sm:$0xff]  ;;  %v356_v26 = vld [vmem:[%s12754_s21 + $0x78] sm:$0xff]  ;;  %v351_v28 = vld [vmem:[%s12754_s21 + $0x50] sm:$0xff] }
 0x118   :  { %503 = vmatprep.subr.mxu0 %v397_v8  ;;  %v352_v27 = vld [vmem:[%s12754_s21 + $0x58] sm:$0xff]  ;;  %v347_v29 = vld [vmem:[%s12754_s21 + $0x30] sm:$0xff]  ;;  %v346_v30 = vld [vmem:[%s12754_s21 + $0x28] sm:$0xff] }
 0x119   :  { %504 = vmatpush1.msra.mxu0 %v396_v9  ;;  %v342_v31 = vld [vmem:[%s12754_s21 + $0x8] sm:$0xff]  ;;  %v341_v32 = vld [vmem:[%s12754_s21] sm:$0xff]  ;;  %v456_v34 = vld [vmem:[%s12754_s21 + $0x398] sm:$0xff] }
 0x11a   :  { %505 = vmatprep.subr.mxu0 %v392_v10  ;;  %v457_v33 = vld [vmem:[%s12754_s21 + $0x3a0] sm:$0xff]  ;;  %v452_v35 = vld [vmem:[%s12754_s21 + $0x378] sm:$0xff]  ;;  %v451_v36 = vld [vmem:[%s12754_s21 + $0x370] sm:$0xff] }
 0x11b   :  { %506 = vmatpush1.msra.mxu0 %v391_v11  ;;  %v447_v37 = vld [vmem:[%s12754_s21 + $0x350] sm:$0xff]  ;;  %v446_v38 = vld [vmem:[%s12754_s21 + $0x348] sm:$0xff]  ;;  %v441_v40 = vld [vmem:[%s12754_s21 + $0x320] sm:$0xff] }
 0x11c   :  { %507 = vmatprep.subr.mxu0 %v387_v12  ;;  %v442_v39 = vld [vmem:[%s12754_s21 + $0x328] sm:$0xff]  ;;  %v437_v41 = vld [vmem:[%s12754_s21 + $0x300] sm:$0xff]  ;;  %v436_v42 = vld [vmem:[%s12754_s21 + $0x2f8] sm:$0xff] }
 0x11d   :  { %508 = vmatpush1.msra.mxu0 %v386_v13  ;;  %v432_v43 = vld [vmem:[%s12754_s21 + $0x2d8] sm:$0xff]  ;;  %v431_v44 = vld [vmem:[%s12754_s21 + $0x2d0] sm:$0xff]  ;;  %v426_v46 = vld [vmem:[%s12754_s21 + $0x2a8] sm:$0xff] }
 0x11e   :  { %509 = vmatprep.subr.mxu0 %v382_v14  ;;  %v427_v45 = vld [vmem:[%s12754_s21 + $0x2b0] sm:$0xff]  ;;  %v422_v47 = vld [vmem:[%s12754_s21 + $0x288] sm:$0xff]  ;;  %v421_v48 = vld [vmem:[%s12754_s21 + $0x280] sm:$0xff] }
 0x11f   :  { %510 = vmatpush1.msra.mxu0 %v381_v15  ;;  %v419_v50 = vld [vmem:[%s12754_s21 + $0x270] sm:$0xff]  ;;  %v418_v51 = vld [vmem:[%s12754_s21 + $0x268] sm:$0xff]  ;;  %v413_v53 = vld [vmem:[%s12754_s21 + $0x240] sm:$0xff] }
 0x120   :  { %511 = vmatprep.subr.mxu0 %v377_v16  ;;  %v414_v52 = vld [vmem:[%s12754_s21 + $0x248] sm:$0xff]  ;;  %572 = vmatprep.subr.mxu1 %v419_v50  ;;  %v409_v55 = vld [vmem:[%s12754_s21 + $0x220] sm:$0xff]  ;;  %v408_v56 = vld [vmem:[%s12754_s21 + $0x218] sm:$0xff] }
 0x121   :  { %512 = vmatpush1.msra.mxu0 %v376_v17  ;;  %573 = vmatpush1.msra.mxu1 %v418_v51  ;;  %v404_v57 = vld [vmem:[%s12754_s21 + $0x1f8] sm:$0xff]  ;;  %v403_v58 = vld [vmem:[%s12754_s21 + $0x1f0] sm:$0xff]  ;;  %v398_v60 = vld [vmem:[%s12754_s21 + $0x1c8] sm:$0xff] }
 0x122   :  { %513 = vmatprep.subr.mxu0 %v372_v18  ;;  %574 = vmatprep.subr.mxu1 %v414_v52  ;;  %v399_v59 = vld [vmem:[%s12754_s21 + $0x1d0] sm:$0xff]  ;;  %v394_v61 = vld [vmem:[%s12754_s21 + $0x1a8] sm:$0xff]  ;;  %v393_v62 = vld [vmem:[%s12754_s21 + $0x1a0] sm:$0xff] }
 0x123   :  { %514 = vmatpush1.msra.mxu0 %v371_v20  ;;  %575 = vmatpush1.msra.mxu1 %v413_v53  ;;  %v389_v63 = vld [vmem:[%s12754_s21 + $0x180] sm:$0xff]  ;;  %v388_v0 = vld [vmem:[%s12754_s21 + $0x178] sm:$0xff]  ;;  %v383_v2 = vld [vmem:[%s12754_s21 + $0x150] sm:$0xff] }
 0x124   :  { %515 = vmatprep.subr.mxu0 %v367_v21  ;;  %576 = vmatprep.subr.mxu1 %v409_v55  ;;  %v384_v1 = vld [vmem:[%s12754_s21 + $0x158] sm:$0xff]  ;;  %v379_v3 = vld [vmem:[%s12754_s21 + $0x130] sm:$0xff]  ;;  %v378_v4 = vld [vmem:[%s12754_s21 + $0x128] sm:$0xff] }
 0x125   :  { %516 = vmatpush1.msra.mxu0 %v366_v22  ;;  %577 = vmatpush1.msra.mxu1 %v408_v56  ;;  %v374_v5 = vld [vmem:[%s12754_s21 + $0x108] sm:$0xff]  ;;  %v9092_v6 = vld [vmem:[#allocation2 + $0x18] sm:$0xff]  ;;  %v373_v7 = vld [vmem:[%s12754_s21 + $0x100] sm:$0xff] }
 0x126   :  { %517 = vmatprep.subr.mxu0 %v362_v23  ;;  %578 = vmatprep.subr.mxu1 %v404_v57  ;;  %v9097_v8 = vld [vmem:[#allocation2 + $0x10] sm:$0xff]  ;;  %v369_v9 = vld [vmem:[%s12754_s21 + $0xe0] sm:$0xff]  ;;  %v368_v10 = vld [vmem:[%s12754_s21 + $0xd8] sm:$0xff] }
 0x127   :  { %518 = vmatpush1.msra.mxu0 %v361_v24  ;;  %579 = vmatpush1.msra.mxu1 %v403_v58  ;;  %v364_v11 = vld [vmem:[%s12754_s21 + $0xb8] sm:$0xff]  ;;  %v363_v12 = vld [vmem:[%s12754_s21 + $0xb0] sm:$0xff]  ;;  %v358_v14 = vld [vmem:[%s12754_s21 + $0x88] sm:$0xff] }
 0x128   :  { %519 = vmatprep.subr.mxu0 %v357_v25  ;;  %580 = vmatprep.subr.mxu1 %v399_v59  ;;  %v359_v13 = vld [vmem:[%s12754_s21 + $0x90] sm:$0xff]  ;;  %v354_v15 = vld [vmem:[%s12754_s21 + $0x68] sm:$0xff]  ;;  %v353_v16 = vld [vmem:[%s12754_s21 + $0x60] sm:$0xff] }
 0x129   :  { %520 = vmatpush1.msra.mxu0 %v356_v26  ;;  %581 = vmatpush1.msra.mxu1 %v398_v60  ;;  %v349_v17 = vld [vmem:[%s12754_s21 + $0x40] sm:$0xff]  ;;  %v348_v18 = vld [vmem:[%s12754_s21 + $0x38] sm:$0xff]  ;;  %v343_v20 = vld [vmem:[%s12754_s21 + $0x10] sm:$0xff] }
 0x12a   :  { %521 = vmatprep.subr.mxu0 %v352_v27  ;;  %582 = vmatprep.subr.mxu1 %v394_v61  ;;  %v459_v21 = vld [vmem:[%s12754_s21 + $0x3b0] sm:$0xff]  ;;  %v458_v22 = vld [vmem:[%s12754_s21 + $0x3a8] sm:$0xff]  ;;  %v453_v24 = vld [vmem:[%s12754_s21 + $0x380] sm:$0xff] }
 0x12b   :  { %522 = vmatpush1.msra.mxu0 %v351_v28  ;;  %583 = vmatpush1.msra.mxu1 %v393_v62  ;;  %v454_v23 = vld [vmem:[%s12754_s21 + $0x388] sm:$0xff]  ;;  %v449_v25 = vld [vmem:[%s12754_s21 + $0x360] sm:$0xff]  ;;  %v448_v26 = vld [vmem:[%s12754_s21 + $0x358] sm:$0xff] }
 0x12c   :  { %523 = vmatprep.subr.mxu0 %v347_v29  ;;  %584 = vmatprep.subr.mxu1 %v389_v63  ;;  %v444_v27 = vld [vmem:[%s12754_s21 + $0x338] sm:$0xff]  ;;  %v443_v28 = vld [vmem:[%s12754_s21 + $0x330] sm:$0xff]  ;;  %v390_v52 = vld [vmem:[%s12754_s21 + $0x188] sm:$0xff] }
 0x12d   :  { %524 = vmatpush1.msra.mxu0 %v346_v30  ;;  %585 = vmatpush1.msra.mxu1 %v388_v0  ;;  %v439_v29 = vld [vmem:[%s12754_s21 + $0x310] sm:$0xff]  ;;  %v438_v30 = vld [vmem:[%s12754_s21 + $0x308] sm:$0xff]  ;;  %v385_v53 = vld [vmem:[%s12754_s21 + $0x160] sm:$0xff] }
 0x12e   :  { %525 = vmatprep.subr.mxu0 %v342_v31  ;;  %586 = vmatprep.subr.mxu1 %v384_v1  ;;  %v434_v31 = vld [vmem:[%s12754_s21 + $0x2e8] sm:$0xff]  ;;  %v395_v51 = vld [vmem:[%s12754_s21 + $0x1b0] sm:$0xff]  ;;  %v380_v55 = vld [vmem:[%s12754_s21 + $0x138] sm:$0xff] }
 0x12f   :  { %526 = vmatpush1.msra.mxu0 %v341_v32  ;;  %587 = vmatpush1.msra.mxu1 %v383_v2  ;;  %v433_v32 = vld [vmem:[%s12754_s21 + $0x2e0] sm:$0xff]  ;;  %v375_v56 = vld [vmem:[%s12754_s21 + $0x110] sm:$0xff]  ;;  %v370_v57 = vld [vmem:[%s12754_s21 + $0xe8] sm:$0xff] }
 0x130   :  { %543 = vmatprep.subr.mxu0 %v457_v33  ;;  %588 = vmatprep.subr.mxu1 %v379_v3  ;;  %v429_v33 = vld [vmem:[%s12754_s21 + $0x2c0] sm:$0xff]  ;;  %v360_v59 = vld [vmem:[%s12754_s21 + $0x98] sm:$0xff]  ;;  %v355_v60 = vld [vmem:[%s12754_s21 + $0x70] sm:$0xff] }
 0x131   :  { %544 = vmatpush2.msra.mxu0 %v456_v34  ;;  %589 = vmatpush1.msra.mxu1 %v378_v4  ;;  %v428_v34 = vld [vmem:[%s12754_s21 + $0x2b8] sm:$0xff]  ;;  %v365_v58 = vld [vmem:[%s12754_s21 + $0xc0] sm:$0xff]  ;;  %v350_v61 = vld [vmem:[%s12754_s21 + $0x48] sm:$0xff] }
 0x132   :  { %545 = vmatprep.subr.mxu0 %v452_v35  ;;  %590 = vmatprep.subr.mxu1 %v374_v5  ;;  %v424_v35 = vld [vmem:[%s12754_s21 + $0x298] sm:$0xff]  ;;  %v345_v62 = vld [vmem:[%s12754_s21 + $0x20] sm:$0xff]  ;;  %v455_v0 = vld [vmem:[%s12754_s21 + $0x390] sm:$0xff] }
 0x133   :  { %546 = vmatpush2.msra.mxu0 %v451_v36  ;;  %591 = vmatpush1.msra.mxu1 %v373_v7  ;;  %v423_v36 = vld [vmem:[%s12754_s21 + $0x290] sm:$0xff]  ;;  %v460_v63 = vld [vmem:[%s12754_s21 + $0x3b8] sm:$0xff]  ;;  %v450_v1 = vld [vmem:[%s12754_s21 + $0x368] sm:$0xff] }
 0x134   :  { %547 = vmatprep.subr.mxu0 %v447_v37  ;;  %592 = vmatprep.subr.mxu1 %v369_v9  ;;  %v463_v37 = vlaneseq  ;;  %v445_v2 = vld [vmem:[%s12754_s21 + $0x340] sm:$0xff]  ;;  %v440_v3 = vld [vmem:[%s12754_s21 + $0x318] sm:$0xff]  ;;  %v435_v4 = vld [vmem:[%s12754_s21 + $0x2f0] sm:$0xff] }
 0x135   :  { %548 = vmatpush2.msra.mxu0 %v446_v38  ;;  %593 = vmatpush1.msra.mxu1 %v368_v10  ;;  %v430_v5 = vld [vmem:[%s12754_s21 + $0x2c8] sm:$0xff]  ;;  %v425_v7 = vld [vmem:[%s12754_s21 + $0x2a0] sm:$0xff] }
 0x136   :  { %549 = vmatprep.subr.mxu0 %v442_v39  ;;  %594 = vmatprep.subr.mxu1 %v364_v11  ;;  %v9193_v38 = vshrl.u32 %v463_v37, 7 }
 0x137   :  { %550 = vmatpush2.msra.mxu0 %v441_v40  ;;  %595 = vmatpush1.msra.mxu1 %v363_v12  ;;  %v420_v40 = vld [vmem:[%s12754_s21 + $0x278] sm:$0xff] }
 0x138   :  { %551 = vmatprep.subr.mxu0 %v437_v41  ;;  %596 = vmatprep.subr.mxu1 %v359_v13  ;;  %v9198_v39 = vsub.s32 1, %v9193_v38  ;;  %v415_v41 = vld [vmem:[%s12754_s21 + $0x250] sm:$0xff]  ;;  %v9318_v9 = vsub.s32 2, %v9193_v38  ;;  %v9321_v10 = vsub.s32 0, %v9193_v38  ;;  %v9324_v11 = vsub.s32 3, %v9193_v38 }
 0x139   :  { %552 = vmatpush2.msra.mxu0 %v436_v42  ;;  %597 = vmatpush1.msra.mxu1 %v358_v14  ;;  %v410_v42 = vld [vmem:[%s12754_s21 + $0x228] sm:$0xff] }
 0x13a   :  { %553 = vmatprep.subr.mxu0 %v432_v43  ;;  %598 = vmatprep.subr.mxu1 %v354_v15  ;;  %v9210_v43 = vld [vmem:[#allocation5] sm:$0x1f] }
 0x13b   :  { %554 = vmatpush2.msra.mxu0 %v431_v44  ;;  %599 = vmatpush1.msra.mxu1 %v353_v16  ;;  %v9214_v44 = vrot.slane %v9210_v43, %v9198_v39 }
 0x13c   :  { %555 = vmatprep.subr.mxu0 %v427_v45  ;;  %600 = vmatprep.subr.mxu1 %v349_v17  ;;  %v405_v45 = vld [vmem:[%s12754_s21 + $0x200] sm:$0xff] }
 0x13d   :  { %556 = vmatpush2.msra.mxu0 %v426_v46  ;;  %601 = vmatpush1.msra.mxu1 %v348_v18 }
 0x13e   :  { %557 = vmatprep.subr.mxu0 %v422_v47  ;;  %v400_v47 = vld [vmem:[%s12754_s21 + $0x1d8] sm:$0xff] }
 0x13f   :  { %558 = vmatpush2.msra.mxu0 %v421_v48 }
 0x140   :  { %560 = vmatmul.mubr.f32.vlgmr.msra.gmra.mxu0 %v9031_v49  ;;  %649 = vmatprep.subr.mxu0 %v8660_v54 }
 0x141   :  { %7591 = vmatprep.mubr.msk.f32.mxu0 %vm488_vm0, %v9092_v6  ;;  %650 = vmatpush1.msra.mxu0 %v420_v40 }
 0x142   :  { %651 = vmatprep.subr.mxu0 %v8660_v54 }
 0x143   :  { %652 = vmatpush1.msra.mxu0 %v415_v41 }
 0x144   :  { %566 = vmatmul.mubr.f32.gmra.mxu0 %v9097_v8  ;;  %653 = vmatprep.subr.mxu0 %v8660_v54 }
 0x145   :  { %7594 = vmatprep.mubr.msk.f32.mxu0 %vm488_vm0, %v8938_v19  ;;  %v344_v19 = vld [vmem:[%s12754_s21 + $0x18] sm:$0xff]  ;;  %654 = vmatpush1.msra.mxu0 %v410_v42  ;;  %s8664_s21 = smov 96  }
 0x146   :  { %602 = vmatprep.subr.mxu1 %v344_v19  ;;  %655 = vmatprep.subr.mxu0 %v8660_v54 }
 0x147   :  { %603 = vmatpush1.msra.mxu1 %v343_v20  ;;  %656 = vmatpush1.msra.mxu0 %v405_v45 }
 0x148   :  { %620 = vmatprep.subr.mxu1 %v459_v21  ;;  %657 = vmatprep.subr.mxu0 %v8660_v54 }
 0x149   :  { %621 = vmatpush2.msra.mxu1 %v458_v22  ;;  %658 = vmatpush1.msra.mxu0 %v400_v47 }
 0x14a   :  { %622 = vmatprep.subr.mxu1 %v454_v23  ;;  %659 = vmatprep.subr.mxu0 %v8660_v54 }
 0x14b   :  { %623 = vmatpush2.msra.mxu1 %v453_v24  ;;  %660 = vmatpush1.msra.mxu0 %v395_v51 }
 0x14c   :  { %624 = vmatprep.subr.mxu1 %v449_v25  ;;  %661 = vmatprep.subr.mxu0 %v8660_v54 }
 0x14d   :  { %625 = vmatpush2.msra.mxu1 %v448_v26  ;;  %662 = vmatpush1.msra.mxu0 %v390_v52 }
 0x14e   :  { %626 = vmatprep.subr.mxu1 %v444_v27  ;;  %663 = vmatprep.subr.mxu0 %v8660_v54 }
 0x14f   :  { %627 = vmatpush2.msra.mxu1 %v443_v28  ;;  %664 = vmatpush1.msra.mxu0 %v385_v53 }
 0x150   :  { %628 = vmatprep.subr.mxu1 %v439_v29  ;;  %665 = vmatprep.subr.mxu0 %v8660_v54 }
 0x151   :  { %629 = vmatpush2.msra.mxu1 %v438_v30  ;;  %666 = vmatpush1.msra.mxu0 %v380_v55 }
 0x152   :  { %630 = vmatprep.subr.mxu1 %v434_v31  ;;  %667 = vmatprep.subr.mxu0 %v8660_v54 }
 0x153   :  { %631 = vmatpush2.msra.mxu1 %v433_v32  ;;  %668 = vmatpush1.msra.mxu0 %v375_v56 }
 0x154   :  { %632 = vmatprep.subr.mxu1 %v429_v33  ;;  %669 = vmatprep.subr.mxu0 %v8660_v54 }
 0x155   :  { %633 = vmatpush2.msra.mxu1 %v428_v34  ;;  %670 = vmatpush1.msra.mxu0 %v370_v57 }
 0x156   :  { %634 = vmatprep.subr.mxu1 %v424_v35  ;;  %671 = vmatprep.subr.mxu0 %v8660_v54 }
 0x157   :  { %635 = vmatpush2.msra.mxu1 %v423_v36  ;;  %672 = vmatpush1.msra.mxu0 %v365_v58 }
 0x158   :  { %637 = vmatmul.mubr.f32.vlgmr.msra.gmra.mxu1 %v9031_v49  ;;  %7788 = vmatprep.subr.mxu1 %v8660_v54 }
 0x159   :  { %7593 = vmatprep.mubr.msk.f32.mxu1 %vm488_vm0, %v9092_v6  ;;  %673 = vmatprep.subr.mxu0 %v8660_v54 }
 0x15a   :  { %674 = vmatpush1.msra.mxu0 %v360_v59 }
 0x15b   :  { %675 = vmatprep.subr.mxu0 %v8660_v54 }
 0x15c   :  { %643 = vmatmul.mubr.f32.gmra.mxu1 %v9097_v8  ;;  %676 = vmatpush1.msra.mxu0 %v355_v60 }
 0x15d   :  { %7790 = vmatprep.mubr.msk.f32.mxu1 %vm8661_vm1, %v8660_v54  ;;  %677 = vmatprep.subr.mxu0 %v8660_v54 }
 0x15e   :  { %678 = vmatpush1.msra.mxu0 %v350_v61 }
 0x15f   :  { %679 = vmatprep.subr.mxu0 %v8660_v54 }
 0x160   :  { %680 = vmatpush1.msra.mxu0 %v345_v62 }
 0x161   :  { %697 = vmatprep.subr.mxu0 %v8660_v54 }
 0x162   :  { %698 = vmatpush2.msra.mxu0 %v460_v63 }
 0x163   :  { %699 = vmatprep.subr.mxu0 %v8660_v54 }
 0x164   :  { %700 = vmatpush2.msra.mxu0 %v455_v0 }
 0x165   :  { %701 = vmatprep.subr.mxu0 %v8660_v54 }
 0x166   :  { %702 = vmatpush2.msra.mxu0 %v450_v1 }
 0x167   :  { %703 = vmatprep.subr.mxu0 %v8660_v54 }
 0x168   :  { %704 = vmatpush2.msra.mxu0 %v445_v2 }
 0x169   :  { %705 = vmatprep.subr.mxu0 %v8660_v54 }
 0x16a   :  { %706 = vmatpush2.msra.mxu0 %v440_v3 }
 0x16b   :  { %707 = vmatprep.subr.mxu0 %v8660_v54 }
 0x16c   :  { %708 = vmatpush2.msra.mxu0 %v435_v4 }
 0x16d   :  { %709 = vmatprep.subr.mxu0 %v8660_v54 }
 0x16e   :  { %710 = vmatpush2.msra.mxu0 %v430_v5 }
 0x16f   :  { %711 = vmatprep.subr.mxu0 %v8660_v54 }
 0x170   :  { %712 = vmatpush2.msra.mxu0 %v425_v7 }
 0x171   :  { %7868 = vmatprep.subr.mxu0 %v8660_v54  ;;  %714 = vmatmul.mubr.f32.vlgmr.msra.gmra.mxu0 %v9031_v49  ;;  %v474_v49 = vrot.slane %v9210_v43, %v9318_v9 }
 0x172   :  { %7595 = vmatprep.mubr.msk.f32.mxu0 %vm488_vm0, %v9092_v6  ;;  %v9330_v6 = vrot.slane %v9210_v43, %v9321_v10 }
 0x175   :  { %719 = vmatmul.mubr.f32.gmra.mxu0 %v9097_v8  ;;  %v9334_v8 = vrot.slane %v9210_v43, %v9324_v11 }
 0x176   :  { %7870 = vmatprep.mubr.msk.f32.mxu0 %vm8661_vm1, %v8660_v54 }
 0x200   :  { %v9220_v46 = vpop.f32.mrf.mxu0 }
 0x201   :  { %v9341_v16 = vadd.f32 %v9220_v46, %v9330_v6 }
 0x202   :  { %v563_v48 = vpop.f32.mrf.mxu0 }
 0x203   :  { %v9227_v50 = vadd.f32 %v563_v48, %v9214_v44 }
 0x205   :  { %890 = vrot.lane.b32.xlu1 %v9227_v50, %s8662_s16  ;;  %725 = vrot.lane.b32.xlu0 %v9227_v50, %s8663_s9 }
 0x218   :  { %v638_v12 = vpop.f32.mrf.mxu1 }
 0x219   :  { %v9336_v14 = vadd.f32 %v638_v12, %v474_v49 }
 0x21a   :  { %v640_v15 = vpop.f32.mrf.mxu1 }
 0x21b   :  { %v9344_v17 = vadd.f32 %v640_v15, %v9334_v8 }
 0x21c   :  { %v644_v18 = vpop.f32.mrf.mxu1 }
 0x21d   :  { %v9349_v19 = vadd.f32 %v644_v18, %v474_v49 }
 0x21e   :  { %v9358_v20 = vpop.f32.mrf.mxu1 }
 0x21f   :  { %7869 = vmatpush3.xpose.msk.msra.mxu0 %vm727_vm2, %v9349_v19 }
 0x220   :  { %7878 = vmatprep.subr.mxu0 %v8660_v54 }
 0x277   :  { %v726_v13 = vpop.permute.xlu0 %725  ;;  %v891_v29 = vpop.permute.xlu1 %890 }
 0x278   :  { %7789 = vmatpush3.xpose.msk.msra.mxu1 %vm727_vm2, %v726_v13 }
 0x279   :  { %7793 = vmatprep.subr.mxu1 %v8660_v54 }
 0x27b   :  { %7791 = vmatmul.mubr.msk.f32.vlgmr.msra.gmra.mxu1 %vm727_vm2, %v9341_v16 }
 0x27c   :  { %7794 = vmatpush3.msra.mxu1 %v9344_v17  ;;  %7795 = vmatprep.mubr.msk.f32.mxu1 %vm8661_vm1, %v8660_v54 }
 0x27d   :  { %7798 = vmatprep.subr.mxu1 %v8660_v54 }
 0x33b   :  { %v799_v21 = vpop.f32.mrf.mxu1 }
 0x33c   :  { %v804_v22 = vsel %vm803_vm3, %v799_v21, -inf }
 0x33d   :  { %805 = vmax.xlane.f32.xlu0 %v804_v22  ;;  %v7792_v23 = vpop.f32.mrf.mxu1 }
 0x3c6   :  { %v806_v24 = vpop.xlane.xlu0 %805 }
 0x3c7   :  { %v807_v25 = vsub.f32 %v799_v21, %v806_v24 }
 0x3c9   :  { %v808_v26 = vmul.f32 1.442695, %v807_v25 }
 0x3cb   :  { %8057 = vpow2.f32 %v808_v26 }
 0x3d8   :  { %v8058_v27 = vpop.eup %8057 }
 0x3d9   :  { %v810_v28 = vsel %vm803_vm3, %v8058_v27, 0.0 }
 0x3da   :  { %811 = vadd.xlane.f32.xlu1 %v810_v28 }
 0x3eb   :  { %888 = vrot.lane.b32.xlu1 %v9341_v16, %s8664_s21 }
 0x463   :  { %v812_v30 = vpop.xlane.xlu1 %811 }
 0x464   :  { %8059 = vrcp.f32 %v812_v30 }
 0x467   :  { %v889_v33 = vpop.permute.xlu1 %888 }
 0x471   :  { %v8060_v31 = vpop.eup %8059 }
 0x472   :  { %v814_v32 = vmul.f32 %v8060_v31, %v8058_v27 }
 0x474   :  { %7796 = vmatmul.mubr.msk.f32.vlgmr.msra.gmra.mxu1 %vm803_vm3, %v814_v32 }
 0x475   :  { %7799 = vmatpush3.xpose.msk.msra.mxu1 %vm727_vm2, %v891_v29  ;;  %7800 = vmatprep.mubr.msk.f32.mxu1 %vm8661_vm1, %v8660_v54 }
 0x476   :  { %7803 = vmatprep.subr.mxu1 %v8660_v54 }
 0x478   :  { %7801 = vmatmul.mubr.msk.f32.vlgmr.msra.gmra.mxu1 %vm727_vm2, %v889_v33 }
 0x479   :  { %7805 = vmatprep.mubr.msk.f32.mxu1 %vm8661_vm1, %v8660_v54 }
 0x534   :  { %v9372_v34 = vpop.f32.mrf.mxu1 }
 0x536   :  { %v7797_v35 = vpop.f32.mrf.mxu1 }
 0x538   :  { %v962_v36 = vpop.f32.mrf.mxu1 }
 0x539   :  { %v966_v37 = vsel %vm803_vm3, %v962_v36, -inf }
 0x53a   :  { %967 = vmax.xlane.f32.xlu1 %v966_v37  ;;  %v7802_v40 = vpop.f32.mrf.mxu1 }
 0x5c3   :  { %v968_v41 = vpop.xlane.xlu1 %967 }
 0x5c4   :  { %v969_v42 = vsub.f32 %v962_v36, %v968_v41 }
 0x5c6   :  { %v970_v45 = vmul.f32 1.442695, %v969_v42  ;;  %v567_v42 = vpop.f32.mrf.mxu0 }
 0x5c8   :  { %8061 = vpow2.f32 %v970_v45  ;;  %v9434_v45 = vsub.s32 4, %v9193_v38 }
 0x5d5   :  { %v8062_v46 = vpop.eup %8061 }
 0x5d6   :  { %v972_v47 = vsel %vm803_vm3, %v8062_v46, 0.0 }
 0x5d7   :  { %973 = vadd.xlane.f32.xlu0 %v972_v47  ;;  %v9438_v47 = vrot.slane %v9210_v43, %v9434_v45 }
 0x5ed   :  { %978 = vrot.lane.b32.xlu0 %v9344_v17, %s8664_s21 }
 0x5f1   :  { %1054 = vrot.lane.b32.xlu0 %v9341_v16, %s8663_s9 }
 0x660   :  { %v974_v48 = vpop.xlane.xlu0 %973 }
 0x661   :  { %8063 = vrcp.f32 %v974_v48 }
 0x664   :  { %v979_v51 = vpop.permute.xlu0 %978 }
 0x665   :  { %7804 = vmatpush3.msra.mxu1 %v979_v51 }
 0x666   :  { %7808 = vmatprep.subr.mxu1 %v8660_v54 }
 0x668   :  { %v1055_v55 = vpop.permute.xlu0 %1054 }
 0x66e   :  { %v8064_v52 = vpop.eup %8063 }
 0x66f   :  { %v976_v53 = vmul.f32 %v8064_v52, %v8062_v46  ;;  %v569_v46 = vpop.f32.mrf.mxu0 }
 0x671   :  { %7806 = vmatmul.mubr.msk.f32.vlgmr.msra.gmra.mxu1 %vm803_vm3, %v976_v53  ;;  %v715_v48 = vpop.f32.mrf.mxu0 }
 0x672   :  { %7809 = vmatpush3.xpose.msk.msra.mxu1 %vm727_vm2, %v9336_v14  ;;  %7810 = vmatprep.mubr.msk.f32.mxu1 %vm8661_vm1, %v8660_v54  ;;  %v716_v51 = vadd.f32 %v715_v48, %v9438_v47 }
 0x673   :  { %7813 = vmatprep.subr.mxu1 %v8660_v54  ;;  %v717_v52 = vpop.f32.mrf.mxu0 }
 0x675   :  { %7811 = vmatmul.mubr.msk.f32.vlgmr.msra.gmra.mxu1 %vm727_vm2, %v1055_v55 }
 0x676   :  { %7815 = vmatprep.mubr.msk.f32.mxu1 %vm8661_vm1, %v8660_v54 }
 0x731   :  { %v9390_v56 = vpop.f32.mrf.mxu1 }
 0x733   :  { %v7807_v57 = vpop.f32.mrf.mxu1 }
 0x735   :  { %v1127_v58 = vpop.f32.mrf.mxu1 }
 0x736   :  { %v1131_v59 = vsel %vm803_vm3, %v1127_v58, -inf }
 0x737   :  { %1132 = vmax.xlane.f32.xlu1 %v1131_v59  ;;  %v7812_v60 = vpop.f32.mrf.mxu1 }
 0x748   :  { %1142 = vrot.lane.b32.xlu1 %v9344_v17, %s8663_s9 }
 0x74c   :  { %1220 = vrot.lane.b32.xlu1 %v9336_v14, %s8664_s21 }
 0x750   :  { %1218 = vrot.lane.b32.xlu1 %v9341_v16, %s8662_s16 }
 0x7c0   :  { %v1133_v61 = vpop.xlane.xlu1 %1132 }
 0x7c1   :  { %v1134_v62 = vsub.f32 %v1127_v58, %v1133_v61 }
 0x7c3   :  { %v1135_v63 = vmul.f32 1.442695, %v1134_v62 }
 0x7c4   :  { %v1143_v0 = vpop.permute.xlu1 %1142 }
 0x7c5   :  { %8065 = vpow2.f32 %v1135_v63  ;;  %7814 = vmatpush3.msra.mxu1 %v1143_v0  ;;  %v9458_v0 = vadd.f32 %v569_v46, %v9214_v44 }
 0x7c6   :  { %7818 = vmatprep.subr.mxu1 %v8660_v54 }
 0x7c8   :  { %v1221_v5 = vpop.permute.xlu1 %1220 }
 0x7cc   :  { %v1219_v49 = vpop.permute.xlu1 %1218 }
 0x7d2   :  { %v8066_v1 = vpop.eup %8065 }
 0x7d3   :  { %v1137_v2 = vsel %vm803_vm3, %v8066_v1, 0.0 }
 0x7d4   :  { %1138 = vadd.xlane.f32.xlu0 %v1137_v2 }
 0x7ea   :  { %1307 = vrot.lane.b32.xlu0 %v9344_v17, %s8662_s16 }
 0x85d   :  { %v1139_v3 = vpop.xlane.xlu0 %1138 }
 0x85e   :  { %8067 = vrcp.f32 %v1139_v3 }
 0x861   :  { %v1308_v12 = vpop.permute.xlu0 %1307 }
 0x86b   :  { %v8068_v4 = vpop.eup %8067 }
 0x86c   :  { %v1141_v7 = vmul.f32 %v8068_v4, %v8066_v1  ;;  %v568_v1 = vadd.f32 %v567_v42, %v9330_v6 }
 0x86e   :  { %7816 = vmatmul.mubr.msk.f32.vlgmr.msra.gmra.mxu1 %vm803_vm3, %v1141_v7 }
 0x86f   :  { %7819 = vmatpush3.xpose.msk.msra.mxu1 %vm727_vm2, %v1221_v5  ;;  %7820 = vmatprep.mubr.msk.f32.mxu1 %vm8661_vm1, %v8660_v54 }
 0x870   :  { %7823 = vmatprep.subr.mxu1 %v8660_v54 }
 0x872   :  { %7821 = vmatmul.mubr.msk.f32.vlgmr.msra.gmra.mxu1 %vm727_vm2, %v1219_v49 }
 0x873   :  { %7824 = vmatpush3.msra.mxu1 %v1308_v12  ;;  %7825 = vmatprep.mubr.msk.f32.mxu1 %vm8661_vm1, %v8660_v54  ;;  %v9475_v12 = vpop.f32.mrf.mxu0 }
 0x874   :  { %7828 = vmatprep.subr.mxu1 %v8660_v54 }
 0x92e   :  { %v9412_v13 = vpop.f32.mrf.mxu1 }
 0x930   :  { %v7817_v15 = vpop.f32.mrf.mxu1 }
 0x931   :  { %v722_v15 = vpop.f32.mrf.mxu0 }
 0x932   :  { %v1292_v16 = vpop.f32.mrf.mxu1  ;;  %v2760_v15 = vld [vmem:[#allocation7 + $0xd8] sm:$0xff] }
 0x933   :  { %v1296_v17 = vsel %vm803_vm3, %v1292_v16, -inf }
 0x934   :  { %1297 = vmax.xlane.f32.xlu1 %v1296_v17  ;;  %v7822_v18 = vpop.f32.mrf.mxu1 }
 0x945   :  { %1545 = vrot.lane.b32.xlu1 %v9336_v14, %s8662_s16 }
 0x9bd   :  { %v1298_v21 = vpop.xlane.xlu1 %1297 }
 0x9be   :  { %v1299_v22 = vsub.f32 %v1292_v16, %v1298_v21 }
 0x9c0   :  { %v1300_v23 = vmul.f32 1.442695, %v1299_v22  ;;  %v9484_v22 = vadd.f32 %v9358_v20, %v9334_v8 }
 0x9c1   :  { %v1546_v53 = vpop.permute.xlu1 %1545 }
 0x9c2   :  { %8069 = vpow2.f32 %v1300_v23 }
 0x9cf   :  { %v8070_v24 = vpop.eup %8069 }
 0x9d0   :  { %v1302_v25 = vsel %vm803_vm3, %v8070_v24, 0.0 }
 0x9d1   :  { %1303 = vadd.xlane.f32.xlu0 %v1302_v25 }
 0x9e7   :  { %1383 = vrot.lane.b32.xlu0 %v9336_v14, %s8663_s9 }
 0xa5a   :  { %v1304_v26 = vpop.xlane.xlu0 %1303 }
 0xa5b   :  { %8071 = vrcp.f32 %v1304_v26 }
 0xa5e   :  { %v1384_v29 = vpop.permute.xlu0 %1383 }
 0xa68   :  { %v8072_v27 = vpop.eup %8071 }
 0xa69   :  { %v1306_v28 = vmul.f32 %v8072_v27, %v8070_v24 }
 0xa6b   :  { %7826 = vmatmul.mubr.msk.f32.vlgmr.msra.gmra.mxu1 %vm803_vm3, %v1306_v28 }
 0xa6c   :  { %7829 = vmatpush3.xpose.msk.msra.mxu1 %vm727_vm2, %v1384_v29  ;;  %7830 = vmatprep.mubr.msk.f32.mxu1 %vm8661_vm1, %v8660_v54 }
 0xa6d   :  { %7833 = vmatprep.subr.mxu1 %v8660_v54 }
 0xa6f   :  { %7831 = vmatmul.mubr.msk.f32.vlgmr.msra.gmra.mxu1 %vm727_vm2, %v9227_v50 }
 0xa70   :  { %7835 = vmatprep.mubr.msk.f32.mxu1 %vm8661_vm1, %v8660_v54  ;;  %7834 = vmatpush3.msra.mxu1 %v716_v51 }
 0xa71   :  { %7838 = vmatprep.subr.mxu1 %v8660_v54 }
 0xb2b   :  { %v9429_v14 = vpop.f32.mrf.mxu1 }
 0xb2d   :  { %v7827_v30 = vpop.f32.mrf.mxu1 }
 0xb2f   :  { %v1455_v31 = vpop.f32.mrf.mxu1 }
 0xb30   :  { %v1459_v32 = vsel %vm803_vm3, %v1455_v31, -inf }
 0xb31   :  { %1460 = vmax.xlane.f32.xlu0 %v1459_v32  ;;  %v7832_v33 = vpop.f32.mrf.mxu1 }
 0xb47   :  { %1633 = vrot.lane.b32.xlu0 %v716_v51, %s8664_s21 }
 0xbba   :  { %v1461_v35 = vpop.xlane.xlu0 %1460 }
 0xbbb   :  { %v1462_v36 = vsub.f32 %v1455_v31, %v1461_v35 }
 0xbbd   :  { %v1463_v37 = vmul.f32 1.442695, %v1462_v36 }
 0xbbe   :  { %v1634_v43 = vpop.permute.xlu0 %1633 }
 0xbbf   :  { %8073 = vpow2.f32 %v1463_v37 }
 0xbcc   :  { %v8074_v40 = vpop.eup %8073 }
 0xbcd   :  { %v1465_v41 = vsel %vm803_vm3, %v8074_v40, 0.0 }
 0xbce   :  { %1466 = vadd.xlane.f32.xlu1 %v1465_v41 }
 0xbdf   :  { %1543 = vrot.lane.b32.xlu1 %v9227_v50, %s8664_s21 }
 0xc57   :  { %v1467_v55 = vpop.xlane.xlu1 %1466 }
 0xc58   :  { %8075 = vrcp.f32 %v1467_v55 }
 0xc5b   :  { %v1544_v50 = vpop.permute.xlu1 %1543 }
 0xc65   :  { %v8076_v57 = vpop.eup %8075 }
 0xc66   :  { %v1469_v58 = vmul.f32 %v8076_v57, %v8074_v40 }
 0xc68   :  { %7836 = vmatmul.mubr.msk.f32.vlgmr.msra.gmra.mxu1 %vm803_vm3, %v1469_v58 }
 0xc69   :  { %7839 = vmatpush3.xpose.msk.msra.mxu1 %vm727_vm2, %v1546_v53  ;;  %7840 = vmatprep.mubr.msk.f32.mxu1 %vm8661_vm1, %v8660_v54 }
 0xc6a   :  { %7843 = vmatprep.subr.mxu1 %v8660_v54 }
 0xc6c   :  { %7841 = vmatmul.mubr.msk.f32.vlgmr.msra.gmra.mxu1 %vm727_vm2, %v1544_v50 }
 0xc6d   :  { %7844 = vmatpush3.msra.mxu1 %v1634_v43  ;;  %7845 = vmatprep.mubr.msk.f32.mxu1 %vm8661_vm1, %v8660_v54 }
 0xc6e   :  { %7848 = vmatprep.subr.mxu1 %v8660_v54 }
 0xd28   :  { %v9454_v59 = vpop.f32.mrf.mxu1 }
 0xd2a   :  { %v7837_v60 = vpop.f32.mrf.mxu1 }
 0xd2c   :  { %v1617_v61 = vpop.f32.mrf.mxu1 }
 0xd2d   :  { %v1621_v62 = vsel %vm803_vm3, %v1617_v61, -inf }
 0xd2e   :  { %1622 = vmax.xlane.f32.xlu1 %v1621_v62  ;;  %v7842_v63 = vpop.f32.mrf.mxu1 }
 0xd3f   :  { %1894 = vrot.lane.b32.xlu1 %v9458_v0, %s8662_s16 }
 0xd43   :  { %1892 = vrot.lane.b32.xlu1 %v568_v1, %s8664_s21 }
 0xd47   :  { %2058 = vrot.lane.b32.xlu1 %v568_v1, %s8663_s9 }
 0xdb7   :  { %v1623_v2 = vpop.xlane.xlu1 %1622 }
 0xdb8   :  { %v1624_v3 = vsub.f32 %v1617_v61, %v1623_v2 }
 0xdba   :  { %v1625_v4 = vmul.f32 1.442695, %v1624_v3 }
 0xdbb   :  { %v9465_v5 = vpop.permute.xlu1 %1894 }
 0xdbc   :  { %8077 = vpow2.f32 %v1625_v4 }
 0xdbf   :  { %v9467_v7 = vpop.permute.xlu1 %1892 }
 0xdc3   :  { %v2059_v49 = vpop.permute.xlu1 %2058 }
 0xdc4   :  { %7871 = vmatmul.mubr.msk.f32.vlgmr.msra.gmra.mxu0 %vm727_vm2, %v2059_v49  ;;  %v2763_v49 = vld [vmem:[#allocation7 + $0xf0] sm:$0xff] }
 0xdc5   :  { %7880 = vmatprep.mubr.msk.f32.mxu0 %vm8661_vm1, %v8660_v54 }
 0xdc9   :  { %v8078_v44 = vpop.eup %8077 }
 0xdca   :  { %v1627_v6 = vsel %vm803_vm3, %v8078_v44, 0.0 }
 0xdcb   :  { %1628 = vadd.xlane.f32.xlu0 %v1627_v6  ;;  %v2761_v6 = vld [vmem:[#allocation7 + $0xe0] sm:$0xff] }
 0xde1   :  { %1731 = vrot.lane.b32.xlu0 %v9458_v0, %s8663_s9 }
 0xe54   :  { %v1629_v16 = vpop.xlane.xlu0 %1628 }
 0xe55   :  { %8079 = vrcp.f32 %v1629_v16  ;;  %v2759_v16 = vld [vmem:[#allocation7 + $0xd0] sm:$0xff] }
 0xe58   :  { %v1732_v21 = vpop.permute.xlu0 %1731 }
 0xe62   :  { %v8080_v17 = vpop.eup %8079 }
 0xe63   :  { %v1631_v18 = vmul.f32 %v8080_v17, %v8078_v44  ;;  %v2762_v44 = vld [vmem:[#allocation7 + $0xe8] sm:$0xff] }
 0xe64   :  { %v2758_v17 = vld [vmem:[#allocation7 + $0xc8] sm:$0xff] }
 0xe65   :  { %7846 = vmatmul.mubr.msk.f32.vlgmr.msra.gmra.mxu1 %vm803_vm3, %v1631_v18  ;;  %v2757_v18 = vld [vmem:[#allocation7 + $0xc0] sm:$0xff] }
 0xe66   :  { %7849 = vmatpush3.xpose.msk.msra.mxu1 %vm727_vm2, %v1732_v21  ;;  %7850 = vmatprep.mubr.msk.f32.mxu1 %vm8661_vm1, %v8660_v54  ;;  %v2756_v21 = vld [vmem:[#allocation7 + $0xb8] sm:$0xff] }
 0xe67   :  { %7853 = vmatprep.subr.mxu1 %v8660_v54 }
 0xe69   :  { %7851 = vmatmul.mubr.msk.f32.vlgmr.msra.gmra.mxu1 %vm727_vm2, %v568_v1 }
 0xe6a   :  { %7854 = vmatpush3.msra.mxu1 %v9484_v22  ;;  %7855 = vmatprep.mubr.msk.f32.mxu1 %vm8661_vm1, %v8660_v54 }
 0xe6b   :  { %7858 = vmatprep.subr.mxu1 %v8660_v54 }
 0xe84   :  { %v2131_v23 = vpop.f32.mrf.mxu0 }
 0xe85   :  { %v2135_v20 = vsel %vm803_vm3, %v2131_v23, -inf }
 0xe86   :  { %v7872_v24 = vpop.f32.mrf.mxu0 }
 0xe87   :  { %v2754_v24 = vld [vmem:[#allocation7 + $0xa8] sm:$0xff] }
 0xf25   :  { %v9491_v25 = vpop.f32.mrf.mxu1 }
 0xf27   :  { %v7847_v26 = vpop.f32.mrf.mxu1 }
 0xf28   :  { %v2753_v26 = vld [vmem:[#allocation7 + $0xa0] sm:$0xff] }
 0xf29   :  { %v1804_v27 = vpop.f32.mrf.mxu1 }
 0xf2a   :  { %v1808_v28 = vsel %vm803_vm3, %v1804_v27, -inf }
 0xf2b   :  { %1809 = vmax.xlane.f32.xlu0 %v1808_v28  ;;  %v7852_v8 = vpop.f32.mrf.mxu1 }
 0xf41   :  { %2222 = vrot.lane.b32.xlu0 %v568_v1, %s8662_s16 }
 0xf60   :  { %2136 = vmax.xlane.f32.xlu0 %v2135_v20 }
 0xfb4   :  { %v1810_v29 = vpop.xlane.xlu0 %1809 }
 0xfb5   :  { %v1811_v30 = vsub.f32 %v1804_v27, %v1810_v29  ;;  %v2752_v27 = vld [vmem:[#allocation7 + $0x98] sm:$0xff] }
 0xfb7   :  { %v1812_v31 = vmul.f32 1.442695, %v1811_v30 }
 0xfb8   :  { %v2223_v37 = vpop.permute.xlu0 %2222 }
 0xfb9   :  { %8081 = vpow2.f32 %v1812_v31 }
 0xfc6   :  { %v8082_v32 = vpop.eup %8081 }
 0xfc7   :  { %v1814_v33 = vsel %vm803_vm3, %v8082_v32, 0.0 }
 0xfc8   :  { %1815 = vadd.xlane.f32.xlu1 %v1814_v33 }
 0xfd9   :  { %2224 = vrot.lane.b32.xlu1 %v9349_v19, %s8664_s21 }
 0xfdd   :  { %2387 = vrot.lane.b32.xlu1 %v9349_v19, %s8663_s9 }
 0xfe1   :  { %2549 = vrot.lane.b32.xlu1 %v9349_v19, %s8662_s16 }
 0xfe5   :  { %2547 = vrot.lane.b32.xlu1 %v9458_v0, %s8664_s21 }
 0xfe9   :  { %v2137_v48 = vpop.xlane.xlu0 %2136 }
 0xfea   :  { %v2138_v52 = vsub.f32 %v2131_v23, %v2137_v48  ;;  %v2755_v23 = vld [vmem:[#allocation7 + $0xb0] sm:$0xff]  ;;  %v2749_v48 = vld [vmem:[#allocation7 + $0x80] sm:$0xff] }
 0xfec   :  { %v2139_v58 = vmul.f32 1.442695, %v2138_v52 }
0x1051   :  { %v1816_v35 = vpop.xlane.xlu1 %1815 }
0x1052   :  { %8083 = vrcp.f32 %v1816_v35 }
0x1053   :  { %8085 = vpow2.f32 %v2139_v58 }
0x1055   :  { %v2225_v36 = vpop.permute.xlu1 %2224 }
0x1056   :  { %7879 = vmatpush3.xpose.msk.msra.mxu0 %vm727_vm2, %v2225_v36 }
0x1057   :  { %7888 = vmatprep.subr.mxu0 %v8660_v54 }
0x1059   :  { %v2388_v40 = vpop.permute.xlu1 %2387  ;;  %7881 = vmatmul.mubr.msk.f32.vlgmr.msra.gmra.mxu0 %vm727_vm2, %v2223_v37 }
0x105a   :  { %7889 = vmatpush3.xpose.msk.msra.mxu0 %vm727_vm2, %v2388_v40  ;;  %7890 = vmatprep.mubr.msk.f32.mxu0 %vm8661_vm1, %v8660_v54 }
0x105b   :  { %7898 = vmatprep.subr.mxu0 %v8660_v54 }
0x105d   :  { %v2550_v19 = vpop.permute.xlu1 %2549  ;;  %7891 = vmatmul.mubr.msk.f32.vlgmr.msra.gmra.mxu0 %vm727_vm2, %v9458_v0 }
0x105e   :  { %7899 = vmatpush3.xpose.msk.msra.mxu0 %vm727_vm2, %v2550_v19  ;;  %7900 = vmatprep.mubr.msk.f32.mxu0 %vm8661_vm1, %v8660_v54 }
0x105f   :  { %v8084_v41 = vpop.eup %8083 }
0x1060   :  { %v1818_v42 = vmul.f32 %v8084_v41, %v8082_v32  ;;  %v9534_v4 = vpop.eup %8085 }
0x1061   :  { %v2548_v46 = vpop.permute.xlu1 %2547 }
0x1062   :  { %7856 = vmatmul.mubr.msk.f32.vlgmr.msra.gmra.mxu1 %vm803_vm3, %v1818_v42  ;;  %7901 = vmatmul.mubr.msk.f32.vlgmr.msra.gmra.mxu0 %vm727_vm2, %v2548_v46  ;;  %v2751_v42 = vld [vmem:[#allocation7 + $0x90] sm:$0xff]  ;;  %v2750_v46 = vld [vmem:[#allocation7 + $0x88] sm:$0xff] }
0x1063   :  { %7859 = vmatpush3.xpose.msk.msra.mxu1 %vm727_vm2, %v9465_v5  ;;  %7860 = vmatprep.mubr.msk.f32.mxu1 %vm8661_vm1, %v8660_v54  ;;  %v2141_v5 = vsel %vm803_vm3, %v9534_v4, 0.0 }
0x1064   :  { %7863 = vmatprep.subr.mxu1 %v8660_v54 }
0x1066   :  { %7861 = vmatmul.mubr.msk.f32.vlgmr.msra.gmra.mxu1 %vm727_vm2, %v9467_v7  ;;  %v2764_v7 = vld [vmem:[#allocation7 + $0xf8] sm:$0xff] }
0x1067   :  { %7865 = vmatprep.mubr.msk.f32.mxu1 %vm8661_vm1, %v8660_v54  ;;  %2799 = vmatprep.subr.mxu0 %v2764_v7  ;;  %v9560_v7 = vadd.f32 %v9475_v12, %v9438_v47  ;;  %v2780_v47 = vld [vmem:[#allocation7 + $0x178] sm:$0xff]  ;;  %v2779_v12 = vld [vmem:[#allocation7 + $0x170] sm:$0xff] }
0x1068   :  { %2800 = vmatpush1.msra.mxu0 %v2763_v49  ;;  %v2738_v49 = vld [vmem:[#allocation7 + $0x28] sm:$0xff] }
0x1069   :  { %2801 = vmatprep.subr.mxu0 %v2762_v44  ;;  %v2737_v44 = vld [vmem:[#allocation7 + $0x20] sm:$0xff] }
0x106a   :  { %2802 = vmatpush1.msra.mxu0 %v2761_v6  ;;  %v2736_v6 = vld [vmem:[#allocation7 + $0x18] sm:$0xff] }
0x106b   :  { %2803 = vmatprep.subr.mxu0 %v2760_v15  ;;  %v2735_v15 = vld [vmem:[#allocation7 + $0x10] sm:$0xff] }
0x106c   :  { %2804 = vmatpush1.msra.mxu0 %v2759_v16  ;;  %v2734_v16 = vld [vmem:[#allocation7 + $0x8] sm:$0xff] }
0x106d   :  { %2805 = vmatprep.subr.mxu0 %v2758_v17  ;;  %v2733_v17 = vld [vmem:[#allocation7] sm:$0xff] }
0x106e   :  { %2806 = vmatpush1.msra.mxu0 %v2757_v18  ;;  %v2778_v18 = vld [vmem:[#allocation7 + $0x168] sm:$0xff] }
0x106f   :  { %2807 = vmatprep.subr.mxu0 %v2756_v21  ;;  %v2777_v21 = vld [vmem:[#allocation7 + $0x160] sm:$0xff] }
0x1070   :  { %2808 = vmatpush1.msra.mxu0 %v2755_v23  ;;  %v2776_v23 = vld [vmem:[#allocation7 + $0x158] sm:$0xff] }
0x1071   :  { %2809 = vmatprep.subr.mxu0 %v2754_v24  ;;  %v2775_v24 = vld [vmem:[#allocation7 + $0x150] sm:$0xff] }
0x1072   :  { %2810 = vmatpush1.msra.mxu0 %v2753_v26  ;;  %v2774_v26 = vld [vmem:[#allocation7 + $0x148] sm:$0xff] }
0x1073   :  { %2811 = vmatprep.subr.mxu0 %v2752_v27  ;;  %v2773_v27 = vld [vmem:[#allocation7 + $0x140] sm:$0xff] }
0x1074   :  { %2812 = vmatpush1.msra.mxu0 %v2751_v42 }
0x1075   :  { %2813 = vmatprep.subr.mxu0 %v2750_v46 }
0x1076   :  { %2814 = vmatpush1.msra.mxu0 %v2749_v48 }
0x1119   :  { %v2296_v51 = vpop.f32.mrf.mxu0 }
0x111a   :  { %v2300_v2 = vsel %vm803_vm3, %v2296_v51, -inf }
0x111b   :  { %v7882_v53 = vpop.f32.mrf.mxu0 }
0x111d   :  { %v2459_v55 = vpop.f32.mrf.mxu0 }
0x111e   :  { %v2463_v57 = vsel %vm803_vm3, %v2459_v55, -inf }
0x111f   :  { %2464 = vmax.xlane.f32.xlu0 %v2463_v57  ;;  %v7892_v43 = vpop.f32.mrf.mxu0  ;;  %v2746_v57 = vld [vmem:[#allocation7 + $0x68] sm:$0xff] }
0x1120   :  { %v2745_v43 = vld [vmem:[#allocation7 + $0x60] sm:$0xff] }
0x1122   :  { %v9529_v50 = vpop.f32.mrf.mxu1  ;;  %v2621_v60 = vpop.f32.mrf.mxu0 }
0x1123   :  { %v2625_v3 = vsel %vm803_vm3, %v2621_v60, -inf }
0x1124   :  { %v7857_v61 = vpop.f32.mrf.mxu1  ;;  %v7902_v62 = vpop.f32.mrf.mxu0 }
0x1125   :  { %v2744_v61 = vld [vmem:[#allocation7 + $0x58] sm:$0xff] }
0x1126   :  { %v1966_v63 = vpop.f32.mrf.mxu1 }
0x1127   :  { %v1970_v0 = vsel %vm803_vm3, %v1966_v63, -inf }
0x1128   :  { %1971 = vmax.xlane.f32.xlu1 %v1970_v0  ;;  %v7862_v1 = vpop.f32.mrf.mxu1  ;;  %v2742_v0 = vld [vmem:[#allocation7 + $0x48] sm:$0xff] }
0x112c   :  { %2301 = vmax.xlane.f32.xlu1 %v2300_v2  ;;  %v2741_v2 = vld [vmem:[#allocation7 + $0x40] sm:$0xff] }
0x1130   :  { %2626 = vmax.xlane.f32.xlu1 %v2625_v3  ;;  %v2740_v3 = vld [vmem:[#allocation7 + $0x38] sm:$0xff] }
0x1134   :  { %2142 = vadd.xlane.f32.xlu1 %v2141_v5  ;;  %v2739_v5 = vld [vmem:[#allocation7 + $0x30] sm:$0xff] }
0x11a8   :  { %v2465_v28 = vpop.xlane.xlu0 %2464 }
0x11a9   :  { %v2466_v8 = vsub.f32 %v2459_v55, %v2465_v28  ;;  %v2747_v55 = vld [vmem:[#allocation7 + $0x70] sm:$0xff] }
0x11aa   :  { %v2771_v28 = vld [vmem:[#allocation7 + $0x130] sm:$0xff] }
0x11ab   :  { %v2467_v20 = vmul.f32 1.442695, %v2466_v8  ;;  %v2770_v8 = vld [vmem:[#allocation7 + $0x128] sm:$0xff] }
0x11ad   :  { %8087 = vpow2.f32 %v2467_v20  ;;  %v2769_v20 = vld [vmem:[#allocation7 + $0x120] sm:$0xff] }
0x11b1   :  { %v1972_v29 = vpop.xlane.xlu1 %1971 }
0x11b2   :  { %v1973_v32 = vsub.f32 %v1966_v63, %v1972_v29  ;;  %v2743_v63 = vld [vmem:[#allocation7 + $0x50] sm:$0xff]  ;;  %v2768_v29 = vld [vmem:[#allocation7 + $0x118] sm:$0xff] }
0x11b4   :  { %v1974_v19 = vmul.f32 1.442695, %v1973_v32 }
0x11b5   :  { %v2302_v30 = vpop.xlane.xlu1 %2301 }
0x11b6   :  { %v2303_v31 = vsub.f32 %v2296_v51, %v2302_v30  ;;  %v2748_v51 = vld [vmem:[#allocation7 + $0x78] sm:$0xff]  ;;  %v2766_v30 = vld [vmem:[#allocation7 + $0x108] sm:$0xff] }
0x11b7   :  { %2815 = vmatprep.subr.mxu0 %v2748_v51 }
0x11b8   :  { %v2304_v33 = vmul.f32 1.442695, %v2303_v31  ;;  %2816 = vmatpush1.msra.mxu0 %v2747_v55  ;;  %v2765_v31 = vld [vmem:[#allocation7 + $0x100] sm:$0xff] }
0x11b9   :  { %v2627_v35 = vpop.xlane.xlu1 %2626  ;;  %2817 = vmatprep.subr.mxu0 %v2746_v57 }
0x11ba   :  { %v9538_v36 = vpop.eup %8087  ;;  %8089 = vpow2.f32 %v2304_v33  ;;  %v2628_v37 = vsub.f32 %v2621_v60, %v2627_v35  ;;  %2818 = vmatpush1.msra.mxu0 %v2745_v43 }
0x11bb   :  { %v2469_v40 = vsel %vm803_vm3, %v9538_v36, 0.0  ;;  %2819 = vmatprep.subr.mxu0 %v2744_v61 }
0x11bc   :  { %v2629_v41 = vmul.f32 1.442695, %v2628_v37  ;;  %2470 = vadd.xlane.f32.xlu1 %v2469_v40  ;;  %2820 = vmatpush1.msra.mxu0 %v2743_v63 }
0x11bd   :  { %2821 = vmatprep.subr.mxu0 %v2742_v0  ;;  %v2143_v32 = vpop.xlane.xlu1 %2142 }
0x11be   :  { %8091 = vpow2.f32 %v2629_v41  ;;  %2822 = vmatpush1.msra.mxu0 %v2741_v2 }
0x11bf   :  { %8093 = vpow2.f32 %v1974_v19  ;;  %2823 = vmatprep.subr.mxu0 %v2740_v3 }
0x11c0   :  { %2824 = vmatpush1.msra.mxu0 %v2739_v5 }
0x11c1   :  { %2825 = vmatprep.subr.mxu0 %v2738_v49 }
0x11c2   :  { %2826 = vmatpush1.msra.mxu0 %v2737_v44 }
0x11c3   :  { %2827 = vmatprep.subr.mxu0 %v2736_v6 }
0x11c4   :  { %2828 = vmatpush1.msra.mxu0 %v2735_v15 }
0x11c5   :  { %2829 = vmatprep.subr.mxu0 %v2734_v16  ;;  %v2781_v16 = vld [vmem:[#allocation8] sm:$0x3] }
0x11c6   :  { %2830 = vmatpush1.msra.mxu0 %v2733_v17  ;;  %v9611_v17 = vrot.slane %v2781_v16, %v9198_v39 }
0x11c7   :  { %v9542_v52 = vpop.eup %8089  ;;  %2847 = vmatprep.subr.mxu0 %v2780_v47 }
0x11c8   :  { %v2306_v53 = vsel %vm803_vm3, %v9542_v52, 0.0  ;;  %2848 = vmatpush2.msra.mxu0 %v2779_v12 }
0x11c9   :  { %2307 = vadd.xlane.f32.xlu0 %v2306_v53  ;;  %2849 = vmatprep.subr.mxu0 %v2778_v18  ;;  %v9615_v18 = vrot.slane %v2781_v16, %v9321_v10 }
0x11ca   :  { %2850 = vmatpush2.msra.mxu0 %v2777_v21  ;;  %v8169_v21 = vld [vmem:[#allocation2 + $0x8] sm:$0xff] }
0x11cb   :  { %v9546_v58 = vpop.eup %8091  ;;  %2851 = vmatprep.subr.mxu0 %v2776_v23 }
0x11cc   :  { %v2631_v60 = vsel %vm803_vm3, %v9546_v58, 0.0  ;;  %v9550_v62 = vpop.eup %8093  ;;  %2852 = vmatpush2.msra.mxu0 %v2775_v24 }
0x11cd   :  { %1982 = vrot.lane.b32.xlu1 %v9484_v22, %s8664_s21  ;;  %2632 = vadd.xlane.f32.xlu0 %v2631_v60  ;;  %v1976_v1 = vsel %vm803_vm3, %v9550_v62, 0.0 }
0x11ce   :  { %2853 = vmatprep.subr.mxu0 %v2774_v26 }
0x11cf   :  { %2854 = vmatpush2.msra.mxu0 %v2773_v27  ;;  %v8170_v27 = vld [vmem:[#allocation2] sm:$0xff] }
0x11d1   :  { %2311 = vrot.lane.b32.xlu1 %v9484_v22, %s8662_s16  ;;  %1977 = vadd.xlane.f32.xlu0 %v1976_v1 }
0x11d5   :  { %2637 = vrot.lane.b32.xlu1 %v9560_v7, %s8664_s21 }
0x11d9   :  { %1714 = vrot.lane.b32.xlu1 %v9412_v13, %s8663_s9  ;;  %v2772_v13 = vld [vmem:[#allocation7 + $0x138] sm:$0xff] }
0x11da   :  { %2855 = vmatprep.subr.mxu0 %v2772_v13 }
0x11db   :  { %2856 = vmatpush2.msra.mxu0 %v2771_v28 }
0x11dc   :  { %2857 = vmatprep.subr.mxu0 %v2770_v8  ;;  %v3040_v8 = vld [vmem:[%s12755_s2 + $0x2d8] sm:$0xff] }
0x11dd   :  { %1718 = vrot.lane.b32.xlu1 %v9429_v14, %s8664_s21  ;;  %v2767_v14 = vld [vmem:[#allocation7 + $0x110] sm:$0xff]  ;;  %2858 = vmatpush2.msra.mxu0 %v2769_v20  ;;  %v3042_v20 = vld [vmem:[%s12755_s2 + $0x2e8] sm:$0xff] }
0x11de   :  { %2859 = vmatprep.subr.mxu0 %v2768_v29  ;;  %v3039_v29 = vld [vmem:[%s12755_s2 + $0x2d0] sm:$0xff] }
0x11df   :  { %2860 = vmatpush2.msra.mxu0 %v2767_v14  ;;  %v3041_v14 = vld [vmem:[%s12755_s2 + $0x2e0] sm:$0xff] }
0x11e0   :  { %2861 = vmatprep.subr.mxu0 %v2766_v30  ;;  %v3034_v30 = vld [vmem:[%s12755_s2 + $0x2a8] sm:$0xff] }
0x11e1   :  { %2862 = vmatpush2.msra.mxu0 %v2765_v31  ;;  %v3036_v31 = vld [vmem:[%s12755_s2 + $0x2b8] sm:$0xff] }
0x11e2   :  { %3208 = vmatprep.subr.mxu0 %v3042_v20  ;;  %v2980_v20 = vld [vmem:[%s12755_s2 + $0xf8] sm:$0xff] }
0x11e7   :  { %2146 = vrot.lane.b32.xlu0 %v9484_v22, %s8663_s9 }
0x11eb   :  { %1710 = vrot.lane.b32.xlu0 %v9390_v56, %s8662_s16 }
0x11ef   :  { %1722 = vrot.lane.b32.xlu0 %v9491_v25, %s8662_s16 }
0x1245   :  { %v2471_v33 = vpop.xlane.xlu1 %2470 }
0x1249   :  { %v1983_v35 = vpop.permute.xlu1 %1982 }
0x124a   :  { %7864 = vmatpush3.msra.mxu1 %v1983_v35  ;;  %v3028_v35 = vld [vmem:[%s12755_s2 + $0x278] sm:$0xff] }
0x124b   :  { %7873 = vmatprep.subr.mxu1 %v8660_v54 }
0x124d   :  { %v2312_v37 = vpop.permute.xlu1 %2311 }
0x1251   :  { %v2638_v41 = vpop.permute.xlu1 %2637 }
0x1252   :  { %v2308_v22 = vpop.xlane.xlu0 %2307 }
0x1255   :  { %v1715_v56 = vpop.permute.xlu1 %1714 }
0x1256   :  { %v2633_v40 = vpop.xlane.xlu0 %2632 }
0x1259   :  { %v1719_v53 = vpop.permute.xlu1 %1718 }
0x125a   :  { %v1978_v19 = vpop.xlane.xlu0 %1977 }
0x125b   :  { %8095 = vrcp.f32 %v1978_v19  ;;  %v3022_v19 = vld [vmem:[%s12755_s2 + $0x248] sm:$0xff] }
0x125c   :  { %8097 = vrcp.f32 %v2143_v32  ;;  %v3033_v32 = vld [vmem:[%s12755_s2 + $0x2a0] sm:$0xff] }
0x125d   :  { %8099 = vrcp.f32 %v2308_v22  ;;  %v3030_v22 = vld [vmem:[%s12755_s2 + $0x288] sm:$0xff] }
0x125e   :  { %v2147_v42 = vpop.permute.xlu0 %2146  ;;  %8101 = vrcp.f32 %v2471_v33  ;;  %v3035_v33 = vld [vmem:[%s12755_s2 + $0x2b0] sm:$0xff] }
0x125f   :  { %8103 = vrcp.f32 %v2633_v40  ;;  %v3029_v40 = vld [vmem:[%s12755_s2 + $0x280] sm:$0xff] }
0x1262   :  { %v1711_v46 = vpop.permute.xlu0 %1710 }
0x1263   :  { %v1725_v25 = vsel %vm727_vm2, %v9372_v34, %v1711_v46  ;;  %v3016_v46 = vld [vmem:[%s12755_s2 + $0x218] sm:$0xff] }
0x1264   :  { %v1726_v48 = vsel %vm488_vm0, %v1725_v25, %v1715_v56  ;;  %v3023_v56 = vld [vmem:[%s12755_s2 + $0x250] sm:$0xff]  ;;  %v3018_v25 = vld [vmem:[%s12755_s2 + $0x228] sm:$0xff] }
0x1265   :  { %v1728_v43 = vsel %vm1727_vm4, %v1726_v48, %v1719_v53  ;;  %v3015_v48 = vld [vmem:[%s12755_s2 + $0x210] sm:$0xff]  ;;  %v3010_v53 = vld [vmem:[%s12755_s2 + $0x1e8] sm:$0xff] }
0x1266   :  { %v1723_v51 = vpop.permute.xlu0 %1722 }
0x1267   :  { %v1729_v55 = vsel %vm727_vm2, %v9454_v59, %v1723_v51  ;;  %v3017_v51 = vld [vmem:[%s12755_s2 + $0x220] sm:$0xff] }
0x1268   :  { %v8096_v57 = vpop.eup %8095  ;;  %7632 = vmatprep.mubr.msk.f32.mxu0 %vm488_vm0, %v1729_v55  ;;  %v3012_v55 = vld [vmem:[%s12755_s2 + $0x1f8] sm:$0xff] }
0x1269   :  { %2864 = vmatmul.mubr.f32.vlgmr.msra.gmra.mxu0 %v1728_v43  ;;  %v1980_v60 = vmul.f32 %v8096_v57, %v9550_v62  ;;  %v8098_v61 = vpop.eup %8097  ;;  %v3009_v57 = vld [vmem:[%s12755_s2 + $0x1e0] sm:$0xff]  ;;  %v3011_v43 = vld [vmem:[%s12755_s2 + $0x1f0] sm:$0xff] }
0x126a   :  { %v2145_v34 = vmul.f32 %v8098_v61, %v9534_v4  ;;  %v8100_v59 = vpop.eup %8099  ;;  %3209 = vmatpush1.msra.mxu0 %v3041_v14  ;;  %v3006_v61 = vld [vmem:[%s12755_s2 + $0x1c8] sm:$0xff]  ;;  %v2979_v14 = vld [vmem:[%s12755_s2 + $0xf0] sm:$0xff] }
0x126b   :  { %7866 = vmatmul.mubr.msk.f32.vlgmr.msra.gmra.mxu1 %vm803_vm3, %v1980_v60  ;;  %v2310_v62 = vmul.f32 %v8100_v59, %v9542_v52  ;;  %v8102_v63 = vpop.eup %8101  ;;  %3210 = vmatprep.subr.mxu0 %v3036_v31  ;;  %v3004_v60 = vld [vmem:[%s12755_s2 + $0x1b8] sm:$0xff]  ;;  %v3005_v59 = vld [vmem:[%s12755_s2 + $0x1c0] sm:$0xff]  ;;  %v2974_v31 = vld [vmem:[%s12755_s2 + $0xc8] sm:$0xff] }
0x126c   :  { %7874 = vmatpush3.msra.mxu1 %v2147_v42  ;;  %7875 = vmatprep.mubr.msk.f32.mxu1 %vm8661_vm1, %v8660_v54  ;;  %v2473_v4 = vmul.f32 %v8102_v63, %v9538_v36  ;;  %v8104_v0 = vpop.eup %8103  ;;  %v3021_v42 = vld [vmem:[%s12755_s2 + $0x240] sm:$0xff]  ;;  %v3000_v63 = vld [vmem:[%s12755_s2 + $0x198] sm:$0xff] }
0x126d   :  { %7883 = vmatprep.subr.mxu1 %v8660_v54  ;;  %v2635_v52 = vmul.f32 %v8104_v0, %v9546_v58  ;;  %3211 = vmatpush1.msra.mxu0 %v3035_v33  ;;  %v2999_v0 = vld [vmem:[%s12755_s2 + $0x190] sm:$0xff]  ;;  %v2973_v33 = vld [vmem:[%s12755_s2 + $0xc0] sm:$0xff] }
0x126e   :  { %3212 = vmatprep.subr.mxu0 %v3030_v22  ;;  %v2968_v22 = vld [vmem:[%s12755_s2 + $0x98] sm:$0xff] }
0x126f   :  { %7876 = vmatmul.mubr.msk.f32.vlgmr.msra.gmra.mxu1 %vm803_vm3, %v2145_v34  ;;  %3213 = vmatpush1.msra.mxu0 %v3029_v40  ;;  %v3003_v34 = vld [vmem:[%s12755_s2 + $0x1b0] sm:$0xff] }
0x1270   :  { %7884 = vmatpush3.msra.mxu1 %v2312_v37  ;;  %7885 = vmatprep.mubr.msk.f32.mxu1 %vm8661_vm1, %v8660_v54  ;;  %v3027_v37 = vld [vmem:[%s12755_s2 + $0x270] sm:$0xff] }
0x1271   :  { %7893 = vmatprep.subr.mxu1 %v8660_v54  ;;  %v2967_v40 = vld [vmem:[%s12755_s2 + $0x90] sm:$0xff] }
0x1273   :  { %7886 = vmatmul.mubr.msk.f32.vlgmr.msra.gmra.mxu1 %vm803_vm3, %v2310_v62  ;;  %v2998_v62 = vld [vmem:[%s12755_s2 + $0x188] sm:$0xff] }
0x1274   :  { %7894 = vmatpush3.msra.mxu1 %v9560_v7  ;;  %7895 = vmatprep.mubr.msk.f32.mxu1 %vm8661_vm1, %v8660_v54 }
0x1275   :  { %7903 = vmatprep.subr.mxu1 %v8660_v54 }
0x1277   :  { %7896 = vmatmul.mubr.msk.f32.vlgmr.msra.gmra.mxu1 %vm803_vm3, %v2473_v4  ;;  %v2997_v4 = vld [vmem:[%s12755_s2 + $0x180] sm:$0xff] }
0x1278   :  { %7904 = vmatpush3.msra.mxu1 %v2638_v41  ;;  %7905 = vmatprep.mubr.msk.f32.mxu1 %vm8661_vm1, %v8660_v54  ;;  %v3024_v41 = vld [vmem:[%s12755_s2 + $0x258] sm:$0xff] }
0x1279   :  { %3131 = vmatprep.subr.mxu1 %v3040_v8  ;;  %3214 = vmatprep.subr.mxu0 %v3024_v41  ;;  %v2987_v8 = vld [vmem:[%s12755_s2 + $0x130] sm:$0xff]  ;;  %v2962_v41 = vld [vmem:[%s12755_s2 + $0x68] sm:$0xff] }
0x127a   :  { %3215 = vmatpush1.msra.mxu0 %v3023_v56  ;;  %v2961_v56 = vld [vmem:[%s12755_s2 + $0x60] sm:$0xff] }
0x127b   :  { %7906 = vmatmul.mubr.msk.f32.vlgmr.msra.gmra.mxu1 %vm803_vm3, %v2635_v52  ;;  %3216 = vmatprep.subr.mxu0 %v3018_v25  ;;  %v2956_v25 = vld [vmem:[%s12755_s2 + $0x38] sm:$0xff] }
0x127c   :  { %3132 = vmatpush1.msra.mxu1 %v3039_v29  ;;  %3217 = vmatpush1.msra.mxu0 %v3017_v51  ;;  %v2982_v29 = vld [vmem:[%s12755_s2 + $0x108] sm:$0xff]  ;;  %v2955_v51 = vld [vmem:[%s12755_s2 + $0x30] sm:$0xff] }
0x127d   :  { %3133 = vmatprep.subr.mxu1 %v3034_v30  ;;  %3218 = vmatprep.subr.mxu0 %v3012_v55  ;;  %v2981_v30 = vld [vmem:[%s12755_s2 + $0x100] sm:$0xff]  ;;  %v2950_v55 = vld [vmem:[%s12755_s2 + $0x8] sm:$0xff] }
0x127e   :  { %3134 = vmatpush1.msra.mxu1 %v3033_v32  ;;  %3219 = vmatpush1.msra.mxu0 %v3011_v43  ;;  %v2976_v32 = vld [vmem:[%s12755_s2 + $0xd8] sm:$0xff]  ;;  %v2949_v43 = vld [vmem:[%s12755_s2] sm:$0xff] }
0x127f   :  { %3135 = vmatprep.subr.mxu1 %v3028_v35  ;;  %3220 = vmatprep.subr.mxu0 %v3006_v61  ;;  %v2975_v35 = vld [vmem:[%s12755_s2 + $0xd0] sm:$0xff]  ;;  %v3088_v61 = vld [vmem:[%s12755_s2 + $0x458] sm:$0xff] }
0x1280   :  { %3136 = vmatpush1.msra.mxu1 %v3027_v37  ;;  %3221 = vmatpush1.msra.mxu0 %v3005_v59  ;;  %v2970_v37 = vld [vmem:[%s12755_s2 + $0xa8] sm:$0xff]  ;;  %v3087_v59 = vld [vmem:[%s12755_s2 + $0x450] sm:$0xff] }
0x1281   :  { %3137 = vmatprep.subr.mxu1 %v3022_v19  ;;  %3222 = vmatprep.subr.mxu0 %v3000_v63  ;;  %v2969_v19 = vld [vmem:[%s12755_s2 + $0xa0] sm:$0xff]  ;;  %v3082_v63 = vld [vmem:[%s12755_s2 + $0x428] sm:$0xff] }
0x1282   :  { %3138 = vmatpush1.msra.mxu1 %v3021_v42  ;;  %3223 = vmatpush1.msra.mxu0 %v2999_v0  ;;  %v2964_v42 = vld [vmem:[%s12755_s2 + $0x78] sm:$0xff]  ;;  %v3081_v0 = vld [vmem:[%s12755_s2 + $0x420] sm:$0xff] }
0x1283   :  { %3139 = vmatprep.subr.mxu1 %v3016_v46  ;;  %v2963_v46 = vld [vmem:[%s12755_s2 + $0x70] sm:$0xff] }
0x1284   :  { %3140 = vmatpush1.msra.mxu1 %v3015_v48  ;;  %v2958_v48 = vld [vmem:[%s12755_s2 + $0x48] sm:$0xff] }
0x1285   :  { %3141 = vmatprep.subr.mxu1 %v3010_v53  ;;  %v2957_v53 = vld [vmem:[%s12755_s2 + $0x40] sm:$0xff] }
0x1286   :  { %3142 = vmatpush1.msra.mxu1 %v3009_v57  ;;  %v2952_v57 = vld [vmem:[%s12755_s2 + $0x18] sm:$0xff] }
0x1287   :  { %3143 = vmatprep.subr.mxu1 %v3004_v60  ;;  %v2951_v60 = vld [vmem:[%s12755_s2 + $0x10] sm:$0xff] }
0x1288   :  { %3144 = vmatpush1.msra.mxu1 %v3003_v34  ;;  %v3090_v34 = vld [vmem:[%s12755_s2 + $0x468] sm:$0xff] }
0x1289   :  { %3145 = vmatprep.subr.mxu1 %v2998_v62  ;;  %v3089_v62 = vld [vmem:[%s12755_s2 + $0x460] sm:$0xff] }
0x128a   :  { %3146 = vmatpush1.msra.mxu1 %v2997_v4  ;;  %v3084_v4 = vld [vmem:[%s12755_s2 + $0x438] sm:$0xff] }
0x1329   :  { %v2865_v15 = vpop.f32.mrf.mxu0 }
0x132a   :  { %v2866_v24 = vadd.f32 %v2865_v15, %v9615_v18 }
0x132b   :  { %v2054_v1 = vpop.f32.mrf.mxu1  ;;  %v2867_v47 = vpop.f32.mrf.mxu0 }
0x132c   :  { %2714 = vrot.lane.b32.xlu0 %v2054_v1, %s8662_s16  ;;  %v2868_v12 = vadd.f32 %v2867_v47, %v9611_v17  ;;  %v9622_v13 = vadd.f32 %v8170_v27, %v2866_v24  ;;  %v2994_v24 = vld [vmem:[%s12755_s2 + $0x168] sm:$0xff] }
0x132d   :  { %v7867_v2 = vpop.f32.mrf.mxu1  ;;  %3224 = vmatprep.subr.mxu0 %v2994_v24  ;;  %v2986_v27 = vld [vmem:[%s12755_s2 + $0x128] sm:$0xff]  ;;  %v3057_v24 = vld [vmem:[%s12755_s2 + $0x360] sm:$0xff] }
0x132e   :  { %v9617_v23 = vadd.f32 %v8169_v21, %v2868_v12  ;;  %v2992_v21 = vld [vmem:[%s12755_s2 + $0x158] sm:$0xff] }
0x132f   :  { %v2218_v3 = vpop.f32.mrf.mxu1  ;;  %3147 = vmatprep.subr.mxu1 %v2992_v21  ;;  %v3060_v21 = vld [vmem:[%s12755_s2 + $0x378] sm:$0xff] }
0x1330   :  { %2718 = vrot.lane.b32.xlu1 %v2218_v3, %s8663_s9  ;;  %v2882_v26 = vsel %vm488_vm0, %v9617_v23, 0.0 }
0x1331   :  { %v7877_v5 = vpop.f32.mrf.mxu1  ;;  %v2883_v28 = vadd.f32 %v2882_v26, %v9622_v13  ;;  %v2993_v26 = vld [vmem:[%s12755_s2 + $0x160] sm:$0xff] }
0x1332   :  { %3225 = vmatpush1.msra.mxu0 %v2993_v26  ;;  %v3052_v26 = vld [vmem:[%s12755_s2 + $0x338] sm:$0xff] }
0x1333   :  { %v2383_v36 = vpop.f32.mrf.mxu1 }
0x1334   :  { %2722 = vrot.lane.b32.xlu1 %v2383_v36, %s8664_s21 }
0x1335   :  { %v7887_v7 = vpop.f32.mrf.mxu1 }
0x1337   :  { %v9607_v49 = vpop.f32.mrf.mxu1 }
0x1339   :  { %v7897_v44 = vpop.f32.mrf.mxu1 }
0x133b   :  { %v2709_v6 = vpop.f32.mrf.mxu1 }
0x133c   :  { %2726 = vrot.lane.b32.xlu0 %v2709_v6, %s8662_s16 }
0x133d   :  { %v7907_v58 = vpop.f32.mrf.mxu1 }
0x135b   :  { %2884 = vadd.xlane.f32.xlu0 %v2883_v28  ;;  %v2985_v28 = vld [vmem:[%s12755_s2 + $0x120] sm:$0xff] }
0x139e   :  { %v2715_v1 = vpop.permute.xlu0 %2714 }
0x139f   :  { %v2729_v3 = vsel %vm727_vm2, %v9529_v50, %v2715_v1  ;;  %v3076_v1 = vld [vmem:[%s12755_s2 + $0x3f8] sm:$0xff] }
0x13a2   :  { %v2719_v52 = vpop.permute.xlu1 %2718 }
0x13a3   :  { %v2730_v36 = vsel %vm488_vm0, %v2729_v3, %v2719_v52  ;;  %v3083_v52 = vld [vmem:[%s12755_s2 + $0x430] sm:$0xff] }
0x13a4   :  { %v3075_v3 = vld [vmem:[%s12755_s2 + $0x3f0] sm:$0xff] }
0x13a6   :  { %v2723_v2 = vpop.permute.xlu1 %2722 }
0x13a7   :  { %v2731_v44 = vsel %vm1727_vm4, %v2730_v36, %v2723_v2  ;;  %v3078_v2 = vld [vmem:[%s12755_s2 + $0x408] sm:$0xff] }
0x13a8   :  { %v3070_v36 = vld [vmem:[%s12755_s2 + $0x3c8] sm:$0xff] }
0x13ae   :  { %v2727_v5 = vpop.permute.xlu0 %2726 }
0x13af   :  { %v2732_v7 = vsel %vm727_vm2, %v9607_v49, %v2727_v5  ;;  %v3077_v5 = vld [vmem:[%s12755_s2 + $0x400] sm:$0xff] }
0x13b0   :  { %7633 = vmatprep.mubr.msk.f32.mxu0 %vm488_vm0, %v2732_v7  ;;  %v3072_v7 = vld [vmem:[%s12755_s2 + $0x3d8] sm:$0xff] }
0x13b1   :  { %2870 = vmatmul.mubr.f32.gmra.mxu0 %v2731_v44  ;;  %v3069_v44 = vld [vmem:[%s12755_s2 + $0x3c0] sm:$0xff] }
0x13e4   :  { %v2885_v6 = vpop.xlane.xlu0 %2884 }
0x13e5   :  { %v2891_v58 = vmul.f32 0.0052083335, %v2885_v6  ;;  %v3071_v6 = vld [vmem:[%s12755_s2 + $0x3d0] sm:$0xff] }
0x13e7   :  { %v9729_v15 = vsub.f32 %v9622_v13, %v2891_v58  ;;  %v9732_v16 = vsub.f32 %v9617_v23, %v2891_v58  ;;  %v2991_v23 = vld [vmem:[%s12755_s2 + $0x150] sm:$0xff]  ;;  %v2988_v13 = vld [vmem:[%s12755_s2 + $0x138] sm:$0xff] }
0x13e8   :  { %3148 = vmatpush1.msra.mxu1 %v2991_v23  ;;  %3226 = vmatprep.subr.mxu0 %v2988_v13  ;;  %v3064_v58 = vld [vmem:[%s12755_s2 + $0x398] sm:$0xff]  ;;  %v3059_v23 = vld [vmem:[%s12755_s2 + $0x370] sm:$0xff] }
0x13e9   :  { %v2897_v50 = vmul.f32 %v9729_v15, %v9729_v15  ;;  %v2898_v47 = vmul.f32 %v9732_v16, %v9732_v16  ;;  %3149 = vmatprep.subr.mxu1 %v2986_v27  ;;  %3227 = vmatpush1.msra.mxu0 %v2987_v8  ;;  %v3054_v27 = vld [vmem:[%s12755_s2 + $0x348] sm:$0xff]  ;;  %v3051_v13 = vld [vmem:[%s12755_s2 + $0x330] sm:$0xff] }
0x13ea   :  { %3150 = vmatpush1.msra.mxu1 %v2985_v28  ;;  %3228 = vmatprep.subr.mxu0 %v2982_v29  ;;  %v3053_v28 = vld [vmem:[%s12755_s2 + $0x340] sm:$0xff]  ;;  %v3046_v8 = vld [vmem:[%s12755_s2 + $0x308] sm:$0xff] }
0x13eb   :  { %v2901_v49 = vsel %vm488_vm0, %v2898_v47, 0.0  ;;  %3151 = vmatprep.subr.mxu1 %v2980_v20  ;;  %3229 = vmatpush1.msra.mxu0 %v2981_v30  ;;  %v3063_v47 = vld [vmem:[%s12755_s2 + $0x390] sm:$0xff]  ;;  %v3048_v20 = vld [vmem:[%s12755_s2 + $0x318] sm:$0xff]  ;;  %v3045_v29 = vld [vmem:[%s12755_s2 + $0x300] sm:$0xff] }
0x13ec   :  { %v2902_v12 = vadd.f32 %v2901_v49, %v2897_v50  ;;  %3152 = vmatpush1.msra.mxu1 %v2979_v14  ;;  %3230 = vmatprep.subr.mxu0 %v2976_v32  ;;  %v3066_v50 = vld [vmem:[%s12755_s2 + $0x3a8] sm:$0xff]  ;;  %v3065_v49 = vld [vmem:[%s12755_s2 + $0x3a0] sm:$0xff]  ;;  %v3047_v14 = vld [vmem:[%s12755_s2 + $0x310] sm:$0xff] }
0x13ed   :  { %3153 = vmatprep.subr.mxu1 %v2974_v31  ;;  %3231 = vmatpush1.msra.mxu0 %v2975_v35  ;;  %v8171_v35 = vld [vmem:[#allocation2 + $0x18] sm:$0xff] }
0x13ee   :  { %2903 = vadd.xlane.f32.xlu0 %v2902_v12  ;;  %3154 = vmatpush1.msra.mxu1 %v2973_v33  ;;  %v3058_v12 = vld [vmem:[%s12755_s2 + $0x368] sm:$0xff] }
0x13ef   :  { %3155 = vmatprep.subr.mxu1 %v2968_v22  ;;  %3232 = vmatprep.subr.mxu0 %v2970_v37  ;;  %v8172_v37 = vld [vmem:[#allocation2 + $0x10] sm:$0xff] }
0x13f0   :  { %3156 = vmatpush1.msra.mxu1 %v2967_v40  ;;  %3233 = vmatpush1.msra.mxu0 %v2969_v19 }
0x13f1   :  { %3157 = vmatprep.subr.mxu1 %v2962_v41  ;;  %3234 = vmatprep.subr.mxu0 %v2964_v42 }
0x13f2   :  { %3158 = vmatpush1.msra.mxu1 %v2961_v56  ;;  %3235 = vmatpush1.msra.mxu0 %v2963_v46 }
0x13f3   :  { %3159 = vmatprep.subr.mxu1 %v2956_v25  ;;  %3236 = vmatprep.subr.mxu0 %v2958_v48  ;;  %v2881_v25 = vld [vmem:[#allocation14] sm:$0x3] }
0x13f4   :  { %3160 = vmatpush1.msra.mxu1 %v2955_v51  ;;  %3237 = vmatpush1.msra.mxu0 %v2957_v53 }
0x13f5   :  { %3161 = vmatprep.subr.mxu1 %v2950_v55  ;;  %3238 = vmatprep.subr.mxu0 %v2952_v57  ;;  %v9948_v55 = vrot.slane %v2881_v25, %v9198_v39 }
0x13f6   :  { %3162 = vmatpush1.msra.mxu1 %v2949_v43  ;;  %3239 = vmatpush1.msra.mxu0 %v2951_v60  ;;  %v9952_v43 = vrot.slane %v2881_v25, %v9321_v10  ;;  %v3381_v25 = vld [vmem:[%s12756_s15 + $0x38] sm:$0xff] }
0x13f7   :  { %3179 = vmatprep.subr.mxu1 %v3088_v61  ;;  %3256 = vmatprep.subr.mxu0 %v3090_v34 }
0x13f8   :  { %3180 = vmatpush2.msra.mxu1 %v3087_v59  ;;  %3257 = vmatpush2.msra.mxu0 %v3089_v62  ;;  %v3403_v62 = vld [vmem:[%s12756_s15 + $0xe8] sm:$0xff] }
0x13f9   :  { %3181 = vmatprep.subr.mxu1 %v3082_v63  ;;  %3258 = vmatprep.subr.mxu0 %v3084_v4  ;;  %v3402_v63 = vld [vmem:[%s12756_s15 + $0xe0] sm:$0xff]  ;;  %v3401_v4 = vld [vmem:[%s12756_s15 + $0xd8] sm:$0xff] }
0x13fa   :  { %3182 = vmatpush2.msra.mxu1 %v3081_v0  ;;  %3259 = vmatpush2.msra.mxu0 %v3083_v52  ;;  %v3400_v0 = vld [vmem:[%s12756_s15 + $0xd0] sm:$0xff]  ;;  %v3399_v52 = vld [vmem:[%s12756_s15 + $0xc8] sm:$0xff] }
0x13fb   :  { %3183 = vmatprep.subr.mxu1 %v3076_v1  ;;  %3260 = vmatprep.subr.mxu0 %v3078_v2  ;;  %v3398_v1 = vld [vmem:[%s12756_s15 + $0xc0] sm:$0xff]  ;;  %v3044_v2 = vld [vmem:[%s12755_s2 + $0x2f8] sm:$0xff] }
0x13fc   :  { %3184 = vmatpush2.msra.mxu1 %v3075_v3  ;;  %3261 = vmatpush2.msra.mxu0 %v3077_v5  ;;  %v3043_v3 = vld [vmem:[%s12755_s2 + $0x2f0] sm:$0xff]  ;;  %v3397_v5 = vld [vmem:[%s12756_s15 + $0xb8] sm:$0xff] }
0x13fd   :  { %3185 = vmatprep.subr.mxu1 %v3070_v36  ;;  %3262 = vmatprep.subr.mxu0 %v3072_v7  ;;  %v3038_v36 = vld [vmem:[%s12755_s2 + $0x2c8] sm:$0xff]  ;;  %v3396_v7 = vld [vmem:[%s12756_s15 + $0xb0] sm:$0xff] }
0x13fe   :  { %3186 = vmatpush2.msra.mxu1 %v3069_v44  ;;  %3263 = vmatpush2.msra.mxu0 %v3071_v6  ;;  %v3037_v44 = vld [vmem:[%s12755_s2 + $0x2c0] sm:$0xff]  ;;  %v3032_v6 = vld [vmem:[%s12755_s2 + $0x298] sm:$0xff] }
0x13ff   :  { %3187 = vmatprep.subr.mxu1 %v3064_v58  ;;  %3264 = vmatprep.subr.mxu0 %v3066_v50  ;;  %v3395_v58 = vld [vmem:[%s12756_s15 + $0xa8] sm:$0xff]  ;;  %v3031_v50 = vld [vmem:[%s12755_s2 + $0x290] sm:$0xff] }
0x1400   :  { %3188 = vmatpush2.msra.mxu1 %v3063_v47  ;;  %3265 = vmatpush2.msra.mxu0 %v3065_v49  ;;  %v3394_v47 = vld [vmem:[%s12756_s15 + $0xa0] sm:$0xff]  ;;  %v3026_v49 = vld [vmem:[%s12755_s2 + $0x268] sm:$0xff] }
0x1401   :  { %3189 = vmatprep.subr.mxu1 %v3058_v12  ;;  %3266 = vmatprep.subr.mxu0 %v3060_v21  ;;  %v3393_v12 = vld [vmem:[%s12756_s15 + $0x98] sm:$0xff]  ;;  %v3025_v21 = vld [vmem:[%s12755_s2 + $0x260] sm:$0xff] }
0x1402   :  { %3190 = vmatpush2.msra.mxu1 %v3057_v24  ;;  %3267 = vmatpush2.msra.mxu0 %v3059_v23  ;;  %v3392_v24 = vld [vmem:[%s12756_s15 + $0x90] sm:$0xff]  ;;  %v3020_v23 = vld [vmem:[%s12755_s2 + $0x238] sm:$0xff] }
0x1403   :  { %3191 = vmatprep.subr.mxu1 %v3052_v26  ;;  %3268 = vmatprep.subr.mxu0 %v3054_v27  ;;  %v3391_v26 = vld [vmem:[%s12756_s15 + $0x88] sm:$0xff]  ;;  %v3019_v27 = vld [vmem:[%s12755_s2 + $0x230] sm:$0xff] }
0x1404   :  { %3192 = vmatpush2.msra.mxu1 %v3051_v13  ;;  %3269 = vmatpush2.msra.mxu0 %v3053_v28  ;;  %v3390_v13 = vld [vmem:[%s12756_s15 + $0x80] sm:$0xff]  ;;  %v3014_v28 = vld [vmem:[%s12755_s2 + $0x208] sm:$0xff] }
0x1405   :  { %3193 = vmatprep.subr.mxu1 %v3046_v8  ;;  %3270 = vmatprep.subr.mxu0 %v3048_v20  ;;  %v3389_v8 = vld [vmem:[%s12756_s15 + $0x78] sm:$0xff]  ;;  %v3013_v20 = vld [vmem:[%s12755_s2 + $0x200] sm:$0xff] }
0x1406   :  { %3194 = vmatpush2.msra.mxu1 %v3045_v29  ;;  %3271 = vmatpush2.msra.mxu0 %v3047_v14  ;;  %v3388_v29 = vld [vmem:[%s12756_s15 + $0x70] sm:$0xff]  ;;  %v3008_v14 = vld [vmem:[%s12755_s2 + $0x1d8] sm:$0xff] }
0x1407   :  { %3285 = vmatprep.subr.mxu1 %v3044_v2 }
0x1471   :  { %v2871_v30 = vpop.f32.mrf.mxu0 }
0x1472   :  { %v2872_v31 = vadd.f32 %v2871_v30, %v9615_v18  ;;  %v2880_v18 = vld [vmem:[#allocation13] sm:$0x3]  ;;  %v3387_v30 = vld [vmem:[%s12756_s15 + $0x68] sm:$0xff] }
0x1473   :  { %v2873_v32 = vpop.f32.mrf.mxu0  ;;  %v9944_v48 = vrot.slane %v2880_v18, %v9321_v10 }
0x1474   :  { %v2874_v33 = vadd.f32 %v2873_v32, %v9611_v17  ;;  %v9935_v40 = vadd.f32 %v8172_v37, %v2872_v31  ;;  %v9941_v17 = vrot.slane %v2880_v18, %v9198_v39  ;;  %v3007_v31 = vld [vmem:[%s12755_s2 + $0x1d0] sm:$0xff]  ;;  %v3386_v32 = vld [vmem:[%s12756_s15 + $0x60] sm:$0xff]  ;;  %v2990_v18 = vld [vmem:[%s12755_s2 + $0x148] sm:$0xff] }
0x1475   :  { %v3001_v37 = vld [vmem:[%s12755_s2 + $0x1a0] sm:$0xff] }
0x1476   :  { %v9933_v22 = vadd.f32 %v8171_v35, %v2874_v33  ;;  %v3002_v33 = vld [vmem:[%s12755_s2 + $0x1a8] sm:$0xff]  ;;  %v3385_v35 = vld [vmem:[%s12756_s15 + $0x58] sm:$0xff] }
0x1477   :  { %v2904_v19 = vpop.xlane.xlu0 %2903 }
0x1478   :  { %v2909_v41 = vmul.f32 0.0052083335, %v2904_v19  ;;  %v2886_v42 = vsel %vm488_vm0, %v9933_v22, 0.0  ;;  %v3384_v19 = vld [vmem:[%s12756_s15 + $0x50] sm:$0xff] }
0x1479   :  { %v2887_v56 = vadd.f32 %v2886_v42, %v9935_v40  ;;  %v3383_v42 = vld [vmem:[%s12756_s15 + $0x48] sm:$0xff] }
0x147a   :  { %v2911_v46 = vadd.f32 1e-05, %v2909_v41  ;;  %v2996_v41 = vld [vmem:[%s12755_s2 + $0x178] sm:$0xff] }
0x147b   :  { %2888 = vadd.xlane.f32.xlu1 %v2887_v56  ;;  %v2995_v56 = vld [vmem:[%s12755_s2 + $0x170] sm:$0xff] }
0x147c   :  { %8105 = vrsqrt.f32 %v2911_v46  ;;  %v3382_v46 = vld [vmem:[%s12756_s15 + $0x40] sm:$0xff] }
0x1489   :  { %v8106_v51 = vpop.eup %8105 }
0x148a   :  { %v2916_v53 = vmul.f32 %v8106_v51, %v9732_v16  ;;  %v2915_v57 = vmul.f32 %v8106_v51, %v9729_v15  ;;  %v3405_v15 = vld [vmem:[%s12756_s15 + $0xf8] sm:$0xff]  ;;  %v3404_v16 = vld [vmem:[%s12756_s15 + $0xf0] sm:$0xff]  ;;  %v2989_v51 = vld [vmem:[%s12755_s2 + $0x140] sm:$0xff] }
0x148b   :  { %3578 = vmatprep.subr.mxu0 %v3405_v15  ;;  %v3376_v15 = vld [vmem:[%s12756_s15 + $0x10] sm:$0xff] }
0x148c   :  { %v2931_v60 = vmul.f32 %v9941_v17, %v2916_v53  ;;  %v2930_v61 = vmul.f32 %v9944_v48, %v2915_v57  ;;  %v3380_v53 = vld [vmem:[%s12756_s15 + $0x30] sm:$0xff]  ;;  %v3379_v57 = vld [vmem:[%s12756_s15 + $0x28] sm:$0xff] }
0x148e   :  { %v9957_v34 = vadd.f32 %v9948_v55, %v2931_v60  ;;  %v9960_v59 = vadd.f32 %v9952_v43, %v2930_v61  ;;  %v3378_v60 = vld [vmem:[%s12756_s15 + $0x20] sm:$0xff]  ;;  %v3377_v61 = vld [vmem:[%s12756_s15 + $0x18] sm:$0xff] }
0x1490   :  { %7634 = vmatprep.mubr.msk.f32.mxu1 %vm488_vm0, %v9957_v34  ;;  %7636 = vmatprep.mubr.msk.f32.mxu0 %vm488_vm0, %v9957_v34 }
0x1491   :  { %3196 = vmatmul.mubr.f32.vlgmr.msra.gmra.mxu1 %v9960_v59  ;;  %3273 = vmatmul.mubr.f32.vlgmr.msra.gmra.mxu0 %v9960_v59 }
0x1492   :  { %3579 = vmatpush1.msra.mxu0 %v3404_v16  ;;  %3286 = vmatpush1.msra.mxu1 %v3043_v3  ;;  %v3375_v16 = vld [vmem:[%s12756_s15 + $0x8] sm:$0xff] }
0x1493   :  { %3580 = vmatprep.subr.mxu0 %v3403_v62  ;;  %3287 = vmatprep.subr.mxu1 %v3038_v36  ;;  %v3374_v62 = vld [vmem:[%s12756_s15] sm:$0xff] }
0x1494   :  { %3581 = vmatpush1.msra.mxu0 %v3402_v63  ;;  %3288 = vmatpush1.msra.mxu1 %v3037_v44  ;;  %v3437_v63 = vld [vmem:[%s12756_s15 + $0x1f8] sm:$0xff] }
0x1495   :  { %3582 = vmatprep.subr.mxu0 %v3401_v4  ;;  %3289 = vmatprep.subr.mxu1 %v3032_v6  ;;  %v3436_v4 = vld [vmem:[%s12756_s15 + $0x1f0] sm:$0xff]  ;;  %v2984_v6 = vld [vmem:[%s12755_s2 + $0x118] sm:$0xff] }
0x1496   :  { %3583 = vmatpush1.msra.mxu0 %v3400_v0  ;;  %3290 = vmatpush1.msra.mxu1 %v3031_v50  ;;  %v3435_v0 = vld [vmem:[%s12756_s15 + $0x1e8] sm:$0xff] }
0x1497   :  { %3584 = vmatprep.subr.mxu0 %v3399_v52  ;;  %3291 = vmatprep.subr.mxu1 %v3026_v49  ;;  %v2978_v50 = vld [vmem:[%s12755_s2 + $0xe8] sm:$0xff]  ;;  %v2977_v49 = vld [vmem:[%s12755_s2 + $0xe0] sm:$0xff] }
0x1498   :  { %3585 = vmatpush1.msra.mxu0 %v3398_v1  ;;  %3292 = vmatpush1.msra.mxu1 %v3025_v21  ;;  %v2972_v21 = vld [vmem:[%s12755_s2 + $0xb8] sm:$0xff] }
0x1499   :  { %3586 = vmatprep.subr.mxu0 %v3397_v5  ;;  %3293 = vmatprep.subr.mxu1 %v3020_v23  ;;  %v2971_v23 = vld [vmem:[%s12755_s2 + $0xb0] sm:$0xff] }
0x149a   :  { %3587 = vmatpush1.msra.mxu0 %v3396_v7  ;;  %3294 = vmatpush1.msra.mxu1 %v3019_v27  ;;  %v2966_v27 = vld [vmem:[%s12755_s2 + $0x88] sm:$0xff] }
0x149b   :  { %3588 = vmatprep.subr.mxu0 %v3395_v58  ;;  %3295 = vmatprep.subr.mxu1 %v3014_v28  ;;  %v3433_v58 = vld [vmem:[%s12756_s15 + $0x1d8] sm:$0xff]  ;;  %v2965_v28 = vld [vmem:[%s12755_s2 + $0x80] sm:$0xff] }
0x149c   :  { %3589 = vmatpush1.msra.mxu0 %v3394_v47  ;;  %3296 = vmatpush1.msra.mxu1 %v3013_v20  ;;  %v3432_v47 = vld [vmem:[%s12756_s15 + $0x1d0] sm:$0xff]  ;;  %v2960_v20 = vld [vmem:[%s12755_s2 + $0x58] sm:$0xff] }
0x149d   :  { %3590 = vmatprep.subr.mxu0 %v3393_v12  ;;  %3297 = vmatprep.subr.mxu1 %v3008_v14  ;;  %v3431_v12 = vld [vmem:[%s12756_s15 + $0x1c8] sm:$0xff]  ;;  %v2959_v14 = vld [vmem:[%s12755_s2 + $0x50] sm:$0xff] }
0x149e   :  { %3591 = vmatpush1.msra.mxu0 %v3392_v24  ;;  %3298 = vmatpush1.msra.mxu1 %v3007_v31  ;;  %v3430_v24 = vld [vmem:[%s12756_s15 + $0x1c0] sm:$0xff]  ;;  %v2954_v31 = vld [vmem:[%s12755_s2 + $0x28] sm:$0xff] }
0x149f   :  { %3592 = vmatprep.subr.mxu0 %v3391_v26  ;;  %3299 = vmatprep.subr.mxu1 %v3002_v33  ;;  %v3429_v26 = vld [vmem:[%s12756_s15 + $0x1b8] sm:$0xff]  ;;  %v2953_v33 = vld [vmem:[%s12755_s2 + $0x20] sm:$0xff] }
0x14a0   :  { %3593 = vmatpush1.msra.mxu0 %v3390_v13  ;;  %3300 = vmatpush1.msra.mxu1 %v3001_v37  ;;  %v3428_v13 = vld [vmem:[%s12756_s15 + $0x1b0] sm:$0xff]  ;;  %v3092_v37 = vld [vmem:[%s12755_s2 + $0x478] sm:$0xff] }
0x14a1   :  { %3594 = vmatprep.subr.mxu0 %v3389_v8  ;;  %3301 = vmatprep.subr.mxu1 %v2996_v41  ;;  %v3427_v8 = vld [vmem:[%s12756_s15 + $0x1a8] sm:$0xff]  ;;  %v3091_v41 = vld [vmem:[%s12755_s2 + $0x470] sm:$0xff] }
0x14a2   :  { %3595 = vmatpush1.msra.mxu0 %v3388_v29  ;;  %3302 = vmatpush1.msra.mxu1 %v2995_v56  ;;  %v3426_v29 = vld [vmem:[%s12756_s15 + $0x1a0] sm:$0xff]  ;;  %v3086_v56 = vld [vmem:[%s12755_s2 + $0x448] sm:$0xff] }
0x14a3   :  { %3596 = vmatprep.subr.mxu0 %v3387_v30  ;;  %3303 = vmatprep.subr.mxu1 %v2990_v18  ;;  %v3425_v30 = vld [vmem:[%s12756_s15 + $0x198] sm:$0xff]  ;;  %v3085_v18 = vld [vmem:[%s12755_s2 + $0x440] sm:$0xff] }
0x14a4   :  { %3597 = vmatpush1.msra.mxu0 %v3386_v32  ;;  %3304 = vmatpush1.msra.mxu1 %v2989_v51  ;;  %v3424_v32 = vld [vmem:[%s12756_s15 + $0x190] sm:$0xff]  ;;  %v3080_v51 = vld [vmem:[%s12755_s2 + $0x418] sm:$0xff] }
0x14a5   :  { %3598 = vmatprep.subr.mxu0 %v3385_v35  ;;  %3305 = vmatprep.subr.mxu1 %v2984_v6  ;;  %v3423_v35 = vld [vmem:[%s12756_s15 + $0x188] sm:$0xff]  ;;  %v3410_v6 = vld [vmem:[%s12756_s15 + $0x120] sm:$0xff] }
0x14a6   :  { %3599 = vmatpush1.msra.mxu0 %v3384_v19  ;;  %v3422_v19 = vld [vmem:[%s12756_s15 + $0x180] sm:$0xff] }
0x14a7   :  { %3600 = vmatprep.subr.mxu0 %v3383_v42  ;;  %v3421_v42 = vld [vmem:[%s12756_s15 + $0x178] sm:$0xff] }
0x14a8   :  { %3601 = vmatpush1.msra.mxu0 %v3382_v46  ;;  %v3420_v46 = vld [vmem:[%s12756_s15 + $0x170] sm:$0xff] }
0x14a9   :  { %3602 = vmatprep.subr.mxu0 %v3381_v25  ;;  %v3419_v25 = vld [vmem:[%s12756_s15 + $0x168] sm:$0xff] }
0x14aa   :  { %3603 = vmatpush1.msra.mxu0 %v3380_v53  ;;  %v3418_v53 = vld [vmem:[%s12756_s15 + $0x160] sm:$0xff] }
0x14ab   :  { %3604 = vmatprep.subr.mxu0 %v3379_v57  ;;  %v3079_v57 = vld [vmem:[%s12755_s2 + $0x410] sm:$0xff] }
0x14ac   :  { %3605 = vmatpush1.msra.mxu0 %v3378_v60  ;;  %v3417_v60 = vld [vmem:[%s12756_s15 + $0x158] sm:$0xff] }
0x14ad   :  { %3606 = vmatprep.subr.mxu0 %v3377_v61  ;;  %v3074_v61 = vld [vmem:[%s12755_s2 + $0x3e8] sm:$0xff] }
0x14ae   :  { %3607 = vmatpush1.msra.mxu0 %v3376_v15  ;;  %v3416_v15 = vld [vmem:[%s12756_s15 + $0x150] sm:$0xff] }
0x14af   :  { %3608 = vmatprep.subr.mxu0 %v3375_v16  ;;  %v3073_v16 = vld [vmem:[%s12755_s2 + $0x3e0] sm:$0xff] }
0x14b0   :  { %3609 = vmatpush1.msra.mxu0 %v3374_v62  ;;  %v3415_v62 = vld [vmem:[%s12756_s15 + $0x148] sm:$0xff] }
0x14b1   :  { %3610 = vmatprep.subr.mxu0 %v3437_v63  ;;  %v3068_v63 = vld [vmem:[%s12755_s2 + $0x3b8] sm:$0xff] }
0x14b2   :  { %3611 = vmatpush2.msra.mxu0 %v3436_v4  ;;  %v3414_v4 = vld [vmem:[%s12756_s15 + $0x140] sm:$0xff] }
0x14b3   :  { %3612 = vmatprep.subr.mxu0 %v3435_v0  ;;  %v3067_v0 = vld [vmem:[%s12755_s2 + $0x3b0] sm:$0xff] }
0x1504   :  { %v2889_v52 = vpop.xlane.xlu1 %2888 }
0x1505   :  { %v2892_v1 = vmul.f32 0.0052083335, %v2889_v52  ;;  %v3413_v52 = vld [vmem:[%s12756_s15 + $0x138] sm:$0xff] }
0x1507   :  { %v10134_v2 = vsub.f32 %v9935_v40, %v2892_v1  ;;  %v10137_v3 = vsub.f32 %v9933_v22, %v2892_v1  ;;  %v3434_v40 = vld [vmem:[%s12756_s15 + $0x1e0] sm:$0xff]  ;;  %v2983_v22 = vld [vmem:[%s12755_s2 + $0x110] sm:$0xff]  ;;  %v3062_v1 = vld [vmem:[%s12755_s2 + $0x388] sm:$0xff] }
0x1508   :  { %3613 = vmatpush2.msra.mxu0 %v3434_v40  ;;  %3306 = vmatpush1.msra.mxu1 %v2983_v22  ;;  %v3055_v40 = vld [vmem:[%s12755_s2 + $0x350] sm:$0xff]  ;;  %v3409_v22 = vld [vmem:[%s12756_s15 + $0x118] sm:$0xff] }
0x1509   :  { %v2899_v5 = vmul.f32 %v10134_v2, %v10134_v2  ;;  %v2900_v36 = vmul.f32 %v10137_v3, %v10137_v3  ;;  %3614 = vmatprep.subr.mxu0 %v3433_v58  ;;  %3307 = vmatprep.subr.mxu1 %v2978_v50  ;;  %v3050_v58 = vld [vmem:[%s12755_s2 + $0x328] sm:$0xff]  ;;  %v3408_v50 = vld [vmem:[%s12756_s15 + $0x110] sm:$0xff] }
0x150a   :  { %3615 = vmatpush2.msra.mxu0 %v3432_v47  ;;  %3308 = vmatpush1.msra.mxu1 %v2977_v49  ;;  %v3049_v47 = vld [vmem:[%s12755_s2 + $0x320] sm:$0xff]  ;;  %v3407_v49 = vld [vmem:[%s12756_s15 + $0x108] sm:$0xff] }
0x150b   :  { %v2905_v7 = vsel %vm488_vm0, %v2900_v36, 0.0  ;;  %3616 = vmatprep.subr.mxu0 %v3431_v12  ;;  %3309 = vmatprep.subr.mxu1 %v2972_v21  ;;  %v3061_v36 = vld [vmem:[%s12755_s2 + $0x380] sm:$0xff]  ;;  %v3469_v21 = vld [vmem:[%s12756_s15 + $0x2f8] sm:$0xff] }
0x150c   :  { %v2906_v44 = vadd.f32 %v2905_v7, %v2899_v5  ;;  %3617 = vmatpush2.msra.mxu0 %v3430_v24  ;;  %3310 = vmatpush1.msra.mxu1 %v2971_v23  ;;  %v3412_v5 = vld [vmem:[%s12756_s15 + $0x130] sm:$0xff]  ;;  %v3411_v7 = vld [vmem:[%s12756_s15 + $0x128] sm:$0xff]  ;;  %v3406_v12 = vld [vmem:[%s12756_s15 + $0x100] sm:$0xff] }
0x150d   :  { %3618 = vmatprep.subr.mxu0 %v3429_v26  ;;  %3311 = vmatprep.subr.mxu1 %v2966_v27  ;;  %v3533_v24 = vld [vmem:[%s12756_s15 + $0x4f8] sm:$0xff] }
0x150e   :  { %2907 = vadd.xlane.f32.xlu0 %v2906_v44  ;;  %3619 = vmatpush2.msra.mxu0 %v3428_v13  ;;  %v3056_v44 = vld [vmem:[%s12755_s2 + $0x358] sm:$0xff] }
0x150f   :  { %3312 = vmatpush1.msra.mxu1 %v2965_v28  ;;  %3620 = vmatprep.subr.mxu0 %v3427_v8  ;;  %v10321_v28 = vld [vmem:[#allocation10] sm:$0x3f] }
0x1510   :  { %3313 = vmatprep.subr.mxu1 %v2960_v20  ;;  %3621 = vmatpush2.msra.mxu0 %v3426_v29  ;;  %v10325_v8 = vrot.slane %v10321_v28, %v9198_v39 }
0x1511   :  { %3314 = vmatpush1.msra.mxu1 %v2959_v14  ;;  %3622 = vmatprep.subr.mxu0 %v3425_v30 }
0x1512   :  { %3315 = vmatprep.subr.mxu1 %v2954_v31  ;;  %3623 = vmatpush2.msra.mxu0 %v3424_v32  ;;  %v10331_v31 = vrot.slane %v10321_v28, %v9321_v10 }
0x1513   :  { %3316 = vmatpush1.msra.mxu1 %v2953_v33  ;;  %3624 = vmatprep.subr.mxu0 %v3423_v35 }
0x1514   :  { %3333 = vmatprep.subr.mxu1 %v3092_v37  ;;  %3625 = vmatpush2.msra.mxu0 %v3422_v19 }
0x1515   :  { %3334 = vmatpush2.msra.mxu1 %v3091_v41  ;;  %3626 = vmatprep.subr.mxu0 %v3421_v42  ;;  %v10347_v42 = vrot.slane %v10321_v28, %v9324_v11 }
0x1516   :  { %3335 = vmatprep.subr.mxu1 %v3086_v56  ;;  %3627 = vmatpush2.msra.mxu0 %v3420_v46  ;;  %v3467_v56 = vld [vmem:[%s12756_s15 + $0x2e8] sm:$0xff]  ;;  %v3532_v46 = vld [vmem:[%s12756_s15 + $0x4f0] sm:$0xff] }
0x1517   :  { %3336 = vmatpush2.msra.mxu1 %v3085_v18  ;;  %3628 = vmatprep.subr.mxu0 %v3419_v25  ;;  %v3466_v18 = vld [vmem:[%s12756_s15 + $0x2e0] sm:$0xff]  ;;  %v3531_v25 = vld [vmem:[%s12756_s15 + $0x4e8] sm:$0xff] }
0x1518   :  { %3337 = vmatprep.subr.mxu1 %v3080_v51  ;;  %3629 = vmatpush2.msra.mxu0 %v3418_v53  ;;  %v3465_v51 = vld [vmem:[%s12756_s15 + $0x2d8] sm:$0xff]  ;;  %v3464_v53 = vld [vmem:[%s12756_s15 + $0x2d0] sm:$0xff] }
0x1519   :  { %3338 = vmatpush2.msra.mxu1 %v3079_v57  ;;  %3630 = vmatprep.subr.mxu0 %v3417_v60  ;;  %v3463_v60 = vld [vmem:[%s12756_s15 + $0x2c8] sm:$0xff] }
0x151a   :  { %3339 = vmatprep.subr.mxu1 %v3074_v61  ;;  %3631 = vmatpush2.msra.mxu0 %v3416_v15  ;;  %v3530_v61 = vld [vmem:[%s12756_s15 + $0x4e0] sm:$0xff] }
0x151b   :  { %3340 = vmatpush2.msra.mxu1 %v3073_v16  ;;  %3632 = vmatprep.subr.mxu0 %v3415_v62  ;;  %v3462_v15 = vld [vmem:[%s12756_s15 + $0x2c0] sm:$0xff]  ;;  %v3529_v16 = vld [vmem:[%s12756_s15 + $0x4d8] sm:$0xff] }
0x151c   :  { %3341 = vmatprep.subr.mxu1 %v3068_v63  ;;  %3633 = vmatpush2.msra.mxu0 %v3414_v4  ;;  %v3461_v62 = vld [vmem:[%s12756_s15 + $0x2b8] sm:$0xff]  ;;  %v3528_v63 = vld [vmem:[%s12756_s15 + $0x4d0] sm:$0xff] }
0x151d   :  { %3342 = vmatpush2.msra.mxu1 %v3067_v0  ;;  %3634 = vmatprep.subr.mxu0 %v3413_v52  ;;  %v3460_v4 = vld [vmem:[%s12756_s15 + $0x2b0] sm:$0xff]  ;;  %v3527_v0 = vld [vmem:[%s12756_s15 + $0x4c8] sm:$0xff] }
0x151e   :  { %3343 = vmatprep.subr.mxu1 %v3062_v1  ;;  %3635 = vmatpush2.msra.mxu0 %v3412_v5  ;;  %v3459_v52 = vld [vmem:[%s12756_s15 + $0x2a8] sm:$0xff]  ;;  %v3526_v1 = vld [vmem:[%s12756_s15 + $0x4c0] sm:$0xff] }
0x151f   :  { %3344 = vmatpush2.msra.mxu1 %v3061_v36  ;;  %3636 = vmatprep.subr.mxu0 %v3411_v7  ;;  %v3458_v5 = vld [vmem:[%s12756_s15 + $0x2a0] sm:$0xff]  ;;  %v3525_v36 = vld [vmem:[%s12756_s15 + $0x4b8] sm:$0xff] }
0x1520   :  { %3345 = vmatprep.subr.mxu1 %v3056_v44  ;;  %3637 = vmatpush2.msra.mxu0 %v3410_v6  ;;  %v3457_v7 = vld [vmem:[%s12756_s15 + $0x298] sm:$0xff]  ;;  %v3524_v44 = vld [vmem:[%s12756_s15 + $0x4b0] sm:$0xff] }
0x1521   :  { %3346 = vmatpush2.msra.mxu1 %v3055_v40  ;;  %3638 = vmatprep.subr.mxu0 %v3409_v22  ;;  %v3456_v6 = vld [vmem:[%s12756_s15 + $0x290] sm:$0xff]  ;;  %v3523_v40 = vld [vmem:[%s12756_s15 + $0x4a8] sm:$0xff] }
0x1522   :  { %3347 = vmatprep.subr.mxu1 %v3050_v58  ;;  %3639 = vmatpush2.msra.mxu0 %v3408_v50  ;;  %v3455_v22 = vld [vmem:[%s12756_s15 + $0x288] sm:$0xff]  ;;  %v3522_v58 = vld [vmem:[%s12756_s15 + $0x4a0] sm:$0xff] }
0x1523   :  { %3348 = vmatpush2.msra.mxu1 %v3049_v47  ;;  %3640 = vmatprep.subr.mxu0 %v3407_v49  ;;  %v3454_v50 = vld [vmem:[%s12756_s15 + $0x280] sm:$0xff]  ;;  %v3521_v47 = vld [vmem:[%s12756_s15 + $0x498] sm:$0xff] }
0x1524   :  { %3641 = vmatpush2.msra.mxu0 %v3406_v12  ;;  %3655 = vmatprep.subr.mxu1 %v3469_v21  ;;  %v3453_v49 = vld [vmem:[%s12756_s15 + $0x278] sm:$0xff]  ;;  %v3520_v12 = vld [vmem:[%s12756_s15 + $0x490] sm:$0xff] }
0x1525   :  { %3732 = vmatprep.subr.mxu0 %v3533_v24  ;;  %v3452_v21 = vld [vmem:[%s12756_s15 + $0x270] sm:$0xff]  ;;  %v3519_v24 = vld [vmem:[%s12756_s15 + $0x488] sm:$0xff] }
0x1551   :  { %v3197_v13 = vpop.f32.mrf.mxu1  ;;  %v10336_v37 = vpop.f32.mrf.mxu0 }
0x1553   :  { %v3199_v29 = vpop.f32.mrf.mxu1 }
0x1554   :  { %v3200_v32 = vadd.f32 %v3199_v29, %v10325_v8  ;;  %v3516_v29 = vld [vmem:[%s12756_s15 + $0x470] sm:$0xff] }
0x1597   :  { %v2908_v23 = vpop.xlane.xlu0 %2907 }
0x1598   :  { %v2910_v26 = vmul.f32 0.0052083335, %v2908_v23  ;;  %v3451_v23 = vld [vmem:[%s12756_s15 + $0x268] sm:$0xff] }
0x159a   :  { %v2912_v27 = vadd.f32 1e-05, %v2910_v26  ;;  %v3518_v26 = vld [vmem:[%s12756_s15 + $0x480] sm:$0xff] }
0x159c   :  { %8107 = vrsqrt.f32 %v2912_v27  ;;  %v3450_v27 = vld [vmem:[%s12756_s15 + $0x260] sm:$0xff] }
0x15a9   :  { %v8108_v20 = vpop.eup %8107 }
0x15aa   :  { %v2918_v14 = vmul.f32 %v8108_v20, %v10137_v3  ;;  %v2917_v30 = vmul.f32 %v8108_v20, %v10134_v2  ;;  %v3198_v2 = vadd.f32 %v3197_v13, %v10331_v31  ;;  %v3363_v3 = vmax.f32 %v3200_v32, 0.0  ;;  %v3517_v13 = vld [vmem:[%s12756_s15 + $0x478] sm:$0xff]  ;;  %v3447_v32 = vld [vmem:[%s12756_s15 + $0x248] sm:$0xff] }
0x15ab   :  { %v3449_v20 = vld [vmem:[%s12756_s15 + $0x258] sm:$0xff] }
0x15ac   :  { %v2933_v33 = vmul.f32 %v9941_v17, %v2918_v14  ;;  %v2932_v35 = vmul.f32 %v9944_v48, %v2917_v30  ;;  %v3276_v17 = vpop.f32.mrf.mxu0  ;;  %v3362_v48 = vmax.f32 %v3198_v2, 0.0  ;;  %v3448_v14 = vld [vmem:[%s12756_s15 + $0x250] sm:$0xff]  ;;  %v3515_v30 = vld [vmem:[%s12756_s15 + $0x468] sm:$0xff]  ;;  %v3513_v2 = vld [vmem:[%s12756_s15 + $0x458] sm:$0xff] }
0x15ae   :  { %v10339_v19 = vadd.f32 %v9948_v55, %v2933_v33  ;;  %v10342_v41 = vadd.f32 %v9952_v43, %v2932_v35  ;;  %v3468_v55 = vld [vmem:[%s12756_s15 + $0x2f0] sm:$0xff]  ;;  %v3277_v43 = vadd.f32 %v3276_v17, %v10347_v42  ;;  %v3514_v33 = vld [vmem:[%s12756_s15 + $0x460] sm:$0xff] }
0x15af   :  { %v3446_v35 = vld [vmem:[%s12756_s15 + $0x240] sm:$0xff]  ;;  %v3512_v17 = vld [vmem:[%s12756_s15 + $0x450] sm:$0xff] }
0x15b0   :  { %7635 = vmatprep.mubr.msk.f32.mxu1 %vm488_vm0, %v10339_v19  ;;  %7637 = vmatprep.mubr.msk.f32.mxu0 %vm488_vm0, %v10339_v19  ;;  %v3365_v57 = vmax.f32 %v3277_v43, 0.0  ;;  %v3443_v43 = vld [vmem:[%s12756_s15 + $0x228] sm:$0xff] }
0x15b1   :  { %3202 = vmatmul.mubr.f32.gmra.mxu1 %v10342_v41  ;;  %3279 = vmatmul.mubr.f32.gmra.mxu0 %v10342_v41 }
0x15b2   :  { %7638 = vmatprep.mubr.msk.f32.mxu1 %vm488_vm0, %v9957_v34  ;;  %3642 = vmatprep.mubr.f32.mxu0 %v3363_v3  ;;  %v3445_v3 = vld [vmem:[%s12756_s15 + $0x238] sm:$0xff] }
0x15b5   :  { %3350 = vmatmul.mubr.f32.vlgmr.msra.gmra.mxu1 %v9960_v59  ;;  %3643 = vmatmul.mubr.f32.vlgmr.msra.gmra.mxu0 %v3362_v48  ;;  %v3444_v48 = vld [vmem:[%s12756_s15 + $0x230] sm:$0xff] }
0x15b6   :  { %3656 = vmatpush1.msra.mxu1 %v3468_v55  ;;  %7639 = vmatprep.mubr.msk.f32.mxu1 %vm488_vm0, %v10339_v19  ;;  %v3511_v55 = vld [vmem:[%s12756_s15 + $0x448] sm:$0xff] }
0x15b7   :  { %3657 = vmatprep.subr.mxu1 %v3467_v56  ;;  %3733 = vmatpush1.msra.mxu0 %v3532_v46  ;;  %v3510_v56 = vld [vmem:[%s12756_s15 + $0x440] sm:$0xff] }
0x15b8   :  { %3658 = vmatpush1.msra.mxu1 %v3466_v18  ;;  %3734 = vmatprep.subr.mxu0 %v3531_v25  ;;  %v3442_v46 = vld [vmem:[%s12756_s15 + $0x220] sm:$0xff]  ;;  %v3509_v18 = vld [vmem:[%s12756_s15 + $0x438] sm:$0xff] }
0x15b9   :  { %3659 = vmatprep.subr.mxu1 %v3465_v51  ;;  %3356 = vmatmul.mubr.f32.gmra.mxu1 %v10342_v41  ;;  %v3441_v25 = vld [vmem:[%s12756_s15 + $0x218] sm:$0xff]  ;;  %v3508_v51 = vld [vmem:[%s12756_s15 + $0x430] sm:$0xff] }
0x15ba   :  { %3660 = vmatpush1.msra.mxu1 %v3464_v53  ;;  %3719 = vmatprep.mubr.f32.mxu1 %v3365_v57  ;;  %v3440_v53 = vld [vmem:[%s12756_s15 + $0x210] sm:$0xff]  ;;  %v3507_v57 = vld [vmem:[%s12756_s15 + $0x428] sm:$0xff] }
0x15bb   :  { %3661 = vmatprep.subr.mxu1 %v3463_v60  ;;  %3735 = vmatpush1.msra.mxu0 %v3530_v61  ;;  %v3439_v60 = vld [vmem:[%s12756_s15 + $0x208] sm:$0xff]  ;;  %v3506_v61 = vld [vmem:[%s12756_s15 + $0x420] sm:$0xff] }
0x15bc   :  { %3662 = vmatpush1.msra.mxu1 %v3462_v15  ;;  %3736 = vmatprep.subr.mxu0 %v3529_v16  ;;  %v3438_v15 = vld [vmem:[%s12756_s15 + $0x200] sm:$0xff]  ;;  %v3505_v16 = vld [vmem:[%s12756_s15 + $0x418] sm:$0xff] }
0x15bd   :  { %3663 = vmatprep.subr.mxu1 %v3461_v62  ;;  %3737 = vmatpush1.msra.mxu0 %v3528_v63  ;;  %v3501_v62 = vld [vmem:[%s12756_s15 + $0x3f8] sm:$0xff]  ;;  %v3504_v63 = vld [vmem:[%s12756_s15 + $0x410] sm:$0xff] }
0x15be   :  { %3664 = vmatpush1.msra.mxu1 %v3460_v4  ;;  %3738 = vmatprep.subr.mxu0 %v3527_v0  ;;  %v3500_v4 = vld [vmem:[%s12756_s15 + $0x3f0] sm:$0xff]  ;;  %v3503_v0 = vld [vmem:[%s12756_s15 + $0x408] sm:$0xff] }
0x15bf   :  { %3665 = vmatprep.subr.mxu1 %v3459_v52  ;;  %3739 = vmatpush1.msra.mxu0 %v3526_v1  ;;  %v3499_v52 = vld [vmem:[%s12756_s15 + $0x3e8] sm:$0xff]  ;;  %v3502_v1 = vld [vmem:[%s12756_s15 + $0x400] sm:$0xff] }
0x15c0   :  { %3666 = vmatpush1.msra.mxu1 %v3458_v5  ;;  %3740 = vmatprep.subr.mxu0 %v3525_v36  ;;  %v3498_v5 = vld [vmem:[%s12756_s15 + $0x3e0] sm:$0xff]  ;;  %v3565_v36 = vld [vmem:[%s12756_s15 + $0x5f8] sm:$0xff] }
0x15c1   :  { %3667 = vmatprep.subr.mxu1 %v3457_v7  ;;  %3741 = vmatpush1.msra.mxu0 %v3524_v44  ;;  %v3497_v7 = vld [vmem:[%s12756_s15 + $0x3d8] sm:$0xff]  ;;  %v3564_v44 = vld [vmem:[%s12756_s15 + $0x5f0] sm:$0xff] }
0x15c2   :  { %3668 = vmatpush1.msra.mxu1 %v3456_v6  ;;  %3742 = vmatprep.subr.mxu0 %v3523_v40  ;;  %v3496_v6 = vld [vmem:[%s12756_s15 + $0x3d0] sm:$0xff]  ;;  %v3563_v40 = vld [vmem:[%s12756_s15 + $0x5e8] sm:$0xff] }
0x15c3   :  { %3669 = vmatprep.subr.mxu1 %v3455_v22  ;;  %3743 = vmatpush1.msra.mxu0 %v3522_v58  ;;  %v3495_v22 = vld [vmem:[%s12756_s15 + $0x3c8] sm:$0xff]  ;;  %v3562_v58 = vld [vmem:[%s12756_s15 + $0x5e0] sm:$0xff] }
0x15c4   :  { %3670 = vmatpush1.msra.mxu1 %v3454_v50  ;;  %3744 = vmatprep.subr.mxu0 %v3521_v47  ;;  %v3494_v50 = vld [vmem:[%s12756_s15 + $0x3c0] sm:$0xff]  ;;  %v3561_v47 = vld [vmem:[%s12756_s15 + $0x5d8] sm:$0xff] }
0x15c5   :  { %3671 = vmatprep.subr.mxu1 %v3453_v49  ;;  %3745 = vmatpush1.msra.mxu0 %v3520_v12  ;;  %v3493_v49 = vld [vmem:[%s12756_s15 + $0x3b8] sm:$0xff]  ;;  %v3560_v12 = vld [vmem:[%s12756_s15 + $0x5d0] sm:$0xff] }
0x15c6   :  { %3672 = vmatpush1.msra.mxu1 %v3452_v21  ;;  %3746 = vmatprep.subr.mxu0 %v3519_v24  ;;  %v3492_v21 = vld [vmem:[%s12756_s15 + $0x3b0] sm:$0xff]  ;;  %v3559_v24 = vld [vmem:[%s12756_s15 + $0x5c8] sm:$0xff] }
0x15c7   :  { %3673 = vmatprep.subr.mxu1 %v3451_v23  ;;  %3747 = vmatpush1.msra.mxu0 %v3518_v26  ;;  %v3491_v23 = vld [vmem:[%s12756_s15 + $0x3a8] sm:$0xff]  ;;  %v3558_v26 = vld [vmem:[%s12756_s15 + $0x5c0] sm:$0xff] }
0x15c8   :  { %3674 = vmatpush1.msra.mxu1 %v3450_v27  ;;  %3748 = vmatprep.subr.mxu0 %v3517_v13  ;;  %v3490_v27 = vld [vmem:[%s12756_s15 + $0x3a0] sm:$0xff]  ;;  %v3557_v13 = vld [vmem:[%s12756_s15 + $0x5b8] sm:$0xff] }
0x15c9   :  { %3675 = vmatprep.subr.mxu1 %v3449_v20  ;;  %3749 = vmatpush1.msra.mxu0 %v3516_v29  ;;  %v3489_v20 = vld [vmem:[%s12756_s15 + $0x398] sm:$0xff]  ;;  %v3556_v29 = vld [vmem:[%s12756_s15 + $0x5b0] sm:$0xff] }
0x15ca   :  { %3676 = vmatpush1.msra.mxu1 %v3448_v14  ;;  %3750 = vmatprep.subr.mxu0 %v3515_v30  ;;  %v3488_v14 = vld [vmem:[%s12756_s15 + $0x390] sm:$0xff]  ;;  %v3555_v30 = vld [vmem:[%s12756_s15 + $0x5a8] sm:$0xff] }
0x15cb   :  { %3677 = vmatprep.subr.mxu1 %v3447_v32  ;;  %3751 = vmatpush1.msra.mxu0 %v3514_v33  ;;  %v3487_v32 = vld [vmem:[%s12756_s15 + $0x388] sm:$0xff]  ;;  %v3554_v33 = vld [vmem:[%s12756_s15 + $0x5a0] sm:$0xff] }
0x15cc   :  { %3678 = vmatpush1.msra.mxu1 %v3446_v35  ;;  %3752 = vmatprep.subr.mxu0 %v3513_v2  ;;  %v3486_v35 = vld [vmem:[%s12756_s15 + $0x380] sm:$0xff]  ;;  %v3553_v2 = vld [vmem:[%s12756_s15 + $0x598] sm:$0xff] }
0x15cd   :  { %3679 = vmatprep.subr.mxu1 %v3445_v3  ;;  %3753 = vmatpush1.msra.mxu0 %v3512_v17  ;;  %v3485_v3 = vld [vmem:[%s12756_s15 + $0x378] sm:$0xff]  ;;  %v3552_v17 = vld [vmem:[%s12756_s15 + $0x590] sm:$0xff] }
0x15ce   :  { %3680 = vmatpush1.msra.mxu1 %v3444_v48  ;;  %3754 = vmatprep.subr.mxu0 %v3511_v55  ;;  %v3484_v48 = vld [vmem:[%s12756_s15 + $0x370] sm:$0xff]  ;;  %v3551_v55 = vld [vmem:[%s12756_s15 + $0x588] sm:$0xff] }
0x15cf   :  { %3681 = vmatprep.subr.mxu1 %v3443_v43  ;;  %3755 = vmatpush1.msra.mxu0 %v3510_v56  ;;  %v3483_v43 = vld [vmem:[%s12756_s15 + $0x368] sm:$0xff]  ;;  %v3550_v56 = vld [vmem:[%s12756_s15 + $0x580] sm:$0xff] }
0x15d0   :  { %3682 = vmatpush1.msra.mxu1 %v3442_v46  ;;  %3756 = vmatprep.subr.mxu0 %v3509_v18  ;;  %v3482_v46 = vld [vmem:[%s12756_s15 + $0x360] sm:$0xff]  ;;  %v3549_v18 = vld [vmem:[%s12756_s15 + $0x578] sm:$0xff] }
0x15d1   :  { %3683 = vmatprep.subr.mxu1 %v3441_v25  ;;  %3757 = vmatpush1.msra.mxu0 %v3508_v51  ;;  %v3481_v25 = vld [vmem:[%s12756_s15 + $0x358] sm:$0xff]  ;;  %v3548_v51 = vld [vmem:[%s12756_s15 + $0x570] sm:$0xff] }
0x15d2   :  { %3684 = vmatpush1.msra.mxu1 %v3440_v53  ;;  %3758 = vmatprep.subr.mxu0 %v3507_v57  ;;  %v3480_v53 = vld [vmem:[%s12756_s15 + $0x350] sm:$0xff]  ;;  %v3547_v57 = vld [vmem:[%s12756_s15 + $0x568] sm:$0xff] }
0x15d3   :  { %3685 = vmatprep.subr.mxu1 %v3439_v60  ;;  %3759 = vmatpush1.msra.mxu0 %v3506_v61  ;;  %v3479_v60 = vld [vmem:[%s12756_s15 + $0x348] sm:$0xff]  ;;  %v3546_v61 = vld [vmem:[%s12756_s15 + $0x560] sm:$0xff] }
0x15d4   :  { %3686 = vmatpush1.msra.mxu1 %v3438_v15  ;;  %3760 = vmatprep.subr.mxu0 %v3505_v16  ;;  %v3478_v15 = vld [vmem:[%s12756_s15 + $0x340] sm:$0xff]  ;;  %v3477_v16 = vld [vmem:[%s12756_s15 + $0x338] sm:$0xff] }
0x15d5   :  { %3687 = vmatprep.subr.mxu1 %v3501_v62  ;;  %3761 = vmatpush1.msra.mxu0 %v3504_v63  ;;  %v3106_v62 = vrot.slane %v10321_v28, %v9318_v9  ;;  %v3476_v63 = vld [vmem:[%s12756_s15 + $0x330] sm:$0xff] }
0x15d6   :  { %3688 = vmatpush2.msra.mxu1 %v3500_v4  ;;  %3762 = vmatprep.subr.mxu0 %v3503_v0  ;;  %v3475_v4 = vld [vmem:[%s12756_s15 + $0x328] sm:$0xff]  ;;  %v3474_v0 = vld [vmem:[%s12756_s15 + $0x320] sm:$0xff] }
0x15d7   :  { %3689 = vmatprep.subr.mxu1 %v3499_v52  ;;  %3763 = vmatpush1.msra.mxu0 %v3502_v1  ;;  %v3473_v52 = vld [vmem:[%s12756_s15 + $0x318] sm:$0xff]  ;;  %v3275_v1 = vadd.f32 %v10336_v37, %v3106_v62  ;;  %v3544_v37 = vld [vmem:[%s12756_s15 + $0x550] sm:$0xff] }
0x15d8   :  { %3690 = vmatpush2.msra.mxu1 %v3498_v5  ;;  %3764 = vmatprep.subr.mxu0 %v3565_v36  ;;  %v3472_v5 = vld [vmem:[%s12756_s15 + $0x310] sm:$0xff]  ;;  %v3471_v36 = vld [vmem:[%s12756_s15 + $0x308] sm:$0xff] }
0x15d9   :  { %3691 = vmatprep.subr.mxu1 %v3497_v7  ;;  %3765 = vmatpush2.msra.mxu0 %v3564_v44  ;;  %v3470_v7 = vld [vmem:[%s12756_s15 + $0x300] sm:$0xff]  ;;  %v3545_v44 = vld [vmem:[%s12756_s15 + $0x558] sm:$0xff] }
0x15da   :  { %3692 = vmatpush2.msra.mxu1 %v3496_v6  ;;  %3766 = vmatprep.subr.mxu0 %v3563_v40  ;;  %v3364_v6 = vmax.f32 %v3275_v1, 0.0  ;;  %v3543_v40 = vld [vmem:[%s12756_s15 + $0x548] sm:$0xff] }
0x15db   :  { %3693 = vmatprep.subr.mxu1 %v3495_v22  ;;  %3767 = vmatpush2.msra.mxu0 %v3562_v58  ;;  %v3542_v22 = vld [vmem:[%s12756_s15 + $0x540] sm:$0xff]  ;;  %v3541_v58 = vld [vmem:[%s12756_s15 + $0x538] sm:$0xff] }
0x15dc   :  { %3694 = vmatpush2.msra.mxu1 %v3494_v50  ;;  %3768 = vmatprep.subr.mxu0 %v3561_v47  ;;  %v3540_v50 = vld [vmem:[%s12756_s15 + $0x530] sm:$0xff]  ;;  %v3539_v47 = vld [vmem:[%s12756_s15 + $0x528] sm:$0xff] }
0x15dd   :  { %3695 = vmatprep.subr.mxu1 %v3493_v49  ;;  %3769 = vmatpush2.msra.mxu0 %v3560_v12  ;;  %v3538_v49 = vld [vmem:[%s12756_s15 + $0x520] sm:$0xff]  ;;  %v3537_v12 = vld [vmem:[%s12756_s15 + $0x518] sm:$0xff] }
0x15de   :  { %3696 = vmatpush2.msra.mxu1 %v3492_v21  ;;  %3770 = vmatprep.subr.mxu0 %v3559_v24  ;;  %v3536_v21 = vld [vmem:[%s12756_s15 + $0x510] sm:$0xff]  ;;  %v3535_v24 = vld [vmem:[%s12756_s15 + $0x508] sm:$0xff] }
0x15df   :  { %3697 = vmatprep.subr.mxu1 %v3491_v23  ;;  %3771 = vmatpush2.msra.mxu0 %v3558_v26  ;;  %v3534_v23 = vld [vmem:[%s12756_s15 + $0x500] sm:$0xff]  ;;  %v3117_v26 = vsub.s32 5, %v9193_v38 }
0x15e0   :  { %3698 = vmatpush2.msra.mxu1 %v3490_v27  ;;  %3772 = vmatprep.subr.mxu0 %v3557_v13 }
0x15e1   :  { %3699 = vmatprep.subr.mxu1 %v3489_v20  ;;  %3773 = vmatpush2.msra.mxu0 %v3556_v29 }
0x15e2   :  { %3700 = vmatpush2.msra.mxu1 %v3488_v14  ;;  %3774 = vmatprep.subr.mxu0 %v3555_v30 }
0x15e3   :  { %3701 = vmatprep.subr.mxu1 %v3487_v32  ;;  %3775 = vmatpush2.msra.mxu0 %v3554_v33  ;;  %v3114_v32 = vrot.slane %v10321_v28, %v9434_v45 }
0x15e4   :  { %3702 = vmatpush2.msra.mxu1 %v3486_v35  ;;  %3776 = vmatprep.subr.mxu0 %v3553_v2  ;;  %v3118_v2 = vrot.slane %v10321_v28, %v3117_v26 }
0x15e5   :  { %3703 = vmatprep.subr.mxu1 %v3485_v3  ;;  %3777 = vmatpush2.msra.mxu0 %v3552_v17 }
0x15e6   :  { %3704 = vmatpush2.msra.mxu1 %v3484_v48  ;;  %3778 = vmatprep.subr.mxu0 %v3551_v55 }
0x15e7   :  { %3705 = vmatprep.subr.mxu1 %v3483_v43  ;;  %3779 = vmatpush2.msra.mxu0 %v3550_v56 }
0x15e8   :  { %3706 = vmatpush2.msra.mxu1 %v3482_v46  ;;  %3780 = vmatprep.subr.mxu0 %v3549_v18 }
0x15e9   :  { %3707 = vmatprep.subr.mxu1 %v3481_v25  ;;  %3781 = vmatpush2.msra.mxu0 %v3548_v51 }
0x15ea   :  { %3708 = vmatpush2.msra.mxu1 %v3480_v53  ;;  %3782 = vmatprep.subr.mxu0 %v3547_v57 }
0x15eb   :  { %3709 = vmatprep.subr.mxu1 %v3479_v60  ;;  %3783 = vmatpush2.msra.mxu0 %v3546_v61  ;;  %v3566_v61 = vld [vmem:[#allocation11] sm:$0x3] }
0x15ec   :  { %3710 = vmatpush2.msra.mxu1 %v3478_v15  ;;  %3784 = vmatprep.subr.mxu0 %v3545_v44  ;;  %v3571_v15 = vrot.slane %v3566_v61, %v9321_v10 }
0x15ed   :  { %3711 = vmatprep.subr.mxu1 %v3477_v16  ;;  %3785 = vmatpush2.msra.mxu0 %v3544_v37 }
0x15ee   :  { %3712 = vmatpush2.msra.mxu1 %v3476_v63  ;;  %3786 = vmatprep.subr.mxu0 %v3543_v40  ;;  %v3575_v63 = vrot.slane %v3566_v61, %v9198_v39  ;;  %v3921_v61 = vld [vmem:[%s12715_s13 + $0x140] sm:$0xff] }
0x15ef   :  { %3713 = vmatprep.subr.mxu1 %v3475_v4  ;;  %3787 = vmatpush2.msra.mxu0 %v3542_v22 }
0x15f0   :  { %3714 = vmatpush2.msra.mxu1 %v3474_v0  ;;  %3788 = vmatprep.subr.mxu0 %v3541_v58 }
0x15f1   :  { %3715 = vmatprep.subr.mxu1 %v3473_v52  ;;  %3789 = vmatpush2.msra.mxu0 %v3540_v50 }
0x15f2   :  { %3716 = vmatpush2.msra.mxu1 %v3472_v5  ;;  %3790 = vmatprep.subr.mxu0 %v3539_v47 }
0x15f3   :  { %3717 = vmatprep.subr.mxu1 %v3471_v36  ;;  %3791 = vmatpush2.msra.mxu0 %v3538_v49 }
0x15f4   :  { %3718 = vmatpush2.msra.mxu1 %v3470_v7  ;;  %3792 = vmatprep.subr.mxu0 %v3537_v12 }
0x15f5   :  { %3720 = vmatmul.mubr.f32.vlgmr.msra.gmra.mxu1 %v3364_v6  ;;  %3793 = vmatpush2.msra.mxu0 %v3536_v21 }
0x15f6   :  { %3794 = vmatprep.subr.mxu0 %v3535_v24 }
0x15f7   :  { %3795 = vmatpush2.msra.mxu0 %v3534_v23 }
0x15f8   :  { %4188 = vmatprep.subr.mxu0 %v8660_v54 }
0x1671   :  { %v3203_v27 = vpop.f32.mrf.mxu1  ;;  %v3280_v13 = vpop.f32.mrf.mxu0 }
0x1672   :  { %v3204_v20 = vadd.f32 %v3203_v27, %v10331_v31  ;;  %v3281_v29 = vadd.f32 %v3280_v13, %v3106_v62 }
0x1673   :  { %v3205_v14 = vpop.f32.mrf.mxu1  ;;  %v3282_v30 = vpop.f32.mrf.mxu0 }
0x1674   :  { %v3206_v33 = vadd.f32 %v3205_v14, %v10325_v8  ;;  %v3283_v35 = vadd.f32 %v3282_v30, %v10347_v42  ;;  %v3368_v55 = vmax.f32 %v3204_v20, 0.0  ;;  %v3370_v43 = vmax.f32 %v3281_v29, 0.0 }
0x1675   :  { %v3351_v3 = vpop.f32.mrf.mxu1  ;;  %v3644_v60 = vpop.f32.mrf.mxu0 }
0x1676   :  { %v3369_v17 = vmax.f32 %v3206_v33, 0.0  ;;  %v3371_v48 = vmax.f32 %v3283_v35, 0.0  ;;  %v3352_v31 = vadd.f32 %v3351_v3, %v3114_v32  ;;  %v3645_v0 = vadd.f32 %v3644_v60, %v3571_v15  ;;  %v3957_v33 = vld [vmem:[%s12715_s13 + $0x260] sm:$0xff]  ;;  %v3956_v35 = vld [vmem:[%s12715_s13 + $0x258] sm:$0xff]  ;;  %v3947_v3 = vld [vmem:[%s12715_s13 + $0x210] sm:$0xff] }
0x1677   :  { %v3353_v56 = vpop.f32.mrf.mxu1  ;;  %v3646_v16 = vpop.f32.mrf.mxu0  ;;  %4034 = vmatprep.subr.mxu1 %v3957_v33  ;;  %v3922_v60 = vld [vmem:[%s12715_s13 + $0x148] sm:$0xff]  ;;  %v3891_v33 = vld [vmem:[%s12715_s13 + $0x50] sm:$0xff] }
0x1678   :  { %v3354_v46 = vadd.f32 %v3353_v56, %v3118_v2  ;;  %3648 = vmatprep.mubr.f32.mxu0 %v3369_v17  ;;  %3725 = vmatprep.mubr.f32.mxu1 %v3371_v48  ;;  %v3366_v25 = vmax.f32 %v3352_v31, 0.0  ;;  %v3647_v5 = vadd.f32 %v3646_v16, %v3575_v63  ;;  %v3955_v17 = vld [vmem:[%s12715_s13 + $0x250] sm:$0xff]  ;;  %v3946_v48 = vld [vmem:[%s12715_s13 + $0x208] sm:$0xff]  ;;  %v3941_v31 = vld [vmem:[%s12715_s13 + $0x1e0] sm:$0xff] }
0x1679   :  { %v3357_v18 = vpop.f32.mrf.mxu1  ;;  %3649 = vmatmul.mubr.f32.gmra.mxu0 %v3368_v55  ;;  %3726 = vmatmul.mubr.f32.gmra.mxu1 %v3370_v43  ;;  %v3950_v55 = vld [vmem:[%s12715_s13 + $0x228] sm:$0xff]  ;;  %v3945_v56 = vld [vmem:[%s12715_s13 + $0x200] sm:$0xff] }
0x167a   :  { %v3367_v8 = vmax.f32 %v3354_v46, 0.0  ;;  %v3358_v42 = vadd.f32 %v3357_v18, %v3114_v32  ;;  %4035 = vmatpush1.msra.mxu1 %v3956_v35  ;;  %v3942_v43 = vld [vmem:[%s12715_s13 + $0x1e8] sm:$0xff]  ;;  %v3937_v46 = vld [vmem:[%s12715_s13 + $0x1c0] sm:$0xff]  ;;  %v3936_v18 = vld [vmem:[%s12715_s13 + $0x1b8] sm:$0xff] }
0x167b   :  { %v3359_v51 = vpop.f32.mrf.mxu1  ;;  %v3917_v16 = vld [vmem:[%s12715_s13 + $0x120] sm:$0xff]  ;;  %v3887_v35 = vld [vmem:[%s12715_s13 + $0x30] sm:$0xff] }
0x167c   :  { %v3360_v53 = vadd.f32 %v3359_v51, %v3118_v2  ;;  %3796 = vmatprep.mubr.f32.mxu0 %v3367_v8  ;;  %v3372_v57 = vmax.f32 %v3358_v42, 0.0  ;;  %v3951_v2 = vld [vmem:[%s12715_s13 + $0x230] sm:$0xff]  ;;  %v3940_v8 = vld [vmem:[%s12715_s13 + $0x1d8] sm:$0xff] }
0x167d   :  { %3797 = vmatmul.mubr.f32.vlgmr.msra.gmra.mxu0 %v3366_v25  ;;  %v3932_v25 = vld [vmem:[%s12715_s13 + $0x198] sm:$0xff]  ;;  %v3931_v42 = vld [vmem:[%s12715_s13 + $0x190] sm:$0xff] }
0x167e   :  { %v3373_v28 = vmax.f32 %v3360_v53, 0.0  ;;  %v3935_v51 = vld [vmem:[%s12715_s13 + $0x1b0] sm:$0xff] }
0x167f   :  { %v3927_v53 = vld [vmem:[%s12715_s13 + $0x170] sm:$0xff] }
0x1680   :  { %3802 = vmatprep.mubr.f32.mxu0 %v3373_v28  ;;  %v3926_v28 = vld [vmem:[%s12715_s13 + $0x168] sm:$0xff] }
0x1681   :  { %3803 = vmatmul.mubr.f32.gmra.mxu0 %v3372_v57  ;;  %v3930_v57 = vld [vmem:[%s12715_s13 + $0x188] sm:$0xff] }
0x16b5   :  { %v3721_v62 = vpop.f32.mrf.mxu1 }
0x16b6   :  { %v3722_v36 = vadd.f32 %v3721_v62, %v3645_v0  ;;  %v3916_v62 = vld [vmem:[%s12715_s13 + $0x118] sm:$0xff]  ;;  %v3911_v0 = vld [vmem:[%s12715_s13 + $0xf0] sm:$0xff] }
0x16b7   :  { %v3723_v52 = vpop.f32.mrf.mxu1 }
0x16b8   :  { %v3724_v6 = vadd.f32 %v3723_v52, %v3647_v5  ;;  %v3915_v52 = vld [vmem:[%s12715_s13 + $0x110] sm:$0xff]  ;;  %v3906_v5 = vld [vmem:[%s12715_s13 + $0xc8] sm:$0xff] }
0x1739   :  { %v3650_v4 = vpop.f32.mrf.mxu0  ;;  %v3727_v44 = vpop.f32.mrf.mxu1 }
0x173a   :  { %v3651_v7 = vadd.f32 %v3650_v4, %v3571_v15  ;;  %v3925_v15 = vld [vmem:[%s12715_s13 + $0x160] sm:$0xff]  ;;  %v3912_v4 = vld [vmem:[%s12715_s13 + $0xf8] sm:$0xff] }
0x173b   :  { %v3652_v1 = vpop.f32.mrf.mxu0  ;;  %v3729_v49 = vpop.f32.mrf.mxu1 }
0x173c   :  { %v3653_v40 = vadd.f32 %v3652_v1, %v3575_v63  ;;  %v3728_v47 = vadd.f32 %v3727_v44, %v3651_v7  ;;  %v3920_v63 = vld [vmem:[%s12715_s13 + $0x138] sm:$0xff]  ;;  %v3907_v1 = vld [vmem:[%s12715_s13 + $0xd0] sm:$0xff]  ;;  %v3902_v7 = vld [vmem:[%s12715_s13 + $0xa8] sm:$0xff] }
0x173d   :  { %v3798_v37 = vpop.f32.mrf.mxu0  ;;  %v3901_v44 = vld [vmem:[%s12715_s13 + $0xa0] sm:$0xff] }
0x173e   :  { %v3799_v22 = vadd.f32 %v3798_v37, %v3722_v36  ;;  %v3730_v21 = vadd.f32 %v3729_v49, %v3653_v40  ;;  %v3910_v36 = vld [vmem:[%s12715_s13 + $0xe8] sm:$0xff] }
0x173f   :  { %v3800_v58 = vpop.f32.mrf.mxu0 }
0x1740   :  { %v3801_v50 = vadd.f32 %v3800_v58, %v3724_v6  ;;  %v10759_v23 = vadd.f32 %v3799_v22, %v9960_v59 }
0x1741   :  { %v3804_v12 = vpop.f32.mrf.mxu0 }
0x1742   :  { %v10756_v24 = vadd.f32 %v3801_v50, %v9957_v34  ;;  %v3805_v27 = vadd.f32 %v3804_v12, %v3728_v47 }
0x1743   :  { %v3806_v13 = vpop.f32.mrf.mxu0 }
0x1744   :  { %v3807_v20 = vadd.f32 %v3806_v13, %v3730_v21  ;;  %v3815_v29 = vsel %vm488_vm0, %v10756_v24, 0.0  ;;  %v10768_v32 = vadd.f32 %v3805_v27, %v10342_v41  ;;  %v3960_v41 = vld [vmem:[%s12715_s13 + $0x278] sm:$0xff] }
0x1745   :  { %v3816_v14 = vadd.f32 %v3815_v29, %v10759_v23  ;;  %4189 = vmatpush1.msra.mxu0 %v3960_v41  ;;  %v3886_v41 = vld [vmem:[%s12715_s13 + $0x28] sm:$0xff] }
0x1746   :  { %v10765_v30 = vadd.f32 %v3807_v20, %v10339_v19  ;;  %v3952_v19 = vld [vmem:[%s12715_s13 + $0x238] sm:$0xff]  ;;  %4190 = vmatprep.subr.mxu0 %v8660_v54 }
0x1747   :  { %3817 = vadd.xlane.f32.xlu1 %v3816_v14  ;;  %4036 = vmatprep.subr.mxu1 %v3952_v19  ;;  %v3897_v14 = vld [vmem:[%s12715_s13 + $0x80] sm:$0xff]  ;;  %v3895_v19 = vld [vmem:[%s12715_s13 + $0x70] sm:$0xff] }
0x1748   :  { %v3819_v34 = vsel %vm488_vm0, %v10765_v30, 0.0  ;;  %4037 = vmatpush1.msra.mxu1 %v3951_v2  ;;  %4191 = vmatpush1.msra.mxu0 %v3955_v17  ;;  %v3882_v2 = vld [vmem:[%s12715_s13 + $0x8] sm:$0xff]  ;;  %v3881_v17 = vld [vmem:[%s12715_s13] sm:$0xff] }
0x1749   :  { %v3820_v59 = vadd.f32 %v3819_v34, %v10768_v32  ;;  %4038 = vmatprep.subr.mxu1 %v3947_v3  ;;  %4192 = vmatprep.subr.mxu0 %v8660_v54  ;;  %v3892_v34 = vld [vmem:[%s12715_s13 + $0x58] sm:$0xff]  ;;  %v3890_v3 = vld [vmem:[%s12715_s13 + $0x48] sm:$0xff] }
0x174a   :  { %4039 = vmatpush1.msra.mxu1 %v3946_v48  ;;  %4193 = vmatpush1.msra.mxu0 %v3950_v55  ;;  %v3997_v48 = vld [vmem:[%s12715_s13 + $0x3a0] sm:$0xff] }
0x174b   :  { %3821 = vadd.xlane.f32.xlu1 %v3820_v59  ;;  %4040 = vmatprep.subr.mxu1 %v3942_v43  ;;  %v3900_v59 = vld [vmem:[%s12715_s13 + $0x98] sm:$0xff]  ;;  %v3885_v55 = vld [vmem:[%s12715_s13 + $0x20] sm:$0xff] }
0x174c   :  { %4194 = vmatprep.subr.mxu0 %v8660_v54  ;;  %4041 = vmatpush1.msra.mxu1 %v3941_v31  ;;  %v3996_v43 = vld [vmem:[%s12715_s13 + $0x398] sm:$0xff] }
0x174d   :  { %4195 = vmatpush1.msra.mxu0 %v3945_v56  ;;  %4042 = vmatprep.subr.mxu1 %v3937_v46  ;;  %v3992_v31 = vld [vmem:[%s12715_s13 + $0x378] sm:$0xff]  ;;  %v3991_v46 = vld [vmem:[%s12715_s13 + $0x370] sm:$0xff] }
0x174e   :  { %4196 = vmatprep.subr.mxu0 %v8660_v54  ;;  %4043 = vmatpush1.msra.mxu1 %v3936_v18  ;;  %v4000_v56 = vld [vmem:[%s12715_s13 + $0x3b8] sm:$0xff]  ;;  %v3987_v18 = vld [vmem:[%s12715_s13 + $0x350] sm:$0xff] }
0x174f   :  { %4197 = vmatpush1.msra.mxu0 %v3940_v8  ;;  %4044 = vmatprep.subr.mxu1 %v3932_v25  ;;  %v3995_v8 = vld [vmem:[%s12715_s13 + $0x390] sm:$0xff]  ;;  %v3986_v25 = vld [vmem:[%s12715_s13 + $0x348] sm:$0xff] }
0x1750   :  { %4198 = vmatprep.subr.mxu0 %v8660_v54  ;;  %4045 = vmatpush1.msra.mxu1 %v3931_v42  ;;  %v3982_v42 = vld [vmem:[%s12715_s13 + $0x328] sm:$0xff] }
0x1751   :  { %4199 = vmatpush1.msra.mxu0 %v3935_v51  ;;  %4046 = vmatprep.subr.mxu1 %v3927_v53  ;;  %v3990_v51 = vld [vmem:[%s12715_s13 + $0x368] sm:$0xff]  ;;  %v3981_v53 = vld [vmem:[%s12715_s13 + $0x320] sm:$0xff] }
0x1752   :  { %4200 = vmatprep.subr.mxu0 %v8660_v54  ;;  %4047 = vmatpush1.msra.mxu1 %v3926_v28  ;;  %v3977_v28 = vld [vmem:[%s12715_s13 + $0x300] sm:$0xff] }
0x1753   :  { %4201 = vmatpush1.msra.mxu0 %v3930_v57  ;;  %4048 = vmatprep.subr.mxu1 %v3922_v60  ;;  %v3985_v57 = vld [vmem:[%s12715_s13 + $0x340] sm:$0xff]  ;;  %v3976_v60 = vld [vmem:[%s12715_s13 + $0x2f8] sm:$0xff] }
0x1754   :  { %4202 = vmatprep.subr.mxu0 %v8660_v54  ;;  %4049 = vmatpush1.msra.mxu1 %v3921_v61  ;;  %v3972_v61 = vld [vmem:[%s12715_s13 + $0x2d8] sm:$0xff] }
0x1755   :  { %4203 = vmatpush1.msra.mxu0 %v3925_v15  ;;  %4050 = vmatprep.subr.mxu1 %v3917_v16  ;;  %v3980_v15 = vld [vmem:[%s12715_s13 + $0x318] sm:$0xff]  ;;  %v3971_v16 = vld [vmem:[%s12715_s13 + $0x2d0] sm:$0xff] }
0x1756   :  { %4204 = vmatprep.subr.mxu0 %v8660_v54  ;;  %4051 = vmatpush1.msra.mxu1 %v3916_v62  ;;  %v3967_v62 = vld [vmem:[%s12715_s13 + $0x2b0] sm:$0xff] }
0x1757   :  { %4205 = vmatpush1.msra.mxu0 %v3920_v63  ;;  %4052 = vmatprep.subr.mxu1 %v3912_v4  ;;  %v3975_v63 = vld [vmem:[%s12715_s13 + $0x2f0] sm:$0xff]  ;;  %v3966_v4 = vld [vmem:[%s12715_s13 + $0x2a8] sm:$0xff] }
0x1758   :  { %4206 = vmatprep.subr.mxu0 %v8660_v54  ;;  %4053 = vmatpush1.msra.mxu1 %v3911_v0  ;;  %v3962_v0 = vld [vmem:[%s12715_s13 + $0x288] sm:$0xff] }
0x1759   :  { %4207 = vmatpush1.msra.mxu0 %v3915_v52  ;;  %4054 = vmatprep.subr.mxu1 %v3907_v1  ;;  %v3970_v52 = vld [vmem:[%s12715_s13 + $0x2c8] sm:$0xff]  ;;  %v3961_v1 = vld [vmem:[%s12715_s13 + $0x280] sm:$0xff] }
0x175a   :  { %4208 = vmatprep.subr.mxu0 %v8660_v54  ;;  %4055 = vmatpush1.msra.mxu1 %v3906_v5  ;;  %v3959_v5 = vld [vmem:[%s12715_s13 + $0x270] sm:$0xff] }
0x175b   :  { %4209 = vmatpush1.msra.mxu0 %v3910_v36  ;;  %4056 = vmatprep.subr.mxu1 %v3902_v7  ;;  %v3965_v36 = vld [vmem:[%s12715_s13 + $0x2a0] sm:$0xff] }
0x175c   :  { %4210 = vmatprep.subr.mxu0 %v8660_v54  ;;  %4057 = vmatpush1.msra.mxu1 %v3901_v44 }
0x175d   :  { %4058 = vmatprep.subr.mxu1 %v3897_v14 }
0x17d0   :  { %v3818_v37 = vpop.xlane.xlu1 %3817 }
0x17d1   :  { %v3823_v6 = vmul.f32 0.0052083335, %v3818_v37 }
0x17d3   :  { %v10890_v40 = vsub.f32 %v10759_v23, %v3823_v6  ;;  %v10893_v22 = vsub.f32 %v10756_v24, %v3823_v6 }
0x17d4   :  { %v3822_v58 = vpop.xlane.xlu1 %3821 }
0x17d5   :  { %v3824_v50 = vmul.f32 0.0052083335, %v3822_v58  ;;  %v3829_v47 = vmul.f32 %v10890_v40, %v10890_v40  ;;  %v3830_v49 = vmul.f32 %v10893_v22, %v10893_v22 }
0x17d7   :  { %v10900_v12 = vsub.f32 %v10768_v32, %v3824_v50  ;;  %v10903_v21 = vsub.f32 %v10765_v30, %v3824_v50  ;;  %v3833_v23 = vsel %vm488_vm0, %v3830_v49, 0.0  ;;  %v3905_v30 = vld [vmem:[%s12715_s13 + $0xc0] sm:$0xff]  ;;  %v3896_v32 = vld [vmem:[%s12715_s13 + $0x78] sm:$0xff]  ;;  %v3814_v49 = vld [vmem:[#allocation17] sm:$0x3] }
0x17d8   :  { %v3834_v27 = vadd.f32 %v3833_v23, %v3829_v47  ;;  %4211 = vmatpush1.msra.mxu0 %v3905_v30  ;;  %4059 = vmatpush1.msra.mxu1 %v3896_v32  ;;  %v3813_v47 = vld [vmem:[#allocation16] sm:$0x3]  ;;  %v3874_v14 = vrot.slane %v3814_v49, %v9198_v39 }
0x17d9   :  { %v3831_v24 = vmul.f32 %v10900_v12, %v10900_v12  ;;  %v3832_v13 = vmul.f32 %v10903_v21, %v10903_v21  ;;  %4212 = vmatprep.subr.mxu0 %v8660_v54  ;;  %4060 = vmatprep.subr.mxu1 %v3892_v34  ;;  %v3855_v23 = vrot.slane %v3813_v47, %v9321_v10 }
0x17da   :  { %3835 = vadd.xlane.f32.xlu0 %v3834_v27  ;;  %4213 = vmatpush1.msra.mxu0 %v3900_v59  ;;  %v3859_v27 = vrot.slane %v3813_v47, %v9198_v39  ;;  %v3988_v47 = vld [vmem:[%s12715_s13 + $0x358] sm:$0xff] }
0x17db   :  { %v3837_v20 = vsel %vm488_vm0, %v3832_v13, 0.0  ;;  %4061 = vmatpush1.msra.mxu1 %v3891_v33  ;;  %4214 = vmatprep.subr.mxu0 %v8660_v54 }
0x17dc   :  { %v3838_v29 = vadd.f32 %v3837_v20, %v3831_v24  ;;  %4062 = vmatprep.subr.mxu1 %v3887_v35  ;;  %4215 = vmatpush1.msra.mxu0 %v3895_v19 }
0x17dd   :  { %4063 = vmatpush1.msra.mxu1 %v3886_v41  ;;  %4216 = vmatprep.subr.mxu0 %v8660_v54 }
0x17de   :  { %3839 = vadd.xlane.f32.xlu0 %v3838_v29  ;;  %4064 = vmatprep.subr.mxu1 %v3882_v2  ;;  %v3870_v29 = vrot.slane %v3814_v49, %v9321_v10  ;;  %v3984_v49 = vld [vmem:[%s12715_s13 + $0x338] sm:$0xff] }
0x17df   :  { %4217 = vmatpush1.msra.mxu0 %v3890_v3  ;;  %4065 = vmatpush1.msra.mxu1 %v3881_v17  ;;  %v3949_v3 = vld [vmem:[%s12715_s13 + $0x220] sm:$0xff] }
0x17e0   :  { %4218 = vmatprep.subr.mxu0 %v8660_v54  ;;  %4082 = vmatprep.subr.mxu1 %v3997_v48  ;;  %v3948_v48 = vld [vmem:[%s12715_s13 + $0x218] sm:$0xff] }
0x17e1   :  { %4219 = vmatpush1.msra.mxu0 %v3885_v55  ;;  %4083 = vmatpush2.msra.mxu1 %v3996_v43  ;;  %v3944_v55 = vld [vmem:[%s12715_s13 + $0x1f8] sm:$0xff]  ;;  %v3943_v43 = vld [vmem:[%s12715_s13 + $0x1f0] sm:$0xff] }
0x17e2   :  { %4236 = vmatprep.subr.mxu0 %v8660_v54  ;;  %4084 = vmatprep.subr.mxu1 %v3992_v31  ;;  %v3939_v31 = vld [vmem:[%s12715_s13 + $0x1d0] sm:$0xff] }
0x17e3   :  { %4237 = vmatpush2.msra.mxu0 %v4000_v56  ;;  %4085 = vmatpush2.msra.mxu1 %v3991_v46  ;;  %v3938_v56 = vld [vmem:[%s12715_s13 + $0x1c8] sm:$0xff] }
0x17e4   :  { %4238 = vmatprep.subr.mxu0 %v8660_v54  ;;  %4086 = vmatprep.subr.mxu1 %v3987_v18  ;;  %v3934_v46 = vld [vmem:[%s12715_s13 + $0x1a8] sm:$0xff]  ;;  %v3933_v18 = vld [vmem:[%s12715_s13 + $0x1a0] sm:$0xff] }
0x17e5   :  { %4239 = vmatpush2.msra.mxu0 %v3995_v8  ;;  %4087 = vmatpush2.msra.mxu1 %v3986_v25  ;;  %v3929_v8 = vld [vmem:[%s12715_s13 + $0x180] sm:$0xff]  ;;  %v3928_v25 = vld [vmem:[%s12715_s13 + $0x178] sm:$0xff] }
0x17e6   :  { %4240 = vmatprep.subr.mxu0 %v8660_v54  ;;  %4088 = vmatprep.subr.mxu1 %v3982_v42  ;;  %v3924_v42 = vld [vmem:[%s12715_s13 + $0x158] sm:$0xff] }
0x17e7   :  { %4241 = vmatpush2.msra.mxu0 %v3990_v51  ;;  %4089 = vmatpush2.msra.mxu1 %v3981_v53  ;;  %v3923_v51 = vld [vmem:[%s12715_s13 + $0x150] sm:$0xff] }
0x17e8   :  { %4242 = vmatprep.subr.mxu0 %v8660_v54  ;;  %4090 = vmatprep.subr.mxu1 %v3977_v28  ;;  %v3919_v53 = vld [vmem:[%s12715_s13 + $0x130] sm:$0xff]  ;;  %v3918_v28 = vld [vmem:[%s12715_s13 + $0x128] sm:$0xff] }
0x17e9   :  { %4243 = vmatpush2.msra.mxu0 %v3985_v57  ;;  %4091 = vmatpush2.msra.mxu1 %v3976_v60  ;;  %v3914_v57 = vld [vmem:[%s12715_s13 + $0x108] sm:$0xff]  ;;  %v3913_v60 = vld [vmem:[%s12715_s13 + $0x100] sm:$0xff] }
0x17ea   :  { %4244 = vmatprep.subr.mxu0 %v8660_v54  ;;  %4092 = vmatprep.subr.mxu1 %v3972_v61  ;;  %v3909_v61 = vld [vmem:[%s12715_s13 + $0xe0] sm:$0xff] }
0x17eb   :  { %4245 = vmatpush2.msra.mxu0 %v3980_v15  ;;  %4093 = vmatpush2.msra.mxu1 %v3971_v16  ;;  %v3908_v15 = vld [vmem:[%s12715_s13 + $0xd8] sm:$0xff] }
0x17ec   :  { %4246 = vmatprep.subr.mxu0 %v8660_v54  ;;  %4094 = vmatprep.subr.mxu1 %v3967_v62  ;;  %v3904_v16 = vld [vmem:[%s12715_s13 + $0xb8] sm:$0xff]  ;;  %v3903_v62 = vld [vmem:[%s12715_s13 + $0xb0] sm:$0xff] }
0x17ed   :  { %4247 = vmatpush2.msra.mxu0 %v3975_v63  ;;  %4095 = vmatpush2.msra.mxu1 %v3966_v4  ;;  %v3899_v63 = vld [vmem:[%s12715_s13 + $0x90] sm:$0xff]  ;;  %v3898_v4 = vld [vmem:[%s12715_s13 + $0x88] sm:$0xff] }
0x17ee   :  { %4248 = vmatprep.subr.mxu0 %v8660_v54  ;;  %4096 = vmatprep.subr.mxu1 %v3962_v0  ;;  %v3894_v0 = vld [vmem:[%s12715_s13 + $0x68] sm:$0xff] }
0x17ef   :  { %4249 = vmatpush2.msra.mxu0 %v3970_v52  ;;  %4097 = vmatpush2.msra.mxu1 %v3961_v1  ;;  %v3893_v52 = vld [vmem:[%s12715_s13 + $0x60] sm:$0xff] }
0x17f0   :  { %4250 = vmatprep.subr.mxu0 %v8660_v54  ;;  %4111 = vmatprep.subr.mxu1 %v3959_v5  ;;  %v3889_v1 = vld [vmem:[%s12715_s13 + $0x40] sm:$0xff]  ;;  %v3888_v5 = vld [vmem:[%s12715_s13 + $0x38] sm:$0xff] }
0x17f1   :  { %4251 = vmatpush2.msra.mxu0 %v3965_v36  ;;  %v3884_v36 = vld [vmem:[%s12715_s13 + $0x18] sm:$0xff] }
0x17f2   :  { %7928 = vmatprep.subr.mxu0 %v8660_v54 }
0x1863   :  { %v3836_v7 = vpop.xlane.xlu0 %3835 }
0x1864   :  { %v3841_v44 = vmul.f32 0.0052083335, %v3836_v7  ;;  %v3883_v7 = vld [vmem:[%s12715_s13 + $0x10] sm:$0xff] }
0x1866   :  { %v3843_v37 = vadd.f32 1e-05, %v3841_v44  ;;  %v3999_v44 = vld [vmem:[%s12715_s13 + $0x3b0] sm:$0xff] }
0x1867   :  { %v3840_v6 = vpop.xlane.xlu0 %3839 }
0x1868   :  { %8109 = vrsqrt.f32 %v3843_v37  ;;  %v3842_v58 = vmul.f32 0.0052083335, %v3840_v6  ;;  %v3998_v37 = vld [vmem:[%s12715_s13 + $0x3a8] sm:$0xff] }
0x1869   :  { %v3994_v6 = vld [vmem:[%s12715_s13 + $0x388] sm:$0xff] }
0x186a   :  { %v3844_v50 = vadd.f32 1e-05, %v3842_v58  ;;  %v3993_v58 = vld [vmem:[%s12715_s13 + $0x380] sm:$0xff] }
0x186c   :  { %8111 = vrsqrt.f32 %v3844_v50  ;;  %v3989_v50 = vld [vmem:[%s12715_s13 + $0x360] sm:$0xff] }
0x1875   :  { %v8110_v24 = vpop.eup %8109 }
0x1876   :  { %v3847_v13 = vmul.f32 %v8110_v24, %v10890_v40  ;;  %v3848_v20 = vmul.f32 %v8110_v24, %v10893_v22  ;;  %v3958_v40 = vld [vmem:[%s12715_s13 + $0x268] sm:$0xff] }
0x1877   :  { %v3954_v22 = vld [vmem:[%s12715_s13 + $0x248] sm:$0xff] }
0x1878   :  { %v3863_v30 = vmul.f32 %v3859_v27, %v3848_v20  ;;  %v3862_v32 = vmul.f32 %v3855_v23, %v3847_v13  ;;  %v3978_v24 = vld [vmem:[%s12715_s13 + $0x308] sm:$0xff]  ;;  %v3973_v20 = vld [vmem:[%s12715_s13 + $0x2e0] sm:$0xff] }
0x1879   :  { %v8112_v34 = vpop.eup %8111  ;;  %v3974_v13 = vld [vmem:[%s12715_s13 + $0x2e8] sm:$0xff] }
0x187a   :  { %v11044_v59 = vadd.f32 %v3874_v14, %v3863_v30  ;;  %v11046_v33 = vadd.f32 %v3870_v29, %v3862_v32  ;;  %v3850_v35 = vmul.f32 %v8112_v34, %v10903_v21  ;;  %v3849_v19 = vmul.f32 %v8112_v34, %v10900_v12  ;;  %v3953_v12 = vld [vmem:[%s12715_s13 + $0x240] sm:$0xff]  ;;  %v3964_v30 = vld [vmem:[%s12715_s13 + $0x298] sm:$0xff]  ;;  %v3963_v32 = vld [vmem:[%s12715_s13 + $0x290] sm:$0xff] }
0x187b   :  { %v4001_v34 = vld [vmem:[#allocation19] sm:$0x1f] }
0x187c   :  { %7640 = vmatprep.mubr.msk.f32.mxu1 %vm488_vm0, %v11044_v59  ;;  %7644 = vmatprep.mubr.msk.f32.mxu0 %vm488_vm0, %v11044_v59  ;;  %v3865_v41 = vmul.f32 %v3859_v27, %v3850_v35  ;;  %v3864_v2 = vmul.f32 %v3855_v23, %v3849_v19  ;;  %v3983_v23 = vld [vmem:[%s12715_s13 + $0x330] sm:$0xff]  ;;  %v4010_v35 = vrot.slane %v4001_v34, %v9198_v39 }
0x187d   :  { %4099 = vmatmul.mubr.f32.vlgmr.msra.gmra.mxu1 %v11046_v33  ;;  %4253 = vmatmul.mubr.f32.vlgmr.msra.gmra.mxu0 %v11046_v33  ;;  %v3979_v27 = vld [vmem:[%s12715_s13 + $0x310] sm:$0xff] }
0x187e   :  { %4112 = vmatpush1.msra.mxu1 %v3958_v40  ;;  %v11065_v21 = vadd.f32 %v3874_v14, %v3865_v41  ;;  %v11070_v17 = vadd.f32 %v3870_v29, %v3864_v2  ;;  %v3969_v29 = vld [vmem:[%s12715_s13 + $0x2c0] sm:$0xff]  ;;  %v3968_v14 = vld [vmem:[%s12715_s13 + $0x2b8] sm:$0xff]  ;;  %v4006_v2 = vrot.slane %v4001_v34, %v9321_v10 }
0x187f   :  { %4113 = vmatprep.subr.mxu1 %v3954_v22 }
0x1880   :  { %4114 = vmatpush1.msra.mxu1 %v3953_v12  ;;  %7641 = vmatprep.mubr.msk.f32.mxu1 %vm488_vm0, %v11065_v21 }
0x1881   :  { %4115 = vmatprep.subr.mxu1 %v3949_v3  ;;  %7645 = vmatprep.mubr.msk.f32.mxu0 %vm488_vm0, %v11065_v21  ;;  %v11225_v3 = vrot.slane %v4001_v34, %v9434_v45 }
0x1882   :  { %4105 = vmatmul.mubr.f32.gmra.mxu1 %v11070_v17  ;;  %4258 = vmatmul.mubr.f32.gmra.mxu0 %v11070_v17 }
0x1883   :  { %4116 = vmatpush1.msra.mxu1 %v3948_v48  ;;  %7642 = vmatprep.mubr.msk.f32.mxu1 %vm488_vm0, %v11044_v59 }
0x1884   :  { %4117 = vmatprep.subr.mxu1 %v3944_v55  ;;  %7930 = vmatprep.mubr.msk.f32.mxu0 %vm8661_vm1, %v8660_v54 }
0x1885   :  { %4118 = vmatpush1.msra.mxu1 %v3943_v43 }
0x1886   :  { %4119 = vmatprep.subr.mxu1 %v3939_v31 }
0x1887   :  { %4120 = vmatpush1.msra.mxu1 %v3938_v56 }
0x1888   :  { %4121 = vmatprep.subr.mxu1 %v3934_v46  ;;  %v4014_v46 = vrot.slane %v4001_v34, %v9318_v9 }
0x1889   :  { %4122 = vmatpush1.msra.mxu1 %v3933_v18 }
0x188a   :  { %4123 = vmatprep.subr.mxu1 %v3929_v8 }
0x188b   :  { %4124 = vmatpush1.msra.mxu1 %v3928_v25 }
0x188c   :  { %4125 = vmatprep.subr.mxu1 %v3924_v42 }
0x188d   :  { %4126 = vmatpush1.msra.mxu1 %v3923_v51 }
0x188e   :  { %4127 = vmatprep.subr.mxu1 %v3919_v53 }
0x188f   :  { %4128 = vmatpush1.msra.mxu1 %v3918_v28 }
0x1890   :  { %4129 = vmatprep.subr.mxu1 %v3914_v57 }
0x1891   :  { %4130 = vmatpush1.msra.mxu1 %v3913_v60  ;;  %v11257_v60 = vrot.slane %v4001_v34, %v9324_v11 }
0x1892   :  { %4131 = vmatprep.subr.mxu1 %v3909_v61 }
0x1893   :  { %4132 = vmatpush1.msra.mxu1 %v3908_v15 }
0x1894   :  { %4133 = vmatprep.subr.mxu1 %v3904_v16 }
0x1895   :  { %4134 = vmatpush1.msra.mxu1 %v3903_v62 }
0x1896   :  { %4135 = vmatprep.subr.mxu1 %v3899_v63 }
0x1897   :  { %4136 = vmatpush1.msra.mxu1 %v3898_v4 }
0x1898   :  { %4137 = vmatprep.subr.mxu1 %v3894_v0 }
0x1899   :  { %4138 = vmatpush1.msra.mxu1 %v3893_v52 }
0x189a   :  { %4139 = vmatprep.subr.mxu1 %v3889_v1 }
0x189b   :  { %4140 = vmatpush1.msra.mxu1 %v3888_v5 }
0x189c   :  { %4141 = vmatprep.subr.mxu1 %v3884_v36 }
0x189d   :  { %4142 = vmatpush1.msra.mxu1 %v3883_v7 }
0x189e   :  { %4159 = vmatprep.subr.mxu1 %v3999_v44 }
0x189f   :  { %4160 = vmatpush2.msra.mxu1 %v3998_v37 }
0x18a0   :  { %4161 = vmatprep.subr.mxu1 %v3994_v6 }
0x18a1   :  { %4162 = vmatpush2.msra.mxu1 %v3993_v58 }
0x18a2   :  { %4163 = vmatprep.subr.mxu1 %v3989_v50 }
0x18a3   :  { %4164 = vmatpush2.msra.mxu1 %v3988_v47 }
0x18a4   :  { %4165 = vmatprep.subr.mxu1 %v3984_v49 }
0x18a5   :  { %4166 = vmatpush2.msra.mxu1 %v3983_v23 }
0x18a6   :  { %4167 = vmatprep.subr.mxu1 %v3979_v27 }
0x18a7   :  { %4168 = vmatpush2.msra.mxu1 %v3978_v24 }
0x18a8   :  { %4169 = vmatprep.subr.mxu1 %v3974_v13 }
0x18a9   :  { %4170 = vmatpush2.msra.mxu1 %v3973_v20 }
0x18aa   :  { %4171 = vmatprep.subr.mxu1 %v3969_v29 }
0x18ab   :  { %4172 = vmatpush2.msra.mxu1 %v3968_v14 }
0x18ac   :  { %4173 = vmatprep.subr.mxu1 %v3964_v30 }
0x18ad   :  { %4174 = vmatpush2.msra.mxu1 %v3963_v32 }
0x18ae   :  { %4176 = vmatmul.mubr.f32.vlgmr.msra.gmra.mxu1 %v11046_v33  ;;  %7908 = vmatprep.subr.mxu1 %v8660_v54 }
0x18af   :  { %7643 = vmatprep.mubr.msk.f32.mxu1 %vm488_vm0, %v11065_v21 }
0x18b2   :  { %4182 = vmatmul.mubr.f32.gmra.mxu1 %v11070_v17 }
0x18b3   :  { %7910 = vmatprep.mubr.msk.f32.mxu1 %vm8661_vm1, %v8660_v54 }
0x193d   :  { %v4100_v19 = vpop.f32.mrf.mxu1  ;;  %v11219_v40 = vpop.f32.mrf.mxu0 }
0x193e   :  { %v4101_v43 = vadd.f32 %v4100_v19, %v4006_v2 }
0x193f   :  { %v4102_v22 = vpop.f32.mrf.mxu1  ;;  %v4256_v41 = vpop.f32.mrf.mxu0 }
0x1940   :  { %v11222_v12 = vadd.f32 %v4102_v22, %v4010_v35 }
0x1942   :  { %v4259_v48 = vpop.f32.mrf.mxu0  ;;  %4264 = vrot.lane.b32.xlu1 %v11222_v12, %s8663_s9  ;;  %v4106_v56 = vpop.f32.mrf.mxu1 }
0x1943   :  { %v11230_v55 = vadd.f32 %v4259_v48, %v11225_v3  ;;  %v11244_v53 = vadd.f32 %v4106_v56, %v4006_v2 }
0x1944   :  { %v4261_v31 = vpop.f32.mrf.mxu0  ;;  %v4108_v18 = vpop.f32.mrf.mxu1 }
0x1945   :  { %v11240_v42 = vadd.f32 %v4108_v18, %v4010_v35 }
0x1946   :  { %4425 = vrot.lane.b32.xlu1 %v4101_v43, %s8664_s21 }
0x194a   :  { %4591 = vrot.lane.b32.xlu1 %v4101_v43, %s8663_s9 }
0x196e   :  { %v4177_v8 = vpop.f32.mrf.mxu1 }
0x196f   :  { %v4178_v25 = vadd.f32 %v4177_v8, %v4014_v46 }
0x1970   :  { %v4179_v51 = vpop.f32.mrf.mxu1 }
0x1971   :  { %4757 = vrot.lane.b32.xlu1 %v4178_v25, %s8664_s21  ;;  %7929 = vmatpush3.xpose.msk.msra.mxu0 %vm727_vm2, %v4178_v25  ;;  %v11262_v15 = vadd.f32 %v4179_v51, %v11257_v60 }
0x1972   :  { %7938 = vmatprep.subr.mxu0 %v8660_v54  ;;  %v4183_v28 = vpop.f32.mrf.mxu1 }
0x1973   :  { %v11248_v57 = vadd.f32 %v4183_v28, %v4014_v46 }
0x1974   :  { %v11279_v0 = vpop.f32.mrf.mxu1 }
0x1975   :  { %4755 = vrot.lane.b32.xlu1 %v4101_v43, %s8662_s16 }
0x1979   :  { %5082 = vrot.lane.b32.xlu1 %v4178_v25, %s8662_s16 }
0x197d   :  { %5267 = vrot.lane.b32.xlu1 %v11240_v42, %s8663_s9 }
0x1981   :  { %5428 = vrot.lane.b32.xlu1 %v11244_v53, %s8664_s21 }
0x1985   :  { %5760 = vrot.lane.b32.xlu1 %v11248_v57, %s8664_s21 }
0x1989   :  { %5923 = vrot.lane.b32.xlu1 %v11248_v57, %s8663_s9 }
0x198d   :  { %6083 = vrot.lane.b32.xlu1 %v11240_v42, %s8664_s21 }
0x19b4   :  { %v4265_v61 = vpop.permute.xlu1 %4264 }
0x19b5   :  { %7909 = vmatpush3.xpose.msk.msra.mxu1 %vm727_vm2, %v4265_v61 }
0x19b6   :  { %7913 = vmatprep.subr.mxu1 %v8660_v54 }
0x19b8   :  { %7911 = vmatmul.mubr.msk.f32.vlgmr.msra.gmra.mxu1 %vm727_vm2, %v4101_v43  ;;  %v11265_v16 = vpop.permute.xlu1 %4425 }
0x19b9   :  { %7914 = vmatpush3.msra.mxu1 %v11262_v15  ;;  %7915 = vmatprep.mubr.msk.f32.mxu1 %vm8661_vm1, %v8660_v54 }
0x19ba   :  { %7918 = vmatprep.subr.mxu1 %v8660_v54 }
0x19bc   :  { %v4592_v62 = vpop.permute.xlu1 %4591 }
0x19bd   :  { %7931 = vmatmul.mubr.msk.f32.vlgmr.msra.gmra.mxu0 %vm727_vm2, %v4592_v62 }
0x19be   :  { %7940 = vmatprep.mubr.msk.f32.mxu0 %vm8661_vm1, %v8660_v54 }
0x19e3   :  { %v4758_v63 = vpop.permute.xlu1 %4757 }
0x19e4   :  { %7939 = vmatpush3.xpose.msk.msra.mxu0 %vm727_vm2, %v4758_v63 }
0x19e5   :  { %7948 = vmatprep.subr.mxu0 %v8660_v54 }
0x19e7   :  { %v4756_v4 = vpop.permute.xlu1 %4755 }
0x19e8   :  { %7941 = vmatmul.mubr.msk.f32.vlgmr.msra.gmra.mxu0 %vm727_vm2, %v4756_v4 }
0x19e9   :  { %7950 = vmatprep.mubr.msk.f32.mxu0 %vm8661_vm1, %v8660_v54 }
0x19eb   :  { %v5083_v13 = vpop.permute.xlu1 %5082 }
0x19ef   :  { %v5268_v30 = vpop.permute.xlu1 %5267 }
0x19f3   :  { %v5429_v35 = vpop.permute.xlu1 %5428 }
0x19f7   :  { %v5761_v22 = vpop.permute.xlu1 %5760 }
0x19fb   :  { %v5924_v2 = vpop.permute.xlu1 %5923 }
0x19ff   :  { %v6084_v48 = vpop.permute.xlu1 %6083 }
0x1a78   :  { %v4337_v52 = vpop.f32.mrf.mxu1 }
0x1a79   :  { %v4341_v1 = vsel %vm803_vm3, %v4337_v52, -inf }
0x1a7a   :  { %4342 = vmax.xlane.f32.xlu0 %v4341_v1  ;;  %v7912_v5 = vpop.f32.mrf.mxu1 }
0x1a7d   :  { %v11282_v36 = vpop.f32.mrf.mxu0 }
0x1a7e   :  { %v4668_v7 = vsel %vm803_vm3, %v11282_v36, -inf }
0x1a7f   :  { %4669 = vmax.xlane.f32.xlu1 %v4668_v7  ;;  %v7932_v44 = vpop.f32.mrf.mxu0 }
0x1aa8   :  { %v11286_v37 = vpop.f32.mrf.mxu0 }
0x1aa9   :  { %v4833_v1 = vsel %vm803_vm3, %v11286_v37, -inf }
0x1aaa   :  { %v7942_v6 = vpop.f32.mrf.mxu0 }
0x1b03   :  { %v4343_v58 = vpop.xlane.xlu0 %4342 }
0x1b04   :  { %v4344_v50 = vsub.f32 %v4337_v52, %v4343_v58 }
0x1b06   :  { %v4345_v47 = vmul.f32 1.442695, %v4344_v50 }
0x1b08   :  { %8113 = vpow2.f32 %v4345_v47  ;;  %v4670_v8 = vpop.xlane.xlu1 %4669 }
0x1b15   :  { %v8114_v49 = vpop.eup %8113 }
0x1b16   :  { %v4347_v23 = vsel %vm803_vm3, %v8114_v49, 0.0 }
0x1b17   :  { %4348 = vadd.xlane.f32.xlu0 %v4347_v23 }
0x1b2d   :  { %4427 = vrot.lane.b32.xlu0 %v11222_v12, %s8662_s16 }
0x1b31   :  { %4920 = vrot.lane.b32.xlu0 %v4178_v25, %s8663_s9 }
0x1b35   :  { %5080 = vrot.lane.b32.xlu0 %v11222_v12, %s8664_s21 }
0x1b39   :  { %5430 = vrot.lane.b32.xlu0 %v11240_v42, %s8662_s16 }
0x1b3d   :  { %5594 = vrot.lane.b32.xlu0 %v11244_v53, %s8663_s9 }
0x1b41   :  { %5758 = vrot.lane.b32.xlu0 %v11244_v53, %s8662_s16 }
0x1b45   :  { %6085 = vrot.lane.b32.xlu0 %v11248_v57, %s8662_s16 }
0x1ba0   :  { %v4349_v27 = vpop.xlane.xlu0 %4348 }
0x1ba1   :  { %8115 = vrcp.f32 %v4349_v27 }
0x1ba4   :  { %v4428_v24 = vpop.permute.xlu0 %4427 }
0x1ba8   :  { %v4921_v20 = vpop.permute.xlu0 %4920 }
0x1ba9   :  { %7949 = vmatpush3.xpose.msk.msra.mxu0 %vm727_vm2, %v4921_v20 }
0x1baa   :  { %7958 = vmatprep.subr.mxu0 %v8660_v54 }
0x1bac   :  { %v5081_v29 = vpop.permute.xlu0 %5080  ;;  %7951 = vmatmul.mubr.msk.f32.vlgmr.msra.gmra.mxu0 %vm727_vm2, %v11222_v12 }
0x1bad   :  { %7959 = vmatpush3.xpose.msk.msra.mxu0 %vm727_vm2, %v5083_v13  ;;  %7960 = vmatprep.mubr.msk.f32.mxu0 %vm8661_vm1, %v8660_v54 }
0x1bae   :  { %v8116_v14 = vpop.eup %8115  ;;  %7968 = vmatprep.subr.mxu0 %v8660_v54 }
0x1baf   :  { %v4351_v32 = vmul.f32 %v8116_v14, %v8114_v49 }
0x1bb0   :  { %7961 = vmatmul.mubr.msk.f32.vlgmr.msra.gmra.mxu0 %vm727_vm2, %v5081_v29  ;;  %v5431_v34 = vpop.permute.xlu0 %5430 }
0x1bb1   :  { %7916 = vmatmul.mubr.msk.f32.vlgmr.msra.gmra.mxu1 %vm803_vm3, %v4351_v32  ;;  %7969 = vmatpush3.xpose.msk.msra.mxu0 %vm727_vm2, %v5268_v30 }
0x1bb2   :  { %7919 = vmatpush3.xpose.msk.msra.mxu1 %vm727_vm2, %v4428_v24  ;;  %7970 = vmatprep.mubr.msk.f32.mxu0 %vm8661_vm1, %v8660_v54 }
0x1bb3   :  { %7920 = vmatprep.mubr.msk.f32.mxu1 %vm8661_vm1, %v8660_v54  ;;  %7978 = vmatprep.subr.mxu0 %v8660_v54 }
0x1bb4   :  { %7971 = vmatmul.mubr.msk.f32.vlgmr.msra.gmra.mxu0 %vm727_vm2, %v11244_v53  ;;  %7923 = vmatprep.subr.mxu1 %v8660_v54  ;;  %v5595_v19 = vpop.permute.xlu0 %5594  ;;  %v4671_v53 = vsub.f32 %v11282_v36, %v4670_v8 }
0x1bb5   :  { %7921 = vmatmul.mubr.msk.f32.vlgmr.msra.gmra.mxu1 %vm727_vm2, %v11265_v16  ;;  %7979 = vmatpush3.xpose.msk.msra.mxu0 %vm727_vm2, %v5431_v34 }
0x1bb6   :  { %7980 = vmatprep.mubr.msk.f32.mxu0 %vm8661_vm1, %v8660_v54  ;;  %7988 = vmatprep.subr.mxu0 %v8660_v54  ;;  %v4672_v63 = vmul.f32 1.442695, %v4671_v53 }
0x1bb7   :  { %7925 = vmatprep.mubr.msk.f32.mxu1 %vm8661_vm1, %v8660_v54 }
0x1bb8   :  { %7981 = vmatmul.mubr.msk.f32.vlgmr.msra.gmra.mxu0 %vm727_vm2, %v5429_v35  ;;  %v5759_v41 = vpop.permute.xlu0 %5758  ;;  %8117 = vpow2.f32 %v4672_v63 }
0x1bb9   :  { %7989 = vmatpush3.xpose.msk.msra.mxu0 %vm727_vm2, %v11248_v57  ;;  %7990 = vmatprep.mubr.msk.f32.mxu0 %vm8661_vm1, %v8660_v54 }
0x1bba   :  { %7998 = vmatprep.subr.mxu0 %v8660_v54 }
0x1bbc   :  { %7991 = vmatmul.mubr.msk.f32.vlgmr.msra.gmra.mxu0 %vm727_vm2, %v5595_v19  ;;  %v6086_v12 = vpop.permute.xlu0 %6085 }
0x1bbd   :  { %7999 = vmatpush3.xpose.msk.msra.mxu0 %vm727_vm2, %v5761_v22  ;;  %8000 = vmatprep.mubr.msk.f32.mxu0 %vm8661_vm1, %v8660_v54 }
0x1bbe   :  { %8008 = vmatprep.subr.mxu0 %v8660_v54 }
0x1bc0   :  { %8001 = vmatmul.mubr.msk.f32.vlgmr.msra.gmra.mxu0 %vm727_vm2, %v5759_v41 }
0x1bc1   :  { %8009 = vmatpush3.xpose.msk.msra.mxu0 %vm727_vm2, %v5924_v2  ;;  %8010 = vmatprep.mubr.msk.f32.mxu0 %vm8661_vm1, %v8660_v54 }
0x1bc2   :  { %8018 = vmatprep.subr.mxu0 %v8660_v54 }
0x1bc4   :  { %8011 = vmatmul.mubr.msk.f32.vlgmr.msra.gmra.mxu0 %vm727_vm2, %v11240_v42 }
0x1bc5   :  { %8019 = vmatpush3.xpose.msk.msra.mxu0 %vm727_vm2, %v6086_v12  ;;  %8020 = vmatprep.mubr.msk.f32.mxu0 %vm8661_vm1, %v8660_v54  ;;  %v11382_v13 = vpop.eup %8117 }
0x1bc6   :  { %v4674_v14 = vsel %vm803_vm3, %v11382_v13, 0.0 }
0x1bc8   :  { %8021 = vmatmul.mubr.msk.f32.vlgmr.msra.gmra.mxu0 %vm727_vm2, %v6084_v48 }
0x1c6c   :  { %v4992_v43 = vpop.f32.mrf.mxu0 }
0x1c6d   :  { %v4996_v7 = vsel %vm803_vm3, %v4992_v43, -inf }
0x1c6e   :  { %v7952_v31 = vpop.f32.mrf.mxu0 }
0x1c70   :  { %v5154_v56 = vpop.f32.mrf.mxu0 }
0x1c71   :  { %v11352_v46 = vpop.f32.mrf.mxu1  ;;  %v5158_v18 = vsel %vm803_vm3, %v5154_v56, -inf }
0x1c72   :  { %5159 = vmax.xlane.f32.xlu1 %v5158_v18  ;;  %v7962_v25 = vpop.f32.mrf.mxu0 }
0x1c73   :  { %v7917_v51 = vpop.f32.mrf.mxu1 }
0x1c74   :  { %v11355_v42 = vpop.f32.mrf.mxu0 }
0x1c75   :  { %v4499_v28 = vpop.f32.mrf.mxu1  ;;  %v5344_v50 = vsel %vm803_vm3, %v11355_v42, -inf }
0x1c76   :  { %v7972_v57 = vpop.f32.mrf.mxu0  ;;  %v4503_v61 = vsel %vm803_vm3, %v4499_v28, -inf }
0x1c77   :  { %4504 = vmax.xlane.f32.xlu0 %v4503_v61  ;;  %v7922_v16 = vpop.f32.mrf.mxu1  ;;  %v11411_v57 = vadd.f32 %v11219_v40, %v11225_v3 }
0x1c78   :  { %v11359_v62 = vpop.f32.mrf.mxu0 }
0x1c79   :  { %v5506_v4 = vsel %vm803_vm3, %v11359_v62, -inf }
0x1c7a   :  { %5507 = vmax.xlane.f32.xlu1 %v5506_v4  ;;  %v7982_v52 = vpop.f32.mrf.mxu0 }
0x1c7b   :  { %4834 = vmax.xlane.f32.xlu0 %v4833_v1 }
0x1c7c   :  { %v11365_v5 = vpop.f32.mrf.mxu0 }
0x1c7d   :  { %v5671_v23 = vsel %vm803_vm3, %v11365_v5, -inf }
0x1c7e   :  { %v7992_v36 = vpop.f32.mrf.mxu0 }
0x1c7f   :  { %4997 = vmax.xlane.f32.xlu0 %v4996_v7 }
0x1c80   :  { %v11368_v44 = vpop.f32.mrf.mxu0 }
0x1c81   :  { %v5836_v6 = vsel %vm803_vm3, %v11368_v44, -inf }
0x1c82   :  { %5837 = vmax.xlane.f32.xlu1 %v5836_v6  ;;  %v8002_v58 = vpop.f32.mrf.mxu0 }
0x1c83   :  { %5345 = vmax.xlane.f32.xlu0 %v5344_v50 }
0x1c84   :  { %v11374_v47 = vpop.f32.mrf.mxu0 }
0x1c85   :  { %v5999_v29 = vsel %vm803_vm3, %v11374_v47, -inf }
0x1c86   :  { %v8012_v49 = vpop.f32.mrf.mxu0 }
0x1c87   :  { %5672 = vmax.xlane.f32.xlu0 %v5671_v23 }
0x1c88   :  { %v11378_v27 = vpop.f32.mrf.mxu0 }
0x1c89   :  { %v6161_v24 = vsel %vm803_vm3, %v11378_v27, -inf }
0x1c8a   :  { %6162 = vmax.xlane.f32.xlu1 %v6161_v24  ;;  %v8022_v20 = vpop.f32.mrf.mxu0 }
0x1c8b   :  { %6000 = vmax.xlane.f32.xlu0 %v5999_v29 }
0x1c8e   :  { %4675 = vadd.xlane.f32.xlu1 %v4674_v14 }
0x1cfb   :  { %v5160_v30 = vpop.xlane.xlu1 %5159 }
0x1cfc   :  { %v5161_v34 = vsub.f32 %v5154_v56, %v5160_v30 }
0x1cfe   :  { %v5162_v22 = vmul.f32 1.442695, %v5161_v34 }
0x1d00   :  { %v4505_v32 = vpop.xlane.xlu0 %4504 }
0x1d01   :  { %v4506_v41 = vsub.f32 %v4499_v28, %v4505_v32 }
0x1d03   :  { %v4507_v31 = vmul.f32 1.442695, %v4506_v41  ;;  %v5508_v63 = vpop.xlane.xlu1 %5507 }
0x1d04   :  { %v4835_v35 = vpop.xlane.xlu0 %4834  ;;  %v5509_v52 = vsub.f32 %v11359_v62, %v5508_v63 }
0x1d05   :  { %v4836_v19 = vsub.f32 %v11286_v37, %v4835_v35 }
0x1d06   :  { %v5510_v40 = vmul.f32 1.442695, %v5509_v52 }
0x1d07   :  { %v4837_v2 = vmul.f32 1.442695, %v4836_v19  ;;  %v4186_v19 = vadd.f32 %v11279_v0, %v11257_v60 }
0x1d08   :  { %v4998_v12 = vpop.xlane.xlu0 %4997 }
0x1d09   :  { %8119 = vpow2.f32 %v4837_v2  ;;  %v4999_v48 = vsub.f32 %v4992_v43, %v4998_v12 }
0x1d0a   :  { %8121 = vpow2.f32 %v5162_v22 }
0x1d0b   :  { %v5000_v18 = vmul.f32 1.442695, %v4999_v48  ;;  %v5838_v1 = vpop.xlane.xlu1 %5837 }
0x1d0c   :  { %v5346_v61 = vpop.xlane.xlu0 %5345  ;;  %v5839_v3 = vsub.f32 %v11368_v44, %v5838_v1 }
0x1d0d   :  { %8123 = vpow2.f32 %v5000_v18  ;;  %v5347_v4 = vsub.f32 %v11355_v42, %v5346_v61 }
0x1d0e   :  { %8125 = vpow2.f32 %v4507_v31 }
0x1d0f   :  { %v5348_v36 = vmul.f32 1.442695, %v5347_v4 }
0x1d10   :  { %v5673_v16 = vpop.xlane.xlu0 %5672 }
0x1d11   :  { %v5674_v7 = vsub.f32 %v11365_v5, %v5673_v16  ;;  %8127 = vpow2.f32 %v5348_v36 }
0x1d12   :  { %8129 = vpow2.f32 %v5510_v40 }
0x1d13   :  { %v5675_v58 = vmul.f32 1.442695, %v5674_v7  ;;  %v6163_v49 = vpop.xlane.xlu1 %6162 }
0x1d14   :  { %v6001_v6 = vpop.xlane.xlu0 %6000  ;;  %v6164_v42 = vsub.f32 %v11378_v27, %v6163_v49 }
0x1d15   :  { %v6002_v50 = vsub.f32 %v11374_v47, %v6001_v6  ;;  %8131 = vpow2.f32 %v5675_v58 }
0x1d16   :  { %v11389_v8 = vpop.eup %8119  ;;  %v6165_v62 = vmul.f32 1.442695, %v6164_v42 }
0x1d17   :  { %v4839_v25 = vsel %vm803_vm3, %v11389_v8, 0.0  ;;  %v11393_v56 = vpop.eup %8121  ;;  %v6003_v23 = vmul.f32 1.442695, %v6002_v50  ;;  %v4676_v22 = vpop.xlane.xlu1 %4675 }
0x1d18   :  { %4840 = vadd.xlane.f32.xlu0 %v4839_v25  ;;  %v5164_v43 = vsel %vm803_vm3, %v11393_v56, 0.0 }
0x1d1a   :  { %v11395_v37 = vpop.eup %8123 }
0x1d1b   :  { %v5002_v51 = vsel %vm803_vm3, %v11395_v37, 0.0  ;;  %v11401_v53 = vpop.eup %8125 }
0x1d1c   :  { %5003 = vadd.xlane.f32.xlu1 %v5002_v51  ;;  %5165 = vadd.xlane.f32.xlu0 %v5164_v43  ;;  %v4509_v28 = vsel %vm803_vm3, %v11401_v53, 0.0 }
0x1d1e   :  { %v11423_v5 = vpop.eup %8127 }
0x1d1f   :  { %v11425_v24 = vpop.eup %8129  ;;  %v5350_v44 = vsel %vm803_vm3, %v11423_v5, 0.0 }
0x1d20   :  { %4510 = vadd.xlane.f32.xlu0 %v4509_v28  ;;  %v5512_v29 = vsel %vm803_vm3, %v11425_v24, 0.0 }
0x1d22   :  { %v11429_v20 = vpop.eup %8131 }
0x1d23   :  { %v5677_v27 = vsel %vm803_vm3, %v11429_v20, 0.0 }
0x1d2d   :  { %4515 = vrot.lane.b32.xlu1 %v11262_v15, %s8664_s21 }
0x1d31   :  { %4844 = vrot.lane.b32.xlu1 %v11262_v15, %s8662_s16 }
0x1d35   :  { %5170 = vrot.lane.b32.xlu1 %v11411_v57, %s8664_s21 }
0x1d36   :  { %4679 = vrot.lane.b32.xlu0 %v11262_v15, %s8663_s9  ;;  %v5840_v15 = vmul.f32 1.442695, %v5839_v3 }
0x1d38   :  { %8133 = vpow2.f32 %v5840_v15 }
0x1d39   :  { %8135 = vpow2.f32 %v6003_v23 }
0x1d3a   :  { %8137 = vpow2.f32 %v6165_v62 }
0x1d45   :  { %v11431_v47 = vpop.eup %8133 }
0x1d46   :  { %v11437_v14 = vpop.eup %8135  ;;  %v5842_v32 = vsel %vm803_vm3, %v11431_v47, 0.0 }
0x1d47   :  { %v6005_v30 = vsel %vm803_vm3, %v11437_v14, 0.0  ;;  %v11443_v34 = vpop.eup %8137 }
0x1d48   :  { %v6167_v35 = vsel %vm803_vm3, %v11443_v34, 0.0 }
0x1d55   :  { %5351 = vadd.xlane.f32.xlu0 %v5350_v44 }
0x1d59   :  { %5678 = vadd.xlane.f32.xlu0 %v5677_v27  ;;  %5513 = vadd.xlane.f32.xlu1 %v5512_v29  ;;  %v6298_v27 = vld [vmem:[#allocation20 + $0xe8] sm:$0xff]  ;;  %v6297_v29 = vld [vmem:[#allocation20 + $0xe0] sm:$0xff] }
0x1d5d   :  { %6006 = vadd.xlane.f32.xlu1 %v6005_v30  ;;  %5843 = vadd.xlane.f32.xlu0 %v5842_v32  ;;  %v6296_v30 = vld [vmem:[#allocation20 + $0xd8] sm:$0xff]  ;;  %v6294_v32 = vld [vmem:[#allocation20 + $0xc8] sm:$0xff] }
0x1d61   :  { %6168 = vadd.xlane.f32.xlu0 %v6167_v35  ;;  %v6293_v35 = vld [vmem:[#allocation20 + $0xc0] sm:$0xff] }
0x1d6e   :  { %5518 = vrot.lane.b32.xlu1 %v4186_v19, %s8664_s21 }
0x1d72   :  { %5847 = vrot.lane.b32.xlu1 %v4186_v19, %s8662_s16 }
0x1d76   :  { %6173 = vrot.lane.b32.xlu1 %v11230_v55, %s8664_s21 }
0x1d77   :  { %5682 = vrot.lane.b32.xlu0 %v4186_v19, %s8663_s9 }
0x1da1   :  { %v4841_v41 = vpop.xlane.xlu0 %4840 }
0x1da5   :  { %v5166_v2 = vpop.xlane.xlu0 %5165  ;;  %v5004_v12 = vpop.xlane.xlu1 %5003 }
0x1da9   :  { %v4511_v48 = vpop.xlane.xlu0 %4510  ;;  %v4516_v31 = vpop.permute.xlu1 %4515 }
0x1daa   :  { %8139 = vrcp.f32 %v4511_v48  ;;  %7924 = vmatpush3.msra.mxu1 %v4516_v31  ;;  %v6285_v48 = vld [vmem:[#allocation20 + $0x80] sm:$0xff]  ;;  %v6284_v31 = vld [vmem:[#allocation20 + $0x78] sm:$0xff] }
0x1dab   :  { %7933 = vmatprep.subr.mxu1 %v8660_v54  ;;  %8141 = vrcp.f32 %v4676_v22  ;;  %v6289_v22 = vld [vmem:[#allocation20 + $0xa0] sm:$0xff] }
0x1dac   :  { %8143 = vrcp.f32 %v4841_v41  ;;  %v6288_v41 = vld [vmem:[#allocation20 + $0x98] sm:$0xff] }
0x1dad   :  { %8145 = vrcp.f32 %v5004_v12  ;;  %v4680_v25 = vpop.permute.xlu0 %4679  ;;  %v4845_v28 = vpop.permute.xlu1 %4844  ;;  %v6286_v12 = vld [vmem:[#allocation20 + $0x88] sm:$0xff] }
0x1dae   :  { %8147 = vrcp.f32 %v5166_v2  ;;  %v6287_v2 = vld [vmem:[#allocation20 + $0x90] sm:$0xff] }
0x1db1   :  { %v5171_v63 = vpop.permute.xlu1 %5170 }
0x1db7   :  { %v8140_v60 = vpop.eup %8139 }
0x1db8   :  { %v4513_v0 = vmul.f32 %v8140_v60, %v11401_v53  ;;  %v8142_v18 = vpop.eup %8141  ;;  %v6283_v60 = vld [vmem:[#allocation20 + $0x70] sm:$0xff] }
0x1db9   :  { %v4678_v51 = vmul.f32 %v8142_v18, %v11382_v13  ;;  %v8144_v43 = vpop.eup %8143  ;;  %v6281_v18 = vld [vmem:[#allocation20 + $0x60] sm:$0xff] }
0x1dba   :  { %7926 = vmatmul.mubr.msk.f32.vlgmr.msra.gmra.mxu1 %vm803_vm3, %v4513_v0  ;;  %v4843_v53 = vmul.f32 %v8144_v43, %v11389_v8  ;;  %v8146_v61 = vpop.eup %8145  ;;  %v6282_v0 = vld [vmem:[#allocation20 + $0x68] sm:$0xff] }
0x1dbb   :  { %7934 = vmatpush3.msra.mxu1 %v4680_v25  ;;  %7935 = vmatprep.mubr.msk.f32.mxu1 %vm8661_vm1, %v8660_v54  ;;  %v5006_v13 = vmul.f32 %v8146_v61, %v11395_v37  ;;  %v8148_v16 = vpop.eup %8147  ;;  %v6280_v25 = vld [vmem:[#allocation20 + $0x58] sm:$0xff]  ;;  %v6278_v43 = vld [vmem:[#allocation20 + $0x48] sm:$0xff]  ;;  %v6275_v61 = vld [vmem:[#allocation20 + $0x30] sm:$0xff] }
0x1dbc   :  { %7943 = vmatprep.subr.mxu1 %v8660_v54  ;;  %v5168_v8 = vmul.f32 %v8148_v16, %v11393_v56  ;;  %v6273_v16 = vld [vmem:[#allocation20 + $0x20] sm:$0xff] }
0x1dbe   :  { %7936 = vmatmul.mubr.msk.f32.vlgmr.msra.gmra.mxu1 %vm803_vm3, %v4678_v51  ;;  %v6279_v51 = vld [vmem:[#allocation20 + $0x50] sm:$0xff] }
0x1dbf   :  { %7944 = vmatpush3.msra.mxu1 %v4845_v28  ;;  %7945 = vmatprep.mubr.msk.f32.mxu1 %vm8661_vm1, %v8660_v54  ;;  %v6277_v28 = vld [vmem:[#allocation20 + $0x40] sm:$0xff] }
0x1dc0   :  { %7953 = vmatprep.subr.mxu1 %v8660_v54 }
0x1dc2   :  { %7946 = vmatmul.mubr.msk.f32.vlgmr.msra.gmra.mxu1 %vm803_vm3, %v4843_v53  ;;  %v6276_v53 = vld [vmem:[#allocation20 + $0x38] sm:$0xff] }
0x1dc3   :  { %7954 = vmatpush3.msra.mxu1 %v11411_v57  ;;  %7955 = vmatprep.mubr.msk.f32.mxu1 %vm8661_vm1, %v8660_v54 }
0x1dc4   :  { %7963 = vmatprep.subr.mxu1 %v8660_v54 }
0x1dc6   :  { %7956 = vmatmul.mubr.msk.f32.vlgmr.msra.gmra.mxu1 %vm803_vm3, %v5006_v13  ;;  %v6274_v13 = vld [vmem:[#allocation20 + $0x28] sm:$0xff] }
0x1dc7   :  { %7964 = vmatpush3.msra.mxu1 %v5171_v63  ;;  %7965 = vmatprep.mubr.msk.f32.mxu1 %vm8661_vm1, %v8660_v54  ;;  %v6272_v63 = vld [vmem:[#allocation20 + $0x18] sm:$0xff] }
0x1dc8   :  { %7973 = vmatprep.subr.mxu1 %v8660_v54 }
0x1dca   :  { %7966 = vmatmul.mubr.msk.f32.vlgmr.msra.gmra.mxu1 %vm803_vm3, %v5168_v8  ;;  %v6271_v8 = vld [vmem:[#allocation20 + $0x10] sm:$0xff] }
0x1dcb   :  { %7974 = vmatpush3.msra.mxu1 %v4186_v19  ;;  %7975 = vmatprep.mubr.msk.f32.mxu1 %vm8661_vm1, %v8660_v54  ;;  %v6292_v19 = vld [vmem:[#allocation20 + $0xb8] sm:$0xff] }
0x1dcc   :  { %7983 = vmatprep.subr.mxu1 %v8660_v54 }
0x1dde   :  { %v5352_v37 = vpop.xlane.xlu0 %5351 }
0x1ddf   :  { %8149 = vrcp.f32 %v5352_v37  ;;  %v6270_v37 = vld [vmem:[#allocation20 + $0x8] sm:$0xff] }
0x1de2   :  { %v5679_v57 = vpop.xlane.xlu0 %5678  ;;  %v5514_v4 = vpop.xlane.xlu1 %5513 }
0x1de3   :  { %8151 = vrcp.f32 %v5514_v4  ;;  %v6316_v4 = vld [vmem:[#allocation20 + $0x178] sm:$0xff] }
0x1de4   :  { %8153 = vrcp.f32 %v5679_v57  ;;  %v6269_v57 = vld [vmem:[#allocation20] sm:$0xff] }
0x1de6   :  { %v5844_v52 = vpop.xlane.xlu0 %5843  ;;  %v6007_v1 = vpop.xlane.xlu1 %6006 }
0x1de7   :  { %8155 = vrcp.f32 %v5844_v52  ;;  %v6315_v52 = vld [vmem:[#allocation20 + $0x170] sm:$0xff] }
0x1de8   :  { %8157 = vrcp.f32 %v6007_v1  ;;  %v6314_v1 = vld [vmem:[#allocation20 + $0x168] sm:$0xff] }
0x1dea   :  { %v6169_v7 = vpop.xlane.xlu0 %6168  ;;  %v5519_v6 = vpop.permute.xlu1 %5518 }
0x1deb   :  { %8159 = vrcp.f32 %v6169_v7  ;;  %v6311_v7 = vld [vmem:[#allocation20 + $0x150] sm:$0xff] }
0x1dec   :  { %v8150_v36 = vpop.eup %8149 }
0x1ded   :  { %v5354_v56 = vmul.f32 %v8150_v36, %v11423_v5  ;;  %v6313_v36 = vld [vmem:[#allocation20 + $0x160] sm:$0xff] }
0x1dee   :  { %v5683_v50 = vpop.permute.xlu0 %5682  ;;  %v5848_v42 = vpop.permute.xlu1 %5847 }
0x1def   :  { %7976 = vmatmul.mubr.msk.f32.vlgmr.msra.gmra.mxu1 %vm803_vm3, %v5354_v56  ;;  %v6312_v56 = vld [vmem:[#allocation20 + $0x158] sm:$0xff] }
0x1df0   :  { %7984 = vmatpush3.msra.mxu1 %v5519_v6  ;;  %7985 = vmatprep.mubr.msk.f32.mxu1 %vm8661_vm1, %v8660_v54  ;;  %v8152_v40 = vpop.eup %8151  ;;  %v6310_v6 = vld [vmem:[#allocation20 + $0x148] sm:$0xff] }
0x1df1   :  { %7993 = vmatprep.subr.mxu1 %v8660_v54  ;;  %v5516_v3 = vmul.f32 %v8152_v40, %v11425_v24  ;;  %v8154_v58 = vpop.eup %8153  ;;  %v6309_v40 = vld [vmem:[#allocation20 + $0x140] sm:$0xff] }
0x1df2   :  { %v5681_v49 = vmul.f32 %v8154_v58, %v11429_v20  ;;  %v6174_v44 = vpop.permute.xlu1 %6173  ;;  %v6307_v58 = vld [vmem:[#allocation20 + $0x130] sm:$0xff] }
0x1df3   :  { %7986 = vmatmul.mubr.msk.f32.vlgmr.msra.gmra.mxu1 %vm803_vm3, %v5516_v3  ;;  %v6308_v3 = vld [vmem:[#allocation20 + $0x138] sm:$0xff] }
0x1df4   :  { %7994 = vmatpush3.msra.mxu1 %v5683_v50  ;;  %7995 = vmatprep.mubr.msk.f32.mxu1 %vm8661_vm1, %v8660_v54  ;;  %v8156_v15 = vpop.eup %8155  ;;  %v6306_v50 = vld [vmem:[#allocation20 + $0x128] sm:$0xff] }
0x1df5   :  { %8003 = vmatprep.subr.mxu1 %v8660_v54  ;;  %v5846_v23 = vmul.f32 %v8156_v15, %v11431_v47  ;;  %v8158_v62 = vpop.eup %8157  ;;  %v6299_v47 = vld [vmem:[#allocation20 + $0xf0] sm:$0xff] }
0x1df6   :  { %v6009_v5 = vmul.f32 %v8158_v62, %v11437_v14  ;;  %v6295_v14 = vld [vmem:[#allocation20 + $0xd0] sm:$0xff] }
0x1df7   :  { %7996 = vmatmul.mubr.msk.f32.vlgmr.msra.gmra.mxu1 %vm803_vm3, %v5681_v49  ;;  %v6305_v49 = vld [vmem:[#allocation20 + $0x120] sm:$0xff] }
0x1df8   :  { %8004 = vmatpush3.msra.mxu1 %v5848_v42  ;;  %8005 = vmatprep.mubr.msk.f32.mxu1 %vm8661_vm1, %v8660_v54  ;;  %v8160_v24 = vpop.eup %8159  ;;  %v6304_v42 = vld [vmem:[#allocation20 + $0x118] sm:$0xff] }
0x1df9   :  { %8013 = vmatprep.subr.mxu1 %v8660_v54  ;;  %v6171_v20 = vmul.f32 %v8160_v24, %v11443_v34  ;;  %v6290_v34 = vld [vmem:[#allocation20 + $0xa8] sm:$0xff] }
0x1dfa   :  { %v6302_v24 = vld [vmem:[#allocation20 + $0x108] sm:$0xff] }
0x1dfb   :  { %8006 = vmatmul.mubr.msk.f32.vlgmr.msra.gmra.mxu1 %vm803_vm3, %v5846_v23  ;;  %v6303_v23 = vld [vmem:[#allocation20 + $0x110] sm:$0xff] }
0x1dfc   :  { %8014 = vmatpush3.msra.mxu1 %v11230_v55  ;;  %8015 = vmatprep.mubr.msk.f32.mxu1 %vm8661_vm1, %v8660_v54  ;;  %v6300_v55 = vld [vmem:[#allocation20 + $0xf8] sm:$0xff] }
0x1dfd   :  { %8023 = vmatprep.subr.mxu1 %v8660_v54  ;;  %6335 = vmatprep.subr.mxu0 %v6300_v55 }
0x1dfe   :  { %6336 = vmatpush1.msra.mxu0 %v6299_v47 }
0x1dff   :  { %8016 = vmatmul.mubr.msk.f32.vlgmr.msra.gmra.mxu1 %vm803_vm3, %v6009_v5  ;;  %6337 = vmatprep.subr.mxu0 %v6298_v27 }
0x1e00   :  { %8024 = vmatpush3.msra.mxu1 %v6174_v44  ;;  %8025 = vmatprep.mubr.msk.f32.mxu1 %vm8661_vm1, %v8660_v54  ;;  %v6291_v54 = vld [vmem:[#allocation20 + $0xb0] sm:$0xff]  ;;  %v6301_v44 = vld [vmem:[#allocation20 + $0x100] sm:$0xff] }
0x1e01   :  { %6338 = vmatpush1.msra.mxu0 %v6297_v29 }
0x1e02   :  { %6339 = vmatprep.subr.mxu0 %v6296_v30 }
0x1e03   :  { %8026 = vmatmul.mubr.msk.f32.vlgmr.msra.gmra.mxu1 %vm803_vm3, %v6171_v20  ;;  %6340 = vmatpush1.msra.mxu0 %v6295_v14 }
0x1e04   :  { %6341 = vmatprep.subr.mxu0 %v6294_v32 }
0x1e05   :  { %6342 = vmatpush1.msra.mxu0 %v6293_v35 }
0x1e06   :  { %6343 = vmatprep.subr.mxu0 %v6292_v19 }
0x1e07   :  { %6344 = vmatpush1.msra.mxu0 %v6291_v54 }
0x1e08   :  { %6345 = vmatprep.subr.mxu0 %v6290_v34 }
0x1e09   :  { %6346 = vmatpush1.msra.mxu0 %v6289_v22 }
0x1e0a   :  { %6347 = vmatprep.subr.mxu0 %v6288_v41 }
0x1e0b   :  { %6348 = vmatpush1.msra.mxu0 %v6287_v2 }
0x1e0c   :  { %6349 = vmatprep.subr.mxu0 %v6286_v12 }
0x1e0d   :  { %6350 = vmatpush1.msra.mxu0 %v6285_v48 }
0x1e0e   :  { %6351 = vmatprep.subr.mxu0 %v6284_v31 }
0x1e0f   :  { %6352 = vmatpush1.msra.mxu0 %v6283_v60 }
0x1e10   :  { %6353 = vmatprep.subr.mxu0 %v6282_v0 }
0x1e11   :  { %6354 = vmatpush1.msra.mxu0 %v6281_v18 }
0x1e12   :  { %6355 = vmatprep.subr.mxu0 %v6280_v25 }
0x1e13   :  { %6356 = vmatpush1.msra.mxu0 %v6279_v51 }
0x1e14   :  { %6357 = vmatprep.subr.mxu0 %v6278_v43 }
0x1e15   :  { %6358 = vmatpush1.msra.mxu0 %v6277_v28 }
0x1e16   :  { %6359 = vmatprep.subr.mxu0 %v6276_v53 }
0x1e17   :  { %6360 = vmatpush1.msra.mxu0 %v6275_v61 }
0x1e18   :  { %6361 = vmatprep.subr.mxu0 %v6274_v13 }
0x1e19   :  { %6362 = vmatpush1.msra.mxu0 %v6273_v16 }
0x1e1a   :  { %6363 = vmatprep.subr.mxu0 %v6272_v63 }
0x1e1b   :  { %6364 = vmatpush1.msra.mxu0 %v6271_v8 }
0x1e1c   :  { %6365 = vmatprep.subr.mxu0 %v6270_v37 }
0x1e1d   :  { %6366 = vmatpush1.msra.mxu0 %v6269_v57 }
0x1e1e   :  { %6383 = vmatprep.subr.mxu0 %v6316_v4 }
0x1e1f   :  { %6384 = vmatpush2.msra.mxu0 %v6315_v52  ;;  %v6317_v52 = vld [vmem:[#allocation22] sm:$0x3] }
0x1e20   :  { %6385 = vmatprep.subr.mxu0 %v6314_v1  ;;  %v6322_v1 = vrot.slane %v6317_v52, %v9321_v10 }
0x1e21   :  { %6386 = vmatpush2.msra.mxu0 %v6313_v36  ;;  %v6326_v36 = vrot.slane %v6317_v52, %v9198_v39  ;;  %v6520_v52 = vld [vmem:[%s12719_s17 + $0x120] sm:$0xff] }
0x1e22   :  { %6387 = vmatprep.subr.mxu0 %v6312_v56 }
0x1e23   :  { %6388 = vmatpush2.msra.mxu0 %v6311_v7 }
0x1e24   :  { %6389 = vmatprep.subr.mxu0 %v6310_v6 }
0x1e25   :  { %6390 = vmatpush2.msra.mxu0 %v6309_v40 }
0x1e26   :  { %6391 = vmatprep.subr.mxu0 %v6308_v3 }
0x1e27   :  { %6392 = vmatpush2.msra.mxu0 %v6307_v58 }
0x1e28   :  { %6393 = vmatprep.subr.mxu0 %v6306_v50 }
0x1e29   :  { %6394 = vmatpush2.msra.mxu0 %v6305_v49 }
0x1e2a   :  { %6395 = vmatprep.subr.mxu0 %v6304_v42 }
0x1e2b   :  { %6396 = vmatpush2.msra.mxu0 %v6303_v23 }
0x1e2c   :  { %6397 = vmatprep.subr.mxu0 %v6302_v24 }
0x1e2d   :  { %6398 = vmatpush2.msra.mxu0 %v6301_v44  ;;  %v6575_v44 = vld [vmem:[%s12719_s17 + $0x2d8] sm:$0xff] }
0x1e2e   :  { %6666 = vmatprep.subr.mxu1 %v6575_v44 }
0x1e7a   :  { %v4587_v15 = vpop.f32.mrf.mxu1 }
0x1e7b   :  { %5247 = vrot.lane.b32.xlu0 %v4587_v15, %s8662_s16 }
0x1e7c   :  { %v7927_v62 = vpop.f32.mrf.mxu1 }
0x1e7e   :  { %v4751_v5 = vpop.f32.mrf.mxu1 }
0x1e7f   :  { %5251 = vrot.lane.b32.xlu1 %v4751_v5, %s8663_s9 }
0x1e80   :  { %v7937_v20 = vpop.f32.mrf.mxu1 }
0x1e81   :  { %v6577_v20 = vld [vmem:[%s12719_s17 + $0x2e8] sm:$0xff] }
0x1e82   :  { %v4916_v55 = vpop.f32.mrf.mxu1  ;;  %6743 = vmatprep.subr.mxu0 %v6577_v20  ;;  %v6508_v20 = vld [vmem:[%s12719_s17 + $0xc0] sm:$0xff] }
0x1e83   :  { %5255 = vrot.lane.b32.xlu1 %v4916_v55, %s8664_s21  ;;  %v6569_v55 = vld [vmem:[%s12719_s17 + $0x2a8] sm:$0xff] }
0x1e84   :  { %v7947_v47 = vpop.f32.mrf.mxu1 }
0x1e85   :  { %v6571_v47 = vld [vmem:[%s12719_s17 + $0x2b8] sm:$0xff] }
0x1e86   :  { %v5076_v27 = vpop.f32.mrf.mxu1 }
0x1e88   :  { %v7957_v29 = vpop.f32.mrf.mxu1 }
0x1e89   :  { %v6570_v29 = vld [vmem:[%s12719_s17 + $0x2b0] sm:$0xff] }
0x1e8a   :  { %v5242_v30 = vpop.f32.mrf.mxu1 }
0x1e8b   :  { %5259 = vrot.lane.b32.xlu0 %v5242_v30, %s8662_s16  ;;  %v6563_v30 = vld [vmem:[%s12719_s17 + $0x278] sm:$0xff] }
0x1e8c   :  { %v7967_v14 = vpop.f32.mrf.mxu1 }
0x1e8d   :  { %v6565_v14 = vld [vmem:[%s12719_s17 + $0x288] sm:$0xff] }
0x1eaf   :  { %v5424_v32 = vpop.f32.mrf.mxu1 }
0x1eb1   :  { %v7977_v35 = vpop.f32.mrf.mxu1 }
0x1eb2   :  { %v6564_v35 = vld [vmem:[%s12719_s17 + $0x280] sm:$0xff] }
0x1eb3   :  { %v5590_v19 = vpop.f32.mrf.mxu1 }
0x1eb4   :  { %6250 = vrot.lane.b32.xlu0 %v5590_v19, %s8662_s16  ;;  %v6557_v19 = vld [vmem:[%s12719_s17 + $0x248] sm:$0xff] }
0x1eb5   :  { %v7987_v54 = vpop.f32.mrf.mxu1 }
0x1eb6   :  { %v6559_v54 = vld [vmem:[%s12719_s17 + $0x258] sm:$0xff] }
0x1eb7   :  { %v5754_v34 = vpop.f32.mrf.mxu1 }
0x1eb8   :  { %6254 = vrot.lane.b32.xlu1 %v5754_v34, %s8663_s9  ;;  %v6556_v34 = vld [vmem:[%s12719_s17 + $0x240] sm:$0xff] }
0x1eb9   :  { %v7997_v22 = vpop.f32.mrf.mxu1 }
0x1eba   :  { %v6558_v22 = vld [vmem:[%s12719_s17 + $0x250] sm:$0xff] }
0x1ebb   :  { %v5919_v41 = vpop.f32.mrf.mxu1 }
0x1ebc   :  { %6258 = vrot.lane.b32.xlu1 %v5919_v41, %s8664_s21  ;;  %v6551_v41 = vld [vmem:[%s12719_s17 + $0x218] sm:$0xff] }
0x1ebd   :  { %v8007_v2 = vpop.f32.mrf.mxu1 }
0x1ebe   :  { %v6553_v2 = vld [vmem:[%s12719_s17 + $0x228] sm:$0xff] }
0x1ebf   :  { %v6079_v12 = vpop.f32.mrf.mxu1 }
0x1ec1   :  { %v8017_v48 = vpop.f32.mrf.mxu1 }
0x1ec2   :  { %v6552_v48 = vld [vmem:[%s12719_s17 + $0x220] sm:$0xff] }
0x1ec3   :  { %v6245_v31 = vpop.f32.mrf.mxu1 }
0x1ec4   :  { %6262 = vrot.lane.b32.xlu0 %v6245_v31, %s8662_s16  ;;  %v6545_v31 = vld [vmem:[%s12719_s17 + $0x1e8] sm:$0xff] }
0x1ec5   :  { %v8027_v60 = vpop.f32.mrf.mxu1 }
0x1ec6   :  { %v6547_v60 = vld [vmem:[%s12719_s17 + $0x1f8] sm:$0xff] }
0x1eed   :  { %v5248_v18 = vpop.permute.xlu0 %5247 }
0x1eee   :  { %v5262_v51 = vsel %vm727_vm2, %v11352_v46, %v5248_v18  ;;  %v6546_v18 = vld [vmem:[%s12719_s17 + $0x1f0] sm:$0xff] }
0x1ef1   :  { %v5252_v0 = vpop.permute.xlu1 %5251 }
0x1ef2   :  { %v5263_v28 = vsel %vm488_vm0, %v5262_v51, %v5252_v0  ;;  %v6544_v0 = vld [vmem:[%s12719_s17 + $0x1e0] sm:$0xff]  ;;  %v6541_v51 = vld [vmem:[%s12719_s17 + $0x1c8] sm:$0xff] }
0x1ef5   :  { %v5256_v25 = vpop.permute.xlu1 %5255 }
0x1ef6   :  { %v5264_v61 = vsel %vm1727_vm4, %v5263_v28, %v5256_v25  ;;  %v6539_v25 = vld [vmem:[%s12719_s17 + $0x1b8] sm:$0xff]  ;;  %v6540_v28 = vld [vmem:[%s12719_s17 + $0x1c0] sm:$0xff] }
0x1efd   :  { %v5260_v43 = vpop.permute.xlu0 %5259 }
0x1efe   :  { %v5265_v53 = vsel %vm727_vm2, %v5076_v27, %v5260_v43  ;;  %v6568_v27 = vld [vmem:[%s12719_s17 + $0x2a0] sm:$0xff]  ;;  %v6538_v43 = vld [vmem:[%s12719_s17 + $0x1b0] sm:$0xff] }
0x1eff   :  { %7682 = vmatprep.mubr.msk.f32.mxu0 %vm488_vm0, %v5265_v53  ;;  %v6533_v53 = vld [vmem:[%s12719_s17 + $0x188] sm:$0xff] }
0x1f00   :  { %6400 = vmatmul.mubr.f32.vlgmr.msra.gmra.mxu0 %v5264_v61  ;;  %v6535_v61 = vld [vmem:[%s12719_s17 + $0x198] sm:$0xff] }
0x1f26   :  { %v6251_v16 = vpop.permute.xlu0 %6250 }
0x1f27   :  { %v6265_v8 = vsel %vm727_vm2, %v5424_v32, %v6251_v16  ;;  %v6562_v32 = vld [vmem:[%s12719_s17 + $0x270] sm:$0xff] }
0x1f28   :  { %v6534_v16 = vld [vmem:[%s12719_s17 + $0x190] sm:$0xff] }
0x1f2a   :  { %v6255_v13 = vpop.permute.xlu1 %6254 }
0x1f2b   :  { %v6266_v57 = vsel %vm488_vm0, %v6265_v8, %v6255_v13  ;;  %v6532_v13 = vld [vmem:[%s12719_s17 + $0x180] sm:$0xff]  ;;  %v6529_v8 = vld [vmem:[%s12719_s17 + $0x168] sm:$0xff] }
0x1f2e   :  { %v6259_v63 = vpop.permute.xlu1 %6258 }
0x1f2f   :  { %v6267_v4 = vsel %vm1727_vm4, %v6266_v57, %v6259_v63  ;;  %v6527_v63 = vld [vmem:[%s12719_s17 + $0x158] sm:$0xff]  ;;  %v6528_v57 = vld [vmem:[%s12719_s17 + $0x160] sm:$0xff] }
0x1f36   :  { %v6263_v37 = vpop.permute.xlu0 %6262 }
0x1f37   :  { %v6268_v46 = vsel %vm727_vm2, %v6079_v12, %v6263_v37  ;;  %v6550_v12 = vld [vmem:[%s12719_s17 + $0x210] sm:$0xff] }
0x1f38   :  { %7683 = vmatprep.mubr.msk.f32.mxu0 %vm488_vm0, %v6268_v46  ;;  %v6526_v37 = vld [vmem:[%s12719_s17 + $0x150] sm:$0xff]  ;;  %v6521_v46 = vld [vmem:[%s12719_s17 + $0x128] sm:$0xff] }
0x1f39   :  { %6406 = vmatmul.mubr.f32.gmra.mxu0 %v6267_v4  ;;  %v6523_v4 = vld [vmem:[%s12719_s17 + $0x138] sm:$0xff] }
0x1fc0   :  { %v6401_v56 = vpop.f32.mrf.mxu0 }
0x1fc1   :  { %v6402_v7 = vadd.f32 %v6401_v56, %v6322_v1  ;;  %v6517_v56 = vld [vmem:[%s12719_s17 + $0x108] sm:$0xff] }
0x1fc2   :  { %v6403_v6 = vpop.f32.mrf.mxu0 }
0x1fc3   :  { %v6404_v40 = vadd.f32 %v6403_v6, %v6326_v36  ;;  %v11533_v58 = vadd.f32 %v6402_v7, %v11046_v33  ;;  %v6514_v7 = vld [vmem:[%s12719_s17 + $0xf0] sm:$0xff]  ;;  %v6516_v6 = vld [vmem:[%s12719_s17 + $0x100] sm:$0xff] }
0x1fc5   :  { %v11530_v3 = vadd.f32 %v6404_v40, %v11044_v59  ;;  %v6509_v40 = vld [vmem:[%s12719_s17 + $0xc8] sm:$0xff] }
0x1fc7   :  { %v6418_v50 = vsel %vm488_vm0, %v11530_v3, 0.0 }
0x1fc8   :  { %v6419_v49 = vadd.f32 %v6418_v50, %v11533_v58  ;;  %v6511_v50 = vld [vmem:[%s12719_s17 + $0xd8] sm:$0xff] }
0x1fca   :  { %6420 = vadd.xlane.f32.xlu0 %v6419_v49 }
0x1ff9   :  { %v6407_v15 = vpop.f32.mrf.mxu0 }
0x1ffa   :  { %v6408_v42 = vadd.f32 %v6407_v15, %v6322_v1  ;;  %v6522_v1 = vld [vmem:[%s12719_s17 + $0x130] sm:$0xff] }
0x1ffb   :  { %v6409_v23 = vpop.f32.mrf.mxu0 }
0x1ffc   :  { %v6410_v62 = vadd.f32 %v6409_v23, %v6326_v36  ;;  %v11542_v24 = vadd.f32 %v6408_v42, %v11070_v17  ;;  %v6576_v17 = vld [vmem:[%s12719_s17 + $0x2e0] sm:$0xff]  ;;  %v6515_v36 = vld [vmem:[%s12719_s17 + $0xf8] sm:$0xff] }
0x1ffd   :  { %6744 = vmatpush1.msra.mxu0 %v6576_v17  ;;  %v6502_v17 = vld [vmem:[%s12719_s17 + $0x90] sm:$0xff] }
0x1ffe   :  { %v11539_v5 = vadd.f32 %v6410_v62, %v11065_v21  ;;  %v6574_v21 = vld [vmem:[%s12719_s17 + $0x2d0] sm:$0xff]  ;;  %6745 = vmatprep.subr.mxu0 %v6571_v47  ;;  %v6497_v47 = vld [vmem:[%s12719_s17 + $0x68] sm:$0xff] }
0x1fff   :  { %6667 = vmatpush1.msra.mxu1 %v6574_v21  ;;  %6746 = vmatpush1.msra.mxu0 %v6570_v29  ;;  %v6505_v21 = vld [vmem:[%s12719_s17 + $0xa8] sm:$0xff]  ;;  %v6496_v29 = vld [vmem:[%s12719_s17 + $0x60] sm:$0xff] }
0x2000   :  { %v6422_v59 = vsel %vm488_vm0, %v11539_v5, 0.0  ;;  %6668 = vmatprep.subr.mxu1 %v6569_v55  ;;  %6747 = vmatprep.subr.mxu0 %v6565_v14  ;;  %v6504_v55 = vld [vmem:[%s12719_s17 + $0xa0] sm:$0xff]  ;;  %v6491_v14 = vld [vmem:[%s12719_s17 + $0x38] sm:$0xff] }
0x2001   :  { %v6423_v33 = vadd.f32 %v6422_v59, %v11542_v24  ;;  %6669 = vmatpush1.msra.mxu1 %v6568_v27  ;;  %6748 = vmatpush1.msra.mxu0 %v6564_v35  ;;  %v6499_v27 = vld [vmem:[%s12719_s17 + $0x78] sm:$0xff]  ;;  %v6490_v35 = vld [vmem:[%s12719_s17 + $0x30] sm:$0xff] }
0x2002   :  { %6670 = vmatprep.subr.mxu1 %v6563_v30  ;;  %6749 = vmatprep.subr.mxu0 %v6559_v54  ;;  %v6498_v30 = vld [vmem:[%s12719_s17 + $0x70] sm:$0xff]  ;;  %v6485_v54 = vld [vmem:[%s12719_s17 + $0x8] sm:$0xff] }
0x2003   :  { %6424 = vadd.xlane.f32.xlu1 %v6423_v33  ;;  %6671 = vmatpush1.msra.mxu1 %v6562_v32  ;;  %v6493_v32 = vld [vmem:[%s12719_s17 + $0x48] sm:$0xff] }
0x2004   :  { %6672 = vmatprep.subr.mxu1 %v6557_v19  ;;  %6750 = vmatpush1.msra.mxu0 %v6558_v22  ;;  %v6492_v19 = vld [vmem:[%s12719_s17 + $0x40] sm:$0xff] }
0x2005   :  { %6673 = vmatpush1.msra.mxu1 %v6556_v34  ;;  %6751 = vmatprep.subr.mxu0 %v6553_v2  ;;  %v6487_v34 = vld [vmem:[%s12719_s17 + $0x18] sm:$0xff]  ;;  %v6484_v22 = vld [vmem:[%s12719_s17] sm:$0xff] }
0x2006   :  { %6674 = vmatprep.subr.mxu1 %v6551_v41  ;;  %6752 = vmatpush1.msra.mxu0 %v6552_v48  ;;  %v6486_v41 = vld [vmem:[%s12719_s17 + $0x10] sm:$0xff]  ;;  %v6623_v2 = vld [vmem:[%s12719_s17 + $0x458] sm:$0xff] }
0x2007   :  { %6675 = vmatpush1.msra.mxu1 %v6550_v12  ;;  %6753 = vmatprep.subr.mxu0 %v6547_v60  ;;  %v6625_v12 = vld [vmem:[%s12719_s17 + $0x468] sm:$0xff]  ;;  %v6622_v48 = vld [vmem:[%s12719_s17 + $0x450] sm:$0xff] }
0x2008   :  { %6676 = vmatprep.subr.mxu1 %v6545_v31  ;;  %6754 = vmatpush1.msra.mxu0 %v6546_v18  ;;  %v6624_v31 = vld [vmem:[%s12719_s17 + $0x460] sm:$0xff]  ;;  %v6617_v60 = vld [vmem:[%s12719_s17 + $0x428] sm:$0xff] }
0x2009   :  { %6677 = vmatpush1.msra.mxu1 %v6544_v0  ;;  %6755 = vmatprep.subr.mxu0 %v6541_v51  ;;  %v6619_v0 = vld [vmem:[%s12719_s17 + $0x438] sm:$0xff]  ;;  %v6616_v18 = vld [vmem:[%s12719_s17 + $0x420] sm:$0xff] }
0x200a   :  { %6678 = vmatprep.subr.mxu1 %v6539_v25  ;;  %6756 = vmatpush1.msra.mxu0 %v6540_v28  ;;  %v6618_v25 = vld [vmem:[%s12719_s17 + $0x430] sm:$0xff]  ;;  %v6611_v51 = vld [vmem:[%s12719_s17 + $0x3f8] sm:$0xff] }
0x200b   :  { %6679 = vmatpush1.msra.mxu1 %v6538_v43  ;;  %6757 = vmatprep.subr.mxu0 %v6535_v61  ;;  %v6613_v43 = vld [vmem:[%s12719_s17 + $0x408] sm:$0xff]  ;;  %v6610_v28 = vld [vmem:[%s12719_s17 + $0x3f0] sm:$0xff] }
0x200c   :  { %6680 = vmatprep.subr.mxu1 %v6533_v53  ;;  %6758 = vmatpush1.msra.mxu0 %v6534_v16  ;;  %v6612_v53 = vld [vmem:[%s12719_s17 + $0x400] sm:$0xff]  ;;  %v6605_v61 = vld [vmem:[%s12719_s17 + $0x3c8] sm:$0xff] }
0x200d   :  { %6681 = vmatpush1.msra.mxu1 %v6532_v13  ;;  %6759 = vmatprep.subr.mxu0 %v6529_v8  ;;  %v6607_v13 = vld [vmem:[%s12719_s17 + $0x3d8] sm:$0xff]  ;;  %v6604_v16 = vld [vmem:[%s12719_s17 + $0x3c0] sm:$0xff] }
0x200e   :  { %6682 = vmatprep.subr.mxu1 %v6527_v63  ;;  %6760 = vmatpush1.msra.mxu0 %v6528_v57  ;;  %v6606_v63 = vld [vmem:[%s12719_s17 + $0x3d0] sm:$0xff]  ;;  %v6599_v8 = vld [vmem:[%s12719_s17 + $0x398] sm:$0xff] }
0x200f   :  { %6683 = vmatpush1.msra.mxu1 %v6526_v37  ;;  %6761 = vmatprep.subr.mxu0 %v6523_v4  ;;  %v6601_v37 = vld [vmem:[%s12719_s17 + $0x3a8] sm:$0xff]  ;;  %v6598_v57 = vld [vmem:[%s12719_s17 + $0x390] sm:$0xff] }
0x2010   :  { %6684 = vmatprep.subr.mxu1 %v6521_v46  ;;  %6762 = vmatpush1.msra.mxu0 %v6522_v1  ;;  %v6600_v46 = vld [vmem:[%s12719_s17 + $0x3a0] sm:$0xff]  ;;  %v6593_v4 = vld [vmem:[%s12719_s17 + $0x368] sm:$0xff] }
0x2011   :  { %6685 = vmatpush1.msra.mxu1 %v6520_v52  ;;  %6763 = vmatprep.subr.mxu0 %v6517_v56  ;;  %v6595_v52 = vld [vmem:[%s12719_s17 + $0x378] sm:$0xff]  ;;  %v6592_v1 = vld [vmem:[%s12719_s17 + $0x360] sm:$0xff] }
0x2012   :  { %6686 = vmatprep.subr.mxu1 %v6515_v36  ;;  %6764 = vmatpush1.msra.mxu0 %v6516_v6  ;;  %v6594_v36 = vld [vmem:[%s12719_s17 + $0x370] sm:$0xff]  ;;  %v6587_v56 = vld [vmem:[%s12719_s17 + $0x338] sm:$0xff] }
0x2013   :  { %6687 = vmatpush1.msra.mxu1 %v6514_v7  ;;  %6765 = vmatprep.subr.mxu0 %v6511_v50  ;;  %v6589_v7 = vld [vmem:[%s12719_s17 + $0x348] sm:$0xff]  ;;  %v6586_v6 = vld [vmem:[%s12719_s17 + $0x330] sm:$0xff] }
0x2014   :  { %6688 = vmatprep.subr.mxu1 %v6509_v40  ;;  %v6588_v40 = vld [vmem:[%s12719_s17 + $0x340] sm:$0xff]  ;;  %v6581_v50 = vld [vmem:[%s12719_s17 + $0x308] sm:$0xff] }
0x2015   :  { %6689 = vmatpush1.msra.mxu1 %v6508_v20 }
0x2053   :  { %v6421_v49 = vpop.xlane.xlu0 %6420 }
0x2054   :  { %v6426_v15 = vmul.f32 0.0052083335, %v6421_v49  ;;  %v6583_v49 = vld [vmem:[%s12719_s17 + $0x318] sm:$0xff] }
0x2056   :  { %v11686_v42 = vsub.f32 %v11533_v58, %v6426_v15  ;;  %v11689_v23 = vsub.f32 %v11530_v3, %v6426_v15  ;;  %v6510_v58 = vld [vmem:[%s12719_s17 + $0xd0] sm:$0xff]  ;;  %v6503_v3 = vld [vmem:[%s12719_s17 + $0x98] sm:$0xff]  ;;  %v6580_v15 = vld [vmem:[%s12719_s17 + $0x300] sm:$0xff] }
0x2057   :  { %6766 = vmatpush1.msra.mxu0 %v6510_v58  ;;  %6690 = vmatprep.subr.mxu1 %v6503_v3 }
0x2058   :  { %v6432_v62 = vmul.f32 %v11686_v42, %v11686_v42  ;;  %v6433_v59 = vmul.f32 %v11689_v23, %v11689_v23  ;;  %6767 = vmatprep.subr.mxu0 %v6505_v21  ;;  %6691 = vmatpush1.msra.mxu1 %v6502_v17 }
0x2059   :  { %6768 = vmatpush1.msra.mxu0 %v6504_v55  ;;  %6692 = vmatprep.subr.mxu1 %v6497_v47  ;;  %v6940_v47 = vld [vmem:[%s12721_s19 + $0xf8] sm:$0xff] }
0x205a   :  { %v6436_v33 = vsel %vm488_vm0, %v6433_v59, 0.0  ;;  %6769 = vmatprep.subr.mxu0 %v6499_v27  ;;  %6693 = vmatpush1.msra.mxu1 %v6496_v29  ;;  %v6579_v59 = vld [vmem:[%s12719_s17 + $0x2f8] sm:$0xff] }
0x205b   :  { %v6437_v44 = vadd.f32 %v6436_v33, %v6432_v62  ;;  %6770 = vmatpush1.msra.mxu0 %v6498_v30  ;;  %6694 = vmatprep.subr.mxu1 %v6491_v14  ;;  %v6582_v62 = vld [vmem:[%s12719_s17 + $0x310] sm:$0xff]  ;;  %v6417_v30 = vld [vmem:[#allocation28] sm:$0x3] }
0x205c   :  { %6771 = vmatprep.subr.mxu0 %v6493_v32  ;;  %6695 = vmatpush1.msra.mxu1 %v6490_v35 }
0x205d   :  { %6438 = vadd.xlane.f32.xlu0 %v6437_v44  ;;  %6772 = vmatpush1.msra.mxu0 %v6492_v19 }
0x205e   :  { %6696 = vmatprep.subr.mxu1 %v6485_v54  ;;  %6773 = vmatprep.subr.mxu0 %v6487_v34  ;;  %v11871_v54 = vrot.slane %v6417_v30, %v9198_v39 }
0x205f   :  { %6697 = vmatpush1.msra.mxu1 %v6484_v22  ;;  %6774 = vmatpush1.msra.mxu0 %v6486_v41  ;;  %v11875_v22 = vrot.slane %v6417_v30, %v9321_v10  ;;  %v6918_v30 = vld [vmem:[%s12721_s19 + $0x48] sm:$0xff] }
0x2060   :  { %6714 = vmatprep.subr.mxu1 %v6623_v2  ;;  %6791 = vmatprep.subr.mxu0 %v6625_v12 }
0x2061   :  { %6715 = vmatpush2.msra.mxu1 %v6622_v48  ;;  %6792 = vmatpush2.msra.mxu0 %v6624_v31  ;;  %v6573_v31 = vld [vmem:[%s12719_s17 + $0x2c8] sm:$0xff] }
0x2062   :  { %6716 = vmatprep.subr.mxu1 %v6617_v60  ;;  %6793 = vmatprep.subr.mxu0 %v6619_v0  ;;  %v6938_v60 = vld [vmem:[%s12721_s19 + $0xe8] sm:$0xff]  ;;  %v6572_v0 = vld [vmem:[%s12719_s17 + $0x2c0] sm:$0xff] }
0x2063   :  { %6717 = vmatpush2.msra.mxu1 %v6616_v18  ;;  %6794 = vmatpush2.msra.mxu0 %v6618_v25  ;;  %v6937_v18 = vld [vmem:[%s12721_s19 + $0xe0] sm:$0xff]  ;;  %v6567_v25 = vld [vmem:[%s12719_s17 + $0x298] sm:$0xff] }
0x2064   :  { %6718 = vmatprep.subr.mxu1 %v6611_v51  ;;  %6795 = vmatprep.subr.mxu0 %v6613_v43  ;;  %v6936_v51 = vld [vmem:[%s12721_s19 + $0xd8] sm:$0xff]  ;;  %v6566_v43 = vld [vmem:[%s12719_s17 + $0x290] sm:$0xff] }
0x2065   :  { %6719 = vmatpush2.msra.mxu1 %v6610_v28  ;;  %6796 = vmatpush2.msra.mxu0 %v6612_v53  ;;  %v6935_v28 = vld [vmem:[%s12721_s19 + $0xd0] sm:$0xff]  ;;  %v6561_v53 = vld [vmem:[%s12719_s17 + $0x268] sm:$0xff] }
0x2066   :  { %6720 = vmatprep.subr.mxu1 %v6605_v61  ;;  %6797 = vmatprep.subr.mxu0 %v6607_v13  ;;  %v6934_v61 = vld [vmem:[%s12721_s19 + $0xc8] sm:$0xff]  ;;  %v6560_v13 = vld [vmem:[%s12719_s17 + $0x260] sm:$0xff] }
0x2067   :  { %6721 = vmatpush2.msra.mxu1 %v6604_v16  ;;  %6798 = vmatpush2.msra.mxu0 %v6606_v63  ;;  %v6933_v16 = vld [vmem:[%s12721_s19 + $0xc0] sm:$0xff]  ;;  %v6555_v63 = vld [vmem:[%s12719_s17 + $0x238] sm:$0xff] }
0x2068   :  { %6722 = vmatprep.subr.mxu1 %v6599_v8  ;;  %6799 = vmatprep.subr.mxu0 %v6601_v37  ;;  %v6932_v8 = vld [vmem:[%s12721_s19 + $0xb8] sm:$0xff]  ;;  %v6554_v37 = vld [vmem:[%s12719_s17 + $0x230] sm:$0xff] }
0x2069   :  { %6723 = vmatpush2.msra.mxu1 %v6598_v57  ;;  %6800 = vmatpush2.msra.mxu0 %v6600_v46  ;;  %v6931_v57 = vld [vmem:[%s12721_s19 + $0xb0] sm:$0xff]  ;;  %v6549_v46 = vld [vmem:[%s12719_s17 + $0x208] sm:$0xff] }
0x206a   :  { %6724 = vmatprep.subr.mxu1 %v6593_v4  ;;  %6801 = vmatprep.subr.mxu0 %v6595_v52  ;;  %v6930_v4 = vld [vmem:[%s12721_s19 + $0xa8] sm:$0xff]  ;;  %v6548_v52 = vld [vmem:[%s12719_s17 + $0x200] sm:$0xff] }
0x206b   :  { %6725 = vmatpush2.msra.mxu1 %v6592_v1  ;;  %6802 = vmatpush2.msra.mxu0 %v6594_v36  ;;  %v6929_v1 = vld [vmem:[%s12721_s19 + $0xa0] sm:$0xff]  ;;  %v6543_v36 = vld [vmem:[%s12719_s17 + $0x1d8] sm:$0xff] }
0x206c   :  { %6726 = vmatprep.subr.mxu1 %v6587_v56  ;;  %6803 = vmatprep.subr.mxu0 %v6589_v7  ;;  %v6928_v56 = vld [vmem:[%s12721_s19 + $0x98] sm:$0xff]  ;;  %v6542_v7 = vld [vmem:[%s12719_s17 + $0x1d0] sm:$0xff] }
0x206d   :  { %6727 = vmatpush2.msra.mxu1 %v6586_v6  ;;  %6804 = vmatpush2.msra.mxu0 %v6588_v40  ;;  %v6927_v6 = vld [vmem:[%s12721_s19 + $0x90] sm:$0xff]  ;;  %v6537_v40 = vld [vmem:[%s12719_s17 + $0x1a8] sm:$0xff] }
0x206e   :  { %6728 = vmatprep.subr.mxu1 %v6581_v50  ;;  %6805 = vmatprep.subr.mxu0 %v6583_v49  ;;  %v6926_v50 = vld [vmem:[%s12721_s19 + $0x88] sm:$0xff]  ;;  %v6536_v49 = vld [vmem:[%s12719_s17 + $0x1a0] sm:$0xff] }
0x206f   :  { %6729 = vmatpush2.msra.mxu1 %v6580_v15  ;;  %6806 = vmatpush2.msra.mxu0 %v6582_v62  ;;  %v6925_v15 = vld [vmem:[%s12721_s19 + $0x80] sm:$0xff]  ;;  %v6531_v62 = vld [vmem:[%s12719_s17 + $0x178] sm:$0xff] }
0x2070   :  { %6820 = vmatprep.subr.mxu1 %v6579_v59  ;;  %7113 = vmatprep.subr.mxu0 %v6940_v47  ;;  %v6924_v59 = vld [vmem:[%s12721_s19 + $0x78] sm:$0xff] }
0x2071   :  { %v6519_v47 = vld [vmem:[%s12719_s17 + $0x118] sm:$0xff] }
0x208c   :  { %v6425_v33 = vpop.xlane.xlu1 %6424 }
0x208d   :  { %v6427_v44 = vmul.f32 0.0052083335, %v6425_v33  ;;  %v6530_v33 = vld [vmem:[%s12719_s17 + $0x170] sm:$0xff] }
0x208f   :  { %v11850_v20 = vsub.f32 %v11542_v24, %v6427_v44  ;;  %v11853_v58 = vsub.f32 %v11539_v5, %v6427_v44  ;;  %v6416_v5 = vld [vmem:[#allocation26] sm:$0x3]  ;;  %v6923_v44 = vld [vmem:[%s12721_s19 + $0x70] sm:$0xff] }
0x2090   :  { %v11864_v14 = vrot.slane %v6416_v5, %v9198_v39  ;;  %v11867_v32 = vrot.slane %v6416_v5, %v9321_v10  ;;  %v6513_v5 = vld [vmem:[%s12719_s17 + $0xe8] sm:$0xff] }
0x2091   :  { %v6434_v3 = vmul.f32 %v11850_v20, %v11850_v20  ;;  %v6435_v21 = vmul.f32 %v11853_v58, %v11853_v58 }
0x2093   :  { %v6440_v17 = vsel %vm488_vm0, %v6435_v21, 0.0  ;;  %v6922_v21 = vld [vmem:[%s12721_s19 + $0x68] sm:$0xff] }
0x2094   :  { %v6441_v55 = vadd.f32 %v6440_v17, %v6434_v3  ;;  %v6525_v3 = vld [vmem:[%s12719_s17 + $0x148] sm:$0xff]  ;;  %v6524_v17 = vld [vmem:[%s12719_s17 + $0x140] sm:$0xff] }
0x2096   :  { %6442 = vadd.xlane.f32.xlu0 %v6441_v55  ;;  %v6921_v55 = vld [vmem:[%s12721_s19 + $0x60] sm:$0xff] }
0x20e6   :  { %v6439_v24 = vpop.xlane.xlu0 %6438 }
0x20e7   :  { %v6444_v27 = vmul.f32 0.0052083335, %v6439_v24  ;;  %v6920_v24 = vld [vmem:[%s12721_s19 + $0x58] sm:$0xff] }
0x20e9   :  { %v6446_v29 = vadd.f32 1e-05, %v6444_v27  ;;  %v6518_v27 = vld [vmem:[%s12719_s17 + $0x110] sm:$0xff] }
0x20eb   :  { %8161 = vrsqrt.f32 %v6446_v29  ;;  %v6919_v29 = vld [vmem:[%s12721_s19 + $0x50] sm:$0xff] }
0x20f8   :  { %v8162_v35 = vpop.eup %8161 }
0x20f9   :  { %v6451_v19 = vmul.f32 %v8162_v35, %v11689_v23  ;;  %v6450_v34 = vmul.f32 %v8162_v35, %v11686_v42  ;;  %v6578_v23 = vld [vmem:[%s12719_s17 + $0x2f0] sm:$0xff]  ;;  %v6512_v35 = vld [vmem:[%s12719_s17 + $0xe0] sm:$0xff] }
0x20fa   :  { %v6939_v42 = vld [vmem:[%s12721_s19 + $0xf0] sm:$0xff] }
0x20fb   :  { %v6466_v41 = vmul.f32 %v11864_v14, %v6451_v19  ;;  %v6465_v2 = vmul.f32 %v11867_v32, %v6450_v34  ;;  %v6917_v19 = vld [vmem:[%s12721_s19 + $0x40] sm:$0xff]  ;;  %v6507_v34 = vld [vmem:[%s12719_s17 + $0xb8] sm:$0xff] }
0x20fd   :  { %v11880_v12 = vadd.f32 %v11871_v54, %v6466_v41  ;;  %v11883_v48 = vadd.f32 %v11875_v22, %v6465_v2  ;;  %v6916_v41 = vld [vmem:[%s12721_s19 + $0x38] sm:$0xff]  ;;  %v6506_v2 = vld [vmem:[%s12719_s17 + $0xb0] sm:$0xff] }
0x20ff   :  { %7684 = vmatprep.mubr.msk.f32.mxu1 %vm488_vm0, %v11880_v12  ;;  %7686 = vmatprep.mubr.msk.f32.mxu0 %vm488_vm0, %v11880_v12 }
0x2100   :  { %6731 = vmatmul.mubr.f32.vlgmr.msra.gmra.mxu1 %v11883_v48  ;;  %6808 = vmatmul.mubr.f32.vlgmr.msra.gmra.mxu0 %v11883_v48 }
0x2101   :  { %6821 = vmatpush1.msra.mxu1 %v6578_v23  ;;  %7114 = vmatpush1.msra.mxu0 %v6939_v42  ;;  %v6915_v23 = vld [vmem:[%s12721_s19 + $0x30] sm:$0xff]  ;;  %v6501_v42 = vld [vmem:[%s12719_s17 + $0x88] sm:$0xff] }
0x2102   :  { %6822 = vmatprep.subr.mxu1 %v6573_v31  ;;  %7115 = vmatprep.subr.mxu0 %v6938_v60  ;;  %v6914_v31 = vld [vmem:[%s12721_s19 + $0x28] sm:$0xff]  ;;  %v6500_v60 = vld [vmem:[%s12719_s17 + $0x80] sm:$0xff] }
0x2103   :  { %6823 = vmatpush1.msra.mxu1 %v6572_v0  ;;  %7116 = vmatpush1.msra.mxu0 %v6937_v18  ;;  %v6913_v0 = vld [vmem:[%s12721_s19 + $0x20] sm:$0xff]  ;;  %v6495_v18 = vld [vmem:[%s12719_s17 + $0x58] sm:$0xff] }
0x2104   :  { %6824 = vmatprep.subr.mxu1 %v6567_v25  ;;  %7117 = vmatprep.subr.mxu0 %v6936_v51  ;;  %v6912_v25 = vld [vmem:[%s12721_s19 + $0x18] sm:$0xff]  ;;  %v6494_v51 = vld [vmem:[%s12719_s17 + $0x50] sm:$0xff] }
0x2105   :  { %6825 = vmatpush1.msra.mxu1 %v6566_v43  ;;  %7118 = vmatpush1.msra.mxu0 %v6935_v28  ;;  %v6911_v43 = vld [vmem:[%s12721_s19 + $0x10] sm:$0xff]  ;;  %v6489_v28 = vld [vmem:[%s12719_s17 + $0x28] sm:$0xff] }
0x2106   :  { %6826 = vmatprep.subr.mxu1 %v6561_v53  ;;  %7119 = vmatprep.subr.mxu0 %v6934_v61  ;;  %v6910_v53 = vld [vmem:[%s12721_s19 + $0x8] sm:$0xff]  ;;  %v6488_v61 = vld [vmem:[%s12719_s17 + $0x20] sm:$0xff] }
0x2107   :  { %6827 = vmatpush1.msra.mxu1 %v6560_v13  ;;  %7120 = vmatpush1.msra.mxu0 %v6933_v16  ;;  %v6909_v13 = vld [vmem:[%s12721_s19] sm:$0xff]  ;;  %v6627_v16 = vld [vmem:[%s12719_s17 + $0x478] sm:$0xff] }
0x2108   :  { %6828 = vmatprep.subr.mxu1 %v6555_v63  ;;  %7121 = vmatprep.subr.mxu0 %v6932_v8  ;;  %v6972_v63 = vld [vmem:[%s12721_s19 + $0x1f8] sm:$0xff]  ;;  %v6626_v8 = vld [vmem:[%s12719_s17 + $0x470] sm:$0xff] }
0x2109   :  { %6829 = vmatpush1.msra.mxu1 %v6554_v37  ;;  %7122 = vmatpush1.msra.mxu0 %v6931_v57  ;;  %v6971_v37 = vld [vmem:[%s12721_s19 + $0x1f0] sm:$0xff]  ;;  %v6621_v57 = vld [vmem:[%s12719_s17 + $0x448] sm:$0xff] }
0x210a   :  { %6830 = vmatprep.subr.mxu1 %v6549_v46  ;;  %7123 = vmatprep.subr.mxu0 %v6930_v4  ;;  %v6970_v46 = vld [vmem:[%s12721_s19 + $0x1e8] sm:$0xff] }
0x210b   :  { %6831 = vmatpush1.msra.mxu1 %v6548_v52  ;;  %7124 = vmatpush1.msra.mxu0 %v6929_v1  ;;  %v6620_v52 = vld [vmem:[%s12719_s17 + $0x440] sm:$0xff] }
0x210c   :  { %6832 = vmatprep.subr.mxu1 %v6543_v36  ;;  %7125 = vmatprep.subr.mxu0 %v6928_v56  ;;  %v6969_v1 = vld [vmem:[%s12721_s19 + $0x1e0] sm:$0xff]  ;;  %v6615_v56 = vld [vmem:[%s12719_s17 + $0x418] sm:$0xff] }
0x210d   :  { %6833 = vmatpush1.msra.mxu1 %v6542_v7  ;;  %7126 = vmatpush1.msra.mxu0 %v6927_v6  ;;  %v6968_v7 = vld [vmem:[%s12721_s19 + $0x1d8] sm:$0xff]  ;;  %v6614_v6 = vld [vmem:[%s12719_s17 + $0x410] sm:$0xff] }
0x210e   :  { %6834 = vmatprep.subr.mxu1 %v6537_v40  ;;  %7127 = vmatprep.subr.mxu0 %v6926_v50  ;;  %v6967_v40 = vld [vmem:[%s12721_s19 + $0x1d0] sm:$0xff] }
0x210f   :  { %6835 = vmatpush1.msra.mxu1 %v6536_v49  ;;  %7128 = vmatpush1.msra.mxu0 %v6925_v15  ;;  %v6609_v49 = vld [vmem:[%s12719_s17 + $0x3e8] sm:$0xff] }
0x2110   :  { %6836 = vmatprep.subr.mxu1 %v6531_v62  ;;  %7129 = vmatprep.subr.mxu0 %v6924_v59  ;;  %v6966_v15 = vld [vmem:[%s12721_s19 + $0x1c8] sm:$0xff]  ;;  %v6608_v62 = vld [vmem:[%s12719_s17 + $0x3e0] sm:$0xff] }
0x2111   :  { %6837 = vmatpush1.msra.mxu1 %v6530_v33  ;;  %7130 = vmatpush1.msra.mxu0 %v6923_v44  ;;  %v6965_v59 = vld [vmem:[%s12721_s19 + $0x1c0] sm:$0xff]  ;;  %v6603_v33 = vld [vmem:[%s12719_s17 + $0x3b8] sm:$0xff] }
0x2112   :  { %6838 = vmatprep.subr.mxu1 %v6525_v3  ;;  %7131 = vmatprep.subr.mxu0 %v6922_v21  ;;  %v6964_v44 = vld [vmem:[%s12721_s19 + $0x1b8] sm:$0xff]  ;;  %v6602_v3 = vld [vmem:[%s12719_s17 + $0x3b0] sm:$0xff] }
0x2113   :  { %6839 = vmatpush1.msra.mxu1 %v6524_v17  ;;  %7132 = vmatpush1.msra.mxu0 %v6921_v55  ;;  %v6963_v21 = vld [vmem:[%s12721_s19 + $0x1b0] sm:$0xff]  ;;  %v6597_v17 = vld [vmem:[%s12719_s17 + $0x388] sm:$0xff] }
0x2114   :  { %6840 = vmatprep.subr.mxu1 %v6519_v47  ;;  %7133 = vmatprep.subr.mxu0 %v6920_v24  ;;  %v6962_v55 = vld [vmem:[%s12721_s19 + $0x1a8] sm:$0xff]  ;;  %v6596_v47 = vld [vmem:[%s12719_s17 + $0x380] sm:$0xff] }
0x2115   :  { %6841 = vmatpush1.msra.mxu1 %v6518_v27  ;;  %7134 = vmatpush1.msra.mxu0 %v6919_v29  ;;  %v6961_v24 = vld [vmem:[%s12721_s19 + $0x1a0] sm:$0xff]  ;;  %v6591_v27 = vld [vmem:[%s12719_s17 + $0x358] sm:$0xff] }
0x2116   :  { %6842 = vmatprep.subr.mxu1 %v6513_v5  ;;  %7135 = vmatprep.subr.mxu0 %v6918_v30  ;;  %v6960_v29 = vld [vmem:[%s12721_s19 + $0x198] sm:$0xff]  ;;  %v6590_v5 = vld [vmem:[%s12719_s17 + $0x350] sm:$0xff] }
0x2117   :  { %6843 = vmatpush1.msra.mxu1 %v6512_v35  ;;  %7136 = vmatpush1.msra.mxu0 %v6917_v19  ;;  %v6959_v30 = vld [vmem:[%s12721_s19 + $0x190] sm:$0xff]  ;;  %v6585_v35 = vld [vmem:[%s12719_s17 + $0x328] sm:$0xff] }
0x2118   :  { %6844 = vmatprep.subr.mxu1 %v6507_v34  ;;  %7137 = vmatprep.subr.mxu0 %v6916_v41  ;;  %v6958_v19 = vld [vmem:[%s12721_s19 + $0x188] sm:$0xff]  ;;  %v6584_v34 = vld [vmem:[%s12719_s17 + $0x320] sm:$0xff] }
0x2119   :  { %6845 = vmatpush1.msra.mxu1 %v6506_v2  ;;  %7138 = vmatpush1.msra.mxu0 %v6915_v23  ;;  %v6957_v41 = vld [vmem:[%s12721_s19 + $0x180] sm:$0xff]  ;;  %v7004_v2 = vld [vmem:[%s12721_s19 + $0x2f8] sm:$0xff] }
0x211a   :  { %6846 = vmatprep.subr.mxu1 %v6501_v42  ;;  %7139 = vmatprep.subr.mxu0 %v6914_v31  ;;  %v6956_v23 = vld [vmem:[%s12721_s19 + $0x178] sm:$0xff]  ;;  %v6955_v42 = vld [vmem:[%s12721_s19 + $0x170] sm:$0xff]  ;;  %v6954_v31 = vld [vmem:[%s12721_s19 + $0x168] sm:$0xff] }
0x211b   :  { %6847 = vmatpush1.msra.mxu1 %v6500_v60  ;;  %7140 = vmatpush1.msra.mxu0 %v6913_v0  ;;  %v6953_v60 = vld [vmem:[%s12721_s19 + $0x160] sm:$0xff]  ;;  %v6952_v0 = vld [vmem:[%s12721_s19 + $0x158] sm:$0xff] }
0x211c   :  { %6848 = vmatprep.subr.mxu1 %v6495_v18  ;;  %7141 = vmatprep.subr.mxu0 %v6912_v25  ;;  %v6951_v25 = vld [vmem:[%s12721_s19 + $0x150] sm:$0xff] }
0x211d   :  { %6849 = vmatpush1.msra.mxu1 %v6494_v51  ;;  %7142 = vmatpush1.msra.mxu0 %v6911_v43 }
0x211e   :  { %6850 = vmatprep.subr.mxu1 %v6489_v28  ;;  %7143 = vmatprep.subr.mxu0 %v6910_v53  ;;  %v6950_v28 = vld [vmem:[%s12721_s19 + $0x148] sm:$0xff]  ;;  %v6949_v53 = vld [vmem:[%s12721_s19 + $0x140] sm:$0xff] }
0x211f   :  { %6851 = vmatpush1.msra.mxu1 %v6488_v61  ;;  %7144 = vmatpush1.msra.mxu0 %v6909_v13  ;;  %v6443_v4 = vpop.xlane.xlu0 %6442 }
0x2120   :  { %6868 = vmatprep.subr.mxu1 %v6627_v16  ;;  %7145 = vmatprep.subr.mxu0 %v6972_v63  ;;  %v6445_v36 = vmul.f32 0.0052083335, %v6443_v4  ;;  %v6999_v63 = vld [vmem:[%s12721_s19 + $0x2d0] sm:$0xff]  ;;  %v6996_v4 = vld [vmem:[%s12721_s19 + $0x2b8] sm:$0xff] }
0x2121   :  { %6869 = vmatpush2.msra.mxu1 %v6626_v8  ;;  %7146 = vmatpush2.msra.mxu0 %v6971_v37  ;;  %v6998_v8 = vld [vmem:[%s12721_s19 + $0x2c8] sm:$0xff]  ;;  %v6947_v37 = vld [vmem:[%s12721_s19 + $0x130] sm:$0xff] }
0x2122   :  { %6870 = vmatprep.subr.mxu1 %v6621_v57  ;;  %7147 = vmatprep.subr.mxu0 %v6970_v46  ;;  %v6447_v50 = vadd.f32 1e-05, %v6445_v36  ;;  %v6997_v57 = vld [vmem:[%s12721_s19 + $0x2c0] sm:$0xff]  ;;  %v6946_v46 = vld [vmem:[%s12721_s19 + $0x128] sm:$0xff]  ;;  %v6944_v36 = vld [vmem:[%s12721_s19 + $0x118] sm:$0xff] }
0x2123   :  { %6871 = vmatpush2.msra.mxu1 %v6620_v52  ;;  %7148 = vmatpush2.msra.mxu0 %v6969_v1  ;;  %v6945_v52 = vld [vmem:[%s12721_s19 + $0x120] sm:$0xff]  ;;  %v6995_v1 = vld [vmem:[%s12721_s19 + $0x2b0] sm:$0xff] }
0x2124   :  { %6872 = vmatprep.subr.mxu1 %v6615_v56  ;;  %7149 = vmatprep.subr.mxu0 %v6968_v7  ;;  %8163 = vrsqrt.f32 %v6447_v50  ;;  %v6994_v56 = vld [vmem:[%s12721_s19 + $0x2a8] sm:$0xff]  ;;  %v6943_v7 = vld [vmem:[%s12721_s19 + $0x110] sm:$0xff]  ;;  %v6941_v50 = vld [vmem:[%s12721_s19 + $0x100] sm:$0xff] }
0x2125   :  { %6873 = vmatpush2.msra.mxu1 %v6614_v6  ;;  %7150 = vmatpush2.msra.mxu0 %v6967_v40  ;;  %v6942_v6 = vld [vmem:[%s12721_s19 + $0x108] sm:$0xff]  ;;  %v6993_v40 = vld [vmem:[%s12721_s19 + $0x2a0] sm:$0xff] }
0x2126   :  { %6874 = vmatprep.subr.mxu1 %v6609_v49  ;;  %7151 = vmatprep.subr.mxu0 %v6966_v15  ;;  %v6992_v49 = vld [vmem:[%s12721_s19 + $0x298] sm:$0xff] }
0x2127   :  { %6875 = vmatpush2.msra.mxu1 %v6608_v62  ;;  %7152 = vmatpush2.msra.mxu0 %v6965_v59  ;;  %v7068_v15 = vld [vmem:[%s12721_s19 + $0x4f8] sm:$0xff]  ;;  %v6991_v62 = vld [vmem:[%s12721_s19 + $0x290] sm:$0xff]  ;;  %v6990_v59 = vld [vmem:[%s12721_s19 + $0x288] sm:$0xff] }
0x2128   :  { %6876 = vmatprep.subr.mxu1 %v6603_v33  ;;  %7153 = vmatprep.subr.mxu0 %v6964_v44  ;;  %v6989_v33 = vld [vmem:[%s12721_s19 + $0x280] sm:$0xff]  ;;  %v6988_v44 = vld [vmem:[%s12721_s19 + $0x278] sm:$0xff] }
0x2129   :  { %6877 = vmatpush2.msra.mxu1 %v6602_v3  ;;  %7154 = vmatpush2.msra.mxu0 %v6963_v21  ;;  %v6987_v3 = vld [vmem:[%s12721_s19 + $0x270] sm:$0xff]  ;;  %v6986_v21 = vld [vmem:[%s12721_s19 + $0x268] sm:$0xff] }
0x212a   :  { %6878 = vmatprep.subr.mxu1 %v6597_v17  ;;  %7155 = vmatprep.subr.mxu0 %v6962_v55  ;;  %v6985_v17 = vld [vmem:[%s12721_s19 + $0x260] sm:$0xff]  ;;  %v6984_v55 = vld [vmem:[%s12721_s19 + $0x258] sm:$0xff] }
0x212b   :  { %6879 = vmatpush2.msra.mxu1 %v6596_v47  ;;  %7156 = vmatpush2.msra.mxu0 %v6961_v24  ;;  %v6983_v47 = vld [vmem:[%s12721_s19 + $0x250] sm:$0xff]  ;;  %v6982_v24 = vld [vmem:[%s12721_s19 + $0x248] sm:$0xff] }
0x212c   :  { %6880 = vmatprep.subr.mxu1 %v6591_v27  ;;  %7157 = vmatprep.subr.mxu0 %v6960_v29  ;;  %v6981_v27 = vld [vmem:[%s12721_s19 + $0x240] sm:$0xff]  ;;  %v6980_v29 = vld [vmem:[%s12721_s19 + $0x238] sm:$0xff] }
0x212d   :  { %6881 = vmatpush2.msra.mxu1 %v6590_v5  ;;  %7158 = vmatpush2.msra.mxu0 %v6959_v30  ;;  %v6979_v5 = vld [vmem:[%s12721_s19 + $0x230] sm:$0xff]  ;;  %v6978_v30 = vld [vmem:[%s12721_s19 + $0x228] sm:$0xff] }
0x212e   :  { %6882 = vmatprep.subr.mxu1 %v6585_v35  ;;  %7159 = vmatprep.subr.mxu0 %v6958_v19  ;;  %v6977_v35 = vld [vmem:[%s12721_s19 + $0x220] sm:$0xff]  ;;  %v6976_v19 = vld [vmem:[%s12721_s19 + $0x218] sm:$0xff] }
0x212f   :  { %6883 = vmatpush2.msra.mxu1 %v6584_v34  ;;  %7160 = vmatpush2.msra.mxu0 %v6957_v41  ;;  %v6975_v34 = vld [vmem:[%s12721_s19 + $0x210] sm:$0xff]  ;;  %v6974_v41 = vld [vmem:[%s12721_s19 + $0x208] sm:$0xff] }
0x2130   :  { %7190 = vmatprep.subr.mxu1 %v7004_v2  ;;  %7161 = vmatprep.subr.mxu0 %v6956_v23  ;;  %v6973_v2 = vld [vmem:[%s12721_s19 + $0x200] sm:$0xff]  ;;  %v7036_v23 = vld [vmem:[%s12721_s19 + $0x3f8] sm:$0xff] }
0x2131   :  { %7162 = vmatpush2.msra.mxu0 %v6955_v42  ;;  %v8164_v18 = vpop.eup %8163  ;;  %v7035_v42 = vld [vmem:[%s12721_s19 + $0x3f0] sm:$0xff] }
0x2132   :  { %7163 = vmatprep.subr.mxu0 %v6954_v31  ;;  %v6453_v51 = vmul.f32 %v8164_v18, %v11853_v58  ;;  %v6452_v43 = vmul.f32 %v8164_v18, %v11850_v20  ;;  %v6948_v58 = vld [vmem:[%s12721_s19 + $0x138] sm:$0xff]  ;;  %v7034_v31 = vld [vmem:[%s12721_s19 + $0x3e8] sm:$0xff]  ;;  %v7031_v18 = vld [vmem:[%s12721_s19 + $0x3d0] sm:$0xff] }
0x2133   :  { %7164 = vmatpush2.msra.mxu0 %v6953_v60  ;;  %v7033_v60 = vld [vmem:[%s12721_s19 + $0x3e0] sm:$0xff] }
0x2134   :  { %7165 = vmatprep.subr.mxu0 %v6952_v0  ;;  %v6468_v61 = vmul.f32 %v11864_v14, %v6453_v51  ;;  %v6467_v13 = vmul.f32 %v11867_v32, %v6452_v43  ;;  %v7003_v14 = vld [vmem:[%s12721_s19 + $0x2f0] sm:$0xff]  ;;  %v7002_v32 = vld [vmem:[%s12721_s19 + $0x2e8] sm:$0xff]  ;;  %v7032_v0 = vld [vmem:[%s12721_s19 + $0x3d8] sm:$0xff] }
0x2135   :  { %7166 = vmatpush2.msra.mxu0 %v6951_v25  ;;  %v7030_v25 = vld [vmem:[%s12721_s19 + $0x3c8] sm:$0xff]  ;;  %v7029_v51 = vld [vmem:[%s12721_s19 + $0x3c0] sm:$0xff]  ;;  %v7028_v43 = vld [vmem:[%s12721_s19 + $0x3b8] sm:$0xff] }
0x2136   :  { %7167 = vmatprep.subr.mxu0 %v6950_v28  ;;  %v12208_v20 = vadd.f32 %v11871_v54, %v6468_v61  ;;  %v12211_v16 = vadd.f32 %v11875_v22, %v6467_v13  ;;  %v7001_v54 = vld [vmem:[%s12721_s19 + $0x2e0] sm:$0xff]  ;;  %v7000_v22 = vld [vmem:[%s12721_s19 + $0x2d8] sm:$0xff]  ;;  %v7027_v28 = vld [vmem:[%s12721_s19 + $0x3b0] sm:$0xff] }
0x2137   :  { %7168 = vmatpush2.msra.mxu0 %v6949_v53  ;;  %v7026_v53 = vld [vmem:[%s12721_s19 + $0x3a8] sm:$0xff]  ;;  %v7025_v61 = vld [vmem:[%s12721_s19 + $0x3a0] sm:$0xff]  ;;  %v7024_v13 = vld [vmem:[%s12721_s19 + $0x398] sm:$0xff] }
0x2138   :  { %7169 = vmatprep.subr.mxu0 %v6948_v58  ;;  %7685 = vmatprep.mubr.msk.f32.mxu1 %vm488_vm0, %v12208_v20  ;;  %v7023_v58 = vld [vmem:[%s12721_s19 + $0x390] sm:$0xff] }
0x2139   :  { %7687 = vmatprep.mubr.msk.f32.mxu0 %vm488_vm0, %v12208_v20  ;;  %6737 = vmatmul.mubr.f32.gmra.mxu1 %v12211_v16 }
0x213a   :  { %6814 = vmatmul.mubr.f32.gmra.mxu0 %v12211_v16  ;;  %7688 = vmatprep.mubr.msk.f32.mxu1 %vm488_vm0, %v11880_v12 }
0x213b   :  { %7170 = vmatpush2.msra.mxu0 %v6947_v37  ;;  %v7016_v37 = vld [vmem:[%s12721_s19 + $0x358] sm:$0xff] }
0x213c   :  { %7171 = vmatprep.subr.mxu0 %v6946_v46  ;;  %v7014_v46 = vld [vmem:[%s12721_s19 + $0x348] sm:$0xff] }
0x213d   :  { %6885 = vmatmul.mubr.f32.vlgmr.msra.gmra.mxu1 %v11883_v48  ;;  %7172 = vmatpush2.msra.mxu0 %v6945_v52  ;;  %v7012_v52 = vld [vmem:[%s12721_s19 + $0x338] sm:$0xff] }
0x213e   :  { %7689 = vmatprep.mubr.msk.f32.mxu1 %vm488_vm0, %v12208_v20  ;;  %7191 = vmatpush1.msra.mxu1 %v7003_v14  ;;  %v7022_v14 = vld [vmem:[%s12721_s19 + $0x388] sm:$0xff] }
0x213f   :  { %7192 = vmatprep.subr.mxu1 %v7002_v32  ;;  %7173 = vmatprep.subr.mxu0 %v6944_v36  ;;  %v7021_v32 = vld [vmem:[%s12721_s19 + $0x380] sm:$0xff]  ;;  %v7010_v36 = vld [vmem:[%s12721_s19 + $0x328] sm:$0xff] }
0x2140   :  { %7193 = vmatpush1.msra.mxu1 %v7001_v54  ;;  %7174 = vmatpush2.msra.mxu0 %v6943_v7  ;;  %v7020_v54 = vld [vmem:[%s12721_s19 + $0x378] sm:$0xff] }
0x2141   :  { %6891 = vmatmul.mubr.f32.gmra.mxu1 %v12211_v16  ;;  %7194 = vmatprep.subr.mxu1 %v7000_v22  ;;  %v7019_v22 = vld [vmem:[%s12721_s19 + $0x370] sm:$0xff]  ;;  %v7008_v7 = vld [vmem:[%s12721_s19 + $0x318] sm:$0xff] }
0x2142   :  { %7195 = vmatpush1.msra.mxu1 %v6999_v63  ;;  %7175 = vmatprep.subr.mxu0 %v6942_v6  ;;  %v7018_v63 = vld [vmem:[%s12721_s19 + $0x368] sm:$0xff]  ;;  %v7007_v6 = vld [vmem:[%s12721_s19 + $0x310] sm:$0xff] }
0x2143   :  { %7196 = vmatprep.subr.mxu1 %v6998_v8  ;;  %7176 = vmatpush2.msra.mxu0 %v6941_v50  ;;  %v7017_v8 = vld [vmem:[%s12721_s19 + $0x360] sm:$0xff] }
0x2144   :  { %7197 = vmatpush1.msra.mxu1 %v6997_v57  ;;  %7267 = vmatprep.subr.mxu0 %v7068_v15  ;;  %v7015_v57 = vld [vmem:[%s12721_s19 + $0x350] sm:$0xff]  ;;  %v7005_v50 = vld [vmem:[%s12721_s19 + $0x300] sm:$0xff] }
0x2145   :  { %7198 = vmatprep.subr.mxu1 %v6996_v4  ;;  %v7013_v4 = vld [vmem:[%s12721_s19 + $0x340] sm:$0xff] }
0x2146   :  { %7199 = vmatpush1.msra.mxu1 %v6995_v1  ;;  %v7011_v1 = vld [vmem:[%s12721_s19 + $0x330] sm:$0xff] }
0x2147   :  { %7200 = vmatprep.subr.mxu1 %v6994_v56  ;;  %v7009_v56 = vld [vmem:[%s12721_s19 + $0x320] sm:$0xff] }
0x2148   :  { %7201 = vmatpush1.msra.mxu1 %v6993_v40  ;;  %v7006_v40 = vld [vmem:[%s12721_s19 + $0x308] sm:$0xff] }
0x2149   :  { %7202 = vmatprep.subr.mxu1 %v6992_v49  ;;  %v12438_v49 = vld [vmem:[#allocation23] sm:$0x3f] }
0x214a   :  { %7203 = vmatpush1.msra.mxu1 %v6991_v62  ;;  %v12442_v15 = vrot.slane %v12438_v49, %v9321_v10  ;;  %v12446_v62 = vrot.slane %v12438_v49, %v9318_v9 }
0x214b   :  { %7204 = vmatprep.subr.mxu1 %v6990_v59  ;;  %v12450_v59 = vrot.slane %v12438_v49, %v9198_v39 }
0x214c   :  { %7205 = vmatpush1.msra.mxu1 %v6989_v33  ;;  %v12454_v33 = vrot.slane %v12438_v49, %v9324_v11  ;;  %v7067_v11 = vld [vmem:[%s12721_s19 + $0x4f0] sm:$0xff] }
0x214d   :  { %7206 = vmatprep.subr.mxu1 %v6988_v44 }
0x214e   :  { %7207 = vmatpush1.msra.mxu1 %v6987_v3 }
0x214f   :  { %7208 = vmatprep.subr.mxu1 %v6986_v21 }
0x2150   :  { %7209 = vmatpush1.msra.mxu1 %v6985_v17 }
0x2151   :  { %7210 = vmatprep.subr.mxu1 %v6984_v55 }
0x2152   :  { %7211 = vmatpush1.msra.mxu1 %v6983_v47 }
0x2153   :  { %7212 = vmatprep.subr.mxu1 %v6982_v24 }
0x2154   :  { %7213 = vmatpush1.msra.mxu1 %v6981_v27 }
0x2155   :  { %7214 = vmatprep.subr.mxu1 %v6980_v29 }
0x2156   :  { %7215 = vmatpush1.msra.mxu1 %v6979_v5 }
0x2157   :  { %7216 = vmatprep.subr.mxu1 %v6978_v30 }
0x2158   :  { %7217 = vmatpush1.msra.mxu1 %v6977_v35  ;;  %v7066_v35 = vld [vmem:[%s12721_s19 + $0x4e8] sm:$0xff] }
0x2159   :  { %7218 = vmatprep.subr.mxu1 %v6976_v19  ;;  %v7065_v19 = vld [vmem:[%s12721_s19 + $0x4e0] sm:$0xff] }
0x215a   :  { %7219 = vmatpush1.msra.mxu1 %v6975_v34  ;;  %v7064_v34 = vld [vmem:[%s12721_s19 + $0x4d8] sm:$0xff] }
0x215b   :  { %7220 = vmatprep.subr.mxu1 %v6974_v41  ;;  %v7063_v41 = vld [vmem:[%s12721_s19 + $0x4d0] sm:$0xff] }
0x215c   :  { %7221 = vmatpush1.msra.mxu1 %v6973_v2  ;;  %v7062_v2 = vld [vmem:[%s12721_s19 + $0x4c8] sm:$0xff] }
0x215d   :  { %7222 = vmatprep.subr.mxu1 %v7036_v23  ;;  %v7061_v23 = vld [vmem:[%s12721_s19 + $0x4c0] sm:$0xff] }
0x215e   :  { %7223 = vmatpush2.msra.mxu1 %v7035_v42  ;;  %v7060_v42 = vld [vmem:[%s12721_s19 + $0x4b8] sm:$0xff] }
0x215f   :  { %7224 = vmatprep.subr.mxu1 %v7034_v31  ;;  %v7059_v31 = vld [vmem:[%s12721_s19 + $0x4b0] sm:$0xff] }
0x2160   :  { %7225 = vmatpush2.msra.mxu1 %v7033_v60  ;;  %v7058_v60 = vld [vmem:[%s12721_s19 + $0x4a8] sm:$0xff] }
0x2161   :  { %7226 = vmatprep.subr.mxu1 %v7032_v0  ;;  %v7057_v0 = vld [vmem:[%s12721_s19 + $0x4a0] sm:$0xff] }
0x2162   :  { %7227 = vmatpush2.msra.mxu1 %v7031_v18  ;;  %v7056_v18 = vld [vmem:[%s12721_s19 + $0x498] sm:$0xff] }
0x2163   :  { %7228 = vmatprep.subr.mxu1 %v7030_v25  ;;  %v7055_v25 = vld [vmem:[%s12721_s19 + $0x490] sm:$0xff] }
0x2164   :  { %7229 = vmatpush2.msra.mxu1 %v7029_v51  ;;  %v7054_v51 = vld [vmem:[%s12721_s19 + $0x488] sm:$0xff] }
0x2165   :  { %7230 = vmatprep.subr.mxu1 %v7028_v43  ;;  %v7053_v43 = vld [vmem:[%s12721_s19 + $0x480] sm:$0xff] }
0x2166   :  { %7231 = vmatpush2.msra.mxu1 %v7027_v28  ;;  %v7052_v28 = vld [vmem:[%s12721_s19 + $0x478] sm:$0xff] }
0x2167   :  { %7232 = vmatprep.subr.mxu1 %v7026_v53  ;;  %v7051_v53 = vld [vmem:[%s12721_s19 + $0x470] sm:$0xff] }
0x2168   :  { %7233 = vmatpush2.msra.mxu1 %v7025_v61  ;;  %v7050_v61 = vld [vmem:[%s12721_s19 + $0x468] sm:$0xff] }
0x2169   :  { %7234 = vmatprep.subr.mxu1 %v7024_v13  ;;  %v7049_v13 = vld [vmem:[%s12721_s19 + $0x460] sm:$0xff] }
0x216a   :  { %7235 = vmatpush2.msra.mxu1 %v7023_v58  ;;  %v7048_v58 = vld [vmem:[%s12721_s19 + $0x458] sm:$0xff] }
0x216b   :  { %7236 = vmatprep.subr.mxu1 %v7022_v14  ;;  %v7047_v14 = vld [vmem:[%s12721_s19 + $0x450] sm:$0xff] }
0x216c   :  { %7237 = vmatpush2.msra.mxu1 %v7021_v32  ;;  %v7046_v32 = vld [vmem:[%s12721_s19 + $0x448] sm:$0xff] }
0x216d   :  { %7238 = vmatprep.subr.mxu1 %v7020_v54  ;;  %v7045_v54 = vld [vmem:[%s12721_s19 + $0x440] sm:$0xff] }
0x216e   :  { %7239 = vmatpush2.msra.mxu1 %v7019_v22  ;;  %v7044_v22 = vld [vmem:[%s12721_s19 + $0x438] sm:$0xff] }
0x216f   :  { %7240 = vmatprep.subr.mxu1 %v7018_v63  ;;  %v7043_v63 = vld [vmem:[%s12721_s19 + $0x430] sm:$0xff] }
0x2170   :  { %7241 = vmatpush2.msra.mxu1 %v7017_v8  ;;  %v7042_v8 = vld [vmem:[%s12721_s19 + $0x428] sm:$0xff] }
0x2171   :  { %7242 = vmatprep.subr.mxu1 %v7016_v37  ;;  %v7041_v37 = vld [vmem:[%s12721_s19 + $0x420] sm:$0xff] }
0x2172   :  { %7243 = vmatpush2.msra.mxu1 %v7015_v57  ;;  %v7040_v57 = vld [vmem:[%s12721_s19 + $0x418] sm:$0xff] }
0x2173   :  { %7244 = vmatprep.subr.mxu1 %v7014_v46  ;;  %v7039_v46 = vld [vmem:[%s12721_s19 + $0x410] sm:$0xff] }
0x2174   :  { %7245 = vmatpush2.msra.mxu1 %v7013_v4  ;;  %v7038_v4 = vld [vmem:[%s12721_s19 + $0x408] sm:$0xff] }
0x2175   :  { %7246 = vmatprep.subr.mxu1 %v7012_v52  ;;  %v7037_v52 = vld [vmem:[%s12721_s19 + $0x400] sm:$0xff] }
0x2176   :  { %7247 = vmatpush2.msra.mxu1 %v7011_v1  ;;  %v7100_v1 = vld [vmem:[%s12721_s19 + $0x5f8] sm:$0xff] }
0x2177   :  { %7248 = vmatprep.subr.mxu1 %v7010_v36  ;;  %v7099_v36 = vld [vmem:[%s12721_s19 + $0x5f0] sm:$0xff] }
0x2178   :  { %7249 = vmatpush2.msra.mxu1 %v7009_v56  ;;  %v7098_v56 = vld [vmem:[%s12721_s19 + $0x5e8] sm:$0xff] }
0x2179   :  { %7250 = vmatprep.subr.mxu1 %v7008_v7  ;;  %v7097_v7 = vld [vmem:[%s12721_s19 + $0x5e0] sm:$0xff] }
0x217a   :  { %7251 = vmatpush2.msra.mxu1 %v7007_v6  ;;  %v7096_v6 = vld [vmem:[%s12721_s19 + $0x5d8] sm:$0xff] }
0x217b   :  { %7252 = vmatprep.subr.mxu1 %v7006_v40  ;;  %v7095_v40 = vld [vmem:[%s12721_s19 + $0x5d0] sm:$0xff] }
0x217c   :  { %7253 = vmatpush2.msra.mxu1 %v7005_v50  ;;  %v7094_v50 = vld [vmem:[%s12721_s19 + $0x5c8] sm:$0xff] }
0x21c0   :  { %v6732_v44 = vpop.f32.mrf.mxu1  ;;  %v6809_v3 = vpop.f32.mrf.mxu0 }
0x21c1   :  { %v6733_v21 = vadd.f32 %v6732_v44, %v12442_v15  ;;  %v6810_v17 = vadd.f32 %v6809_v3, %v12446_v62  ;;  %v7093_v44 = vld [vmem:[%s12721_s19 + $0x5c0] sm:$0xff]  ;;  %v7092_v3 = vld [vmem:[%s12721_s19 + $0x5b8] sm:$0xff] }
0x21c2   :  { %v6734_v55 = vpop.f32.mrf.mxu1  ;;  %v6811_v47 = vpop.f32.mrf.mxu0 }
0x21c3   :  { %v6735_v24 = vadd.f32 %v6734_v55, %v12450_v59  ;;  %v6812_v9 = vadd.f32 %v6811_v47, %v12454_v33  ;;  %v6897_v5 = vmax.f32 %v6733_v21, 0.0  ;;  %v6899_v30 = vmax.f32 %v6810_v17, 0.0  ;;  %v7091_v21 = vld [vmem:[%s12721_s19 + $0x5b0] sm:$0xff]  ;;  %v7090_v17 = vld [vmem:[%s12721_s19 + $0x5a8] sm:$0xff]  ;;  %v7089_v55 = vld [vmem:[%s12721_s19 + $0x5a0] sm:$0xff] }
0x21c4   :  { %v7088_v47 = vld [vmem:[%s12721_s19 + $0x598] sm:$0xff] }
0x21c5   :  { %v6898_v27 = vmax.f32 %v6735_v24, 0.0  ;;  %v6900_v29 = vmax.f32 %v6812_v9, 0.0  ;;  %v7087_v24 = vld [vmem:[%s12721_s19 + $0x590] sm:$0xff]  ;;  %v7086_v9 = vld [vmem:[%s12721_s19 + $0x588] sm:$0xff] }
0x21c7   :  { %7177 = vmatprep.mubr.f32.mxu0 %v6898_v27  ;;  %7254 = vmatprep.mubr.f32.mxu1 %v6900_v29  ;;  %v7085_v27 = vld [vmem:[%s12721_s19 + $0x580] sm:$0xff]  ;;  %v7084_v29 = vld [vmem:[%s12721_s19 + $0x578] sm:$0xff] }
0x21c8   :  { %7178 = vmatmul.mubr.f32.vlgmr.msra.gmra.mxu0 %v6897_v5  ;;  %7255 = vmatmul.mubr.f32.vlgmr.msra.gmra.mxu1 %v6899_v30  ;;  %v7083_v5 = vld [vmem:[%s12721_s19 + $0x570] sm:$0xff]  ;;  %v7082_v30 = vld [vmem:[%s12721_s19 + $0x568] sm:$0xff] }
0x21c9   :  { %7268 = vmatpush1.msra.mxu0 %v7067_v11  ;;  %v7081_v11 = vld [vmem:[%s12721_s19 + $0x560] sm:$0xff] }
0x21ca   :  { %7269 = vmatprep.subr.mxu0 %v7066_v35  ;;  %v7080_v35 = vld [vmem:[%s12721_s19 + $0x558] sm:$0xff] }
0x21cb   :  { %7270 = vmatpush1.msra.mxu0 %v7065_v19 }
0x21cc   :  { %7271 = vmatprep.subr.mxu0 %v7064_v34 }
0x21cd   :  { %7272 = vmatpush1.msra.mxu0 %v7063_v41  ;;  %v7079_v41 = vld [vmem:[%s12721_s19 + $0x550] sm:$0xff] }
0x21ce   :  { %7273 = vmatprep.subr.mxu0 %v7062_v2  ;;  %v7078_v2 = vld [vmem:[%s12721_s19 + $0x548] sm:$0xff] }
0x21cf   :  { %7274 = vmatpush1.msra.mxu0 %v7061_v23 }
0x21d0   :  { %7275 = vmatprep.subr.mxu0 %v7060_v42 }
0x21d1   :  { %7276 = vmatpush1.msra.mxu0 %v7059_v31 }
0x21d2   :  { %7277 = vmatprep.subr.mxu0 %v7058_v60  ;;  %v7077_v60 = vld [vmem:[%s12721_s19 + $0x540] sm:$0xff] }
0x21d3   :  { %7278 = vmatpush1.msra.mxu0 %v7057_v0 }
0x21d4   :  { %7279 = vmatprep.subr.mxu0 %v7056_v18 }
0x21d5   :  { %7280 = vmatpush1.msra.mxu0 %v7055_v25 }
0x21d6   :  { %7281 = vmatprep.subr.mxu0 %v7054_v51  ;;  %v6653_v51 = vrot.slane %v12438_v49, %v3117_v26  ;;  %v7074_v26 = vld [vmem:[%s12721_s19 + $0x528] sm:$0xff] }
0x21d7   :  { %7282 = vmatpush1.msra.mxu0 %v7053_v43 }
0x21d8   :  { %7283 = vmatprep.subr.mxu0 %v7052_v28 }
0x21d9   :  { %7284 = vmatpush1.msra.mxu0 %v7051_v53 }
0x21da   :  { %7285 = vmatprep.subr.mxu0 %v7050_v61 }
0x21db   :  { %7286 = vmatpush1.msra.mxu0 %v7049_v13 }
0x21dc   :  { %7287 = vmatprep.subr.mxu0 %v7048_v58  ;;  %v7072_v58 = vld [vmem:[%s12721_s19 + $0x518] sm:$0xff] }
0x21dd   :  { %7288 = vmatpush1.msra.mxu0 %v7047_v14 }
0x21de   :  { %7289 = vmatprep.subr.mxu0 %v7046_v32 }
0x21df   :  { %7290 = vmatpush1.msra.mxu0 %v7045_v54  ;;  %v7071_v54 = vld [vmem:[%s12721_s19 + $0x510] sm:$0xff] }
0x21e0   :  { %7291 = vmatprep.subr.mxu0 %v7044_v22 }
0x21e1   :  { %7292 = vmatpush1.msra.mxu0 %v7043_v63  ;;  %v7070_v63 = vld [vmem:[%s12721_s19 + $0x508] sm:$0xff] }
0x21e2   :  { %7293 = vmatprep.subr.mxu0 %v7042_v8 }
0x21e3   :  { %7294 = vmatpush1.msra.mxu0 %v7041_v37  ;;  %v7069_v37 = vld [vmem:[%s12721_s19 + $0x500] sm:$0xff] }
0x21e4   :  { %7295 = vmatprep.subr.mxu0 %v7040_v57 }
0x21e5   :  { %7296 = vmatpush1.msra.mxu0 %v7039_v46 }
0x21e6   :  { %7297 = vmatprep.subr.mxu0 %v7038_v4 }
0x21e7   :  { %7298 = vmatpush1.msra.mxu0 %v7037_v52 }
0x21e8   :  { %7299 = vmatprep.subr.mxu0 %v7100_v1 }
0x21e9   :  { %7300 = vmatpush2.msra.mxu0 %v7099_v36  ;;  %v7101_v36 = vld [vmem:[#allocation25] sm:$0x3] }
0x21ea   :  { %7301 = vmatprep.subr.mxu0 %v7098_v56  ;;  %v7106_v56 = vrot.slane %v7101_v36, %v9321_v10 }
0x21eb   :  { %7302 = vmatpush2.msra.mxu0 %v7097_v7 }
0x21ec   :  { %7303 = vmatprep.subr.mxu0 %v7096_v6  ;;  %v7110_v6 = vrot.slane %v7101_v36, %v9198_v39 }
0x21ed   :  { %7304 = vmatpush2.msra.mxu0 %v7095_v40 }
0x21ee   :  { %7305 = vmatprep.subr.mxu0 %v7094_v50 }
0x21ef   :  { %7306 = vmatpush2.msra.mxu0 %v7093_v44 }
0x21f0   :  { %7307 = vmatprep.subr.mxu0 %v7092_v3 }
0x21f1   :  { %7308 = vmatpush2.msra.mxu0 %v7091_v21 }
0x21f2   :  { %7309 = vmatprep.subr.mxu0 %v7090_v17 }
0x21f3   :  { %7310 = vmatpush2.msra.mxu0 %v7089_v55 }
0x21f4   :  { %7311 = vmatprep.subr.mxu0 %v7088_v47 }
0x21f5   :  { %7312 = vmatpush2.msra.mxu0 %v7087_v24 }
0x21f6   :  { %7313 = vmatprep.subr.mxu0 %v7086_v9 }
0x21f7   :  { %7314 = vmatpush2.msra.mxu0 %v7085_v27 }
0x21f8   :  { %7315 = vmatprep.subr.mxu0 %v7084_v29 }
0x21f9   :  { %7316 = vmatpush2.msra.mxu0 %v7083_v5  ;;  %v6738_v19 = vpop.f32.mrf.mxu1 }
0x21fa   :  { %v6815_v34 = vpop.f32.mrf.mxu0  ;;  %7317 = vmatprep.subr.mxu0 %v7082_v30  ;;  %v6739_v0 = vadd.f32 %v6738_v19, %v12442_v15  ;;  %v6649_v15 = vrot.slane %v12438_v49, %v9434_v45  ;;  %v7073_v45 = vld [vmem:[%s12721_s19 + $0x520] sm:$0xff] }
0x21fb   :  { %7318 = vmatpush2.msra.mxu0 %v7081_v11  ;;  %v6816_v23 = vadd.f32 %v6815_v34, %v12446_v62  ;;  %v6740_v42 = vpop.f32.mrf.mxu1  ;;  %v7076_v62 = vld [vmem:[%s12721_s19 + $0x538] sm:$0xff] }
0x21fc   :  { %v6817_v31 = vpop.f32.mrf.mxu0  ;;  %7319 = vmatprep.subr.mxu0 %v7080_v35  ;;  %v6741_v18 = vadd.f32 %v6740_v42, %v12450_v59  ;;  %v7075_v59 = vld [vmem:[%s12721_s19 + $0x530] sm:$0xff]  ;;  %v6903_v61 = vmax.f32 %v6739_v0, 0.0  ;;  %s8665_s19 = smov [#allocation35]  }
0x21fd   :  { %v6818_v25 = vadd.f32 %v6817_v31, %v12454_v33  ;;  %7320 = vmatpush2.msra.mxu0 %v7079_v41  ;;  %v6886_v43 = vpop.f32.mrf.mxu1  ;;  %v6905_v33 = vmax.f32 %v6816_v23, 0.0  ;;  %s7568_s22 = sshll.u32 %s8665_s19, 4  ;;  %s7569_s22 = int_to_ptr.vmem [resolvable:$true] %s7568_s22 }
0x21fe   :  { %7321 = vmatprep.subr.mxu0 %v7078_v2  ;;  %v6904_v28 = vmax.f32 %v6741_v18, 0.0  ;;  %v6887_v14 = vadd.f32 %v6886_v43, %v6649_v15  ;;  %s8593_s29 = scalar_lea.vmem %s7569_s22, 512  ;;  %p8598_p8 = scmp.lt.s32.totalorder %s7569_s22, %s7569_s22 }
0x21ff   :  { %v6906_v53 = vmax.f32 %v6818_v25, 0.0  ;;  %7322 = vmatpush2.msra.mxu0 %v7077_v60  ;;  %v6888_v38 = vpop.f32.mrf.mxu1  ;;  %p8594_p7 = scmp.ne.s32.totalorder %s7569_s22, %s8593_s29  ;;  %p8599_p9 = scmp.lt.s32.totalorder %s8593_s29, %s8593_s29 }
0x2200   :  { %7323 = vmatprep.subr.mxu0 %v7076_v62  ;;  %v6889_v13 = vadd.f32 %v6888_v38, %v6653_v51  ;;  %7183 = vmatprep.mubr.f32.mxu0 %v6904_v28  ;;  %v6901_v57 = vmax.f32 %v6887_v14, 0.0  ;;  %v7447_v28 = vld [vmem:[#allocation32 + $0xf8] sm:$0xff]  ;;  %v7438_v38 = vld [vmem:[#allocation32 + $0xb0] sm:$0xff] }
0x2201   :  { %7260 = vmatprep.mubr.f32.mxu1 %v6906_v53  ;;  %7324 = vmatpush2.msra.mxu0 %v7075_v59  ;;  %v6892_v49 = vpop.f32.mrf.mxu1  ;;  %v7446_v53 = vld [vmem:[#allocation32 + $0xf0] sm:$0xff]  ;;  %v7431_v14 = vld [vmem:[#allocation32 + $0x78] sm:$0xff]  ;;  %p8600_p10 = por %p8599_p9, %p8598_p8 }
0x2202   :  { %7261 = vmatmul.mubr.f32.gmra.mxu1 %v6905_v33  ;;  %v6902_v32 = vmax.f32 %v6889_v13, 0.0  ;;  %7184 = vmatmul.mubr.f32.gmra.mxu0 %v6903_v61  ;;  %v6893_v46 = vadd.f32 %v6892_v49, %v6649_v15  ;;  %v7443_v15 = vld [vmem:[#allocation32 + $0xd8] sm:$0xff]  ;;  %v7442_v59 = vld [vmem:[#allocation32 + $0xd0] sm:$0xff]  ;;  %v7441_v33 = vld [vmem:[#allocation32 + $0xc8] sm:$0xff] }
0x2203   :  { %7325 = vmatprep.subr.mxu0 %v7074_v26  ;;  %v6894_v22 = vpop.f32.mrf.mxu1  ;;  %7482 = vmatprep.subr.mxu1 %v7447_v28  ;;  %v7437_v26 = vld [vmem:[#allocation32 + $0xa8] sm:$0xff]  ;;  %v7436_v61 = vld [vmem:[#allocation32 + $0xa0] sm:$0xff]  ;;  %v7435_v13 = vld [vmem:[#allocation32 + $0x98] sm:$0xff]  ;;  %p8601_p11 = pnand %p8600_p10, %p8594_p7 }
0x2204   :  { %7326 = vmatpush2.msra.mxu0 %v7073_v45  ;;  %v6895_v8 = vadd.f32 %v6894_v22, %v6653_v51  ;;  %7331 = vmatprep.mubr.f32.mxu0 %v6902_v32  ;;  %v6907_v52 = vmax.f32 %v6893_v46, 0.0  ;;  %v7434_v45 = vld [vmem:[#allocation32 + $0x90] sm:$0xff]  ;;  %v7433_v49 = vld [vmem:[#allocation32 + $0x88] sm:$0xff]  ;;  %v7428_v22 = vld [vmem:[#allocation32 + $0x60] sm:$0xff] }
0x2205   :  { %7327 = vmatprep.subr.mxu0 %v7072_v58  ;;  %7483 = vmatpush1.msra.mxu1 %v7446_v53  ;;  %v7432_v58 = vld [vmem:[#allocation32 + $0x80] sm:$0xff]  ;;  %v7430_v32 = vld [vmem:[#allocation32 + $0x70] sm:$0xff]  ;;  %v7449_v28 = vld [vmem:[#allocation32 + $0x108] sm:$0xff] }
0x2206   :  { %7328 = vmatpush2.msra.mxu0 %v7071_v54  ;;  %v6908_v4 = vmax.f32 %v6895_v8, 0.0  ;;  %v7429_v54 = vld [vmem:[#allocation32 + $0x68] sm:$0xff]  ;;  %v7426_v8 = vld [vmem:[#allocation32 + $0x50] sm:$0xff]  ;;  %v7448_v53 = vld [vmem:[#allocation32 + $0x100] sm:$0xff] }
0x2207   :  { %7329 = vmatprep.subr.mxu0 %v7070_v63  ;;  %v7427_v63 = vld [vmem:[#allocation32 + $0x58] sm:$0xff] }
0x2208   :  { %7330 = vmatpush2.msra.mxu0 %v7069_v37  ;;  %v7425_v37 = vld [vmem:[#allocation32 + $0x48] sm:$0xff] }
0x2209   :  { %7332 = vmatmul.mubr.f32.vlgmr.msra.gmra.mxu0 %v6901_v57 }
0x220a   :  { %7337 = vmatprep.mubr.f32.mxu0 %v6908_v4 }
0x220d   :  { %7338 = vmatmul.mubr.f32.gmra.mxu0 %v6907_v52 }
0x2288   :  { %v7179_v1 = vpop.f32.mrf.mxu0  ;;  %v7256_v40 = vpop.f32.mrf.mxu1 }
0x2289   :  { %v7180_v44 = vadd.f32 %v7179_v1, %v7106_v56 }
0x228a   :  { %v7181_v7 = vpop.f32.mrf.mxu0  ;;  %v7258_v21 = vpop.f32.mrf.mxu1 }
0x228b   :  { %v7182_v3 = vadd.f32 %v7181_v7, %v7110_v6  ;;  %v7257_v55 = vadd.f32 %v7256_v40, %v7180_v44 }
0x228d   :  { %v7259_v27 = vadd.f32 %v7258_v21, %v7182_v3 }
0x22c2   :  { %v7185_v50 = vpop.f32.mrf.mxu0  ;;  %v7262_v24 = vpop.f32.mrf.mxu1 }
0x22c3   :  { %v7186_v47 = vadd.f32 %v7185_v50, %v7106_v56 }
0x22c4   :  { %v7187_v17 = vpop.f32.mrf.mxu0  ;;  %v7264_v19 = vpop.f32.mrf.mxu1 }
0x22c5   :  { %v7188_v29 = vadd.f32 %v7187_v17, %v7110_v6  ;;  %v7263_v35 = vadd.f32 %v7262_v24, %v7186_v47  ;;  %v7424_v47 = vld [vmem:[#allocation32 + $0x40] sm:$0xff]  ;;  %v7423_v24 = vld [vmem:[#allocation32 + $0x38] sm:$0xff] }
0x22c7   :  { %v7265_v41 = vadd.f32 %v7264_v19, %v7188_v29  ;;  %v7420_v29 = vld [vmem:[#allocation32 + $0x20] sm:$0xff]  ;;  %v7463_v19 = vld [vmem:[#allocation32 + $0x178] sm:$0xff] }
0x22c9   :  { %v7333_v9 = vpop.f32.mrf.mxu0 }
0x22ca   :  { %v7334_v5 = vadd.f32 %v7333_v9, %v7257_v55  ;;  %v7422_v9 = vld [vmem:[#allocation32 + $0x30] sm:$0xff] }
0x22cb   :  { %v7335_v30 = vpop.f32.mrf.mxu0 }
0x22cc   :  { %v7336_v11 = vadd.f32 %v7335_v30, %v7259_v27  ;;  %v7344_v23 = vadd.f32 %v7334_v5, %v11883_v48  ;;  %v7444_v48 = vld [vmem:[#allocation32 + $0xe0] sm:$0xff]  ;;  %v7421_v27 = vld [vmem:[#allocation32 + $0x28] sm:$0xff]  ;;  %v7419_v5 = vld [vmem:[#allocation32 + $0x18] sm:$0xff] }
0x22cd   :  { %v7339_v34 = vpop.f32.mrf.mxu0  ;;  %v7418_v30 = vld [vmem:[#allocation32 + $0x10] sm:$0xff] }
0x22ce   :  { %v7345_v2 = vadd.f32 %v7336_v11, %v11880_v12  ;;  %v7340_v42 = vadd.f32 %v7339_v34, %v7263_v35  ;;  %v7445_v12 = vld [vmem:[#allocation32 + $0xe8] sm:$0xff]  ;;  %v7416_v35 = vld [vmem:[#allocation32] sm:$0xff]  ;;  %v7462_v34 = vld [vmem:[#allocation32 + $0x170] sm:$0xff] }
0x22cf   :  { %v7341_v31 = vpop.f32.mrf.mxu0  ;;  %7484 = vmatprep.subr.mxu1 %v7445_v12  ;;  %v7417_v11 = vld [vmem:[#allocation32 + $0x8] sm:$0xff] }
0x22d0   :  { %v7350_v60 = vsel %vm488_vm0, %v7345_v2, 0.0  ;;  %v7342_v0 = vadd.f32 %v7341_v31, %v7265_v41  ;;  %v7346_v51 = vadd.f32 %v7340_v42, %v12211_v16  ;;  %7485 = vmatpush1.msra.mxu1 %v7444_v48  ;;  %v7439_v16 = vld [vmem:[#allocation32 + $0xb8] sm:$0xff]  ;;  %v7461_v41 = vld [vmem:[#allocation32 + $0x168] sm:$0xff]  ;;  %v7458_v42 = vld [vmem:[#allocation32 + $0x150] sm:$0xff] }
0x22d1   :  { %v7351_v18 = vadd.f32 %v7350_v60, %v7344_v23  ;;  %7486 = vmatprep.subr.mxu1 %v7443_v15  ;;  %v7457_v31 = vld [vmem:[#allocation32 + $0x148] sm:$0xff]  ;;  %v7456_v60 = vld [vmem:[#allocation32 + $0x140] sm:$0xff] }
0x22d2   :  { %v7347_v25 = vadd.f32 %v7342_v0, %v12208_v20  ;;  %v7440_v20 = vld [vmem:[#allocation32 + $0xc0] sm:$0xff]  ;;  %7487 = vmatpush1.msra.mxu1 %v7442_v59  ;;  %v7455_v0 = vld [vmem:[#allocation32 + $0x138] sm:$0xff] }
0x22d3   :  { %7352 = vadd.xlane.f32.xlu1 %v7351_v18  ;;  %7488 = vmatprep.subr.mxu1 %v7441_v33  ;;  %v7454_v18 = vld [vmem:[#allocation32 + $0x130] sm:$0xff] }
0x22d4   :  { %v7354_v62 = vsel %vm488_vm0, %v7347_v25, 0.0  ;;  %7489 = vmatpush1.msra.mxu1 %v7440_v20 }
0x22d5   :  { %v7355_v43 = vadd.f32 %v7354_v62, %v7346_v51  ;;  %7490 = vmatprep.subr.mxu1 %v7439_v16  ;;  %v7451_v62 = vld [vmem:[#allocation32 + $0x118] sm:$0xff] }
0x22d6   :  { %7491 = vmatpush1.msra.mxu1 %v7438_v38  ;;  %v7348_v16 = vld [vmem:[#allocation29] sm:$0x3]  ;;  %v7349_v38 = vld [vmem:[#allocation31] sm:$0x3] }
0x22d7   :  { %7356 = vadd.xlane.f32.xlu0 %v7355_v43  ;;  %7492 = vmatprep.subr.mxu1 %v7437_v26  ;;  %v7450_v43 = vld [vmem:[#allocation32 + $0x110] sm:$0xff]  ;;  %v7390_v26 = vrot.slane %v7348_v16, %v9321_v10 }
0x22d8   :  { %7493 = vmatpush1.msra.mxu1 %v7436_v61  ;;  %v7394_v61 = vrot.slane %v7348_v16, %v9198_v39 }
0x22d9   :  { %7494 = vmatprep.subr.mxu1 %v7435_v13 }
0x22da   :  { %7495 = vmatpush1.msra.mxu1 %v7434_v45 }
0x22db   :  { %7496 = vmatprep.subr.mxu1 %v7433_v49 }
0x22dc   :  { %7497 = vmatpush1.msra.mxu1 %v7432_v58  ;;  %v7405_v58 = vrot.slane %v7349_v38, %v9321_v10 }
0x22dd   :  { %7498 = vmatprep.subr.mxu1 %v7431_v14  ;;  %v7409_v14 = vrot.slane %v7349_v38, %v9198_v39 }
0x22de   :  { %7499 = vmatpush1.msra.mxu1 %v7430_v32 }
0x22df   :  { %7500 = vmatprep.subr.mxu1 %v7429_v54 }
0x22e0   :  { %7501 = vmatpush1.msra.mxu1 %v7428_v22 }
0x22e1   :  { %7502 = vmatprep.subr.mxu1 %v7427_v63 }
0x22e2   :  { %7503 = vmatpush1.msra.mxu1 %v7426_v8 }
0x22e3   :  { %7504 = vmatprep.subr.mxu1 %v7425_v37 }
0x22e4   :  { %7505 = vmatpush1.msra.mxu1 %v7424_v47 }
0x22e5   :  { %7506 = vmatprep.subr.mxu1 %v7423_v24 }
0x22e6   :  { %7507 = vmatpush1.msra.mxu1 %v7422_v9 }
0x22e7   :  { %7508 = vmatprep.subr.mxu1 %v7421_v27 }
0x22e8   :  { %7509 = vmatpush1.msra.mxu1 %v7420_v29 }
0x22e9   :  { %7510 = vmatprep.subr.mxu1 %v7419_v5 }
0x22ea   :  { %7511 = vmatpush1.msra.mxu1 %v7418_v30 }
0x22eb   :  { %7512 = vmatprep.subr.mxu1 %v7417_v11 }
0x22ec   :  { %7513 = vmatpush1.msra.mxu1 %v7416_v35 }
0x22ed   :  { %7530 = vmatprep.subr.mxu1 %v7463_v19 }
0x22ee   :  { %7531 = vmatpush2.msra.mxu1 %v7462_v34 }
0x22ef   :  { %7532 = vmatprep.subr.mxu1 %v7461_v41 }
0x235c   :  { %v7353_v57 = vpop.xlane.xlu1 %7352 }
0x235d   :  { %v7358_v46 = vmul.f32 0.0052083335, %v7353_v57 }
0x235f   :  { %v12666_v4 = vsub.f32 %v7344_v23, %v7358_v46  ;;  %v12668_v52 = vsub.f32 %v7345_v2, %v7358_v46  ;;  %v7460_v2 = vld [vmem:[#allocation32 + $0x160] sm:$0xff]  ;;  %v7459_v23 = vld [vmem:[#allocation32 + $0x158] sm:$0xff] }
0x2360   :  { %v7357_v1 = vpop.xlane.xlu0 %7356  ;;  %7533 = vmatpush2.msra.mxu1 %v7460_v2 }
0x2361   :  { %v7364_v36 = vmul.f32 %v12666_v4, %v12666_v4  ;;  %v7365_v56 = vmul.f32 %v12668_v52, %v12668_v52  ;;  %v7359_v7 = vmul.f32 0.0052083335, %v7357_v1  ;;  %7534 = vmatprep.subr.mxu1 %v7459_v23 }
0x2362   :  { %7535 = vmatpush2.msra.mxu1 %v7458_v42 }
0x2363   :  { %v12674_v6 = vsub.f32 %v7346_v51, %v7359_v7  ;;  %v12676_v40 = vsub.f32 %v7347_v25, %v7359_v7  ;;  %v7368_v50 = vsel %vm488_vm0, %v7365_v56, 0.0  ;;  %7536 = vmatprep.subr.mxu1 %v7457_v31  ;;  %v7453_v25 = vld [vmem:[#allocation32 + $0x128] sm:$0xff]  ;;  %v7452_v51 = vld [vmem:[#allocation32 + $0x120] sm:$0xff] }
0x2364   :  { %v7369_v44 = vadd.f32 %v7368_v50, %v7364_v36  ;;  %7537 = vmatpush2.msra.mxu1 %v7456_v60  ;;  %v7464_v36 = vld [vmem:[#allocation34] sm:$0x3] }
0x2365   :  { %v7366_v3 = vmul.f32 %v12674_v6, %v12674_v6  ;;  %v7367_v21 = vmul.f32 %v12676_v40, %v12676_v40  ;;  %7538 = vmatprep.subr.mxu1 %v7455_v0  ;;  %v7469_v56 = vrot.slane %v7464_v36, %v9321_v10  ;;  %v7473_v7 = vrot.slane %v7464_v36, %v9198_v39 }
0x2366   :  { %7370 = vadd.xlane.f32.xlu1 %v7369_v44  ;;  %7539 = vmatpush2.msra.mxu1 %v7454_v18 }
0x2367   :  { %v7372_v17 = vsel %vm488_vm0, %v7367_v21, 0.0  ;;  %7540 = vmatprep.subr.mxu1 %v7453_v25 }
0x2368   :  { %v7373_v55 = vadd.f32 %v7372_v17, %v7366_v3  ;;  %7541 = vmatpush2.msra.mxu1 %v7452_v51 }
0x2369   :  { %7542 = vmatprep.subr.mxu1 %v7451_v62 }
0x236a   :  { %7374 = vadd.xlane.f32.xlu0 %v7373_v55  ;;  %7543 = vmatpush2.msra.mxu1 %v7450_v43 }
0x236b   :  { %7544 = vmatprep.subr.mxu1 %v7449_v28 }
0x236c   :  { %7545 = vmatpush2.msra.mxu1 %v7448_v53 }
0x23ef   :  { %v7371_v12 = vpop.xlane.xlu1 %7370 }
0x23f0   :  { %v7376_v48 = vmul.f32 0.0052083335, %v7371_v12 }
0x23f2   :  { %v7378_v15 = vadd.f32 1e-05, %v7376_v48 }
0x23f3   :  { %v7375_v59 = vpop.xlane.xlu0 %7374 }
0x23f4   :  { %8165 = vrsqrt.f32 %v7378_v15  ;;  %v7377_v33 = vmul.f32 0.0052083335, %v7375_v59 }
0x23f6   :  { %v7379_v20 = vadd.f32 1e-05, %v7377_v33 }
0x23f8   :  { %8167 = vrsqrt.f32 %v7379_v20 }
0x2401   :  { %v8166_v13 = vpop.eup %8165 }
0x2402   :  { %v7382_v45 = vmul.f32 %v8166_v13, %v12666_v4  ;;  %v7383_v49 = vmul.f32 %v8166_v13, %v12668_v52 }
0x2404   :  { %v7398_v32 = vmul.f32 %v7394_v61, %v7383_v49  ;;  %v7397_v54 = vmul.f32 %v7390_v26, %v7382_v45 }
0x2405   :  { %v8168_v22 = vpop.eup %8167 }
0x2406   :  { %v7413_v63 = vadd.f32 %v7409_v14, %v7398_v32  ;;  %v7412_v8 = vadd.f32 %v7405_v58, %v7397_v54  ;;  %v7385_v37 = vmul.f32 %v8168_v22, %v12676_v40  ;;  %v7384_v57 = vmul.f32 %v8168_v22, %v12674_v6 }
0x2408   :  { %7690 = vmatprep.mubr.msk.f32.mxu1 %vm488_vm0, %v7413_v63  ;;  %v7400_v46 = vmul.f32 %v7394_v61, %v7385_v37  ;;  %v7399_v1 = vmul.f32 %v7390_v26, %v7384_v57 }
0x2409   :  { %7547 = vmatmul.mubr.f32.vlgmr.msra.gmra.mxu1 %v7412_v8 }
0x240a   :  { %v7415_v4 = vadd.f32 %v7409_v14, %v7400_v46  ;;  %v7414_v52 = vadd.f32 %v7405_v58, %v7399_v1 }
0x240c   :  { %7691 = vmatprep.mubr.msk.f32.mxu1 %vm488_vm0, %v7415_v4 }
0x240d   :  { %7553 = vmatmul.mubr.f32.gmra.mxu1 %v7414_v52 }
0x24c9   :  { %v7548_v50 = vpop.f32.mrf.mxu1 }
0x24ca   :  { %v7549_v44 = vadd.f32 %v7548_v50, %v7469_v56 }
0x24cb   :  { %v7550_v40 = vpop.f32.mrf.mxu1 }
0x24cc   :  { %7559 = vst [vmem:[#allocation35] sm:$0xff] %v7549_v44  ;;  %v7551_v6 = vadd.f32 %v7550_v40, %v7473_v7 }
0x24cd   :  { %v7554_v3 = vpop.f32.mrf.mxu1 }
0x24ce   :  { %7560 = vst [vmem:[#allocation35 + $0x8] sm:$0xff] %v7551_v6  ;;  %v7555_v21 = vadd.f32 %v7554_v3, %v7469_v56 }
0x24cf   :  { %v7556_v17 = vpop.f32.mrf.mxu1 }
0x24d0   :  { %7561 = vst [vmem:[#allocation35 + $0x10] sm:$0xff] %v7555_v21  ;;  %v7557_v55 = vadd.f32 %v7556_v17, %v7473_v7 }
0x24d2   :  { %7562 = vst [vmem:[#allocation35 + $0x18] sm:$0xff] %v7557_v55 }
0x24d3   :  { %8604 = shalt.err (!%p8601_p11)
}
0x24d4   :  { %7574 = dma.vmem_to_hbm [thread:$0]  %s7569_s22, 512, %s12729_s27, [#allocation4], %s8644_s28, %s8644_s28, %s8645_s0  }
0x24d5   :  { %8635 = dma.done.wait [#allocation4], 512  }
0x24d6   :  { %8636 = vsyncadd [#allocation4], 4294966784 }
0x24d7   :  { %7578 = vsyncpa [#allocation3], 1 }
0x24d8   :  { %7579 = vsyncpa [#allocation6], 1 }
0x24d9   :  { %7580 = vsyncpa [#allocation9], 1 }
0x24da   :  { %7581 = vsyncpa [#allocation12], 1 }
0x24db   :  { %7582 = vsyncpa [#allocation15], 1 }
0x24dc   :  { %7583 = vsyncpa [#allocation18], 1 }
0x24dd   :  { %7584 = vsyncpa [#allocation21], 1 }
0x24de   :  { %7585 = vsyncpa [#allocation24], 1 }
0x24df   :  { %7586 = vsyncpa [#allocation27], 1 }
0x24e0   :  { %7587 = vsyncpa [#allocation30], 1 }
0x24e1   :  { %7588 = vsyncpa [#allocation33], 1 }
0x24e2   :  { %7589 = vsyncpa [#allocation4], 1 }

</bundles_post_ra>
